<compile_context>
chip_gen: v6e
topology: v6e:2x2x1
jax: 0.10.0
libtpu: 0.0.40
codegen_flags: <defaults>
</compile_context>

<pallas_src>
import functools

import numpy as np
import jax
import jax.numpy as jnp
from jax.experimental import pallas as pl
from jax.experimental.pallas import tpu as pltpu

LANE = 128  # TPU lane width; all feature dims are zero-padded to this


# ---------------------------------------------------------------------------
# Parameter init (PyTorch nn.Linear default: U(-1/sqrt(fan_in), 1/sqrt(fan_in)))
# ---------------------------------------------------------------------------
def _init_linear(key, fan_in, fan_out):
    kw, kb = jax.random.split(key)
    s = 1.0 / np.sqrt(fan_in)
    w = jax.random.uniform(kw, (fan_in, fan_out), jnp.float32, -s, s)
    b = jax.random.uniform(kb, (fan_out,), jnp.float32, -s, s)
    return w, b


def _init_gcl(key, hidden, edges_in_d):
    ks = jax.random.split(key, 4)
    p = {}
    p["edge_w1"], p["edge_b1"] = _init_linear(ks[0], 2 * hidden + edges_in_d, hidden)
    p["edge_w2"], p["edge_b2"] = _init_linear(ks[1], hidden, hidden)
    p["node_w1"], p["node_b1"] = _init_linear(ks[2], hidden + hidden, hidden)
    p["node_w2"], p["node_b2"] = _init_linear(ks[3], hidden, hidden)
    return p


def init_params(key, in_node_nf, in_edge_nf, hidden, n_layers, out_node_nf=None):
    if out_node_nf is None:
        out_node_nf = in_node_nf
    keys = jax.random.split(key, 2 + n_layers)
    params = {}
    params["emb_w"], params["emb_b"] = _init_linear(keys[0], in_node_nf, hidden)
    params["emb_out_w"], params["emb_out_b"] = _init_linear(keys[1], hidden, out_node_nf)
    params["gcl"] = [_init_gcl(keys[2 + i], hidden, in_edge_nf) for i in range(n_layers)]
    return params


# ---------------------------------------------------------------------------
# One-time packing (outside jit): pad to 128 lanes, split/pack concat-weights, bf16
# ---------------------------------------------------------------------------
def _pad_w(w):
    """Zero-pad a weight matrix to (128, 128) and cast to bf16 (MXU input dtype)."""
    r, c = w.shape
    return jnp.zeros((LANE, LANE), jnp.bfloat16).at[:r, :c].set(w.astype(jnp.bfloat16))


def _pad_b(b):
    """Zero-pad a bias to (1, 128); kept f32 (bias/activation math stays f32)."""
    return jnp.zeros((1, LANE), jnp.float32).at[0, : b.shape[0]].set(b.astype(jnp.float32))


def prepare_params(params, hidden, in_edge_nf):
    H = hidden
    pp = {
        "emb_w": _pad_w(params["emb_w"]),
        "emb_b": _pad_b(params["emb_b"]),
        "embo_w": _pad_w(params["emb_out_w"]),
        "embo_b": _pad_b(params["emb_out_b"]),
    }
    slab, wea_cols, eb1, ew2, eb2 = [], [], [], [], []
    wnagg, nb1, nw2, nb2 = [], [], [], []
    for p in params["gcl"]:
        ew1 = p["edge_w1"]  # (2H + in_edge_nf, H); rows = [src | dst | edge_attr]
        nw1 = p["node_w1"]  # (2H, H);             rows = [h | agg]
        # Per-layer (128, 384) slab: [W_src | W_dst | W_node_h]  -> ONE hb matmul per layer.
        slab.append(jnp.concatenate([_pad_w(ew1[:H]),
                                     _pad_w(ew1[H:2 * H]),
                                     _pad_w(nw1[:H])], axis=1))
        # edge-attr weights of ALL layers get concatenated lane-wise for one hoisted dot.
        wea_cols.append(_pad_w(ew1[2 * H:2 * H + in_edge_nf]))
        eb1.append(_pad_b(p["edge_b1"]))
        ew2.append(_pad_w(p["edge_w2"]))
        eb2.append(_pad_b(p["edge_b2"]))
        wnagg.append(_pad_w(nw1[H:2 * H]))
        nb1.append(_pad_b(p["node_b1"]))
        nw2.append(_pad_w(p["node_w2"]))
        nb2.append(_pad_b(p["node_b2"]))
    pp["slab"] = jnp.stack(slab)                        # (L, 128, 384) bf16
    pp["wea_all"] = jnp.concatenate(wea_cols, axis=1)   # (128, L*128) bf16, hoisted ea proj
    for name, lst in (("eb1", eb1), ("ew2", ew2), ("eb2", eb2),
                      ("wnagg", wnagg), ("nb1", nb1), ("nw2", nw2), ("nb2", nb2)):
        pp[name] = jnp.stack(lst)
    return pp


# ---------------------------------------------------------------------------
# Fused whole-network Pallas kernel
# ---------------------------------------------------------------------------
def _gnn_fused_kernel(h0_ref, ea_ref, gdst_ref,
                      emb_w_ref, emb_b_ref,
                      slab_ref, wea_all_ref, eb1_ref, ew2_ref, eb2_ref,
                      wnagg_ref, nb1_ref, nw2_ref, nb2_ref,
                      embo_w_ref, embo_b_ref,
                      out_ref, *, n_layers, n_nodes, deg):
    """embedding -> n_layers x GCL -> embedding_out, all activations VMEM-resident."""
    f32 = jnp.float32
    bf16 = jnp.bfloat16
    n_edges = n_nodes * deg

    def silu(x):
        return x * jax.nn.sigmoid(x)

    # node embedding (h0 already bf16, lane-padded)
    h = jnp.dot(h0_ref[...], emb_w_ref[...],
                preferred_element_type=f32) + emb_b_ref[...]            # (N, 128) f32

    # hoisted, loop-invariant edge-attr projection for ALL layers: one wide MXU push
    ea_all = jnp.dot(ea_ref[...], wea_all_ref[...],
                     preferred_element_type=f32)                        # (E, L*128) f32

    gdst = gdst_ref[...]                                                # (E, N) one-hot bf16

    # 4 layers: statically unrolled (switch to lax.fori_loop over stacked refs if deep).
    for i in range(n_layers):
        hb = h.astype(bf16)

        # -- one (N, 384) projection of hb: [edge-src | edge-dst | node-MLP h-branch] -----
        proj = jnp.dot(hb, slab_ref[i], preferred_element_type=f32)     # (N, 384) f32
        src_p = proj[:, :LANE]
        dst_p = proj[:, LANE:2 * LANE]
        nh_p = proj[:, 2 * LANE:]

        # h_src: edges grouped by source node -> broadcast over the degree axis (no gather)
        src_e = jnp.broadcast_to(src_p[:, None, :],
                                 (n_nodes, deg, LANE)).reshape(n_edges, LANE)
        # h_dst: one-hot row gather of the projected features, single-pass bf16 MXU matmul
        dst_e = jnp.dot(gdst, dst_p.astype(bf16), preferred_element_type=f32)  # (E, 128)
        ea_e = ea_all[:, i * LANE:(i + 1) * LANE]                       # (E, 128), hoisted
        m = silu(src_e + dst_e + ea_e + eb1_ref[i])
        m = silu(jnp.dot(m.astype(bf16), ew2_ref[i],
                         preferred_element_type=f32) + eb2_ref[i])      # (E, 128) edge_feat
        # TODO(synk): optional edge_mask would multiply `m` here (example passes None).

        # -- unsorted_segment_sum(edge_feat, rows): constant degree, source-grouped --------
        agg = jnp.sum(m.reshape(n_nodes, deg, LANE), axis=1)            # (N, 128) f32, exact

        # -- node MLP: h-branch already computed in nh_p; only the agg branch needs a dot --
        n1 = silu(nh_p + jnp.dot(agg.astype(bf16), wnagg_ref[i],
                                 preferred_element_type=f32) + nb1_ref[i])
        h = h + (jnp.dot(n1.astype(bf16), nw2_ref[i],
                         preferred_element_type=f32) + nb2_ref[i])      # recurrent residual

    # output embedding (N is padded to a multiple of 8 -> unmasked vreg-tile stores)
    out_ref[...] = jnp.dot(h.astype(bf16), embo_w_ref[...],
                           preferred_element_type=f32) + embo_b_ref[...]


def gnn_forward(pp, h0_pad, ea_pad, gdst, *, n_nodes, deg, n_layers, node_mask=None):
    """Launch the single fused kernel; all operands are already lane-padded / packed.

    grid=() single launch is latency-optimal on v5e/v6e at these sizes.  On v7x (2 TCs,
    64 MiB VMEM) and for larger batches, add a per-graph grid=(B,) with
    dimension_semantics=("parallel",) and per-graph BlockSpecs for h0/ea/gdst/out.
    """
    kernel = functools.partial(_gnn_fused_kernel,
                               n_layers=n_layers, n_nodes=n_nodes, deg=deg)
    operands = (h0_pad, ea_pad, gdst,
                pp["emb_w"], pp["emb_b"],
                pp["slab"], pp["wea_all"], pp["eb1"], pp["ew2"], pp["eb2"],
                pp["wnagg"], pp["nb1"], pp["nw2"], pp["nb2"],
                pp["embo_w"], pp["embo_b"])
    vmem_spec = pl.BlockSpec(memory_space=pltpu.MemorySpace.VMEM)
    out = pl.pallas_call(
        kernel,
        out_shape=jax.ShapeDtypeStruct((n_nodes, LANE), jnp.float32),
        in_specs=[vmem_spec] * len(operands),
        out_specs=vmem_spec,
        compiler_params=pltpu.CompilerParams(vmem_limit_bytes=32 * 1024 * 1024),
    )(*operands)
    if node_mask is not None:
        out = out * node_mask
    return out


# ---------------------------------------------------------------------------
# Pure-JAX float32 reference with the exact PyTorch GNN/GCL semantics
# ---------------------------------------------------------------------------
def gnn_reference(params, h0, rows, cols, edge_attr, n_layers):
    silu = lambda x: x * jax.nn.sigmoid(x)
    lin = lambda x, w, b: x @ w + b
    h = lin(h0, params["emb_w"], params["emb_b"])
    n = h.shape[0]
    for p in params["gcl"]:
        e_in = jnp.concatenate([h[rows], h[cols], edge_attr], axis=1)
        m = silu(lin(e_in, p["edge_w1"], p["edge_b1"]))
        m = silu(lin(m, p["edge_w2"], p["edge_b2"]))
        agg = jnp.zeros((n, m.shape[1]), m.dtype).at[rows].add(m)   # unsorted_segment_sum
        out = silu(lin(jnp.concatenate([h, agg], axis=1), p["node_w1"], p["node_b1"]))
        out = lin(out, p["node_w2"], p["node_b2"])
        h = h + out                                                 # recurrent=True
    return lin(h, params["emb_out_w"], params["emb_out_b"])


# ---------------------------------------------------------------------------
# Graph construction: fully connected per graph, edges grouped by source node
# ---------------------------------------------------------------------------
def build_edges(n_particles, n_batch):
    rows, cols = [], []
    for b in range(n_batch):
        for i in range(n_particles):
            for j in range(n_particles):
                if j != i:
                    rows.append(b * n_particles + i)
                    cols.append(b * n_particles + j)
    return np.asarray(rows, np.int32), np.asarray(cols, np.int32)


def validate_edge_contract(rows, cols, n_nodes, deg):
    """The kernel's segment-sum assumes edges grouped by source node, constant degree."""
    rows = np.asarray(rows)
    cols = np.asarray(cols)
    assert rows.shape == cols.shape and rows.shape[0] == n_nodes * deg
    assert np.array_equal(rows, np.repeat(np.arange(n_nodes, dtype=rows.dtype), deg)), \
        "edges must be grouped by source node with constant degree (build_edges order)"
    assert np.all(cols != rows)


if __name__ == "__main__":
    # SMALL shapes: 2 fully-connected graphs of 9 nodes (degree 8 = one sublane tile),
    # node features 4, edge features 1, hidden 32, 4 GCL layers (module default).
    P, B = 9, 2
    IN_NODE_NF, IN_EDGE_NF = 4, 1
    HIDDEN_NF, N_LAYERS = 32, 4
    N, DEG = B * P, P - 1
    E = N * DEG
    # Pad node count to a multiple of 8 so every (N,128) intermediate is an exact vreg tile.
    N_PAD = ((N + 7) // 8) * 8
    E_PAD = N_PAD * DEG

    key = jax.random.PRNGKey(0)
    k_p, k_h, k_e = jax.random.split(key, 3)
    params = init_params(k_p, IN_NODE_NF, IN_EDGE_NF, HIDDEN_NF, N_LAYERS)
    h0 = jax.random.normal(k_h, (N, IN_NODE_NF), jnp.float32)
    edge_attr = jax.random.normal(k_e, (E, IN_EDGE_NF), jnp.float32)
    rows, cols = build_edges(P, B)
    validate_edge_contract(rows, cols, N, DEG)

    # One-time (outside jit) packing into lane-padded / bf16 layouts.
    pp = prepare_params(params, HIDDEN_NF, IN_EDGE_NF)
    h0_pad = jnp.zeros((N_PAD, LANE), jnp.bfloat16).at[:N, :IN_NODE_NF].set(
        h0.astype(jnp.bfloat16))
    ea_pad = jnp.zeros((E_PAD, LANE), jnp.bfloat16).at[:E, :IN_EDGE_NF].set(
        edge_attr.astype(jnp.bfloat16))
    # One-hot destination gather matrix, bf16 (exact for one-hot); padded (fake) edge rows
    # are all-zero so they contribute nothing and aggregate only into padded (fake) nodes.
    gdst_np = np.zeros((E_PAD, N_PAD), np.float32)
    gdst_np[np.arange(E), cols] = 1.0
    gdst = jnp.asarray(gdst_np, jnp.bfloat16)

    fwd = jax.jit(functools.partial(gnn_forward, n_nodes=N_PAD, deg=DEG, n_layers=N_LAYERS))
    out_pad = jax.block_until_ready(fwd(pp, h0_pad, ea_pad, gdst))
    out = out_pad[:N, :IN_NODE_NF]                            # out_node_nf == in_node_nf

    # correctness vs. the float32 module reference (kernel matmuls are bf16 -> loose tol)
    ref = gnn_reference(params, h0, rows, cols, edge_attr, N_LAYERS)
    assert out.shape == (N, IN_NODE_NF)
    assert bool(jnp.all(jnp.isfinite(out)))
    err = float(jnp.max(jnp.abs(out - ref)))
    scale = float(jnp.max(jnp.abs(ref))) + 1.0
    assert err / scale < 0.08, f"mismatch vs f32 reference: abs={err}, scale={scale}"
    print("KERNEL_OK")
</pallas_src>

<mosaic_0001>
module attributes {stable_mosaic.version = 11 : i64} {
  func.func @_gnn_fused_kernel(%arg0: memref<24x128xbf16, #tpu.memory_space<vmem>>, %arg1: memref<192x128xbf16, #tpu.memory_space<vmem>>, %arg2: memref<192x24xbf16, #tpu.memory_space<vmem>>, %arg3: memref<128x128xbf16, #tpu.memory_space<vmem>>, %arg4: memref<1x128xf32, #tpu.memory_space<vmem>>, %arg5: memref<4x128x384xbf16, #tpu.memory_space<vmem>>, %arg6: memref<128x512xbf16, #tpu.memory_space<vmem>>, %arg7: memref<4x1x128xf32, #tpu.memory_space<vmem>>, %arg8: memref<4x128x128xbf16, #tpu.memory_space<vmem>>, %arg9: memref<4x1x128xf32, #tpu.memory_space<vmem>>, %arg10: memref<4x128x128xbf16, #tpu.memory_space<vmem>>, %arg11: memref<4x1x128xf32, #tpu.memory_space<vmem>>, %arg12: memref<4x128x128xbf16, #tpu.memory_space<vmem>>, %arg13: memref<4x1x128xf32, #tpu.memory_space<vmem>>, %arg14: memref<128x128xbf16, #tpu.memory_space<vmem>>, %arg15: memref<1x128xf32, #tpu.memory_space<vmem>>, %arg16: memref<24x128xf32, #tpu.memory_space<vmem>>) attributes {dimension_semantics = [], scalar_prefetch = 0 : i64, scratch_operands = 0 : i64, tpu.core_type = #tpu.core_type<tc>} {
    %c0 = arith.constant 0 : index
    %c0_0 = arith.constant 0 : index
    %0 = vector.load %arg0[%c0, %c0_0] : memref<24x128xbf16, #tpu.memory_space<vmem>>, vector<24x128xbf16>
    %c0_1 = arith.constant 0 : index
    %c0_2 = arith.constant 0 : index
    %1 = vector.load %arg3[%c0_1, %c0_2] : memref<128x128xbf16, #tpu.memory_space<vmem>>, vector<128x128xbf16>
    %cst = arith.constant dense<0.000000e+00> : vector<24x128xf32>
    %2 = tpu.matmul %0, %1, %cst {dimension_numbers = #tpu.dot_dimension_numbers<[1], [0], [0], [1], [0, 0, 1, 1], [], []>} : vector<24x128xbf16>, vector<128x128xbf16>, vector<24x128xf32> -> vector<24x128xf32>
    %c0_3 = arith.constant 0 : index
    %c0_4 = arith.constant 0 : index
    %3 = vector.load %arg4[%c0_3, %c0_4] : memref<1x128xf32, #tpu.memory_space<vmem>>, vector<1x128xf32>
    %4 = vector.broadcast %3 : vector<1x128xf32> to vector<24x128xf32>
    %5 = arith.addf %2, %4 : vector<24x128xf32>
    %c0_5 = arith.constant 0 : index
    %c0_6 = arith.constant 0 : index
    %6 = vector.load %arg1[%c0_5, %c0_6] : memref<192x128xbf16, #tpu.memory_space<vmem>>, vector<192x128xbf16>
    %c0_7 = arith.constant 0 : index
    %c0_8 = arith.constant 0 : index
    %7 = vector.load %arg6[%c0_7, %c0_8] : memref<128x512xbf16, #tpu.memory_space<vmem>>, vector<128x512xbf16>
    %cst_9 = arith.constant dense<0.000000e+00> : vector<192x512xf32>
    %8 = tpu.matmul %6, %7, %cst_9 {dimension_numbers = #tpu.dot_dimension_numbers<[1], [0], [0], [1], [0, 0, 1, 1], [], []>} : vector<192x128xbf16>, vector<128x512xbf16>, vector<192x512xf32> -> vector<192x512xf32>
    %c0_10 = arith.constant 0 : index
    %c0_11 = arith.constant 0 : index
    %9 = vector.load %arg2[%c0_10, %c0_11] : memref<192x24xbf16, #tpu.memory_space<vmem>>, vector<192x24xbf16>
    %10 = arith.truncf %5 : vector<24x128xf32> to vector<24x128xbf16>
    %c0_12 = arith.constant 0 : index
    %c0_13 = arith.constant 0 : index
    %c0_14 = arith.constant 0 : index
    %11 = vector.load %arg5[%c0_12, %c0_13, %c0_14] : memref<4x128x384xbf16, #tpu.memory_space<vmem>>, vector<1x128x384xbf16>
    %12 = vector.shape_cast %11 : vector<1x128x384xbf16> to vector<128x384xbf16>
    %cst_15 = arith.constant dense<0.000000e+00> : vector<24x384xf32>
    %13 = tpu.matmul %10, %12, %cst_15 {dimension_numbers = #tpu.dot_dimension_numbers<[1], [0], [0], [1], [0, 0, 1, 1], [], []>} : vector<24x128xbf16>, vector<128x384xbf16>, vector<24x384xf32> -> vector<24x384xf32>
    %14 = vector.extract_strided_slice %13 {offsets = [0, 0], sizes = [24, 128], strides = [1, 1]} : vector<24x384xf32> to vector<24x128xf32>
    %15 = vector.extract_strided_slice %13 {offsets = [0, 128], sizes = [24, 128], strides = [1, 1]} : vector<24x384xf32> to vector<24x128xf32>
    %16 = vector.extract_strided_slice %13 {offsets = [0, 256], sizes = [24, 128], strides = [1, 1]} : vector<24x384xf32> to vector<24x128xf32>
    %17 = vector.shape_cast %14 : vector<24x128xf32> to vector<24x1x128xf32>
    %18 = vector.shape_cast %17 : vector<24x1x128xf32> to vector<24x1x128xf32>
    %19 = vector.broadcast %18 : vector<24x1x128xf32> to vector<24x8x128xf32>
    %20 = vector.shape_cast %19 : vector<24x8x128xf32> to vector<192x128xf32>
    %21 = arith.truncf %15 : vector<24x128xf32> to vector<24x128xbf16>
    %cst_16 = arith.constant dense<0.000000e+00> : vector<192x128xf32>
    %22 = tpu.matmul %9, %21, %cst_16 {dimension_numbers = #tpu.dot_dimension_numbers<[1], [0], [0], [1], [0, 0, 1, 1], [], []>} : vector<192x24xbf16>, vector<24x128xbf16>, vector<192x128xf32> -> vector<192x128xf32>
    %23 = vector.extract_strided_slice %8 {offsets = [0, 0], sizes = [192, 128], strides = [1, 1]} : vector<192x512xf32> to vector<192x128xf32>
    %24 = arith.addf %20, %22 : vector<192x128xf32>
    %25 = arith.addf %24, %23 : vector<192x128xf32>
    %c0_17 = arith.constant 0 : index
    %c0_18 = arith.constant 0 : index
    %c0_19 = arith.constant 0 : index
    %26 = vector.load %arg7[%c0_17, %c0_18, %c0_19] : memref<4x1x128xf32, #tpu.memory_space<vmem>>, vector<1x1x128xf32>
    %27 = vector.shape_cast %26 : vector<1x1x128xf32> to vector<1x128xf32>
    %28 = vector.broadcast %27 : vector<1x128xf32> to vector<192x128xf32>
    %29 = arith.addf %25, %28 : vector<192x128xf32>
    %30 = arith.negf %29 : vector<192x128xf32>
    %31 = math.exp %30 : vector<192x128xf32>
    %cst_20 = arith.constant 1.000000e+00 : f32
    %32 = vector.broadcast %cst_20 : f32 to vector<192x128xf32>
    %33 = arith.addf %32, %31 : vector<192x128xf32>
    %34 = arith.divf %32, %33 : vector<192x128xf32>
    %35 = arith.mulf %29, %34 : vector<192x128xf32>
    %36 = arith.truncf %35 : vector<192x128xf32> to vector<192x128xbf16>
    %c0_21 = arith.constant 0 : index
    %c0_22 = arith.constant 0 : index
    %c0_23 = arith.constant 0 : index
    %37 = vector.load %arg8[%c0_21, %c0_22, %c0_23] : memref<4x128x128xbf16, #tpu.memory_space<vmem>>, vector<1x128x128xbf16>
    %38 = vector.shape_cast %37 : vector<1x128x128xbf16> to vector<128x128xbf16>
    %cst_24 = arith.constant dense<0.000000e+00> : vector<192x128xf32>
    %39 = tpu.matmul %36, %38, %cst_24 {dimension_numbers = #tpu.dot_dimension_numbers<[1], [0], [0], [1], [0, 0, 1, 1], [], []>} : vector<192x128xbf16>, vector<128x128xbf16>, vector<192x128xf32> -> vector<192x128xf32>
    %c0_25 = arith.constant 0 : index
    %c0_26 = arith.constant 0 : index
    %c0_27 = arith.constant 0 : index
    %40 = vector.load %arg9[%c0_25, %c0_26, %c0_27] : memref<4x1x128xf32, #tpu.memory_space<vmem>>, vector<1x1x128xf32>
    %41 = vector.shape_cast %40 : vector<1x1x128xf32> to vector<1x128xf32>
    %42 = vector.broadcast %41 : vector<1x128xf32> to vector<192x128xf32>
    %43 = arith.addf %39, %42 : vector<192x128xf32>
    %44 = arith.negf %43 : vector<192x128xf32>
    %45 = math.exp %44 : vector<192x128xf32>
    %cst_28 = arith.constant 1.000000e+00 : f32
    %46 = vector.broadcast %cst_28 : f32 to vector<192x128xf32>
    %47 = arith.addf %46, %45 : vector<192x128xf32>
    %48 = arith.divf %46, %47 : vector<192x128xf32>
    %49 = arith.mulf %43, %48 : vector<192x128xf32>
    %50 = vector.shape_cast %49 : vector<192x128xf32> to vector<24x8x128xf32>
    %cst_29 = arith.constant dense<0.000000e+00> : vector<24x128xf32>
    %51 = vector.multi_reduction <add>, %50, %cst_29 [1] : vector<24x8x128xf32> to vector<24x128xf32>
    %52 = arith.truncf %51 : vector<24x128xf32> to vector<24x128xbf16>
    %c0_30 = arith.constant 0 : index
    %c0_31 = arith.constant 0 : index
    %c0_32 = arith.constant 0 : index
    %53 = vector.load %arg10[%c0_30, %c0_31, %c0_32] : memref<4x128x128xbf16, #tpu.memory_space<vmem>>, vector<1x128x128xbf16>
    %54 = vector.shape_cast %53 : vector<1x128x128xbf16> to vector<128x128xbf16>
    %cst_33 = arith.constant dense<0.000000e+00> : vector<24x128xf32>
    %55 = tpu.matmul %52, %54, %cst_33 {dimension_numbers = #tpu.dot_dimension_numbers<[1], [0], [0], [1], [0, 0, 1, 1], [], []>} : vector<24x128xbf16>, vector<128x128xbf16>, vector<24x128xf32> -> vector<24x128xf32>
    %56 = arith.addf %16, %55 : vector<24x128xf32>
    %c0_34 = arith.constant 0 : index
    %c0_35 = arith.constant 0 : index
    %c0_36 = arith.constant 0 : index
    %57 = vector.load %arg11[%c0_34, %c0_35, %c0_36] : memref<4x1x128xf32, #tpu.memory_space<vmem>>, vector<1x1x128xf32>
    %58 = vector.shape_cast %57 : vector<1x1x128xf32> to vector<1x128xf32>
    %59 = vector.broadcast %58 : vector<1x128xf32> to vector<24x128xf32>
    %60 = arith.addf %56, %59 : vector<24x128xf32>
    %61 = arith.negf %60 : vector<24x128xf32>
    %62 = math.exp %61 : vector<24x128xf32>
    %cst_37 = arith.constant 1.000000e+00 : f32
    %63 = vector.broadcast %cst_37 : f32 to vector<24x128xf32>
    %64 = arith.addf %63, %62 : vector<24x128xf32>
    %65 = arith.divf %63, %64 : vector<24x128xf32>
    %66 = arith.mulf %60, %65 : vector<24x128xf32>
    %67 = arith.truncf %66 : vector<24x128xf32> to vector<24x128xbf16>
    %c0_38 = arith.constant 0 : index
    %c0_39 = arith.constant 0 : index
    %c0_40 = arith.constant 0 : index
    %68 = vector.load %arg12[%c0_38, %c0_39, %c0_40] : memref<4x128x128xbf16, #tpu.memory_space<vmem>>, vector<1x128x128xbf16>
    %69 = vector.shape_cast %68 : vector<1x128x128xbf16> to vector<128x128xbf16>
    %cst_41 = arith.constant dense<0.000000e+00> : vector<24x128xf32>
    %70 = tpu.matmul %67, %69, %cst_41 {dimension_numbers = #tpu.dot_dimension_numbers<[1], [0], [0], [1], [0, 0, 1, 1], [], []>} : vector<24x128xbf16>, vector<128x128xbf16>, vector<24x128xf32> -> vector<24x128xf32>
    %c0_42 = arith.constant 0 : index
    %c0_43 = arith.constant 0 : index
    %c0_44 = arith.constant 0 : index
    %71 = vector.load %arg13[%c0_42, %c0_43, %c0_44] : memref<4x1x128xf32, #tpu.memory_space<vmem>>, vector<1x1x128xf32>
    %72 = vector.shape_cast %71 : vector<1x1x128xf32> to vector<1x128xf32>
    %73 = vector.broadcast %72 : vector<1x128xf32> to vector<24x128xf32>
    %74 = arith.addf %70, %73 : vector<24x128xf32>
    %75 = arith.addf %5, %74 : vector<24x128xf32>
    %76 = arith.truncf %75 : vector<24x128xf32> to vector<24x128xbf16>
    %c1 = arith.constant 1 : index
    %c0_45 = arith.constant 0 : index
    %c0_46 = arith.constant 0 : index
    %77 = vector.load %arg5[%c1, %c0_45, %c0_46] : memref<4x128x384xbf16, #tpu.memory_space<vmem>>, vector<1x128x384xbf16>
    %78 = vector.shape_cast %77 : vector<1x128x384xbf16> to vector<128x384xbf16>
    %cst_47 = arith.constant dense<0.000000e+00> : vector<24x384xf32>
    %79 = tpu.matmul %76, %78, %cst_47 {dimension_numbers = #tpu.dot_dimension_numbers<[1], [0], [0], [1], [0, 0, 1, 1], [], []>} : vector<24x128xbf16>, vector<128x384xbf16>, vector<24x384xf32> -> vector<24x384xf32>
    %80 = vector.extract_strided_slice %79 {offsets = [0, 0], sizes = [24, 128], strides = [1, 1]} : vector<24x384xf32> to vector<24x128xf32>
    %81 = vector.extract_strided_slice %79 {offsets = [0, 128], sizes = [24, 128], strides = [1, 1]} : vector<24x384xf32> to vector<24x128xf32>
    %82 = vector.extract_strided_slice %79 {offsets = [0, 256], sizes = [24, 128], strides = [1, 1]} : vector<24x384xf32> to vector<24x128xf32>
    %83 = vector.shape_cast %80 : vector<24x128xf32> to vector<24x1x128xf32>
    %84 = vector.shape_cast %83 : vector<24x1x128xf32> to vector<24x1x128xf32>
    %85 = vector.broadcast %84 : vector<24x1x128xf32> to vector<24x8x128xf32>
    %86 = vector.shape_cast %85 : vector<24x8x128xf32> to vector<192x128xf32>
    %87 = arith.truncf %81 : vector<24x128xf32> to vector<24x128xbf16>
    %cst_48 = arith.constant dense<0.000000e+00> : vector<192x128xf32>
    %88 = tpu.matmul %9, %87, %cst_48 {dimension_numbers = #tpu.dot_dimension_numbers<[1], [0], [0], [1], [0, 0, 1, 1], [], []>} : vector<192x24xbf16>, vector<24x128xbf16>, vector<192x128xf32> -> vector<192x128xf32>
    %89 = vector.extract_strided_slice %8 {offsets = [0, 128], sizes = [192, 128], strides = [1, 1]} : vector<192x512xf32> to vector<192x128xf32>
    %90 = arith.addf %86, %88 : vector<192x128xf32>
    %91 = arith.addf %90, %89 : vector<192x128xf32>
    %c1_49 = arith.constant 1 : index
    %c0_50 = arith.constant 0 : index
    %c0_51 = arith.constant 0 : index
    %92 = vector.load %arg7[%c1_49, %c0_50, %c0_51] : memref<4x1x128xf32, #tpu.memory_space<vmem>>, vector<1x1x128xf32>
    %93 = vector.shape_cast %92 : vector<1x1x128xf32> to vector<1x128xf32>
    %94 = vector.broadcast %93 : vector<1x128xf32> to vector<192x128xf32>
    %95 = arith.addf %91, %94 : vector<192x128xf32>
    %96 = arith.negf %95 : vector<192x128xf32>
    %97 = math.exp %96 : vector<192x128xf32>
    %cst_52 = arith.constant 1.000000e+00 : f32
    %98 = vector.broadcast %cst_52 : f32 to vector<192x128xf32>
    %99 = arith.addf %98, %97 : vector<192x128xf32>
    %100 = arith.divf %98, %99 : vector<192x128xf32>
    %101 = arith.mulf %95, %100 : vector<192x128xf32>
    %102 = arith.truncf %101 : vector<192x128xf32> to vector<192x128xbf16>
    %c1_53 = arith.constant 1 : index
    %c0_54 = arith.constant 0 : index
    %c0_55 = arith.constant 0 : index
    %103 = vector.load %arg8[%c1_53, %c0_54, %c0_55] : memref<4x128x128xbf16, #tpu.memory_space<vmem>>, vector<1x128x128xbf16>
    %104 = vector.shape_cast %103 : vector<1x128x128xbf16> to vector<128x128xbf16>
    %cst_56 = arith.constant dense<0.000000e+00> : vector<192x128xf32>
    %105 = tpu.matmul %102, %104, %cst_56 {dimension_numbers = #tpu.dot_dimension_numbers<[1], [0], [0], [1], [0, 0, 1, 1], [], []>} : vector<192x128xbf16>, vector<128x128xbf16>, vector<192x128xf32> -> vector<192x128xf32>
    %c1_57 = arith.constant 1 : index
    %c0_58 = arith.constant 0 : index
    %c0_59 = arith.constant 0 : index
    %106 = vector.load %arg9[%c1_57, %c0_58, %c0_59] : memref<4x1x128xf32, #tpu.memory_space<vmem>>, vector<1x1x128xf32>
    %107 = vector.shape_cast %106 : vector<1x1x128xf32> to vector<1x128xf32>
    %108 = vector.broadcast %107 : vector<1x128xf32> to vector<192x128xf32>
    %109 = arith.addf %105, %108 : vector<192x128xf32>
    %110 = arith.negf %109 : vector<192x128xf32>
    %111 = math.exp %110 : vector<192x128xf32>
    %cst_60 = arith.constant 1.000000e+00 : f32
    %112 = vector.broadcast %cst_60 : f32 to vector<192x128xf32>
    %113 = arith.addf %112, %111 : vector<192x128xf32>
    %114 = arith.divf %112, %113 : vector<192x128xf32>
    %115 = arith.mulf %109, %114 : vector<192x128xf32>
    %116 = vector.shape_cast %115 : vector<192x128xf32> to vector<24x8x128xf32>
    %cst_61 = arith.constant dense<0.000000e+00> : vector<24x128xf32>
    %117 = vector.multi_reduction <add>, %116, %cst_61 [1] : vector<24x8x128xf32> to vector<24x128xf32>
    %118 = arith.truncf %117 : vector<24x128xf32> to vector<24x128xbf16>
    %c1_62 = arith.constant 1 : index
    %c0_63 = arith.constant 0 : index
    %c0_64 = arith.constant 0 : index
    %119 = vector.load %arg10[%c1_62, %c0_63, %c0_64] : memref<4x128x128xbf16, #tpu.memory_space<vmem>>, vector<1x128x128xbf16>
    %120 = vector.shape_cast %119 : vector<1x128x128xbf16> to vector<128x128xbf16>
    %cst_65 = arith.constant dense<0.000000e+00> : vector<24x128xf32>
    %121 = tpu.matmul %118, %120, %cst_65 {dimension_numbers = #tpu.dot_dimension_numbers<[1], [0], [0], [1], [0, 0, 1, 1], [], []>} : vector<24x128xbf16>, vector<128x128xbf16>, vector<24x128xf32> -> vector<24x128xf32>
    %122 = arith.addf %82, %121 : vector<24x128xf32>
    %c1_66 = arith.constant 1 : index
    %c0_67 = arith.constant 0 : index
    %c0_68 = arith.constant 0 : index
    %123 = vector.load %arg11[%c1_66, %c0_67, %c0_68] : memref<4x1x128xf32, #tpu.memory_space<vmem>>, vector<1x1x128xf32>
    %124 = vector.shape_cast %123 : vector<1x1x128xf32> to vector<1x128xf32>
    %125 = vector.broadcast %124 : vector<1x128xf32> to vector<24x128xf32>
    %126 = arith.addf %122, %125 : vector<24x128xf32>
    %127 = arith.negf %126 : vector<24x128xf32>
    %128 = math.exp %127 : vector<24x128xf32>
    %cst_69 = arith.constant 1.000000e+00 : f32
    %129 = vector.broadcast %cst_69 : f32 to vector<24x128xf32>
    %130 = arith.addf %129, %128 : vector<24x128xf32>
    %131 = arith.divf %129, %130 : vector<24x128xf32>
    %132 = arith.mulf %126, %131 : vector<24x128xf32>
    %133 = arith.truncf %132 : vector<24x128xf32> to vector<24x128xbf16>
    %c1_70 = arith.constant 1 : index
    %c0_71 = arith.constant 0 : index
    %c0_72 = arith.constant 0 : index
    %134 = vector.load %arg12[%c1_70, %c0_71, %c0_72] : memref<4x128x128xbf16, #tpu.memory_space<vmem>>, vector<1x128x128xbf16>
    %135 = vector.shape_cast %134 : vector<1x128x128xbf16> to vector<128x128xbf16>
    %cst_73 = arith.constant dense<0.000000e+00> : vector<24x128xf32>
    %136 = tpu.matmul %133, %135, %cst_73 {dimension_numbers = #tpu.dot_dimension_numbers<[1], [0], [0], [1], [0, 0, 1, 1], [], []>} : vector<24x128xbf16>, vector<128x128xbf16>, vector<24x128xf32> -> vector<24x128xf32>
    %c1_74 = arith.constant 1 : index
    %c0_75 = arith.constant 0 : index
    %c0_76 = arith.constant 0 : index
    %137 = vector.load %arg13[%c1_74, %c0_75, %c0_76] : memref<4x1x128xf32, #tpu.memory_space<vmem>>, vector<1x1x128xf32>
    %138 = vector.shape_cast %137 : vector<1x1x128xf32> to vector<1x128xf32>
    %139 = vector.broadcast %138 : vector<1x128xf32> to vector<24x128xf32>
    %140 = arith.addf %136, %139 : vector<24x128xf32>
    %141 = arith.addf %75, %140 : vector<24x128xf32>
    %142 = arith.truncf %141 : vector<24x128xf32> to vector<24x128xbf16>
    %c2 = arith.constant 2 : index
    %c0_77 = arith.constant 0 : index
    %c0_78 = arith.constant 0 : index
    %143 = vector.load %arg5[%c2, %c0_77, %c0_78] : memref<4x128x384xbf16, #tpu.memory_space<vmem>>, vector<1x128x384xbf16>
    %144 = vector.shape_cast %143 : vector<1x128x384xbf16> to vector<128x384xbf16>
    %cst_79 = arith.constant dense<0.000000e+00> : vector<24x384xf32>
    %145 = tpu.matmul %142, %144, %cst_79 {dimension_numbers = #tpu.dot_dimension_numbers<[1], [0], [0], [1], [0, 0, 1, 1], [], []>} : vector<24x128xbf16>, vector<128x384xbf16>, vector<24x384xf32> -> vector<24x384xf32>
    %146 = vector.extract_strided_slice %145 {offsets = [0, 0], sizes = [24, 128], strides = [1, 1]} : vector<24x384xf32> to vector<24x128xf32>
    %147 = vector.extract_strided_slice %145 {offsets = [0, 128], sizes = [24, 128], strides = [1, 1]} : vector<24x384xf32> to vector<24x128xf32>
    %148 = vector.extract_strided_slice %145 {offsets = [0, 256], sizes = [24, 128], strides = [1, 1]} : vector<24x384xf32> to vector<24x128xf32>
    %149 = vector.shape_cast %146 : vector<24x128xf32> to vector<24x1x128xf32>
    %150 = vector.shape_cast %149 : vector<24x1x128xf32> to vector<24x1x128xf32>
    %151 = vector.broadcast %150 : vector<24x1x128xf32> to vector<24x8x128xf32>
    %152 = vector.shape_cast %151 : vector<24x8x128xf32> to vector<192x128xf32>
    %153 = arith.truncf %147 : vector<24x128xf32> to vector<24x128xbf16>
    %cst_80 = arith.constant dense<0.000000e+00> : vector<192x128xf32>
    %154 = tpu.matmul %9, %153, %cst_80 {dimension_numbers = #tpu.dot_dimension_numbers<[1], [0], [0], [1], [0, 0, 1, 1], [], []>} : vector<192x24xbf16>, vector<24x128xbf16>, vector<192x128xf32> -> vector<192x128xf32>
    %155 = vector.extract_strided_slice %8 {offsets = [0, 256], sizes = [192, 128], strides = [1, 1]} : vector<192x512xf32> to vector<192x128xf32>
    %156 = arith.addf %152, %154 : vector<192x128xf32>
    %157 = arith.addf %156, %155 : vector<192x128xf32>
    %c2_81 = arith.constant 2 : index
    %c0_82 = arith.constant 0 : index
    %c0_83 = arith.constant 0 : index
    %158 = vector.load %arg7[%c2_81, %c0_82, %c0_83] : memref<4x1x128xf32, #tpu.memory_space<vmem>>, vector<1x1x128xf32>
    %159 = vector.shape_cast %158 : vector<1x1x128xf32> to vector<1x128xf32>
    %160 = vector.broadcast %159 : vector<1x128xf32> to vector<192x128xf32>
    %161 = arith.addf %157, %160 : vector<192x128xf32>
    %162 = arith.negf %161 : vector<192x128xf32>
    %163 = math.exp %162 : vector<192x128xf32>
    %cst_84 = arith.constant 1.000000e+00 : f32
    %164 = vector.broadcast %cst_84 : f32 to vector<192x128xf32>
    %165 = arith.addf %164, %163 : vector<192x128xf32>
    %166 = arith.divf %164, %165 : vector<192x128xf32>
    %167 = arith.mulf %161, %166 : vector<192x128xf32>
    %168 = arith.truncf %167 : vector<192x128xf32> to vector<192x128xbf16>
    %c2_85 = arith.constant 2 : index
    %c0_86 = arith.constant 0 : index
    %c0_87 = arith.constant 0 : index
    %169 = vector.load %arg8[%c2_85, %c0_86, %c0_87] : memref<4x128x128xbf16, #tpu.memory_space<vmem>>, vector<1x128x128xbf16>
    %170 = vector.shape_cast %169 : vector<1x128x128xbf16> to vector<128x128xbf16>
    %cst_88 = arith.constant dense<0.000000e+00> : vector<192x128xf32>
    %171 = tpu.matmul %168, %170, %cst_88 {dimension_numbers = #tpu.dot_dimension_numbers<[1], [0], [0], [1], [0, 0, 1, 1], [], []>} : vector<192x128xbf16>, vector<128x128xbf16>, vector<192x128xf32> -> vector<192x128xf32>
    %c2_89 = arith.constant 2 : index
    %c0_90 = arith.constant 0 : index
    %c0_91 = arith.constant 0 : index
    %172 = vector.load %arg9[%c2_89, %c0_90, %c0_91] : memref<4x1x128xf32, #tpu.memory_space<vmem>>, vector<1x1x128xf32>
    %173 = vector.shape_cast %172 : vector<1x1x128xf32> to vector<1x128xf32>
    %174 = vector.broadcast %173 : vector<1x128xf32> to vector<192x128xf32>
    %175 = arith.addf %171, %174 : vector<192x128xf32>
    %176 = arith.negf %175 : vector<192x128xf32>
    %177 = math.exp %176 : vector<192x128xf32>
    %cst_92 = arith.constant 1.000000e+00 : f32
    %178 = vector.broadcast %cst_92 : f32 to vector<192x128xf32>
    %179 = arith.addf %178, %177 : vector<192x128xf32>
    %180 = arith.divf %178, %179 : vector<192x128xf32>
    %181 = arith.mulf %175, %180 : vector<192x128xf32>
    %182 = vector.shape_cast %181 : vector<192x128xf32> to vector<24x8x128xf32>
    %cst_93 = arith.constant dense<0.000000e+00> : vector<24x128xf32>
    %183 = vector.multi_reduction <add>, %182, %cst_93 [1] : vector<24x8x128xf32> to vector<24x128xf32>
    %184 = arith.truncf %183 : vector<24x128xf32> to vector<24x128xbf16>
    %c2_94 = arith.constant 2 : index
    %c0_95 = arith.constant 0 : index
    %c0_96 = arith.constant 0 : index
    %185 = vector.load %arg10[%c2_94, %c0_95, %c0_96] : memref<4x128x128xbf16, #tpu.memory_space<vmem>>, vector<1x128x128xbf16>
    %186 = vector.shape_cast %185 : vector<1x128x128xbf16> to vector<128x128xbf16>
    %cst_97 = arith.constant dense<0.000000e+00> : vector<24x128xf32>
    %187 = tpu.matmul %184, %186, %cst_97 {dimension_numbers = #tpu.dot_dimension_numbers<[1], [0], [0], [1], [0, 0, 1, 1], [], []>} : vector<24x128xbf16>, vector<128x128xbf16>, vector<24x128xf32> -> vector<24x128xf32>
    %188 = arith.addf %148, %187 : vector<24x128xf32>
    %c2_98 = arith.constant 2 : index
    %c0_99 = arith.constant 0 : index
    %c0_100 = arith.constant 0 : index
    %189 = vector.load %arg11[%c2_98, %c0_99, %c0_100] : memref<4x1x128xf32, #tpu.memory_space<vmem>>, vector<1x1x128xf32>
    %190 = vector.shape_cast %189 : vector<1x1x128xf32> to vector<1x128xf32>
    %191 = vector.broadcast %190 : vector<1x128xf32> to vector<24x128xf32>
    %192 = arith.addf %188, %191 : vector<24x128xf32>
    %193 = arith.negf %192 : vector<24x128xf32>
    %194 = math.exp %193 : vector<24x128xf32>
    %cst_101 = arith.constant 1.000000e+00 : f32
    %195 = vector.broadcast %cst_101 : f32 to vector<24x128xf32>
    %196 = arith.addf %195, %194 : vector<24x128xf32>
    %197 = arith.divf %195, %196 : vector<24x128xf32>
    %198 = arith.mulf %192, %197 : vector<24x128xf32>
    %199 = arith.truncf %198 : vector<24x128xf32> to vector<24x128xbf16>
    %c2_102 = arith.constant 2 : index
    %c0_103 = arith.constant 0 : index
    %c0_104 = arith.constant 0 : index
    %200 = vector.load %arg12[%c2_102, %c0_103, %c0_104] : memref<4x128x128xbf16, #tpu.memory_space<vmem>>, vector<1x128x128xbf16>
    %201 = vector.shape_cast %200 : vector<1x128x128xbf16> to vector<128x128xbf16>
    %cst_105 = arith.constant dense<0.000000e+00> : vector<24x128xf32>
    %202 = tpu.matmul %199, %201, %cst_105 {dimension_numbers = #tpu.dot_dimension_numbers<[1], [0], [0], [1], [0, 0, 1, 1], [], []>} : vector<24x128xbf16>, vector<128x128xbf16>, vector<24x128xf32> -> vector<24x128xf32>
    %c2_106 = arith.constant 2 : index
    %c0_107 = arith.constant 0 : index
    %c0_108 = arith.constant 0 : index
    %203 = vector.load %arg13[%c2_106, %c0_107, %c0_108] : memref<4x1x128xf32, #tpu.memory_space<vmem>>, vector<1x1x128xf32>
    %204 = vector.shape_cast %203 : vector<1x1x128xf32> to vector<1x128xf32>
    %205 = vector.broadcast %204 : vector<1x128xf32> to vector<24x128xf32>
    %206 = arith.addf %202, %205 : vector<24x128xf32>
    %207 = arith.addf %141, %206 : vector<24x128xf32>
    %208 = arith.truncf %207 : vector<24x128xf32> to vector<24x128xbf16>
    %c3 = arith.constant 3 : index
    %c0_109 = arith.constant 0 : index
    %c0_110 = arith.constant 0 : index
    %209 = vector.load %arg5[%c3, %c0_109, %c0_110] : memref<4x128x384xbf16, #tpu.memory_space<vmem>>, vector<1x128x384xbf16>
    %210 = vector.shape_cast %209 : vector<1x128x384xbf16> to vector<128x384xbf16>
    %cst_111 = arith.constant dense<0.000000e+00> : vector<24x384xf32>
    %211 = tpu.matmul %208, %210, %cst_111 {dimension_numbers = #tpu.dot_dimension_numbers<[1], [0], [0], [1], [0, 0, 1, 1], [], []>} : vector<24x128xbf16>, vector<128x384xbf16>, vector<24x384xf32> -> vector<24x384xf32>
    %212 = vector.extract_strided_slice %211 {offsets = [0, 0], sizes = [24, 128], strides = [1, 1]} : vector<24x384xf32> to vector<24x128xf32>
    %213 = vector.extract_strided_slice %211 {offsets = [0, 128], sizes = [24, 128], strides = [1, 1]} : vector<24x384xf32> to vector<24x128xf32>
    %214 = vector.extract_strided_slice %211 {offsets = [0, 256], sizes = [24, 128], strides = [1, 1]} : vector<24x384xf32> to vector<24x128xf32>
    %215 = vector.shape_cast %212 : vector<24x128xf32> to vector<24x1x128xf32>
    %216 = vector.shape_cast %215 : vector<24x1x128xf32> to vector<24x1x128xf32>
    %217 = vector.broadcast %216 : vector<24x1x128xf32> to vector<24x8x128xf32>
    %218 = vector.shape_cast %217 : vector<24x8x128xf32> to vector<192x128xf32>
    %219 = arith.truncf %213 : vector<24x128xf32> to vector<24x128xbf16>
    %cst_112 = arith.constant dense<0.000000e+00> : vector<192x128xf32>
    %220 = tpu.matmul %9, %219, %cst_112 {dimension_numbers = #tpu.dot_dimension_numbers<[1], [0], [0], [1], [0, 0, 1, 1], [], []>} : vector<192x24xbf16>, vector<24x128xbf16>, vector<192x128xf32> -> vector<192x128xf32>
    %221 = vector.extract_strided_slice %8 {offsets = [0, 384], sizes = [192, 128], strides = [1, 1]} : vector<192x512xf32> to vector<192x128xf32>
    %222 = arith.addf %218, %220 : vector<192x128xf32>
    %223 = arith.addf %222, %221 : vector<192x128xf32>
    %c3_113 = arith.constant 3 : index
    %c0_114 = arith.constant 0 : index
    %c0_115 = arith.constant 0 : index
    %224 = vector.load %arg7[%c3_113, %c0_114, %c0_115] : memref<4x1x128xf32, #tpu.memory_space<vmem>>, vector<1x1x128xf32>
    %225 = vector.shape_cast %224 : vector<1x1x128xf32> to vector<1x128xf32>
    %226 = vector.broadcast %225 : vector<1x128xf32> to vector<192x128xf32>
    %227 = arith.addf %223, %226 : vector<192x128xf32>
    %228 = arith.negf %227 : vector<192x128xf32>
    %229 = math.exp %228 : vector<192x128xf32>
    %cst_116 = arith.constant 1.000000e+00 : f32
    %230 = vector.broadcast %cst_116 : f32 to vector<192x128xf32>
    %231 = arith.addf %230, %229 : vector<192x128xf32>
    %232 = arith.divf %230, %231 : vector<192x128xf32>
    %233 = arith.mulf %227, %232 : vector<192x128xf32>
    %234 = arith.truncf %233 : vector<192x128xf32> to vector<192x128xbf16>
    %c3_117 = arith.constant 3 : index
    %c0_118 = arith.constant 0 : index
    %c0_119 = arith.constant 0 : index
    %235 = vector.load %arg8[%c3_117, %c0_118, %c0_119] : memref<4x128x128xbf16, #tpu.memory_space<vmem>>, vector<1x128x128xbf16>
    %236 = vector.shape_cast %235 : vector<1x128x128xbf16> to vector<128x128xbf16>
    %cst_120 = arith.constant dense<0.000000e+00> : vector<192x128xf32>
    %237 = tpu.matmul %234, %236, %cst_120 {dimension_numbers = #tpu.dot_dimension_numbers<[1], [0], [0], [1], [0, 0, 1, 1], [], []>} : vector<192x128xbf16>, vector<128x128xbf16>, vector<192x128xf32> -> vector<192x128xf32>
    %c3_121 = arith.constant 3 : index
    %c0_122 = arith.constant 0 : index
    %c0_123 = arith.constant 0 : index
    %238 = vector.load %arg9[%c3_121, %c0_122, %c0_123] : memref<4x1x128xf32, #tpu.memory_space<vmem>>, vector<1x1x128xf32>
    %239 = vector.shape_cast %238 : vector<1x1x128xf32> to vector<1x128xf32>
    %240 = vector.broadcast %239 : vector<1x128xf32> to vector<192x128xf32>
    %241 = arith.addf %237, %240 : vector<192x128xf32>
    %242 = arith.negf %241 : vector<192x128xf32>
    %243 = math.exp %242 : vector<192x128xf32>
    %cst_124 = arith.constant 1.000000e+00 : f32
    %244 = vector.broadcast %cst_124 : f32 to vector<192x128xf32>
    %245 = arith.addf %244, %243 : vector<192x128xf32>
    %246 = arith.divf %244, %245 : vector<192x128xf32>
    %247 = arith.mulf %241, %246 : vector<192x128xf32>
    %248 = vector.shape_cast %247 : vector<192x128xf32> to vector<24x8x128xf32>
    %cst_125 = arith.constant dense<0.000000e+00> : vector<24x128xf32>
    %249 = vector.multi_reduction <add>, %248, %cst_125 [1] : vector<24x8x128xf32> to vector<24x128xf32>
    %250 = arith.truncf %249 : vector<24x128xf32> to vector<24x128xbf16>
    %c3_126 = arith.constant 3 : index
    %c0_127 = arith.constant 0 : index
    %c0_128 = arith.constant 0 : index
    %251 = vector.load %arg10[%c3_126, %c0_127, %c0_128] : memref<4x128x128xbf16, #tpu.memory_space<vmem>>, vector<1x128x128xbf16>
    %252 = vector.shape_cast %251 : vector<1x128x128xbf16> to vector<128x128xbf16>
    %cst_129 = arith.constant dense<0.000000e+00> : vector<24x128xf32>
    %253 = tpu.matmul %250, %252, %cst_129 {dimension_numbers = #tpu.dot_dimension_numbers<[1], [0], [0], [1], [0, 0, 1, 1], [], []>} : vector<24x128xbf16>, vector<128x128xbf16>, vector<24x128xf32> -> vector<24x128xf32>
    %254 = arith.addf %214, %253 : vector<24x128xf32>
    %c3_130 = arith.constant 3 : index
    %c0_131 = arith.constant 0 : index
    %c0_132 = arith.constant 0 : index
    %255 = vector.load %arg11[%c3_130, %c0_131, %c0_132] : memref<4x1x128xf32, #tpu.memory_space<vmem>>, vector<1x1x128xf32>
    %256 = vector.shape_cast %255 : vector<1x1x128xf32> to vector<1x128xf32>
    %257 = vector.broadcast %256 : vector<1x128xf32> to vector<24x128xf32>
    %258 = arith.addf %254, %257 : vector<24x128xf32>
    %259 = arith.negf %258 : vector<24x128xf32>
    %260 = math.exp %259 : vector<24x128xf32>
    %cst_133 = arith.constant 1.000000e+00 : f32
    %261 = vector.broadcast %cst_133 : f32 to vector<24x128xf32>
    %262 = arith.addf %261, %260 : vector<24x128xf32>
    %263 = arith.divf %261, %262 : vector<24x128xf32>
    %264 = arith.mulf %258, %263 : vector<24x128xf32>
    %265 = arith.truncf %264 : vector<24x128xf32> to vector<24x128xbf16>
    %c3_134 = arith.constant 3 : index
    %c0_135 = arith.constant 0 : index
    %c0_136 = arith.constant 0 : index
    %266 = vector.load %arg12[%c3_134, %c0_135, %c0_136] : memref<4x128x128xbf16, #tpu.memory_space<vmem>>, vector<1x128x128xbf16>
    %267 = vector.shape_cast %266 : vector<1x128x128xbf16> to vector<128x128xbf16>
    %cst_137 = arith.constant dense<0.000000e+00> : vector<24x128xf32>
    %268 = tpu.matmul %265, %267, %cst_137 {dimension_numbers = #tpu.dot_dimension_numbers<[1], [0], [0], [1], [0, 0, 1, 1], [], []>} : vector<24x128xbf16>, vector<128x128xbf16>, vector<24x128xf32> -> vector<24x128xf32>
    %c3_138 = arith.constant 3 : index
    %c0_139 = arith.constant 0 : index
    %c0_140 = arith.constant 0 : index
    %269 = vector.load %arg13[%c3_138, %c0_139, %c0_140] : memref<4x1x128xf32, #tpu.memory_space<vmem>>, vector<1x1x128xf32>
    %270 = vector.shape_cast %269 : vector<1x1x128xf32> to vector<1x128xf32>
    %271 = vector.broadcast %270 : vector<1x128xf32> to vector<24x128xf32>
    %272 = arith.addf %268, %271 : vector<24x128xf32>
    %273 = arith.addf %207, %272 : vector<24x128xf32>
    %274 = arith.truncf %273 : vector<24x128xf32> to vector<24x128xbf16>
    %c0_141 = arith.constant 0 : index
    %c0_142 = arith.constant 0 : index
    %275 = vector.load %arg14[%c0_141, %c0_142] : memref<128x128xbf16, #tpu.memory_space<vmem>>, vector<128x128xbf16>
    %cst_143 = arith.constant dense<0.000000e+00> : vector<24x128xf32>
    %276 = tpu.matmul %274, %275, %cst_143 {dimension_numbers = #tpu.dot_dimension_numbers<[1], [0], [0], [1], [0, 0, 1, 1], [], []>} : vector<24x128xbf16>, vector<128x128xbf16>, vector<24x128xf32> -> vector<24x128xf32>
    %c0_144 = arith.constant 0 : index
    %c0_145 = arith.constant 0 : index
    %277 = vector.load %arg15[%c0_144, %c0_145] : memref<1x128xf32, #tpu.memory_space<vmem>>, vector<1x128xf32>
    %278 = vector.broadcast %277 : vector<1x128xf32> to vector<24x128xf32>
    %279 = arith.addf %276, %278 : vector<24x128xf32>
    %c0_146 = arith.constant 0 : index
    %c0_147 = arith.constant 0 : index
    %280 = vector.load %arg16[%c0_146, %c0_147] : memref<24x128xf32, #tpu.memory_space<vmem>>, vector<24x128xf32>
    tpu.vector_store %arg16[%c0_146, %c0_147], %279 {strides = array<i32>} : memref<24x128xf32, #tpu.memory_space<vmem>>, vector<24x128xf32>,
    return
  }
}

</mosaic_0001>

<bundles_post_ra>
// kernel: gnn_forward.1
= control target key start
LH: loop header
LB: loop body
LE: loop exit
PB: predicated region body
PF: predicated region fallthrough
CT: control target
= control target key end

     0   :  { %s13612_s0 = inlined_call_operand.vmem [shape: bf16[24,128], index: 0, kind: input, shape index: {}]   ;;  %s13613_s1 = inlined_call_operand.vmem [shape: bf16[192,128], index: 1, kind: input, shape index: {}]   ;;  %s13614_s2 = inlined_call_operand.vmem [shape: bf16[192,24], index: 2, kind: input, shape index: {}]   ;;  %s13615_s3 = inlined_call_operand.hbm [shape: bf16[128,128], index: 3, kind: input, shape index: {}]   ;;  %s13616_s4 = inlined_call_operand.vmem [shape: f32[1,128], index: 4, kind: input, shape index: {}]   ;;  %s13617_s5 = inlined_call_operand.hbm [shape: bf16[4,128,384], index: 5, kind: input, shape index: {}]   ;;  %s13618_s6 = inlined_call_operand.hbm [shape: bf16[128,512], index: 6, kind: input, shape index: {}]   ;;  %s13619_s7 = inlined_call_operand.vmem [shape: f32[4,1,128], index: 7, kind: input, shape index: {}]   ;;  %s13620_s8 = inlined_call_operand.hbm [shape: bf16[4,128,128], index: 8, kind: input, shape index: {}]   ;;  %s13621_s9 = inlined_call_operand.vmem [shape: f32[4,1,128], index: 9, kind: input, shape index: {}]   ;;  %s13622_s10 = inlined_call_operand.hbm [shape: bf16[4,128,128], index: 10, kind: input, shape index: {}]   ;;  %s13623_s11 = inlined_call_operand.vmem [shape: f32[4,1,128], index: 11, kind: input, shape index: {}]   ;;  %s13624_s12 = inlined_call_operand.hbm [shape: bf16[4,128,128], index: 12, kind: input, shape index: {}]   ;;  %s13625_s13 = inlined_call_operand.hbm [shape: f32[4,1,128], index: 13, kind: input, shape index: {}]   ;;  %s13626_s14 = inlined_call_operand.hbm [shape: bf16[128,128], index: 14, kind: input, shape index: {}]   ;;  %s13627_s15 = inlined_call_operand.vmem [shape: f32[1,128], index: 15, kind: input, shape index: {}]   ;;  %s13628_s16 = inlined_call_operand.hbm [shape: f32[24,128], index: 16, kind: output, shape index: {}]  }
   0x1   :  { %13632 = sst [smem:[#allocation93_spill]] %s13612_s0 }
   0x2   :  { %21 = vsyncpa [#allocation3], 0 }
   0x3   :  { %22 = vsyncpa [#allocation6], 0 }
   0x4   :  { %23 = vsyncpa [#allocation9], 0 }
   0x5   :  { %24 = vsyncpa [#allocation12], 0 }
   0x6   :  { %25 = vsyncpa [#allocation15], 0 }
   0x7   :  { %26 = vsyncpa [#allocation4], 0  ;;  %s11155_s21 = smov [#allocation5]  }
   0x8   :  { %s52_s22 = sshll.u32 %s11155_s21, 4  ;;  %s53_s22 = int_to_ptr.vmem [resolvable:$true] %s52_s22 }
   0x9   :  { %s10971_s23 = scalar_lea.vmem %s53_s22, 12288  ;;  %p10976_p1 = scmp.lt.s32.totalorder %s53_s22, %s53_s22 }
   0xa   :  { %p10972_p0 = scmp.ne.s32.totalorder %s53_s22, %s10971_s23  ;;  %p10977_p2 = scmp.lt.s32.totalorder %s10971_s23, %s10971_s23 }
   0xc   :  { %p10978_p3 = por %p10977_p2, %p10976_p1 }
   0xe   :  { %p10979_p4 = pnand %p10978_p3, %p10972_p0 }
  0x10   :  { %10982 = shalt.err (!%p10979_p4)
}
  0x11   :  { %s11156_s24 = smov 192   ;;  %s11157_s25 = smov 12  }
  0x12   :  { %58 = dma.hbm_to_vmem [thread:$0]  %s13617_s5, 12288, %s53_s22, [#allocation6], %s11156_s24, %s11156_s24, %s11157_s25  }
  0x13   :  { %s11158_s28 = smov [#allocation8]   ;;  %s11159_s30 = smov [#allocation11]  }
  0x14   :  { %s78_s29 = sshll.u32 %s11158_s28, 4  ;;  %s106_s0 = sshll.u32 %s11159_s30, 4  ;;  %s79_s29 = int_to_ptr.vmem [resolvable:$true] %s78_s29  ;;  %s107_s0 = int_to_ptr.vmem [resolvable:$true] %s106_s0 }
  0x15   :  { %s10991_s17 = scalar_lea.vmem %s79_s29, 4096  ;;  %p10996_p6 = scmp.lt.s32.totalorder %s79_s29, %s79_s29 }
  0x16   :  { %p10992_p5 = scmp.ne.s32.totalorder %s79_s29, %s10991_s17  ;;  %p10997_p7 = scmp.lt.s32.totalorder %s10991_s17, %s10991_s17 }
  0x18   :  { %p10998_p8 = por %p10997_p7, %p10996_p6 }
  0x1a   :  { %p10999_p9 = pnand %p10998_p8, %p10992_p5 }
  0x1c   :  { %11002 = shalt.err (!%p10999_p9)
}
  0x1d   :  { %s11160_s18 = smov 64   ;;  %s11161_s19 = smov 4  }
  0x1e   :  { %84 = dma.hbm_to_vmem [thread:$0]  %s13620_s8, 4096, %s79_s29, [#allocation9], %s11160_s18, %s11160_s18, %s11161_s19  }
  0x1f   :  { %s11011_s5 = scalar_lea.vmem %s107_s0, 4096  ;;  %p11016_p11 = scmp.lt.s32.totalorder %s107_s0, %s107_s0 }
  0x20   :  { %p11012_p10 = scmp.ne.s32.totalorder %s107_s0, %s11011_s5  ;;  %p11017_p12 = scmp.lt.s32.totalorder %s11011_s5, %s11011_s5 }
  0x22   :  { %p11018_p13 = por %p11017_p12, %p11016_p11 }
  0x24   :  { %p11019_p0 = pnand %p11018_p13, %p11012_p10 }
  0x26   :  { %11022 = shalt.err (!%p11019_p0)
}
  0x27   :  { %112 = dma.hbm_to_vmem [thread:$0]  %s13624_s12, 4096, %s107_s0, [#allocation12], %s11160_s18, %s11160_s18, %s11161_s19  }
  0x28   :  { %s11162_s24 = smov [#allocation2]   ;;  %s11163_s26 = smov [#allocation7]  }
  0x29   :  { %s38_s25 = sshll.u32 %s11162_s24, 4  ;;  %s64_s8 = sshll.u32 %s11163_s26, 4  ;;  %s39_s25 = int_to_ptr.vmem [resolvable:$true] %s38_s25  ;;  %s65_s8 = int_to_ptr.vmem [resolvable:$true] %s64_s8 }
  0x2a   :  { %s11031_s27 = scalar_lea.vmem %s39_s25, 1024  ;;  %p11036_p2 = scmp.lt.s32.totalorder %s39_s25, %s39_s25 }
  0x2b   :  { %p11032_p1 = scmp.ne.s32.totalorder %s39_s25, %s11031_s27  ;;  %p11037_p3 = scmp.lt.s32.totalorder %s11031_s27, %s11031_s27 }
  0x2d   :  { %p11038_p4 = por %p11037_p3, %p11036_p2 }
  0x2f   :  { %p11039_p5 = pnand %p11038_p4, %p11032_p1 }
  0x31   :  { %11042 = shalt.err (!%p11039_p5)
}
  0x32   :  { %44 = dma.hbm_to_vmem [thread:$0]  %s13615_s3, 1024, %s39_s25, [#allocation3], %s11160_s18, %s11160_s18, %s11161_s19  }
  0x33   :  { %s11051_s12 = scalar_lea.vmem %s65_s8, 4096  ;;  %p11056_p7 = scmp.lt.s32.totalorder %s65_s8, %s65_s8 }
  0x34   :  { %p11052_p6 = scmp.ne.s32.totalorder %s65_s8, %s11051_s12  ;;  %p11057_p8 = scmp.lt.s32.totalorder %s11051_s12, %s11051_s12 }
  0x36   :  { %p11058_p9 = por %p11057_p8, %p11056_p7 }
  0x38   :  { %p11059_p10 = pnand %p11058_p9, %p11052_p6 }
  0x3a   :  { %11062 = shalt.err (!%p11059_p10)
}
  0x3b   :  { %s11164_s30 = smov 256   ;;  %s11165_s0 = smov 16  }
  0x3c   :  { %70 = dma.hbm_to_vmem [thread:$0]  %s13618_s6, 4096, %s65_s8, [#allocation6], %s11164_s30, %s11164_s30, %s11165_s0  }
  0x3d   :  { %s11166_s21 = smov [#allocation10]   ;;  %s11167_s22 = smov [#allocation13]  }
  0x3e   :  { %s92_s5 = sshll.u32 %s11166_s21, 4  ;;  %s118_s23 = sshll.u32 %s11167_s22, 4  ;;  %s93_s5 = int_to_ptr.vmem [resolvable:$true] %s92_s5  ;;  %s119_s23 = int_to_ptr.vmem [resolvable:$true] %s118_s23 }
  0x3f   :  { %s11071_s3 = scalar_lea.vmem %s93_s5, 4096  ;;  %p11076_p12 = scmp.lt.s32.totalorder %s93_s5, %s93_s5 }
  0x40   :  { %p11072_p11 = scmp.ne.s32.totalorder %s93_s5, %s11071_s3  ;;  %p11077_p13 = scmp.lt.s32.totalorder %s11071_s3, %s11071_s3 }
  0x42   :  { %p11078_p0 = por %p11077_p13, %p11076_p12 }
  0x44   :  { %p11079_p1 = pnand %p11078_p0, %p11072_p11 }
  0x46   :  { %11082 = shalt.err (!%p11079_p1)
}
  0x47   :  { %98 = dma.hbm_to_vmem [thread:$0]  %s13622_s10, 4096, %s93_s5, [#allocation9], %s11160_s18, %s11160_s18, %s11161_s19  }
  0x48   :  { %s11091_s6 = scalar_lea.vmem %s119_s23, 64  ;;  %p11096_p3 = scmp.lt.s32.totalorder %s119_s23, %s119_s23 }
  0x49   :  { %p11092_p2 = scmp.ne.s32.totalorder %s119_s23, %s11091_s6  ;;  %p11097_p4 = scmp.lt.s32.totalorder %s11091_s6, %s11091_s6 }
  0x4b   :  { %p11098_p5 = por %p11097_p4, %p11096_p3 }
  0x4d   :  { %p11099_p6 = pnand %p11098_p5, %p11092_p2 }
  0x4f   :  { %11102 = shalt.err (!%p11099_p6)
}
  0x50   :  { %s11168_s26 = smov 1   ;;  %s11169_s28 = smov [#allocation14]  }
  0x51   :  { %124 = dma.hbm_to_vmem [thread:$0]  %s13625_s13, 64, %s119_s23, [#allocation12], %s11165_s0, %s11165_s0, %s11168_s26  }
  0x52   :  { %s130_s29 = sshll.u32 %s11169_s28, 4  ;;  %s131_s29 = int_to_ptr.vmem [resolvable:$true] %s130_s29 }
  0x53   :  { %s11111_s12 = scalar_lea.vmem %s131_s29, 1024  ;;  %p11116_p8 = scmp.lt.s32.totalorder %s131_s29, %s131_s29 }
  0x54   :  { %p11112_p7 = scmp.ne.s32.totalorder %s131_s29, %s11111_s12  ;;  %p11117_p9 = scmp.lt.s32.totalorder %s11111_s12, %s11111_s12 }
  0x56   :  { %p11118_p10 = por %p11117_p9, %p11116_p8 }
  0x58   :  { %p11119_p11 = pnand %p11118_p10, %p11112_p7 }
  0x5a   :  { %11122 = shalt.err (!%p11119_p11)
}
  0x5b   :  { %136 = dma.hbm_to_vmem [thread:$0]  %s13626_s14, 1024, %s131_s29, [#allocation15], %s11160_s18, %s11160_s18, %s11161_s19  }
  0x5c   :  { %11143 = dma.done.wait [#allocation3], 1024  }
  0x5d   :  { %11144 = vsyncadd [#allocation3], 4294966272 }
  0x5e   :  { %11145 = dma.done.wait [#allocation6], 16384  }
  0x5f   :  { %11146 = vsyncadd [#allocation6], 4294950912 }
  0x60   :  { %11147 = dma.done.wait [#allocation9], 8192  }
  0x61   :  { %11148 = vsyncadd [#allocation9], 4294959104 }
  0x62   :  { %11149 = dma.done.wait [#allocation12], 4160  }
  0x63   :  { %11150 = vsyncadd [#allocation12], 4294963136 }
  0x64   :  { %11151 = dma.done.wait [#allocation15], 1024  }
  0x65   :  { %11152 = vsyncadd [#allocation15], 4294966272  ;;  %v13630_v0 = vmov 0   ;;  %v9797_v1 = vld [vmem:[#allocation2 + $0x38] sm:$0xff]   ;;  %v9798_v2 = vld [vmem:[#allocation2 + $0x30] sm:$0xff]   ;;  %s13633_s18 = sld [smem:[#allocation93_spill]] }
  0x66   :  { %616 = vmatprep.mubr.bf16.mxu1 %v13630_v0  ;;  %9221 = vmatprep.subr.bf16.mxu0 %v9797_v1  ;;  %v9799_v3 = vld [vmem:[#allocation2 + $0x28] sm:$0xff]   ;;  %v9800_v4 = vld [vmem:[#allocation2 + $0x20] sm:$0xff]   ;;  %v9801_v9 = vld [vmem:[#allocation2 + $0x18] sm:$0xff]   ;;  %vm1507_vm0 = vcmask 195584   ;;  %vm1544_vm1 = vcmask 1043456   ;;  %vm2536_vm2 = vcmask 1041409  }
  0x67   :  { %9222 = vmatpush3.bf16.msra.mxu0 %v9797_v1  ;;  %v9807_v6 = vld [vmem:[#allocation7 + $0xe4] ss:$16 sps:$4 sm:$0xff]   ;;  %v9809_v7 = vld [vmem:[#allocation7 + $0xe0] ss:$16 sps:$4 sm:$0xff]   ;;  %v9803_v15 = vld [vmem:[#allocation2 + $0x8] sm:$0xff]   ;;  %vm2538_vm3 = vcmask 1042434  }
  0x68   :  { %9223 = vmatprep.subr.bf16.mxu0 %v9798_v2  ;;  %v9810_v8 = vld [vmem:[#allocation7 + $0xc4] ss:$16 sps:$4 sm:$0xff]   ;;  %584 = vmatprep.subr.bf16.mxu1 %v9807_v6  ;;  %v9812_v10 = vld [vmem:[#allocation7 + $0xc0] ss:$16 sps:$4 sm:$0xff]   ;;  %v9815_v21 = vld [vmem:[#allocation7 + $0xec] ss:$16 sps:$4 sm:$0xff]  }
  0x69   :  { %585 = vmatpush1.bf16.msra.mxu1 %v9809_v7  ;;  %v9816_v11 = vld [vmem:[#allocation7 + $0xa4] ss:$16 sps:$4 sm:$0xff]   ;;  %v9818_v13 = vld [vmem:[#allocation7 + $0xa0] ss:$16 sps:$4 sm:$0xff]   ;;  %v9813_v25 = vld [vmem:[#allocation7 + $0xe8] ss:$16 sps:$4 sm:$0xff]  }
  0x6a   :  { %586 = vmatprep.subr.bf16.mxu1 %v9810_v8  ;;  %v9802_v12 = vld [vmem:[#allocation2 + $0x10] sm:$0xff]   ;;  %v9804_v18 = vld [vmem:[#allocation2] sm:$0xff]   ;;  %v9821_v26 = vld [vmem:[#allocation7 + $0xcc] ss:$16 sps:$4 sm:$0xff]   ;;  %vm2540_vm4 = vcmask 1043459   ;;  %vm2542_vm5 = vcmask 1044484  }
  0x6b   :  { %9224 = vmatpush3.bf16.msra.mxu0 %v9798_v2  ;;  %v9805_v5 = vld [vmem:[%s13633_s18] sm:$0xff]   ;;  %v9806_v22 = vld [vmem:[%s13633_s18 + $0x8] ss:$0 sps:$4 sm:$0xff]   ;;  %v9827_v30 = vld [vmem:[#allocation7 + $0xac] ss:$16 sps:$4 sm:$0xff]   ;;  %vm2544_vm6 = vcmask 1045509  }
  0x6c   :  { %9225 = vmatprep.subr.bf16.mxu0 %v9799_v3  ;;  %9237 = vmatprep.mubr.bf16.mxu0 %v9805_v5  ;;  %v9822_v14 = vld [vmem:[#allocation7 + $0x84] ss:$16 sps:$4 sm:$0xff]   ;;  %v9824_v16 = vld [vmem:[#allocation7 + $0x80] ss:$16 sps:$4 sm:$0xff]   ;;  %v9819_v29 = vld [vmem:[#allocation7 + $0xc8] ss:$16 sps:$4 sm:$0xff]  }
  0x6d   :  { %587 = vmatpush1.bf16.msra.mxu1 %v9812_v10  ;;  %v9828_v17 = vld [vmem:[#allocation7 + $0x64] ss:$16 sps:$4 sm:$0xff]   ;;  %v9830_v19 = vld [vmem:[#allocation7 + $0x60] ss:$16 sps:$4 sm:$0xff]   ;;  %v9859_v32 = vld [vmem:[#allocation5 + $0xac] ss:$12 sps:$4 sm:$0xff]  }
  0x6e   :  { %588 = vmatprep.subr.bf16.mxu1 %v9816_v11  ;;  %v9834_v20 = vld [vmem:[#allocation7 + $0x44] ss:$16 sps:$4 sm:$0xff]   ;;  %v9836_v23 = vld [vmem:[#allocation7 + $0x40] ss:$16 sps:$4 sm:$0xff]   ;;  %v9825_v33 = vld [vmem:[#allocation7 + $0xa8] ss:$16 sps:$4 sm:$0xff]  }
  0x6f   :  { %9226 = vmatpush3.bf16.msra.mxu0 %v9799_v3  ;;  %v9840_v24 = vld [vmem:[#allocation7 + $0x24] ss:$16 sps:$4 sm:$0xff]   ;;  %v9842_v27 = vld [vmem:[#allocation7 + $0x20] ss:$16 sps:$4 sm:$0xff]   ;;  %v9833_v34 = vld [vmem:[#allocation7 + $0x8c] ss:$16 sps:$4 sm:$0xff]  }
  0x70   :  { %9227 = vmatprep.subr.bf16.mxu0 %v9800_v4  ;;  %v9846_v28 = vld [vmem:[#allocation7 + $0x4] ss:$16 sps:$4 sm:$0xff]   ;;  %v9848_v31 = vld [vmem:[#allocation7] ss:$16 sps:$4 sm:$0xff]   ;;  %v9831_v38 = vld [vmem:[#allocation7 + $0x88] ss:$16 sps:$4 sm:$0xff]  }
  0x71   :  { %589 = vmatpush1.bf16.msra.mxu1 %v9818_v13  ;;  %v9852_v35 = vld [vmem:[%s13613_s1] sm:$0xff]   ;;  %v9857_v36 = vld [vmem:[#allocation5 + $0xa8] ss:$12 sps:$4 sm:$0xff]   ;;  %v9839_v39 = vld [vmem:[#allocation7 + $0x6c] ss:$16 sps:$4 sm:$0xff]   ;;  %vm2546_vm7 = vcmask 1046534  }
  0x72   :  { %590 = vmatprep.subr.bf16.mxu1 %v9822_v14  ;;  %v9864_v37 = vld [vmem:[#allocation5 + $0x94] ss:$12 sps:$4 sm:$0xff]   ;;  %v9837_v40 = vld [vmem:[#allocation7 + $0x68] ss:$16 sps:$4 sm:$0xff]   ;;  %v9862_v41 = vld [vmem:[#allocation5 + $0x90] ss:$12 sps:$4 sm:$0xff]  }
  0x73   :  { %9228 = vmatpush3.bf16.msra.mxu0 %v9800_v4  ;;  %v9868_v42 = vld [vmem:[#allocation5 + $0x7c] ss:$12 sps:$4 sm:$0xff]   ;;  %v9866_v45 = vld [vmem:[#allocation5 + $0x78] ss:$12 sps:$4 sm:$0xff]   ;;  %v9871_v50 = vld [vmem:[#allocation5 + $0x60] ss:$12 sps:$4 sm:$0xff]  }
  0x74   :  { %9229 = vmatprep.subr.bf16.mxu0 %v9801_v9  ;;  %v9845_v43 = vld [vmem:[#allocation7 + $0x4c] ss:$16 sps:$4 sm:$0xff]   ;;  %v9873_v46 = vld [vmem:[#allocation5 + $0x64] ss:$12 sps:$4 sm:$0xff]   ;;  %v9843_v47 = vld [vmem:[#allocation7 + $0x48] ss:$16 sps:$4 sm:$0xff]  }
  0x75   :  { %591 = vmatpush1.bf16.msra.mxu1 %v9824_v16  ;;  %v9856_v44 = vld [vmem:[%s13613_s1 + $0x8] sm:$0xff]   ;;  %v9860_v53 = vld [vmem:[%s13613_s1 + $0x10] sm:$0xff]   ;;  %v9861_v60 = vld [vmem:[%s13613_s1 + $0x18] sm:$0xff]   ;;  %vm2548_vm8 = vcmask 1047559   ;;  %s11172_s14 = smov [#allocation16]  }
  0x76   :  { %592 = vmatprep.subr.bf16.mxu1 %v9828_v17  ;;  %v9851_v48 = vld [vmem:[#allocation7 + $0x2c] ss:$16 sps:$4 sm:$0xff]   ;;  %v9849_v49 = vld [vmem:[#allocation7 + $0x28] ss:$16 sps:$4 sm:$0xff]   ;;  %v9883_v56 = vld [vmem:[#allocation5 + $0x34] ss:$12 sps:$4 sm:$0xff]  }
  0x77   :  { %9230 = vmatpush3.bf16.msra.mxu0 %v9801_v9  ;;  %v9855_v51 = vld [vmem:[#allocation7 + $0xc] ss:$16 sps:$4 sm:$0xff]   ;;  %v9875_v54 = vld [vmem:[#allocation5 + $0x48] ss:$12 sps:$4 sm:$0xff]   ;;  %v9884_v61 = vld [vmem:[#allocation5 + $0x98] ss:$12 sps:$4 sm:$0xff]  }
  0x78   :  { %9231 = vmatprep.subr.bf16.mxu0 %v9802_v12  ;;  %v9877_v52 = vld [vmem:[#allocation5 + $0x4c] ss:$12 sps:$4 sm:$0xff]   ;;  %v9879_v57 = vld [vmem:[#allocation5 + $0xb0] ss:$12 sps:$4 sm:$0xff]   ;;  %v9865_v1 = vld [vmem:[%s13613_s1 + $0x20] sm:$0xff]   ;;  %s8384_s18 = sshll.u32 %s11172_s14, 4  ;;  %s8385_s18 = int_to_ptr.vmem [resolvable:$true] %s8384_s18 }
  0x79   :  { %593 = vmatpush1.bf16.msra.mxu1 %v9830_v19  ;;  %v9853_v55 = vld [vmem:[#allocation7 + $0x8] ss:$16 sps:$4 sm:$0xff]   ;;  %v9881_v58 = vld [vmem:[#allocation5 + $0x30] ss:$12 sps:$4 sm:$0xff]   ;;  %v9885_v63 = vld [vmem:[#allocation5 + $0x80] ss:$12 sps:$4 sm:$0xff]   ;;  %p11128_p13 = scmp.lt.s32.totalorder %s8385_s18, %s8385_s18 }
  0x7a   :  { %594 = vmatprep.subr.bf16.mxu1 %v9834_v20  ;;  %v9890_v59 = vld [vmem:[#allocation5 + $0x1c] ss:$12 sps:$4 sm:$0xff]   ;;  %v9888_v62 = vld [vmem:[#allocation5 + $0x18] ss:$12 sps:$4 sm:$0xff]   ;;  %v9870_v5 = vld [vmem:[%s13613_s1 + $0x30] sm:$0xff]   ;;  %s11123_s19 = scalar_lea.vmem %s8385_s18, 384 }
  0x7b   :  { %9232 = vmatpush3.bf16.msra.mxu0 %v9802_v12  ;;  %v9887_v2 = vld [vmem:[#allocation5 + $0x68] ss:$12 sps:$4 sm:$0xff]   ;;  %v9891_v3 = vld [vmem:[#allocation5 + $0x50] ss:$12 sps:$4 sm:$0xff]   ;;  %v9893_v7 = vld [vmem:[#allocation5 + $0x38] ss:$12 sps:$4 sm:$0xff]   ;;  %p11124_p12 = scmp.ne.s32.totalorder %s8385_s18, %s11123_s19  ;;  %p11129_p0 = scmp.lt.s32.totalorder %s11123_s19, %s11123_s19 }
  0x7c   :  { %9233 = vmatprep.subr.bf16.mxu0 %v9803_v15  ;;  %v9869_v4 = vld [vmem:[%s13613_s1 + $0x28] sm:$0xff]   ;;  %v9874_v6 = vld [vmem:[%s13613_s1 + $0x38] sm:$0xff]   ;;  %v9878_v9 = vld [vmem:[%s13613_s1 + $0x40] sm:$0xff]  }
  0x7d   :  { %595 = vmatpush1.bf16.msra.mxu1 %v9836_v23  ;;  %v9894_v8 = vld [vmem:[#allocation5 + $0x20] ss:$12 sps:$4 sm:$0xff]   ;;  %v9897_v10 = vld [vmem:[#allocation5 + $0x4] ss:$12 sps:$4 sm:$0xff]   ;;  %v9898_v12 = vld [vmem:[#allocation5 + $0x8] ss:$12 sps:$4 sm:$0xff]   ;;  %p11130_p1 = por %p11129_p0, %p11128_p13 }
  0x7e   :  { %596 = vmatprep.subr.bf16.mxu1 %v9840_v24  ;;  %v9895_v11 = vld [vmem:[#allocation5] ss:$12 sps:$4 sm:$0xff]   ;;  %v9886_v14 = vld [vmem:[%s13613_s1 + $0x50] sm:$0xff]  }
  0x7f   :  { %9234 = vmatpush3.bf16.msra.mxu0 %v9803_v15  ;;  %v9880_v13 = vld [vmem:[%s13613_s1 + $0x48] sm:$0xff]   ;;  %v9892_v15 = vld [vmem:[%s13613_s1 + $0x58] sm:$0xff]   ;;  %p11131_p2 = pnand %p11130_p1, %p11124_p12 }
  0x80   :  { %9235 = vmatprep.subr.bf16.mxu0 %v9804_v18 }
  0x81   :  { %597 = vmatpush1.bf16.msra.mxu1 %v9842_v27 }
  0x82   :  { %598 = vmatprep.subr.bf16.mxu1 %v9846_v28 }
  0x83   :  { %9236 = vmatpush3.bf16.msra.mxu0 %v9804_v18  ;;  %v8400_v18 = vld [vmem:[%s13616_s4] ss:$0 sm:$0xff] }
  0x84   :  { %737 = vmatprep.subr.bf16.mxu0 %v9815_v21 }
  0x85   :  { %599 = vmatpush1.bf16.msra.mxu1 %v9848_v31 }
  0x86   :  { %9238 = vmatmul.mubr.bf16.vlgmr.msra.gmra.mxu0 %v9806_v22  ;;  %1076 = vmatprep.subr.bf16.mxu1 %v9859_v32 }
  0x87   :  { %738 = vmatpush1.bf16.msra.mxu0 %v9813_v25  ;;  %769 = vmatprep.mubr.bf16.mxu0 %v13630_v0 }
  0x88   :  { %739 = vmatprep.subr.bf16.mxu0 %v9821_v26  ;;  %617 = vmatmul.mubr.bf16.vlgmr.msra.gmra.mxu1 %v9852_v35 }
  0x89   :  { %626 = vmatprep.mubr.bf16.mxu1 %v13630_v0  ;;  %1077 = vmatpush1.bf16.msra.mxu1 %v9857_v36 }
  0x8a   :  { %1078 = vmatprep.subr.bf16.mxu1 %v9864_v37 }
  0x8b   :  { %740 = vmatpush1.bf16.msra.mxu0 %v9819_v29 }
  0x8c   :  { %741 = vmatprep.subr.bf16.mxu0 %v9827_v30 }
  0x8d   :  { %1079 = vmatpush1.bf16.msra.mxu1 %v9862_v41 }
  0x8e   :  { %1080 = vmatprep.subr.bf16.mxu1 %v9868_v42 }
  0x8f   :  { %742 = vmatpush1.bf16.msra.mxu0 %v9825_v33 }
  0x90   :  { %743 = vmatprep.subr.bf16.mxu0 %v9833_v34  ;;  %627 = vmatmul.mubr.bf16.gmra.mxu1 %v9856_v44 }
  0x91   :  { %636 = vmatprep.mubr.bf16.mxu1 %v13630_v0  ;;  %1081 = vmatpush1.bf16.msra.mxu1 %v9866_v45 }
  0x92   :  { %1082 = vmatprep.subr.bf16.mxu1 %v9873_v46 }
  0x93   :  { %744 = vmatpush1.bf16.msra.mxu0 %v9831_v38 }
  0x94   :  { %745 = vmatprep.subr.bf16.mxu0 %v9839_v39 }
  0x95   :  { %1083 = vmatpush1.bf16.msra.mxu1 %v9871_v50 }
  0x96   :  { %1084 = vmatprep.subr.bf16.mxu1 %v9877_v52 }
  0x97   :  { %746 = vmatpush1.bf16.msra.mxu0 %v9837_v40 }
  0x98   :  { %747 = vmatprep.subr.bf16.mxu0 %v9845_v43  ;;  %637 = vmatmul.mubr.bf16.gmra.mxu1 %v9860_v53 }
  0x99   :  { %646 = vmatprep.mubr.bf16.mxu1 %v13630_v0  ;;  %1085 = vmatpush1.bf16.msra.mxu1 %v9875_v54 }
  0x9a   :  { %1086 = vmatprep.subr.bf16.mxu1 %v9883_v56 }
  0x9b   :  { %748 = vmatpush1.bf16.msra.mxu0 %v9843_v47 }
  0x9c   :  { %749 = vmatprep.subr.bf16.mxu0 %v9851_v48 }
  0x9d   :  { %1087 = vmatpush1.bf16.msra.mxu1 %v9881_v58 }
  0x9e   :  { %1088 = vmatprep.subr.bf16.mxu1 %v9890_v59 }
  0x9f   :  { %750 = vmatpush1.bf16.msra.mxu0 %v9849_v49 }
  0xa0   :  { %751 = vmatprep.subr.bf16.mxu0 %v9855_v51  ;;  %647 = vmatmul.mubr.bf16.gmra.mxu1 %v9861_v60 }
  0xa1   :  { %656 = vmatprep.mubr.bf16.mxu1 %v13630_v0  ;;  %1089 = vmatpush1.bf16.msra.mxu1 %v9888_v62 }
  0xa2   :  { %1090 = vmatprep.subr.bf16.mxu1 %v9897_v10 }
  0xa3   :  { %752 = vmatpush1.bf16.msra.mxu0 %v9853_v55 }
  0xa4   :  { %9241 = vmatprep.subr.bf16.mxu0 %v9879_v57 }
  0xa5   :  { %1091 = vmatpush1.bf16.msra.mxu1 %v9895_v11 }
  0xa6   :  { %770 = vmatmul.mubr.bf16.vlgmr.msra.gmra.mxu0 %v9852_v35 }
  0xa7   :  { %779 = vmatprep.mubr.bf16.mxu0 %v13630_v0  ;;  %9242 = vmatpush3.bf16.msra.mxu0 %v9879_v57 }
  0xa8   :  { %9243 = vmatprep.subr.bf16.mxu0 %v9884_v61  ;;  %657 = vmatmul.mubr.bf16.gmra.mxu1 %v9865_v1 }
  0xa9   :  { %666 = vmatprep.mubr.bf16.mxu1 %v13630_v0 }
  0xab   :  { %9244 = vmatpush3.bf16.msra.mxu0 %v9884_v61 }
  0xac   :  { %9245 = vmatprep.subr.bf16.mxu0 %v9885_v63 }
  0xae   :  { %780 = vmatmul.mubr.bf16.gmra.mxu0 %v9856_v44 }
  0xaf   :  { %789 = vmatprep.mubr.bf16.mxu0 %v13630_v0  ;;  %9246 = vmatpush3.bf16.msra.mxu0 %v9885_v63 }
  0xb0   :  { %9247 = vmatprep.subr.bf16.mxu0 %v9887_v2  ;;  %667 = vmatmul.mubr.bf16.gmra.mxu1 %v9869_v4 }
  0xb1   :  { %676 = vmatprep.mubr.bf16.mxu1 %v13630_v0 }
  0xb3   :  { %9248 = vmatpush3.bf16.msra.mxu0 %v9887_v2 }
  0xb4   :  { %9249 = vmatprep.subr.bf16.mxu0 %v9891_v3 }
  0xb6   :  { %790 = vmatmul.mubr.bf16.gmra.mxu0 %v9860_v53 }
  0xb7   :  { %799 = vmatprep.mubr.bf16.mxu0 %v13630_v0  ;;  %9250 = vmatpush3.bf16.msra.mxu0 %v9891_v3 }
  0xb8   :  { %677 = vmatmul.mubr.bf16.gmra.mxu1 %v9870_v5  ;;  %9251 = vmatprep.subr.bf16.mxu0 %v9893_v7 }
  0xb9   :  { %686 = vmatprep.mubr.bf16.mxu1 %v13630_v0 }
  0xbb   :  { %9252 = vmatpush3.bf16.msra.mxu0 %v9893_v7 }
  0xbc   :  { %9253 = vmatprep.subr.bf16.mxu0 %v9894_v8 }
  0xbe   :  { %800 = vmatmul.mubr.bf16.gmra.mxu0 %v9861_v60 }
  0xbf   :  { %809 = vmatprep.mubr.bf16.mxu0 %v13630_v0  ;;  %9254 = vmatpush3.bf16.msra.mxu0 %v9894_v8 }
  0xc0   :  { %687 = vmatmul.mubr.bf16.gmra.mxu1 %v9874_v6  ;;  %9255 = vmatprep.subr.bf16.mxu0 %v9898_v12 }
  0xc1   :  { %696 = vmatprep.mubr.bf16.mxu1 %v13630_v0 }
  0xc3   :  { %9256 = vmatpush3.bf16.msra.mxu0 %v9898_v12 }
  0xc6   :  { %810 = vmatmul.mubr.bf16.gmra.mxu0 %v9865_v1 }
  0xc7   :  { %819 = vmatprep.mubr.bf16.mxu0 %v13630_v0 }
  0xc8   :  { %697 = vmatmul.mubr.bf16.gmra.mxu1 %v9878_v9 }
  0xc9   :  { %706 = vmatprep.mubr.bf16.mxu1 %v13630_v0 }
  0xce   :  { %820 = vmatmul.mubr.bf16.gmra.mxu0 %v9869_v4 }
  0xcf   :  { %829 = vmatprep.mubr.bf16.mxu0 %v13630_v0 }
  0xd0   :  { %707 = vmatmul.mubr.bf16.gmra.mxu1 %v9880_v13 }
  0xd1   :  { %716 = vmatprep.mubr.bf16.mxu1 %v13630_v0 }
  0xd6   :  { %830 = vmatmul.mubr.bf16.gmra.mxu0 %v9870_v5  ;;  %v9899_v5 = vld [vmem:[%s13614_s2] sm:$0xff]  }
  0xd7   :  { %839 = vmatprep.mubr.bf16.mxu0 %v13630_v0 }
  0xd8   :  { %717 = vmatmul.mubr.bf16.gmra.mxu1 %v9886_v14 }
  0xd9   :  { %726 = vmatprep.mubr.bf16.mxu1 %v13630_v0 }
  0xde   :  { %840 = vmatmul.mubr.bf16.gmra.mxu0 %v9874_v6 }
  0xdf   :  { %849 = vmatprep.mubr.bf16.mxu0 %v13630_v0 }
  0xe0   :  { %727 = vmatmul.mubr.bf16.gmra.mxu1 %v9892_v15 }
  0xe1   :  { %1108 = vmatprep.mubr.bf16.mxu1 %v13630_v0 }
  0xe6   :  { %850 = vmatmul.mubr.bf16.gmra.mxu0 %v9878_v9 }
  0xe7   :  { %859 = vmatprep.mubr.bf16.mxu0 %v13630_v0 }
  0xee   :  { %860 = vmatmul.mubr.bf16.gmra.mxu0 %v9880_v13 }
  0xef   :  { %869 = vmatprep.mubr.bf16.mxu0 %v13630_v0 }
  0xf6   :  { %870 = vmatmul.mubr.bf16.gmra.mxu0 %v9886_v14 }
  0xf7   :  { %879 = vmatprep.mubr.bf16.mxu0 %v13630_v0 }
  0xfe   :  { %880 = vmatmul.mubr.bf16.gmra.mxu0 %v9892_v15 }
 0x146   :  { %v9239_v16 = vpop.f32.mrf.mxu0 }
 0x147   :  { %v11369_v20 = vadd.f32 %v9239_v16, %v8400_v18 }
 0x148   :  { %v282_v17 = vpop.f32.mrf.mxu0  ;;  %v11380_v26 = vpop.f32.mrf.mxu1 }
 0x149   :  { %v11371_v22 = vadd.f32 %v8400_v18, %v282_v17  ;;  %v915_v25 = vpack.c.bf16 %v11369_v20, %v11369_v20 }
 0x14a   :  { %v9240_v19 = vpop.f32.mrf.mxu0  ;;  %v11382_v27 = vpop.f32.mrf.mxu1 }
 0x14c   :  { %v285_v21 = vpop.f32.mrf.mxu0  ;;  %v11384_v28 = vpop.f32.mrf.mxu1 }
 0x14d   :  { %v11373_v23 = vadd.f32 %v8400_v18, %v285_v21 }
 0x14e   :  { %v11386_v29 = vpop.f32.mrf.mxu1 }
 0x14f   :  { %v914_v24 = vpack.c.bf16 %v11373_v23, %v11371_v22  ;;  %13634 = vst [vmem:[#allocation23_spill] sm:$0xff] %v11386_v29 }
 0x150   :  { %v11388_v30 = vpop.f32.mrf.mxu1 }
 0x151   :  { %1109 = vmatmul.mubr.bf16.vlgmr.msra.gmra.mxu1 %v914_v24  ;;  %9257 = vmatprep.mubr.bf16.mxu0 %v914_v24 }
 0x152   :  { %9258 = vmatmul.mubr.bf16.vlgmr.msra.gmra.mxu0 %v915_v25  ;;  %1118 = vmatprep.mubr.bf16.mxu1 %v13630_v0  ;;  %v11392_v32 = vpop.f32.mrf.mxu1 }
 0x154   :  { %v11398_v35 = vpop.f32.mrf.mxu1 }
 0x156   :  { %v11404_v38 = vpop.f32.mrf.mxu1 }
 0x157   :  { %13640 = vst [vmem:[#allocation29_spill] sm:$0xff] %v11404_v38 }
 0x158   :  { %v11410_v41 = vpop.f32.mrf.mxu1 }
 0x159   :  { %1119 = vmatmul.mubr.bf16.gmra.mxu1 %v915_v25 }
 0x15a   :  { %v11416_v44 = vpop.f32.mrf.mxu1  ;;  %9265 = vmatprep.mubr.msk.bf16.mxu1 %vm1507_vm0, %v9899_v5 }
 0x15b   :  { %13645 = vst [vmem:[#allocation34_spill] sm:$0xff] %v11416_v44 }
 0x15c   :  { %v11422_v47 = vpop.f32.mrf.mxu1 }
 0x15e   :  { %v11426_v49 = vpop.f32.mrf.mxu1 }
 0x15f   :  { %13649 = vst [vmem:[#allocation38_spill] sm:$0xff] %v11426_v49 }
 0x160   :  { %v11430_v51 = vpop.f32.mrf.mxu1 }
 0x162   :  { %v11434_v53 = vpop.f32.mrf.mxu1 }
 0x163   :  { %13652 = vst [vmem:[#allocation41_spill] sm:$0xff] %v11434_v53 }
 0x164   :  { %v11438_v55 = vpop.f32.mrf.mxu1 }
 0x166   :  { %v11390_v31 = vpop.f32.mrf.mxu0  ;;  %v11442_v57 = vpop.f32.mrf.mxu1 }
 0x167   :  { %13635 = vst [vmem:[#allocation24_spill] sm:$0xff] %v11390_v31  ;;  %13655 = vst [vmem:[#allocation44_spill] sm:$0xff] %v11442_v57 }
 0x168   :  { %v11394_v33 = vpop.f32.mrf.mxu0  ;;  %v11446_v59 = vpop.f32.mrf.mxu1 }
 0x169   :  { %13636 = vst [vmem:[#allocation25_spill] sm:$0xff] %v11394_v33 }
 0x16a   :  { %v11396_v34 = vpop.f32.mrf.mxu0  ;;  %v11450_v61 = vpop.f32.mrf.mxu1 }
 0x16b   :  { %13637 = vst [vmem:[#allocation26_spill] sm:$0xff] %v11396_v34  ;;  %13658 = vst [vmem:[#allocation47_spill] sm:$0xff] %v11450_v61 }
 0x16c   :  { %v11400_v36 = vpop.f32.mrf.mxu0  ;;  %v11454_v63 = vpop.f32.mrf.mxu1 }
 0x16d   :  { %13638 = vst [vmem:[#allocation27_spill] sm:$0xff] %v11400_v36 }
 0x16e   :  { %v11402_v37 = vpop.f32.mrf.mxu0  ;;  %v11458_v2 = vpop.f32.mrf.mxu1 }
 0x16f   :  { %13639 = vst [vmem:[#allocation28_spill] sm:$0xff] %v11402_v37  ;;  %13661 = vst [vmem:[#allocation50_spill] sm:$0xff] %v11458_v2 }
 0x170   :  { %v11406_v39 = vpop.f32.mrf.mxu0  ;;  %v11462_v4 = vpop.f32.mrf.mxu1 }
 0x171   :  { %13641 = vst [vmem:[#allocation30_spill] sm:$0xff] %v11406_v39 }
 0x172   :  { %v11408_v40 = vpop.f32.mrf.mxu0  ;;  %v11470_v7 = vpop.f32.mrf.mxu1 }
 0x173   :  { %13642 = vst [vmem:[#allocation31_spill] sm:$0xff] %v11408_v40  ;;  %13664 = vst [vmem:[#allocation53_spill] sm:$0xff] %v11470_v7 }
 0x174   :  { %v11412_v42 = vpop.f32.mrf.mxu0  ;;  %v11474_v9 = vpop.f32.mrf.mxu1 }
 0x175   :  { %13643 = vst [vmem:[#allocation32_spill] sm:$0xff] %v11412_v42 }
 0x176   :  { %v11414_v43 = vpop.f32.mrf.mxu0  ;;  %v11478_v11 = vpop.f32.mrf.mxu1 }
 0x177   :  { %13644 = vst [vmem:[#allocation33_spill] sm:$0xff] %v11414_v43  ;;  %13667 = vst [vmem:[#allocation56_spill] sm:$0xff] %v11478_v11 }
 0x178   :  { %v11418_v45 = vpop.f32.mrf.mxu0  ;;  %v11482_v13 = vpop.f32.mrf.mxu1 }
 0x179   :  { %13646 = vst [vmem:[#allocation35_spill] sm:$0xff] %v11418_v45 }
 0x17a   :  { %v11420_v46 = vpop.f32.mrf.mxu0  ;;  %v11486_v15 = vpop.f32.mrf.mxu1 }
 0x17b   :  { %13647 = vst [vmem:[#allocation36_spill] sm:$0xff] %v11420_v46  ;;  %13670 = vst [vmem:[#allocation59_spill] sm:$0xff] %v11486_v15 }
 0x17c   :  { %v11424_v48 = vpop.f32.mrf.mxu0  ;;  %v11490_v17 = vpop.f32.mrf.mxu1 }
 0x17d   :  { %13648 = vst [vmem:[#allocation37_spill] sm:$0xff] %v11424_v48 }
 0x17e   :  { %v11428_v50 = vpop.f32.mrf.mxu0  ;;  %v11494_v19 = vpop.f32.mrf.mxu1 }
 0x17f   :  { %13650 = vst [vmem:[#allocation39_spill] sm:$0xff] %v11428_v50  ;;  %13673 = vst [vmem:[#allocation62_spill] sm:$0xff] %v11494_v19 }
 0x180   :  { %v11432_v52 = vpop.f32.mrf.mxu0  ;;  %v11498_v24 = vpop.f32.mrf.mxu1 }
 0x181   :  { %13651 = vst [vmem:[#allocation40_spill] sm:$0xff] %v11432_v52 }
 0x182   :  { %v11436_v54 = vpop.f32.mrf.mxu0  ;;  %v11502_v5 = vpop.f32.mrf.mxu1 }
 0x183   :  { %13653 = vst [vmem:[#allocation42_spill] sm:$0xff] %v11436_v54  ;;  %13676 = vst [vmem:[#allocation65_spill] sm:$0xff] %v11502_v5 }
 0x184   :  { %v11440_v56 = vpop.f32.mrf.mxu0 }
 0x185   :  { %13654 = vst [vmem:[#allocation43_spill] sm:$0xff] %v11440_v56 }
 0x186   :  { %v11444_v58 = vpop.f32.mrf.mxu0 }
 0x187   :  { %13656 = vst [vmem:[#allocation45_spill] sm:$0xff] %v11444_v58 }
 0x188   :  { %v11448_v60 = vpop.f32.mrf.mxu0 }
 0x189   :  { %13657 = vst [vmem:[#allocation46_spill] sm:$0xff] %v11448_v60 }
 0x18a   :  { %v11452_v62 = vpop.f32.mrf.mxu0 }
 0x18b   :  { %13659 = vst [vmem:[#allocation48_spill] sm:$0xff] %v11452_v62 }
 0x18c   :  { %v11456_v1 = vpop.f32.mrf.mxu0 }
 0x18d   :  { %13660 = vst [vmem:[#allocation49_spill] sm:$0xff] %v11456_v1 }
 0x18e   :  { %v11460_v3 = vpop.f32.mrf.mxu0 }
 0x18f   :  { %13662 = vst [vmem:[#allocation51_spill] sm:$0xff] %v11460_v3 }
 0x190   :  { %v11468_v6 = vpop.f32.mrf.mxu0 }
 0x191   :  { %13663 = vst [vmem:[#allocation52_spill] sm:$0xff] %v11468_v6 }
 0x192   :  { %v11472_v8 = vpop.f32.mrf.mxu0 }
 0x193   :  { %13665 = vst [vmem:[#allocation54_spill] sm:$0xff] %v11472_v8 }
 0x194   :  { %v11476_v10 = vpop.f32.mrf.mxu0 }
 0x195   :  { %13666 = vst [vmem:[#allocation55_spill] sm:$0xff] %v11476_v10 }
 0x196   :  { %v11480_v12 = vpop.f32.mrf.mxu0 }
 0x197   :  { %13668 = vst [vmem:[#allocation57_spill] sm:$0xff] %v11480_v12 }
 0x198   :  { %v11484_v14 = vpop.f32.mrf.mxu0 }
 0x199   :  { %13669 = vst [vmem:[#allocation58_spill] sm:$0xff] %v11484_v14  ;;  %v11506_v14 = vpop.f32.mrf.mxu1 }
 0x19a   :  { %v11488_v16 = vpop.f32.mrf.mxu0 }
 0x19b   :  { %13671 = vst [vmem:[#allocation60_spill] sm:$0xff] %v11488_v16  ;;  %v11510_v10 = vpop.f32.mrf.mxu1 }
 0x19c   :  { %v11492_v18 = vpop.f32.mrf.mxu0  ;;  %13679 = vst [vmem:[#allocation68_spill] sm:$0xff] %v11510_v10 }
 0x19d   :  { %13672 = vst [vmem:[#allocation61_spill] sm:$0xff] %v11492_v18  ;;  %v11514_v18 = vpop.f32.mrf.mxu1 }
 0x19e   :  { %v11496_v21 = vpop.f32.mrf.mxu0 }
 0x19f   :  { %13674 = vst [vmem:[#allocation63_spill] sm:$0xff] %v11496_v21  ;;  %v11518_v48 = vpop.f32.mrf.mxu1 }
 0x1a0   :  { %v11500_v25 = vpop.f32.mrf.mxu0  ;;  %13682 = vst [vmem:[#allocation71_spill] sm:$0xff] %v11518_v48 }
 0x1a1   :  { %13675 = vst [vmem:[#allocation64_spill] sm:$0xff] %v11500_v25  ;;  %v11522_v25 = vpop.f32.mrf.mxu1 }
 0x1a2   :  { %v11504_v0 = vpop.f32.mrf.mxu0 }
 0x1a3   :  { %13677 = vst [vmem:[#allocation66_spill] sm:$0xff] %v11504_v0  ;;  %v11526_v52 = vpop.f32.mrf.mxu1 }
 0x1a4   :  { %v11508_v1 = vpop.f32.mrf.mxu0  ;;  %13685 = vst [vmem:[#allocation74_spill] sm:$0xff] %v11526_v52 }
 0x1a5   :  { %13678 = vst [vmem:[#allocation67_spill] sm:$0xff] %v11508_v1  ;;  %v11530_v1 = vpop.f32.mrf.mxu1 }
 0x1a6   :  { %v11512_v60 = vpop.f32.mrf.mxu0 }
 0x1a7   :  { %13680 = vst [vmem:[#allocation69_spill] sm:$0xff] %v11512_v60  ;;  %v11534_v33 = vpop.f32.mrf.mxu1 }
 0x1a8   :  { %v11516_v6 = vpop.f32.mrf.mxu0  ;;  %13688 = vst [vmem:[#allocation77_spill] sm:$0xff] %v11534_v33 }
 0x1a9   :  { %13681 = vst [vmem:[#allocation70_spill] sm:$0xff] %v11516_v6  ;;  %v11538_v6 = vpop.f32.mrf.mxu1 }
 0x1aa   :  { %v11520_v56 = vpop.f32.mrf.mxu0 }
 0x1ab   :  { %13683 = vst [vmem:[#allocation72_spill] sm:$0xff] %v11520_v56  ;;  %v11542_v56 = vpop.f32.mrf.mxu1 }
 0x1ac   :  { %v11524_v45 = vpop.f32.mrf.mxu0  ;;  %13691 = vst [vmem:[#allocation80_spill] sm:$0xff] %v11542_v56 }
 0x1ad   :  { %13684 = vst [vmem:[#allocation73_spill] sm:$0xff] %v11524_v45  ;;  %v11546_v45 = vpop.f32.mrf.mxu1 }
 0x1ae   :  { %v11528_v36 = vpop.f32.mrf.mxu0 }
 0x1af   :  { %13686 = vst [vmem:[#allocation75_spill] sm:$0xff] %v11528_v36  ;;  %v11550_v36 = vpop.f32.mrf.mxu1 }
 0x1b0   :  { %v11532_v42 = vpop.f32.mrf.mxu0  ;;  %13694 = vst [vmem:[#allocation83_spill] sm:$0xff] %v11550_v36 }
 0x1b1   :  { %13687 = vst [vmem:[#allocation76_spill] sm:$0xff] %v11532_v42  ;;  %v11554_v42 = vpop.f32.mrf.mxu1 }
 0x1b2   :  { %v11536_v39 = vpop.f32.mrf.mxu0 }
 0x1b3   :  { %13689 = vst [vmem:[#allocation78_spill] sm:$0xff] %v11536_v39  ;;  %v11558_v39 = vpop.f32.mrf.mxu1 }
 0x1b4   :  { %v11540_v60 = vpop.f32.mrf.mxu0  ;;  %13697 = vst [vmem:[#allocation86_spill] sm:$0xff] %v11558_v39 }
 0x1b5   :  { %13690 = vst [vmem:[#allocation79_spill] sm:$0xff] %v11540_v60  ;;  %v11562_v60 = vpop.f32.mrf.mxu1 }
 0x1b6   :  { %v11544_v16 = vpop.f32.mrf.mxu0 }
 0x1b7   :  { %13692 = vst [vmem:[#allocation81_spill] sm:$0xff] %v11544_v16  ;;  %v11566_v16 = vpop.f32.mrf.mxu1 }
 0x1b8   :  { %v11548_v0 = vpop.f32.mrf.mxu0  ;;  %13700 = vst [vmem:[#allocation89_spill] sm:$0xff] %v11566_v16 }
 0x1b9   :  { %13693 = vst [vmem:[#allocation82_spill] sm:$0xff] %v11548_v0  ;;  %v11570_v0 = vpop.f32.mrf.mxu1 }
 0x1ba   :  { %v11552_v12 = vpop.f32.mrf.mxu0 }
 0x1bb   :  { %13695 = vst [vmem:[#allocation84_spill] sm:$0xff] %v11552_v12  ;;  %v11574_v12 = vpop.f32.mrf.mxu1 }
 0x1bc   :  { %v11556_v21 = vpop.f32.mrf.mxu0  ;;  %13703 = vst [vmem:[#allocation92_spill] sm:$0xff] %v11574_v12  ;;  %v9900_v12 = vld [vmem:[%s13614_s2 + $0x8] sm:$0xff]  }
 0x1bd   :  { %13696 = vst [vmem:[#allocation85_spill] sm:$0xff] %v11556_v21 }
 0x1be   :  { %v11560_v62 = vpop.f32.mrf.mxu0 }
 0x1bf   :  { %13698 = vst [vmem:[#allocation87_spill] sm:$0xff] %v11560_v62 }
 0x1c0   :  { %v11564_v8 = vpop.f32.mrf.mxu0 }
 0x1c1   :  { %13699 = vst [vmem:[#allocation88_spill] sm:$0xff] %v11564_v8 }
 0x1c2   :  { %v11568_v58 = vpop.f32.mrf.mxu0 }
 0x1c3   :  { %13701 = vst [vmem:[#allocation90_spill] sm:$0xff] %v11568_v58 }
 0x1c4   :  { %v11572_v3 = vpop.f32.mrf.mxu0 }
 0x1c5   :  { %13702 = vst [vmem:[#allocation91_spill] sm:$0xff] %v11572_v3 }
 0x211   :  { %v11576_v46 = vpop.f32.mrf.mxu1 }
 0x212   :  { %v11578_v21 = vpop.f32.mrf.mxu0 }
 0x213   :  { %v1112_v54 = vpop.f32.mrf.mxu1 }
 0x214   :  { %v11580_v62 = vpop.f32.mrf.mxu0 }
 0x215   :  { %v11582_v43 = vpop.f32.mrf.mxu1 }
 0x216   :  { %v9260_v8 = vpop.f32.mrf.mxu0 }
 0x217   :  { %v1116_v50 = vpop.f32.mrf.mxu1  ;;  %v9901_v8 = vld [vmem:[%s13614_s2 + $0x10] sm:$0xff]  }
 0x218   :  { %v1445_v3 = vpack.c.bf16 %v1116_v50, %v1112_v54  ;;  %v9906_v50 = vld [vmem:[%s13614_s2 + $0x38] sm:$0xff]   ;;  %v9907_v54 = vld [vmem:[%s13614_s2 + $0x40] sm:$0xff]  }
 0x219   :  { %v11584_v34 = vpop.f32.mrf.mxu1 }
 0x21b   :  { %v1122_v58 = vpop.f32.mrf.mxu1 }
 0x21c   :  { %v1446_v40 = vpack.c.bf16 %v1122_v58, %v1122_v58  ;;  %v9908_v58 = vld [vmem:[%s13614_s2 + $0x48] sm:$0xff]  }
 0x21d   :  { %v1124_v31 = vpop.f32.mrf.mxu1 }
 0x21e   :  { %v1546_v37 = vsel %vm1544_vm1, %v1446_v40, 0  ;;  %9773 = vmatprep.subr.msk.bf16.mxu1 %vm1544_vm1, %v1446_v40  ;;  %v9902_v31 = vld [vmem:[%s13614_s2 + $0x18] sm:$0xff]   ;;  %v9905_v40 = vld [vmem:[%s13614_s2 + $0x30] sm:$0xff]  }
 0x21f   :  { %v1125_v39 = vpop.f32.mrf.mxu1  ;;  %9262 = vmatpush3.bf16.msra.mxu1 %v1546_v37  ;;  %v9903_v37 = vld [vmem:[%s13614_s2 + $0x20] sm:$0xff]  }
 0x220   :  { %9263 = vmatprep.subr.bf16.mxu1 %v1445_v3  ;;  %v9904_v39 = vld [vmem:[%s13614_s2 + $0x28] sm:$0xff]  }
 0x223   :  { %9264 = vmatpush3.bf16.msra.mxu1 %v1445_v3  ;;  %v9909_v3 = vld [vmem:[%s13614_s2 + $0x50] sm:$0xff]  }
 0x226   :  { %9266 = vmatmul.mubr.msk.bf16.vlgmr.msra.gmra.mxu1 %vm1507_vm0, %v9900_v12  ;;  %v9910_v12 = vld [vmem:[%s13614_s2 + $0x58] sm:$0xff]  }
 0x227   :  { %9269 = vmatprep.mubr.msk.bf16.mxu1 %vm1507_vm0, %v9901_v8  ;;  %v9911_v8 = vld [vmem:[#allocation8 + $0x38] sm:$0xff]  }
 0x228   :  { %9289 = vmatprep.subr.bf16.mxu0 %v9911_v8 }
 0x229   :  { %9290 = vmatpush3.bf16.msra.mxu0 %v9911_v8  ;;  %v1182_v8 = vlaneseq }
 0x22e   :  { %9270 = vmatmul.mubr.msk.bf16.gmra.mxu1 %vm1507_vm0, %v9902_v31  ;;  %v9912_v31 = vld [vmem:[#allocation8 + $0x30] sm:$0xff]  }
 0x22f   :  { %9273 = vmatprep.mubr.msk.bf16.mxu1 %vm1507_vm0, %v9903_v37  ;;  %9291 = vmatprep.subr.bf16.mxu0 %v9912_v31  ;;  %v9913_v37 = vld [vmem:[#allocation8 + $0x28] sm:$0xff]  }
 0x230   :  { %9292 = vmatpush3.bf16.msra.mxu0 %v9912_v31 }
 0x231   :  { %9293 = vmatprep.subr.bf16.mxu0 %v9913_v37 }
 0x234   :  { %9294 = vmatpush3.bf16.msra.mxu0 %v9913_v37  ;;  %v1183_v37 = vshrl.u32 %v1182_v8, 7 }
 0x236   :  { %9274 = vmatmul.mubr.msk.bf16.gmra.mxu1 %vm1507_vm0, %v9904_v39  ;;  %v9914_v39 = vld [vmem:[#allocation8 + $0x20] sm:$0xff]  }
 0x237   :  { %9277 = vmatprep.mubr.msk.bf16.mxu1 %vm1507_vm0, %v9905_v40  ;;  %9295 = vmatprep.subr.bf16.mxu0 %v9914_v39  ;;  %v9915_v40 = vld [vmem:[#allocation8 + $0x18] sm:$0xff]  }
 0x238   :  { %9296 = vmatpush3.bf16.msra.mxu0 %v9914_v39 }
 0x239   :  { %9297 = vmatprep.subr.bf16.mxu0 %v9915_v40 }
 0x23c   :  { %9298 = vmatpush3.bf16.msra.mxu0 %v9915_v40  ;;  %v1178_v40 = vcombine.high %v11576_v46, %v11576_v46 }
 0x23e   :  { %9278 = vmatmul.mubr.msk.bf16.gmra.mxu1 %vm1507_vm0, %v9906_v50  ;;  %v9916_v50 = vld [vmem:[#allocation8 + $0x10] sm:$0xff]  }
 0x23f   :  { %9281 = vmatprep.mubr.msk.bf16.mxu1 %vm1507_vm0, %v9907_v54  ;;  %9299 = vmatprep.subr.bf16.mxu0 %v9916_v50  ;;  %v9917_v54 = vld [vmem:[#allocation8 + $0x8] sm:$0xff]  }
 0x240   :  { %9300 = vmatpush3.bf16.msra.mxu0 %v9916_v50 }
 0x241   :  { %9301 = vmatprep.subr.bf16.mxu0 %v9917_v54 }
 0x244   :  { %9302 = vmatpush3.bf16.msra.mxu0 %v9917_v54 }
 0x246   :  { %9282 = vmatmul.mubr.msk.bf16.gmra.mxu1 %vm1507_vm0, %v9908_v58  ;;  %v9918_v58 = vld [vmem:[#allocation8] sm:$0xff]  }
 0x247   :  { %9285 = vmatprep.mubr.msk.bf16.mxu1 %vm1507_vm0, %v9909_v3  ;;  %9303 = vmatprep.subr.bf16.mxu0 %v9918_v58  ;;  %v11171_v3 = vmov 1966171168  }
 0x248   :  { %9304 = vmatpush3.bf16.msra.mxu0 %v9918_v58 }
 0x24e   :  { %9286 = vmatmul.mubr.msk.bf16.gmra.mxu1 %vm1507_vm0, %v9910_v12  ;;  %v1180_v12 = vunpack.c.l.s4 %v11171_v3  ;;  %v1227_v3 = vcombine.high %v11582_v43, %v11582_v43 }
 0x250   :  { %v1181_v31 = vunpack.c.0.s8 %v1180_v12  ;;  %v11643_v12 = vsub.s32 0, %v1183_v37 }
 0x252   :  { %v11632_v36 = vsub.s32 %v1181_v31, %v1183_v37  ;;  %v11656_v37 = vld [vmem:[%s13619_s7] ss:$0 sm:$0xff] }
 0x254   :  { %v1185_v39 = vrot.slane %v11576_v46, %v11632_v36  ;;  %v1192_v54 = vrot.slane %v1178_v40, %v11632_v36  ;;  %v1234_v56 = vrot.slane %v11582_v43, %v11632_v36  ;;  %v11650_v40 = vrot.slane %v1227_v3, %v11632_v36 }
 0x256   :  { %v1193_v50 = vcombine.high %v1185_v39, %v1185_v39  ;;  %v1201_v16 = vrot.slane %v1185_v39, %v11632_v36  ;;  %v1194_v8 = vcombine.high %v1192_v54, %v1192_v54  ;;  %v1208_v31 = vrot.slane %v1192_v54, %v11632_v36 }
 0x257   :  { %v1242_v19 = vcombine.high %v1234_v56, %v1234_v56  ;;  %v11662_v3 = vrot.slane %v1234_v56, %v11632_v36  ;;  %v11677_v56 = vrot.slane %v11650_v40, %v11632_v36 }
 0x258   :  { %v1215_v58 = vrot.slane %v1193_v50, %v11632_v36  ;;  %v1223_v52 = vcombine.high %v1201_v16, %v1201_v16  ;;  %v1328_v33 = vrot.slane %v1201_v16, %v11643_v12  ;;  %v1224_v10 = vcombine.high %v1208_v31, %v1208_v31 }
 0x259   :  { %v1222_v43 = vrot.slane %v1194_v8, %v11632_v36  ;;  %v1276_v16 = vcombine.high %v11584_v34, %v11584_v34  ;;  %v1243_v8 = vcombine.high %v11650_v40, %v11650_v40 }
 0x25a   :  { %v1336_v46 = vrot.slane %v1223_v52, %v11643_v12  ;;  %v1225_v48 = vcombine.high %v1215_v58, %v1215_v58  ;;  %v1332_v2 = vrot.slane %v1215_v58, %v11643_v12 }
 0x25b   :  { %v1226_v58 = vcombine.high %v1222_v43, %v1222_v43 }
 0x25c   :  { %v1340_v5 = vrot.slane %v1225_v48, %v11643_v12 }
 0x2e6   :  { %v9267_v39 = vpop.f32.mrf.mxu1 }
 0x2e7   :  { %v1679_v50 = vadd.f32 %v9267_v39, %v1336_v46  ;;  %v1283_v46 = vrot.slane %v11584_v34, %v11632_v36 }
 0x2e8   :  { %v1582_v54 = vpop.f32.mrf.mxu1 }
 0x2e9   :  { %v1703_v52 = vadd.f32 %v1679_v50, %v11388_v30  ;;  %v1677_v15 = vadd.f32 %v1582_v54, %v1328_v33  ;;  %v11680_v50 = vrot.slane %v1242_v19, %v11632_v36  ;;  %v1352_v54 = vrot.slane %v1224_v10, %v11643_v12 }
 0x2ea   :  { %v9268_v39 = vpop.f32.mrf.mxu1  ;;  %v11692_v40 = vrot.slane %v1283_v46, %v11632_v36 }
 0x2eb   :  { %v11672_v30 = vadd.f32 %v11656_v37, %v1703_v52  ;;  %v1701_v33 = vadd.f32 %v1677_v15, %v11380_v26  ;;  %v1680_v48 = vadd.f32 %v9268_v39, %v1340_v5  ;;  %v11689_v15 = vrot.slane %v1276_v16, %v11632_v36 }
 0x2ec   :  { %v1585_v34 = vpop.f32.mrf.mxu1  ;;  %v1291_v5 = vcombine.high %v1283_v46, %v1283_v46  ;;  %v1344_v39 = vrot.slane %v1208_v31, %v11643_v12  ;;  %v1356_v16 = vrot.slane %v1226_v58, %v11643_v12  ;;  %v1360_v46 = vrot.slane %v11662_v3, %v11643_v12 }
 0x2ed   :  { %v8506_v11 = vmul.f32 -1.442695, %v11672_v30  ;;  %v11685_v61 = vadd.f32 %v11656_v37, %v1701_v33  ;;  %v1704_v52 = vadd.f32 %v1680_v48, %v11398_v35  ;;  %v1678_v26 = vadd.f32 %v1585_v34, %v1332_v2 }
 0x2ee   :  { %v9271_v19 = vpop.f32.mrf.mxu1  ;;  %v1272_v48 = vcombine.high %v11662_v3, %v11662_v3  ;;  %v1348_v58 = vrot.slane %v1222_v43, %v11643_v12 }
 0x2ef   :  { %10111 = vpow2.f32 %v8506_v11  ;;  %v8504_v10 = vmul.f32 -1.442695, %v11685_v61  ;;  %v11697_v7 = vadd.f32 %v11656_v37, %v1704_v52  ;;  %v1702_v33 = vadd.f32 %v1678_v26, %v11384_v28 }
 0x2f0   :  { %v1683_v35 = vadd.f32 %v9271_v19, %v1352_v54  ;;  %v1598_v2 = vpop.f32.mrf.mxu1  ;;  %v1274_v26 = vcombine.high %v11680_v50, %v11680_v50 }
 0x2f1   :  { %10113 = vpow2.f32 %v8504_v10  ;;  %v8507_v11 = vmul.f32 -1.442695, %v11697_v7  ;;  %v11707_v31 = vadd.f32 %v11656_v37, %v1702_v33  ;;  %v1681_v34 = vadd.f32 %v1598_v2, %v1344_v39 }
 0x2f2   :  { %v1707_v54 = vadd.f32 %v1683_v35, %v11430_v51  ;;  %v9272_v52 = vpop.f32.mrf.mxu1  ;;  %v11719_v39 = vrot.slane %v11689_v15, %v11632_v36  ;;  %v11722_v33 = vrot.slane %v1291_v5, %v11632_v36  ;;  %v1368_v35 = vrot.slane %v1272_v48, %v11643_v12 }
 0x2f3   :  { %10115 = vpow2.f32 %v8507_v11  ;;  %v8505_v3 = vmul.f32 -1.442695, %v11707_v31  ;;  %v1705_v19 = vadd.f32 %v1681_v34, %v11410_v41  ;;  %v1684_v10 = vadd.f32 %v9272_v52, %v1356_v16 }
 0x2f4   :  { %v11725_v51 = vadd.f32 %v11656_v37, %v1707_v54  ;;  %v1601_v43 = vpop.f32.mrf.mxu1  ;;  %v1372_v52 = vrot.slane %v1274_v26, %v11643_v12  ;;  %v1364_v5 = vrot.slane %v11680_v50, %v11643_v12  ;;  %v1273_v54 = vcombine.high %v11677_v56, %v11677_v56 }
 0x2f5   :  { %10117 = vpow2.f32 %v8505_v3  ;;  %v11729_v2 = vadd.f32 %v11656_v37, %v1705_v19  ;;  %v1708_v41 = vadd.f32 %v1684_v10, %v11438_v55  ;;  %v1682_v16 = vadd.f32 %v1601_v43, %v1348_v58 }
 0x2f6   :  { %v8510_v11 = vmul.f32 -1.442695, %v11725_v51  ;;  %v9275_v34 = vpop.f32.mrf.mxu1  ;;  %v1376_v10 = vrot.slane %v11677_v56, %v11643_v12  ;;  %v11746_v26 = vrot.slane %v1243_v8, %v11632_v36  ;;  %v1321_v50 = vcombine.high %v11692_v40, %v11692_v40 }
 0x2f7   :  { %v8508_v48 = vmul.f32 -1.442695, %v11729_v2  ;;  %v11740_v3 = vadd.f32 %v11656_v37, %v1708_v41  ;;  %v1706_v19 = vadd.f32 %v1682_v16, %v11422_v47  ;;  %v1687_v55 = vadd.f32 %v9275_v34, %v1368_v35 }
 0x2f8   :  { %10119 = vpow2.f32 %v8510_v11  ;;  %v1614_v58 = vpop.f32.mrf.mxu1  ;;  %v1384_v11 = vrot.slane %v1273_v54, %v11643_v12  ;;  %v1323_v8 = vcombine.high %v11722_v33, %v11722_v33  ;;  %v1275_v54 = vcombine.high %v11746_v26, %v11746_v26 }
 0x2f9   :  { %10121 = vpow2.f32 %v8508_v48  ;;  %v8511_v43 = vmul.f32 -1.442695, %v11740_v3  ;;  %v11752_v41 = vadd.f32 %v11656_v37, %v1706_v19  ;;  %v1711_v47 = vadd.f32 %v1687_v55, %v11462_v4 }
 0x2fa   :  { %v1685_v35 = vadd.f32 %v1614_v58, %v1360_v46  ;;  %v9276_v16 = vpop.f32.mrf.mxu1  ;;  %v1380_v55 = vrot.slane %v11746_v26, %v11643_v12  ;;  %v1400_v49 = vrot.slane %v1321_v50, %v11643_v12  ;;  %v11778_v57 = vrot.slane %v1323_v8, %v11643_v12 }
 0x2fb   :  { %10123 = vpow2.f32 %v8511_v43  ;;  %v8509_v34 = vmul.f32 -1.442695, %v11752_v41  ;;  %v11762_v48 = vadd.f32 %v11656_v37, %v1711_v47  ;;  %v1688_v19 = vadd.f32 %v9276_v16, %v1372_v52 }
 0x2fc   :  { %v10112_v28 = vpop.eup %10111  ;;  %v1709_v4 = vadd.f32 %v1685_v35, %v11446_v59  ;;  %v1617_v46 = vpop.f32.mrf.mxu1 }
 0x2fd   :  { %v1830_v43 = vadd.f32 1.0, %v10112_v28  ;;  %10125 = vpow2.f32 %v8509_v34  ;;  %v8514_v56 = vmul.f32 -1.442695, %v11762_v48  ;;  %v1712_v47 = vadd.f32 %v1688_v19, %v11474_v9 }
 0x2fe   :  { %v10114_v52 = vpop.eup %10113  ;;  %v11774_v16 = vadd.f32 %v11656_v37, %v1709_v4  ;;  %v1686_v59 = vadd.f32 %v1617_v46, %v1364_v5  ;;  %v9279_v35 = vpop.f32.mrf.mxu1  ;;  %v1388_v5 = vrot.slane %v1275_v54, %v11643_v12 }
 0x2ff   :  { %10127 = vrcp.f32 %v1830_v43  ;;  %v1828_v26 = vadd.f32 1.0, %v10114_v52  ;;  %v11781_v28 = vadd.f32 %v11656_v37, %v1712_v47  ;;  %v1691_v34 = vadd.f32 %v9279_v35, %v1384_v11 }
 0x300   :  { %v10116_v58 = vpop.eup %10115  ;;  %10129 = vpow2.f32 %v8514_v56  ;;  %v8512_v9 = vmul.f32 -1.442695, %v11774_v16  ;;  %v1710_v19 = vadd.f32 %v1686_v59, %v11454_v63  ;;  %v1630_v4 = vpop.f32.mrf.mxu1  ;;  %v1322_v52 = vcombine.high %v11719_v39, %v11719_v39 }
 0x301   :  { %10131 = vrcp.f32 %v1828_v26  ;;  %v1831_v50 = vadd.f32 1.0, %v10116_v58  ;;  %v8515_v8 = vmul.f32 -1.442695, %v11781_v28  ;;  %v1715_v46 = vadd.f32 %v1691_v34, %v11498_v24 }
 0x302   :  { %v10118_v43 = vpop.eup %10117  ;;  %10133 = vpow2.f32 %v8512_v9  ;;  %v11789_v47 = vadd.f32 %v11656_v37, %v1710_v19  ;;  %v1689_v11 = vadd.f32 %v1630_v4, %v1376_v10  ;;  %v9280_v56 = vpop.f32.mrf.mxu1  ;;  %v13704_v10 = vcombine.high %v11689_v15, %v11689_v15 }
 0x303   :  { %10135 = vrcp.f32 %v1831_v50  ;;  %v1829_v63 = vadd.f32 1.0, %v10118_v43  ;;  %v11794_v54 = vadd.f32 %v11656_v37, %v1715_v46  ;;  %v1692_v58 = vadd.f32 %v9280_v56, %v1388_v5 }
 0x304   :  { %10137 = vpow2.f32 %v8515_v8  ;;  %v8513_v59 = vmul.f32 -1.442695, %v11789_v47  ;;  %v1713_v24 = vadd.f32 %v1689_v11, %v11482_v13  ;;  %v1633_v35 = vpop.f32.mrf.mxu1  ;;  %v11802_v26 = vrot.slane %v13704_v10, %v11632_v36 }
 0x305   :  { %v10120_v34 = vpop.eup %10119  ;;  %10139 = vrcp.f32 %v1829_v63  ;;  %v8518_v9 = vmul.f32 -1.442695, %v11794_v54  ;;  %v1716_v19 = vadd.f32 %v1692_v58, %v11506_v14  ;;  %v1690_v4 = vadd.f32 %v1633_v35, %v1380_v55 }
 0x306   :  { %v10122_v5 = vpop.eup %10121  ;;  %v1834_v50 = vadd.f32 1.0, %v10120_v34  ;;  %10141 = vpow2.f32 %v8513_v59  ;;  %v11807_v8 = vadd.f32 %v11656_v37, %v1713_v24  ;;  %v9283_v13 = vpop.f32.mrf.mxu1  ;;  %v1408_v46 = vrot.slane %v11719_v39, %v11643_v12 }
 0x307   :  { %v1832_v15 = vadd.f32 1.0, %v10122_v5  ;;  %10143 = vpow2.f32 %v8518_v9  ;;  %v11812_v43 = vadd.f32 %v11656_v37, %v1716_v19  ;;  %v1714_v11 = vadd.f32 %v1690_v4, %v11490_v17 }
 0x308   :  { %v10124_v56 = vpop.eup %10123  ;;  %10145 = vrcp.f32 %v1834_v50  ;;  %v8516_v14 = vmul.f32 -1.442695, %v11807_v8  ;;  %v1695_v55 = vadd.f32 %v9283_v13, %v1400_v49  ;;  %v1646_v63 = vpop.f32.mrf.mxu1  ;;  %v1324_v58 = vcombine.high %v11802_v26, %v11802_v26 }
 0x309   :  { %10147 = vrcp.f32 %v1832_v15  ;;  %v1835_v59 = vadd.f32 1.0, %v10124_v56  ;;  %v8519_v39 = vmul.f32 -1.442695, %v11812_v43  ;;  %v11820_v24 = vadd.f32 %v11656_v37, %v1714_v11 }
 0x30a   :  { %v10126_v35 = vpop.eup %10125  ;;  %10149 = vpow2.f32 %v8516_v14  ;;  %v1719_v17 = vadd.f32 %v1695_v55, %v11530_v1  ;;  %v13705_v10 = vrot.slane %v11692_v40, %v11643_v12  ;;  %v9284_v49 = vpop.f32.mrf.mxu1  ;;  %v1416_v9 = vrot.slane %v1322_v52, %v11643_v12 }
 0x30b   :  { %10151 = vrcp.f32 %v1835_v59  ;;  %v1833_v19 = vadd.f32 1.0, %v10126_v35  ;;  %v8517_v4 = vmul.f32 -1.442695, %v11820_v24  ;;  %v1696_v5 = vadd.f32 %v9284_v49, %v11778_v57 }
 0x30c   :  { %v1693_v34 = vadd.f32 %v1646_v63, %v13705_v10  ;;  %v10128_v50 = vpop.eup %10127  ;;  %10153 = vpow2.f32 %v8519_v39  ;;  %v11830_v13 = vadd.f32 %v11656_v37, %v1719_v17  ;;  %v1649_v15 = vpop.f32.mrf.mxu1  ;;  %v1412_v40 = vrot.slane %v11802_v26, %v11643_v12 }
 0x30d   :  { %v10130_v11 = vpop.eup %10129  ;;  %10155 = vrcp.f32 %v1833_v19  ;;  %v1720_v52 = vadd.f32 %v1696_v5, %v11538_v6  ;;  %v13706_v56 = vrot.slane %v11722_v33, %v11643_v12  ;;  %v1420_v57 = vrot.slane %v1324_v58, %v11643_v12 }
 0x30e   :  { %v1717_v1 = vadd.f32 %v1693_v34, %v11514_v18  ;;  %v10132_v55 = vpop.eup %10131  ;;  %v1838_v63 = vadd.f32 1.0, %v10130_v11  ;;  %10157 = vpow2.f32 %v8517_v4  ;;  %v8522_v59 = vmul.f32 -1.442695, %v11830_v13  ;;  %v9287_v39 = vpop.f32.mrf.mxu1 }
 0x30f   :  { %v1694_v14 = vadd.f32 %v1649_v15, %v13706_v56  ;;  %v10134_v26 = vpop.eup %10133  ;;  %v1902_v35 = vmul.f32 %v10128_v50, %v11672_v30  ;;  %v11846_v6 = vadd.f32 %v11656_v37, %v1720_v52  ;;  %v1699_v17 = vadd.f32 %v9287_v39, %v1416_v9 }
 0x310   :  { %v11842_v18 = vadd.f32 %v11656_v37, %v1717_v1  ;;  %v10136_v10 = vpop.eup %10135  ;;  %10159 = vrcp.f32 %v1838_v63  ;;  %v1836_v58 = vadd.f32 1.0, %v10134_v26  ;;  %v1662_v49 = vpop.f32.mrf.mxu1  ;;  %v1900_v19 = vmul.f32 %v10132_v55, %v11685_v61 }
 0x311   :  { %v1718_v33 = vadd.f32 %v1694_v14, %v11522_v25  ;;  %v10138_v4 = vpop.eup %10137  ;;  %v1903_v5 = vmul.f32 %v10136_v10, %v11697_v7  ;;  %10161 = vpow2.f32 %v8522_v59  ;;  %v8523_v30 = vmul.f32 -1.442695, %v11846_v6 }
 0x312   :  { %v8520_v34 = vmul.f32 -1.442695, %v11842_v18  ;;  %v10140_v1 = vpop.eup %10139  ;;  %10163 = vrcp.f32 %v1836_v58  ;;  %v1839_v25 = vadd.f32 1.0, %v10138_v4  ;;  %v1723_v9 = vadd.f32 %v1699_v17, %v11562_v60  ;;  %v9288_v11 = vpop.f32.mrf.mxu1 }
 0x313   :  { %v11854_v50 = vadd.f32 %v11656_v37, %v1718_v33  ;;  %v1697_v15 = vadd.f32 %v1662_v49, %v1408_v46  ;;  %v10142_v52 = vpop.eup %10141  ;;  %v1700_v56 = vadd.f32 %v9288_v11, %v1420_v57  ;;  %v1901_v7 = vmul.f32 %v10140_v1, %v11707_v31 }
 0x314   :  { %10165 = vpow2.f32 %v8520_v34  ;;  %v10144_v14 = vpop.eup %10143  ;;  %v1837_v55 = vadd.f32 1.0, %v10142_v52  ;;  %v11860_v63 = vadd.f32 %v11656_v37, %v1723_v9  ;;  %v1665_v39 = vpop.f32.mrf.mxu1  ;;  %v1925_v49 = vpack.c.bf16 %v1903_v5, %v1902_v35 }
 0x315   :  { %v8521_v61 = vmul.f32 -1.442695, %v11854_v50  ;;  %10167 = vrcp.f32 %v1839_v25  ;;  %v1721_v59 = vadd.f32 %v1697_v15, %v11546_v45  ;;  %v10146_v26 = vpop.eup %10145  ;;  %v1842_v60 = vadd.f32 1.0, %v10144_v14 }
 0x316   :  { %10169 = vpow2.f32 %v8523_v30  ;;  %v1724_v46 = vadd.f32 %v1700_v56, %v11570_v0  ;;  %v1698_v33 = vadd.f32 %v1665_v39, %v1412_v40  ;;  %v10148_v17 = vpop.eup %10147  ;;  %v8526_v57 = vmul.f32 -1.442695, %v11860_v63 }
 0x317   :  { %10171 = vrcp.f32 %v1837_v55  ;;  %v11866_v31 = vadd.f32 %v11656_v37, %v1721_v59  ;;  %v1924_v10 = vpack.c.bf16 %v1901_v7, %v1900_v19  ;;  %v10150_v58 = vpop.eup %10149  ;;  %v1906_v56 = vmul.f32 %v10146_v26, %v11725_v51 }
 0x318   :  { %10173 = vrcp.f32 %v1842_v60  ;;  %v11869_v34 = vadd.f32 %v11656_v37, %v1724_v46  ;;  %v1722_v45 = vadd.f32 %v1698_v33, %v11554_v42  ;;  %v10152_v4 = vpop.eup %10151  ;;  %v1840_v30 = vadd.f32 1.0, %v10150_v58 }
 0x319   :  { %10175 = vpow2.f32 %v8521_v61  ;;  %v8524_v0 = vmul.f32 -1.442695, %v11866_v31  ;;  %9305 = vmatprep.mubr.bf16.mxu0 %v1924_v10  ;;  %v10154_v40 = vpop.eup %10153  ;;  %v1904_v42 = vmul.f32 %v10148_v17, %v11729_v2  ;;  %v1907_v11 = vmul.f32 %v10152_v4, %v11740_v3 }
 0x31a   :  { %10177 = vpow2.f32 %v8526_v57  ;;  %v8527_v1 = vmul.f32 -1.442695, %v11869_v34  ;;  %v11875_v19 = vadd.f32 %v11656_v37, %v1722_v45  ;;  %9306 = vmatmul.mubr.bf16.vlgmr.msra.gmra.mxu0 %v1925_v49  ;;  %v10156_v25 = vpop.eup %10155  ;;  %v1843_v9 = vadd.f32 1.0, %v10154_v40 }
 0x31b   :  { %10179 = vrcp.f32 %v1840_v30  ;;  %v10158_v35 = vpop.eup %10157  ;;  %v1905_v15 = vmul.f32 %v10156_v25, %v11752_v41  ;;  %v1927_v2 = vpack.c.bf16 %v1907_v11, %v1906_v56 }
 0x31c   :  { %10181 = vpow2.f32 %v8524_v0  ;;  %v8525_v5 = vmul.f32 -1.442695, %v11875_v19  ;;  %v1841_v52 = vadd.f32 1.0, %v10158_v35 }
 0x31d   :  { %10183 = vrcp.f32 %v1843_v9  ;;  %v10160_v61 = vpop.eup %10159  ;;  %v1926_v37 = vpack.c.bf16 %v1905_v15, %v1904_v42 }
 0x31e   :  { %10185 = vpow2.f32 %v8527_v1  ;;  %v10162_v7 = vpop.eup %10161  ;;  %v1910_v10 = vmul.f32 %v10160_v61, %v11762_v48 }
 0x31f   :  { %10187 = vrcp.f32 %v1841_v52  ;;  %v10164_v14 = vpop.eup %10163  ;;  %9309 = vmatprep.mubr.bf16.mxu0 %v1926_v37  ;;  %v1846_v3 = vadd.f32 1.0, %v10162_v7 }
 0x320   :  { %10189 = vpow2.f32 %v8525_v5  ;;  %v1908_v57 = vmul.f32 %v10164_v14, %v11774_v16 }
 0x321   :  { %v10166_v55 = vpop.eup %10165 }
 0x322   :  { %v10168_v59 = vpop.eup %10167  ;;  %9310 = vmatmul.mubr.bf16.gmra.mxu0 %v1927_v2  ;;  %v1844_v41 = vadd.f32 1.0, %v10166_v55 }
 0x323   :  { %v10170_v39 = vpop.eup %10169  ;;  %v1911_v33 = vmul.f32 %v10168_v59, %v11781_v28 }
 0x324   :  { %v10172_v60 = vpop.eup %10171  ;;  %v1847_v46 = vadd.f32 1.0, %v10170_v39 }
 0x325   :  { %v10174_v17 = vpop.eup %10173  ;;  %v1909_v51 = vmul.f32 %v10172_v60, %v11789_v47  ;;  %v1929_v30 = vpack.c.bf16 %v1911_v33, %v1910_v10  ;;  %v9919_v33 = vld [vmem:[#allocation10 + $0x38] sm:$0xff]   ;;  %v9926_v10 = vld [vmem:[#allocation10] sm:$0xff]  }
 0x326   :  { %v10176_v26 = vpop.eup %10175  ;;  %10191 = vrcp.f32 %v1847_v46  ;;  %v1914_v15 = vmul.f32 %v10174_v17, %v11794_v54  ;;  %9329 = vmatprep.subr.bf16.mxu1 %v9919_v33  ;;  %v9920_v17 = vld [vmem:[#allocation10 + $0x30] sm:$0xff]  }
 0x327   :  { %v10178_v58 = vpop.eup %10177  ;;  %10193 = vrcp.f32 %v1844_v41  ;;  %v1845_v45 = vadd.f32 1.0, %v10176_v26  ;;  %v1928_v49 = vpack.c.bf16 %v1909_v51, %v1908_v57  ;;  %9330 = vmatpush3.bf16.msra.mxu1 %v9919_v33  ;;  %v9921_v57 = vld [vmem:[#allocation10 + $0x28] sm:$0xff]   ;;  %v11904_v51 = vld [vmem:[%s13621_s9] ss:$0 sm:$0xff] }
 0x328   :  { %v10180_v4 = vpop.eup %10179  ;;  %10195 = vrcp.f32 %v1846_v3  ;;  %v1850_v1 = vadd.f32 1.0, %v10178_v58  ;;  %9331 = vmatprep.subr.bf16.mxu1 %v9920_v17  ;;  %v9925_v26 = vld [vmem:[#allocation10 + $0x8] sm:$0xff]  }
 0x329   :  { %v10182_v0 = vpop.eup %10181  ;;  %10197 = vrcp.f32 %v1845_v45  ;;  %9313 = vmatprep.mubr.bf16.mxu0 %v1928_v49  ;;  %v1912_v42 = vmul.f32 %v10180_v4, %v11807_v8 }
 0x32a   :  { %v10184_v28 = vpop.eup %10183  ;;  %v1848_v40 = vadd.f32 1.0, %v10182_v0  ;;  %9314 = vmatmul.mubr.bf16.gmra.mxu0 %v1929_v30 }
 0x32b   :  { %v10186_v16 = vpop.eup %10185  ;;  %v1915_v9 = vmul.f32 %v10184_v28, %v11812_v43  ;;  %9332 = vmatpush3.bf16.msra.mxu1 %v9920_v17 }
 0x32c   :  { %v10188_v47 = vpop.eup %10187  ;;  %v1851_v25 = vadd.f32 1.0, %v10186_v16  ;;  %10199 = vrcp.f32 %v1848_v40  ;;  %9333 = vmatprep.subr.bf16.mxu1 %v9921_v57 }
 0x32d   :  { %v10190_v48 = vpop.eup %10189  ;;  %v1913_v35 = vmul.f32 %v10188_v47, %v11820_v24  ;;  %v1931_v52 = vpack.c.bf16 %v1915_v9, %v1914_v15 }
 0x32e   :  { %10201 = vrcp.f32 %v1851_v25  ;;  %v1849_v5 = vadd.f32 1.0, %v10190_v48 }
 0x32f   :  { %10203 = vrcp.f32 %v1850_v1  ;;  %v1930_v11 = vpack.c.bf16 %v1913_v35, %v1912_v42  ;;  %9334 = vmatpush3.bf16.msra.mxu1 %v9921_v57 }
 0x330   :  { %10205 = vrcp.f32 %v1849_v5 }
 0x331   :  { %9317 = vmatprep.mubr.bf16.mxu0 %v1930_v11 }
 0x332   :  { %9318 = vmatmul.mubr.bf16.gmra.mxu0 %v1931_v52 }
 0x333   :  { %v10192_v61 = vpop.eup %10191 }
 0x334   :  { %v10194_v37 = vpop.eup %10193  ;;  %v1919_v7 = vmul.f32 %v10192_v61, %v11846_v6 }
 0x335   :  { %v10196_v56 = vpop.eup %10195  ;;  %v1916_v8 = vmul.f32 %v10194_v37, %v11842_v18 }
 0x336   :  { %v10198_v43 = vpop.eup %10197  ;;  %v1918_v14 = vmul.f32 %v10196_v56, %v11830_v13  ;;  %v13707_v13 = vmov 0  }
 0x337   :  { %v1917_v24 = vmul.f32 %v10198_v43, %v11854_v50 }
 0x338   :  { %v1933_v55 = vpack.c.bf16 %v1919_v7, %v1918_v14 }
 0x339   :  { %v1932_v2 = vpack.c.bf16 %v1917_v24, %v1916_v8  ;;  %v10200_v54 = vpop.eup %10199 }
 0x33a   :  { %v1920_v60 = vmul.f32 %v10200_v54, %v11866_v31  ;;  %v9922_v31 = vld [vmem:[#allocation10 + $0x20] sm:$0xff]  }
 0x33b   :  { %v10202_v59 = vpop.eup %10201  ;;  %9321 = vmatprep.mubr.bf16.mxu0 %v1932_v2  ;;  %9335 = vmatprep.subr.bf16.mxu1 %v9922_v31 }
 0x33c   :  { %v10204_v39 = vpop.eup %10203  ;;  %9322 = vmatmul.mubr.bf16.gmra.mxu0 %v1933_v55  ;;  %v1923_v6 = vmul.f32 %v10202_v59, %v11869_v34  ;;  %9336 = vmatpush3.bf16.msra.mxu1 %v9922_v31  ;;  %v9923_v34 = vld [vmem:[#allocation10 + $0x18] sm:$0xff]  }
 0x33d   :  { %v10206_v41 = vpop.eup %10205  ;;  %v1922_v18 = vmul.f32 %v10204_v39, %v11860_v63  ;;  %9337 = vmatprep.subr.bf16.mxu1 %v9923_v34  ;;  %v9924_v63 = vld [vmem:[#allocation10 + $0x10] sm:$0xff]  }
 0x33e   :  { %v1921_v3 = vmul.f32 %v10206_v41, %v11875_v19  ;;  %v11899_v19 = vpop.f32.mrf.mxu0 }
 0x33f   :  { %v1935_v50 = vpack.c.bf16 %v1923_v6, %v1922_v18 }
 0x340   :  { %v1934_v46 = vpack.c.bf16 %v1921_v3, %v1920_v60  ;;  %9338 = vmatpush3.bf16.msra.mxu1 %v9923_v34 }
 0x341   :  { %9339 = vmatprep.subr.bf16.mxu1 %v9924_v63 }
 0x342   :  { %9325 = vmatprep.mubr.bf16.mxu0 %v1934_v46 }
 0x344   :  { %9326 = vmatmul.mubr.bf16.gmra.mxu0 %v1935_v50  ;;  %9340 = vmatpush3.bf16.msra.mxu1 %v9924_v63 }
 0x345   :  { %3017 = vmatprep.mubr.bf16.mxu0 %v13707_v13  ;;  %9341 = vmatprep.subr.bf16.mxu1 %v9925_v26 }
 0x348   :  { %9342 = vmatpush3.bf16.msra.mxu1 %v9925_v26 }
 0x349   :  { %9343 = vmatprep.subr.bf16.mxu1 %v9926_v10 }
 0x34c   :  { %9344 = vmatpush3.bf16.msra.mxu1 %v9926_v10 }
 0x3da   :  { %v9307_v58 = vpop.f32.mrf.mxu0 }
 0x3db   :  { %v11907_v45 = vadd.f32 %v9307_v58, %v11904_v51 }
 0x3dc   :  { %v2041_v49 = vpop.f32.mrf.mxu0 }
 0x3dd   :  { %v8539_v4 = vmul.f32 -1.442695, %v11907_v45  ;;  %v11911_v30 = vadd.f32 %v11904_v51, %v2041_v49 }
 0x3de   :  { %v9308_v0 = vpop.f32.mrf.mxu0 }
 0x3df   :  { %10207 = vpow2.f32 %v8539_v4  ;;  %v8537_v28 = vmul.f32 -1.442695, %v11911_v30  ;;  %v11915_v40 = vadd.f32 %v9308_v0, %v11904_v51 }
 0x3e0   :  { %v2044_v16 = vpop.f32.mrf.mxu0 }
 0x3e1   :  { %10209 = vpow2.f32 %v8537_v28  ;;  %v8540_v1 = vmul.f32 -1.442695, %v11915_v40  ;;  %v11919_v47 = vadd.f32 %v11904_v51, %v2044_v16 }
 0x3e2   :  { %v9311_v25 = vpop.f32.mrf.mxu0 }
 0x3e3   :  { %10211 = vpow2.f32 %v8540_v1  ;;  %v8538_v9 = vmul.f32 -1.442695, %v11919_v47  ;;  %v11923_v48 = vadd.f32 %v9311_v25, %v11904_v51 }
 0x3e4   :  { %v2057_v42 = vpop.f32.mrf.mxu0 }
 0x3e5   :  { %10213 = vpow2.f32 %v8538_v9  ;;  %v8543_v35 = vmul.f32 -1.442695, %v11923_v48  ;;  %v11927_v5 = vadd.f32 %v11904_v51, %v2057_v42 }
 0x3e6   :  { %v9312_v15 = vpop.f32.mrf.mxu0 }
 0x3e7   :  { %v8541_v11 = vmul.f32 -1.442695, %v11927_v5  ;;  %v11931_v52 = vadd.f32 %v9312_v15, %v11904_v51  ;;  %10215 = vpow2.f32 %v8543_v35 }
 0x3e8   :  { %v2060_v61 = vpop.f32.mrf.mxu0 }
 0x3e9   :  { %10217 = vpow2.f32 %v8541_v11  ;;  %v8544_v37 = vmul.f32 -1.442695, %v11931_v52  ;;  %v11935_v56 = vadd.f32 %v11904_v51, %v2060_v61 }
 0x3ea   :  { %v9315_v43 = vpop.f32.mrf.mxu0 }
 0x3eb   :  { %v8542_v7 = vmul.f32 -1.442695, %v11935_v56  ;;  %v11939_v8 = vadd.f32 %v9315_v43, %v11904_v51  ;;  %10219 = vpow2.f32 %v8544_v37 }
 0x3ec   :  { %v10208_v24 = vpop.eup %10207  ;;  %v2073_v14 = vpop.f32.mrf.mxu0 }
 0x3ed   :  { %v2210_v2 = vadd.f32 1.0, %v10208_v24  ;;  %10221 = vpow2.f32 %v8542_v7  ;;  %v8547_v54 = vmul.f32 -1.442695, %v11939_v8  ;;  %v11943_v55 = vadd.f32 %v11904_v51, %v2073_v14 }
 0x3ee   :  { %v10210_v59 = vpop.eup %10209  ;;  %v9316_v39 = vpop.f32.mrf.mxu0 }
 0x3ef   :  { %10223 = vrcp.f32 %v2210_v2  ;;  %v2208_v41 = vadd.f32 1.0, %v10210_v59  ;;  %v8545_v60 = vmul.f32 -1.442695, %v11943_v55  ;;  %v11947_v3 = vadd.f32 %v9316_v39, %v11904_v51 }
 0x3f0   :  { %v10212_v6 = vpop.eup %10211  ;;  %10225 = vpow2.f32 %v8547_v54  ;;  %v2076_v46 = vpop.f32.mrf.mxu0 }
 0x3f1   :  { %10227 = vrcp.f32 %v2208_v41  ;;  %v2211_v18 = vadd.f32 1.0, %v10212_v6  ;;  %v8548_v50 = vmul.f32 -1.442695, %v11947_v3  ;;  %v11951_v33 = vadd.f32 %v11904_v51, %v2076_v46 }
 0x3f2   :  { %v10214_v17 = vpop.eup %10213  ;;  %10229 = vpow2.f32 %v8545_v60  ;;  %v9319_v57 = vpop.f32.mrf.mxu0 }
 0x3f3   :  { %10231 = vrcp.f32 %v2211_v18  ;;  %v2209_v31 = vadd.f32 1.0, %v10214_v17  ;;  %v8546_v34 = vmul.f32 -1.442695, %v11951_v33  ;;  %v11955_v63 = vadd.f32 %v9319_v57, %v11904_v51 }
 0x3f4   :  { %10233 = vpow2.f32 %v8548_v50  ;;  %v2089_v26 = vpop.f32.mrf.mxu0  ;;  %v10216_v10 = vpop.eup %10215 }
 0x3f5   :  { %10235 = vrcp.f32 %v2209_v31  ;;  %v8551_v58 = vmul.f32 -1.442695, %v11955_v63  ;;  %v11959_v49 = vadd.f32 %v11904_v51, %v2089_v26  ;;  %v2214_v28 = vadd.f32 1.0, %v10216_v10 }
 0x3f6   :  { %v10218_v4 = vpop.eup %10217  ;;  %10237 = vpow2.f32 %v8546_v34  ;;  %v9320_v42 = vpop.f32.mrf.mxu0 }
 0x3f7   :  { %v8549_v0 = vmul.f32 -1.442695, %v11959_v49  ;;  %10239 = vpow2.f32 %v8551_v58  ;;  %v2212_v1 = vadd.f32 1.0, %v10218_v4  ;;  %v11965_v60 = vadd.f32 %v9320_v42, %v11904_v51 }
 0x3f8   :  { %v10220_v16 = vpop.eup %10219  ;;  %v2092_v14 = vpop.f32.mrf.mxu0 }
 0x3f9   :  { %10241 = vpow2.f32 %v8549_v0  ;;  %v2215_v61 = vadd.f32 1.0, %v10220_v16  ;;  %v11970_v34 = vadd.f32 %v11904_v51, %v2092_v14  ;;  %v8552_v26 = vmul.f32 -1.442695, %v11965_v60 }
 0x3fa   :  { %v10222_v25 = vpop.eup %10221  ;;  %10243 = vrcp.f32 %v2214_v28 }
 0x3fb   :  { %v2213_v9 = vadd.f32 1.0, %v10222_v25  ;;  %10245 = vrcp.f32 %v2212_v1 }
 0x3fc   :  { %v10224_v35 = vpop.eup %10223  ;;  %v9323_v18 = vpop.f32.mrf.mxu0 }
 0x3fd   :  { %v10226_v15 = vpop.eup %10225  ;;  %v2282_v11 = vmul.f32 %v10224_v35, %v11907_v45  ;;  %10247 = vrcp.f32 %v2213_v9  ;;  %v11974_v10 = vadd.f32 %v9323_v18, %v11904_v51 }
 0x3fe   :  { %v10228_v37 = vpop.eup %10227  ;;  %v2218_v43 = vadd.f32 1.0, %v10226_v15  ;;  %v2105_v9 = vpop.f32.mrf.mxu0 }
 0x3ff   :  { %v10230_v7 = vpop.eup %10229  ;;  %v2316_v24 = vrot.slane %v2282_v11, 4  ;;  %v2280_v54 = vmul.f32 %v10228_v37, %v11911_v30  ;;  %v8555_v35 = vmul.f32 -1.442695, %v11974_v10 }
 0x400   :  { %v10232_v2 = vpop.eup %10231  ;;  %10249 = vrcp.f32 %v2218_v43  ;;  %v2216_v59 = vadd.f32 1.0, %v10230_v7  ;;  %v9324_v14 = vpop.f32.mrf.mxu0 }
 0x401   :  { %v10234_v39 = vpop.eup %10233  ;;  %10251 = vrcp.f32 %v2215_v61  ;;  %v2317_v6 = vadd.f32 %v2316_v24, %v2282_v11  ;;  %v2304_v50 = vrot.slane %v2280_v54, 4  ;;  %v2283_v30 = vmul.f32 %v10232_v2, %v11915_v40 }
 0x402   :  { %v10236_v41 = vpop.eup %10235  ;;  %10253 = vrcp.f32 %v2216_v59  ;;  %v2219_v17 = vadd.f32 1.0, %v10234_v39  ;;  %v8550_v40 = vmul.f32 -1.442695, %v11970_v34 }
 0x403   :  { %v10238_v45 = vpop.eup %10237  ;;  %v2281_v46 = vmul.f32 %v10236_v41, %v11919_v47  ;;  %v2318_v4 = vrot.slane %v2317_v6, 2  ;;  %v2305_v47 = vadd.f32 %v2304_v50, %v2280_v54  ;;  %v2322_v25 = vrot.slane %v2283_v30, 4 }
 0x404   :  { %v2217_v57 = vadd.f32 1.0, %v10238_v45  ;;  %v10240_v31 = vpop.eup %10239 }
 0x405   :  { %v2310_v0 = vrot.slane %v2281_v46, 4  ;;  %v2222_v28 = vadd.f32 1.0, %v10240_v31  ;;  %v2319_v61 = vadd.f32 %v2318_v4, %v2317_v6  ;;  %v2306_v37 = vrot.slane %v2305_v47, 2 }
 0x406   :  { %v10242_v58 = vpop.eup %10241  ;;  %10255 = vrcp.f32 %v2217_v57  ;;  %v2323_v7 = vadd.f32 %v2322_v25, %v2283_v30  ;;  %v2108_v57 = vpop.f32.mrf.mxu0 }
 0x407   :  { %10257 = vrcp.f32 %v2219_v17  ;;  %v2220_v16 = vadd.f32 1.0, %v10242_v58  ;;  %v10244_v1 = vpop.eup %10243  ;;  %v2311_v11 = vadd.f32 %v2310_v0, %v2281_v46  ;;  %v2320_v46 = vrot.slane %v2319_v61, 1 }
 0x408   :  { %v10246_v42 = vpop.eup %10245  ;;  %10259 = vpow2.f32 %v8552_v26  ;;  %v2286_v54 = vmul.f32 %v10244_v1, %v11923_v48  ;;  %v2307_v6 = vadd.f32 %v2306_v37, %v2305_v47  ;;  %v2324_v18 = vrot.slane %v2323_v7, 2 }
 0x409   :  { %10261 = vrcp.f32 %v2220_v16  ;;  %v2284_v24 = vmul.f32 %v10246_v42, %v11927_v5  ;;  %v2312_v39 = vrot.slane %v2311_v11, 2  ;;  %v11984_v26 = vadd.f32 %v11904_v51, %v2105_v9 }
 0x40a   :  { %v10248_v15 = vpop.eup %10247  ;;  %10263 = vrcp.f32 %v2222_v28  ;;  %v2340_v5 = vrot.slane %v2286_v54, 4  ;;  %v11988_v58 = vadd.f32 %v9324_v14, %v11904_v51  ;;  %v11990_v4 = vadd.f32 %v2320_v46, %v2319_v61 }
 0x40b   :  { %10265 = vpow2.f32 %v8550_v40  ;;  %v2285_v59 = vmul.f32 %v10248_v15, %v11935_v56  ;;  %v2328_v50 = vrot.slane %v2284_v24, 4  ;;  %v2313_v48 = vadd.f32 %v2312_v39, %v2311_v11 }
 0x40c   :  { %10267 = vpow2.f32 %v8555_v35  ;;  %v2308_v0 = vrot.slane %v2307_v6, 1  ;;  %v11993_v47 = vadd.f32 %v11904_v51, %v2108_v57  ;;  %v2325_v28 = vadd.f32 %v2324_v18, %v2323_v7 }
 0x40d   :  { %v10250_v43 = vpop.eup %10249  ;;  %v2334_v31 = vrot.slane %v2285_v59, 4  ;;  %v2329_v16 = vadd.f32 %v2328_v50, %v2284_v24  ;;  %v2341_v25 = vadd.f32 %v2340_v5, %v2286_v54  ;;  %v8553_v42 = vmul.f32 -1.442695, %v11984_v26 }
 0x40e   :  { %v10252_v2 = vpop.eup %10251  ;;  %v2290_v41 = vmul.f32 %v10250_v43, %v11939_v8  ;;  %v2314_v15 = vrot.slane %v2313_v48, 1  ;;  %v8556_v37 = vmul.f32 -1.442695, %v11988_v58  ;;  %v12000_v7 = vadd.f32 %v2308_v0, %v2307_v6 }
 0x40f   :  { %v10254_v45 = vpop.eup %10253  ;;  %v2287_v17 = vmul.f32 %v10252_v2, %v11931_v52  ;;  %v2335_v40 = vadd.f32 %v2334_v31, %v2285_v59  ;;  %v8554_v2 = vmul.f32 -1.442695, %v11993_v47  ;;  %v2326_v59 = vrot.slane %v2325_v28, 1 }
 0x410   :  { %v2364_v30 = vrot.slane %v2290_v41, 4  ;;  %v2288_v56 = vmul.f32 %v10254_v45, %v11943_v55  ;;  %v9327_v55 = vpop.f32.mrf.mxu0  ;;  %v2330_v39 = vrot.slane %v2329_v16, 2  ;;  %v2342_v18 = vrot.slane %v2341_v25, 2 }
 0x411   :  { %v2346_v1 = vrot.slane %v2287_v17, 4 }
 0x412   :  { %v2365_v9 = vadd.f32 %v2364_v30, %v2290_v41  ;;  %v2352_v11 = vrot.slane %v2288_v56, 4  ;;  %v2121_v5 = vpop.f32.mrf.mxu0  ;;  %v2315_v30 = vadd.f32 %v2314_v15, %v2313_v48 }
 0x413   :  { %v10256_v8 = vpop.eup %10255  ;;  %v2347_v41 = vadd.f32 %v2346_v1, %v2287_v17  ;;  %v12008_v17 = vadd.f32 %v2326_v59, %v2325_v28  ;;  %v2331_v1 = vadd.f32 %v2330_v39, %v2329_v16 }
 0x414   :  { %v10258_v52 = vpop.eup %10257  ;;  %v2289_v61 = vmul.f32 %v10256_v8, %v11951_v33  ;;  %v2336_v33 = vrot.slane %v2335_v40, 2  ;;  %v2366_v50 = vrot.slane %v2365_v9, 2  ;;  %v2353_v8 = vadd.f32 %v2352_v11, %v2288_v56  ;;  %v9328_v56 = vpop.f32.mrf.mxu0 }
 0x415   :  { %v10260_v35 = vpop.eup %10259  ;;  %v2291_v24 = vmul.f32 %v10258_v52, %v11947_v3  ;;  %v2448_v3 = vpack.c.bf16 %v12000_v7, %v12000_v7  ;;  %v2348_v44 = vrot.slane %v2347_v41, 2  ;;  %v2449_v15 = vpack.c.bf16 %v2315_v30, %v2315_v30 }
 0x416   :  { %v10262_v43 = vpop.eup %10261  ;;  %v2358_v45 = vrot.slane %v2289_v61, 4  ;;  %v2223_v57 = vadd.f32 1.0, %v10260_v35  ;;  %v2337_v35 = vadd.f32 %v2336_v33, %v2335_v40  ;;  %v2367_v29 = vadd.f32 %v2366_v50, %v2365_v9 }
 0x417   :  { %v10264_v54 = vpop.eup %10263  ;;  %v2292_v0 = vmul.f32 %v10262_v43, %v11959_v49  ;;  %v2370_v52 = vrot.slane %v2291_v24, 4  ;;  %v12010_v11 = vadd.f32 %v2342_v18, %v2341_v25  ;;  %v2354_v49 = vrot.slane %v2353_v8, 2  ;;  %v2124_v25 = vpop.f32.mrf.mxu0 }
 0x418   :  { %v10266_v46 = vpop.eup %10265  ;;  %v2359_v6 = vadd.f32 %v2358_v45, %v2289_v61  ;;  %v2294_v14 = vmul.f32 %v10264_v54, %v11955_v63  ;;  %10269 = vrcp.f32 %v2223_v57  ;;  %v12013_v63 = vadd.f32 %v9327_v55, %v11904_v51 }
 0x419   :  { %v10268_v31 = vpop.eup %10267  ;;  %v2221_v38 = vadd.f32 1.0, %v10266_v46  ;;  %v2376_v61 = vrot.slane %v2292_v0, 4  ;;  %v2371_v43 = vadd.f32 %v2370_v52, %v2291_v24  ;;  %v2332_v28 = vrot.slane %v2331_v1, 1 }
 0x41a   :  { %v2360_v53 = vrot.slane %v2359_v6, 2  ;;  %v2226_v48 = vadd.f32 1.0, %v10268_v31  ;;  %v2388_v7 = vrot.slane %v2294_v14, 4  ;;  %v2349_v16 = vadd.f32 %v2348_v44, %v2347_v41 }
 0x41b   :  { %10271 = vrcp.f32 %v2221_v38  ;;  %v2338_v40 = vrot.slane %v2337_v35, 1  ;;  %v2368_v9 = vrot.slane %v2367_v29, 1  ;;  %v8559_v59 = vmul.f32 -1.442695, %v12013_v63 }
 0x41c   :  { %v2361_v54 = vadd.f32 %v2360_v53, %v2359_v6  ;;  %10273 = vrcp.f32 %v2226_v48  ;;  %v2355_v39 = vadd.f32 %v2354_v49, %v2353_v8  ;;  %v2377_v45 = vadd.f32 %v2376_v61, %v2292_v0 }
 0x41d   :  { %10275 = vpow2.f32 %v8553_v42  ;;  %v12017_v24 = vadd.f32 %v11904_v51, %v2121_v5  ;;  %v2372_v38 = vrot.slane %v2371_v43, 2  ;;  %v2389_v55 = vadd.f32 %v2388_v7, %v2294_v14 }
 0x41e   :  { %10277 = vpow2.f32 %v8556_v37  ;;  %v12020_v44 = vadd.f32 %v9328_v56, %v11904_v51  ;;  %v2362_v53 = vrot.slane %v2361_v54, 1  ;;  %v12024_v42 = vadd.f32 %v11904_v51, %v2124_v25 }
 0x41f   :  { %10279 = vpow2.f32 %v8554_v2  ;;  %v8557_v41 = vmul.f32 -1.442695, %v12017_v24  ;;  %v2333_v46 = vadd.f32 %v2332_v28, %v2331_v1  ;;  %v2339_v18 = vadd.f32 %v2338_v40, %v2337_v35 }
 0x420   :  { %10281 = vpow2.f32 %v8559_v59  ;;  %v2369_v33 = vadd.f32 %v2368_v9, %v2367_v29  ;;  %v8560_v37 = vmul.f32 -1.442695, %v12020_v44  ;;  %v2356_v50 = vrot.slane %v2355_v39, 1 }
 0x421   :  { %v2378_v57 = vrot.slane %v2377_v45, 2  ;;  %10283 = vpow2.f32 %v8557_v41  ;;  %v8558_v14 = vmul.f32 -1.442695, %v12024_v42  ;;  %v2451_v2 = vpack.c.bf16 %v12008_v17, %v12008_v17 }
 0x422   :  { %v2344_v5 = vrot.slane %v12010_v11, 1  ;;  %v2373_v31 = vadd.f32 %v2372_v38, %v2371_v43  ;;  %10285 = vpow2.f32 %v8560_v37  ;;  %v2513_v51 = vunpack.c.l.b16 %v2449_v15 }
 0x423   :  { %v2363_v8 = vadd.f32 %v2362_v53, %v2361_v54  ;;  %v2390_v6 = vrot.slane %v2389_v55, 2  ;;  %10287 = vpow2.f32 %v8558_v14  ;;  %v2512_v29 = vunpack.c.l.b16 %v2448_v3 }
 0x424   :  { %v2452_v0 = vpack.c.bf16 %v2333_v46, %v2333_v46  ;;  %v2350_v52 = vrot.slane %v2349_v16, 1  ;;  %v2453_v35 = vpack.c.bf16 %v2339_v18, %v2339_v18  ;;  %v2458_v48 = vpack.c.bf16 %v2369_v33, %v2369_v33 }
 0x425   :  { %v10270_v30 = vpop.eup %10269  ;;  %v2357_v56 = vadd.f32 %v2356_v50, %v2355_v39  ;;  %v2379_v49 = vadd.f32 %v2378_v57, %v2377_v45  ;;  %v13708_v17 = vpack.c.bf16 %v11990_v4, %v11990_v4  ;;  %v2515_v43 = vunpack.c.l.b16 %v2451_v2 }
 0x426   :  { %v2295_v1 = vmul.f32 %v10270_v30, %v11965_v60  ;;  %v2374_v7 = vrot.slane %v2373_v31, 1  ;;  %v2537_v54 = vsel %vm2536_vm2, %v2513_v51, %v2512_v29  ;;  %v12037_v3 = vadd.f32 %v2344_v5, %v12010_v11 }
 0x427   :  { %v2514_v61 = vunpack.c.l.b16 %v13708_v17  ;;  %v2457_v40 = vpack.c.bf16 %v2363_v8, %v2363_v8  ;;  %v2391_v60 = vadd.f32 %v2390_v6, %v2389_v55  ;;  %v2516_v59 = vunpack.c.l.b16 %v2452_v0 }
 0x428   :  { %v2394_v15 = vrot.slane %v2295_v1, 4  ;;  %v10272_v28 = vpop.eup %10271  ;;  %v12039_v25 = vadd.f32 %v2350_v52, %v2349_v16  ;;  %v2517_v38 = vunpack.c.l.b16 %v2453_v35  ;;  %v2522_v53 = vunpack.c.l.b16 %v2458_v48 }
 0x429   :  { %v10274_v9 = vpop.eup %10273  ;;  %v2293_v4 = vmul.f32 %v10272_v28, %v11970_v34  ;;  %v2456_v41 = vpack.c.bf16 %v2357_v56, %v2357_v56  ;;  %v2380_v46 = vrot.slane %v2379_v49, 1  ;;  %v2375_v33 = vadd.f32 %v2374_v7, %v2373_v31 }
 0x42a   :  { %v2395_v39 = vadd.f32 %v2394_v15, %v2295_v1  ;;  %v10276_v45 = vpop.eup %10275  ;;  %v2521_v57 = vunpack.c.l.b16 %v2457_v40  ;;  %v2392_v14 = vrot.slane %v2391_v60, 1  ;;  %v2298_v16 = vmul.f32 %v10274_v9, %v11974_v10 }
 0x42b   :  { %v10278_v18 = vpop.eup %10277  ;;  %v2382_v11 = vrot.slane %v2293_v4, 4  ;;  %v2224_v50 = vadd.f32 1.0, %v10276_v45  ;;  %v2520_v8 = vunpack.c.l.b16 %v2456_v41  ;;  %v2381_v6 = vadd.f32 %v2380_v46, %v2379_v49 }
 0x42c   :  { %v2396_v37 = vrot.slane %v2395_v39, 2  ;;  %v10280_v55 = vpop.eup %10279  ;;  %v2227_v2 = vadd.f32 1.0, %v10278_v18  ;;  %v2539_v1 = vsel %vm2538_vm3, %v2514_v61, %v2537_v54  ;;  %v2459_v48 = vpack.c.bf16 %v2375_v33, %v2375_v33 }
 0x42d   :  { %v10282_v5 = vpop.eup %10281  ;;  %v2383_v30 = vadd.f32 %v2382_v11, %v2293_v4  ;;  %10289 = vrcp.f32 %v2224_v50  ;;  %v2225_v51 = vadd.f32 1.0, %v10280_v55  ;;  %v2393_v56 = vadd.f32 %v2392_v14, %v2391_v60 }
 0x42e   :  { %v2397_v34 = vadd.f32 %v2396_v37, %v2395_v39  ;;  %10291 = vrcp.f32 %v2227_v2  ;;  %v2230_v29 = vadd.f32 1.0, %v10282_v5  ;;  %v10284_v31 = vpop.eup %10283  ;;  %v2550_v7 = vsel %vm2536_vm2, %v2521_v57, %v2520_v8 }
 0x42f   :  { %v2384_v52 = vrot.slane %v2383_v30, 2  ;;  %10293 = vrcp.f32 %v2225_v51  ;;  %v10286_v35 = vpop.eup %10285  ;;  %v2228_v10 = vadd.f32 1.0, %v10284_v31  ;;  %v2412_v28 = vrot.slane %v2298_v16, 4 }
 0x430   :  { %v2398_v0 = vrot.slane %v2397_v34, 1  ;;  %10295 = vrcp.f32 %v2230_v29  ;;  %v10288_v17 = vpop.eup %10287  ;;  %v2231_v40 = vadd.f32 1.0, %v10286_v35  ;;  %v2460_v49 = vpack.c.bf16 %v2381_v6, %v2381_v6 }
 0x431   :  { %v2385_v15 = vadd.f32 %v2384_v52, %v2383_v30  ;;  %10297 = vrcp.f32 %v2228_v10  ;;  %v2229_v9 = vadd.f32 1.0, %v10288_v17  ;;  %v2541_v39 = vsel %vm2540_vm4, %v2515_v43, %v2539_v1 }
 0x432   :  { %v2454_v4 = vpack.c.bf16 %v12037_v3, %v12037_v3  ;;  %v2399_v61 = vadd.f32 %v2398_v0, %v2397_v34  ;;  %10299 = vrcp.f32 %v2231_v40  ;;  %v2551_v60 = vsel %vm2538_vm3, %v2522_v53, %v2550_v7 }
 0x433   :  { %v2386_v54 = vrot.slane %v2385_v15, 1  ;;  %10301 = vrcp.f32 %v2229_v9  ;;  %v2523_v45 = vunpack.c.l.b16 %v2459_v48  ;;  %v2413_v46 = vadd.f32 %v2412_v28, %v2298_v16 }
 0x434   :  { %v2543_v18 = vsel %vm2542_vm5, %v2516_v59, %v2541_v39  ;;  %v2455_v33 = vpack.c.bf16 %v12039_v25, %v12039_v25  ;;  %v2462_v37 = vpack.c.bf16 %v2393_v56, %v2393_v56  ;;  %v2524_v43 = vunpack.c.l.b16 %v2460_v49 }
 0x435   :  { %v2387_v41 = vadd.f32 %v2386_v54, %v2385_v15  ;;  %v2545_v11 = vsel %vm2544_vm6, %v2517_v38, %v2543_v18  ;;  %v2518_v3 = vunpack.c.l.b16 %v2454_v4  ;;  %v2463_v50 = vpack.c.bf16 %v2399_v61, %v2399_v61 }
 0x436   :  { %v2552_v57 = vsel %vm2540_vm4, %v2523_v45, %v2551_v60  ;;  %v2414_v2 = vrot.slane %v2413_v46, 2  ;;  %v2526_v5 = vunpack.c.l.b16 %v2462_v37  ;;  %v2519_v59 = vunpack.c.l.b16 %v2455_v33 }
 0x437   :  { %v2461_v55 = vpack.c.bf16 %v2387_v41, %v2387_v41  ;;  %v2547_v53 = vsel %vm2546_vm7, %v2518_v3, %v2545_v11  ;;  %v2553_v34 = vsel %vm2542_vm5, %v2524_v43, %v2552_v57  ;;  %v2527_v51 = vunpack.c.l.b16 %v2463_v50 }
 0x438   :  { %v2549_v29 = vsel %vm2548_vm8, %v2519_v59, %v2547_v53  ;;  %v2415_v52 = vadd.f32 %v2414_v2, %v2413_v46 }
 0x439   :  { %v2525_v14 = vunpack.c.l.b16 %v2461_v55 }
 0x43a   :  { %v10290_v16 = vpop.eup %10289  ;;  %v2416_v39 = vrot.slane %v2415_v52, 1 }
 0x43b   :  { %v10292_v25 = vpop.eup %10291  ;;  %v2296_v30 = vmul.f32 %v10290_v16, %v11984_v26  ;;  %v2554_v38 = vsel %vm2544_vm6, %v2525_v14, %v2553_v34 }
 0x43c   :  { %v10294_v8 = vpop.eup %10293  ;;  %v2299_v6 = vmul.f32 %v10292_v25, %v11988_v58  ;;  %v2555_v31 = vsel %vm2546_vm7, %v2526_v5, %v2554_v38 }
 0x43d   :  { %v10296_v0 = vpop.eup %10295  ;;  %v2400_v1 = vrot.slane %v2296_v30, 4  ;;  %v2297_v35 = vmul.f32 %v10294_v8, %v11993_v47  ;;  %v2556_v48 = vsel %vm2548_vm8, %v2527_v51, %v2555_v31 }
 0x43e   :  { %v2418_v56 = vrot.slane %v2299_v6, 4  ;;  %v2302_v26 = vmul.f32 %v10296_v0, %v12013_v63  ;;  %v2564_v10 = vpack.c.b16 %v2556_v48, %v2549_v29  ;;  %v10298_v17 = vpop.eup %10297 }
 0x43f   :  { %v2401_v7 = vadd.f32 %v2400_v1, %v2296_v30  ;;  %v2406_v15 = vrot.slane %v2297_v35, 4  ;;  %v10300_v28 = vpop.eup %10299  ;;  %v2300_v49 = vmul.f32 %v10298_v17, %v12017_v24  ;;  %v2417_v24 = vadd.f32 %v2416_v39, %v2415_v52 }
 0x440   :  { %v2419_v58 = vadd.f32 %v2418_v56, %v2299_v6  ;;  %v2436_v40 = vrot.slane %v2302_v26, 4  ;;  %9345 = vmatprep.mubr.bf16.mxu1 %v2564_v10  ;;  %v10302_v9 = vpop.eup %10301  ;;  %v2303_v47 = vmul.f32 %v10300_v28, %v12020_v44 }
 0x441   :  { %v2402_v4 = vrot.slane %v2401_v7, 2  ;;  %v2407_v61 = vadd.f32 %v2406_v15, %v2297_v35  ;;  %v2424_v45 = vrot.slane %v2300_v49, 4  ;;  %v2301_v63 = vmul.f32 %v10302_v9, %v12024_v42 }
 0x442   :  { %v2420_v54 = vrot.slane %v2419_v58, 2  ;;  %v2437_v60 = vadd.f32 %v2436_v40, %v2302_v26  ;;  %v2442_v18 = vrot.slane %v2303_v47, 4  ;;  %v2466_v8 = vpack.c.bf16 %v2417_v24, %v2417_v24  ;;  %v9931_v24 = vld [vmem:[#allocation11 + $0x18] sm:$0xff]  }
 0x443   :  { %v2403_v41 = vadd.f32 %v2402_v4, %v2401_v7  ;;  %v2408_v46 = vrot.slane %v2407_v61, 2  ;;  %v2425_v43 = vadd.f32 %v2424_v45, %v2300_v49  ;;  %v2430_v11 = vrot.slane %v2301_v63, 4 }
 0x444   :  { %v2421_v33 = vadd.f32 %v2420_v54, %v2419_v58  ;;  %v2438_v37 = vrot.slane %v2437_v60, 2  ;;  %v2443_v55 = vadd.f32 %v2442_v18, %v2303_v47  ;;  %v2530_v17 = vunpack.c.l.b16 %v2466_v8 }
 0x445   :  { %v2404_v3 = vrot.slane %v2403_v41, 1  ;;  %v2409_v50 = vadd.f32 %v2408_v46, %v2407_v61  ;;  %v2426_v2 = vrot.slane %v2425_v43, 2  ;;  %v2431_v44 = vadd.f32 %v2430_v11, %v2301_v63  ;;  %v9930_v11 = vld [vmem:[#allocation11 + $0x20] sm:$0xff]  }
 0x446   :  { %v2422_v57 = vrot.slane %v2421_v33, 1  ;;  %v2439_v14 = vadd.f32 %v2438_v37, %v2437_v60  ;;  %v2444_v5 = vrot.slane %v2443_v55, 2  ;;  %v9928_v37 = vld [vmem:[#allocation11 + $0x30] sm:$0xff]  }
 0x447   :  { %v2405_v53 = vadd.f32 %v2404_v3, %v2403_v41  ;;  %v2410_v16 = vrot.slane %v2409_v50, 1  ;;  %v2427_v34 = vadd.f32 %v2426_v2, %v2425_v43  ;;  %v2432_v25 = vrot.slane %v2431_v44, 2  ;;  %v9929_v43 = vld [vmem:[#allocation11 + $0x28] sm:$0xff]   ;;  %v9932_v3 = vld [vmem:[#allocation11 + $0x10] sm:$0xff]  }
 0x448   :  { %v2423_v59 = vadd.f32 %v2422_v57, %v2421_v33  ;;  %v2440_v42 = vrot.slane %v2439_v14, 1  ;;  %v2445_v38 = vadd.f32 %v2444_v5, %v2443_v55  ;;  %v9927_v33 = vld [vmem:[#allocation11 + $0x38] sm:$0xff]   ;;  %v9934_v55 = vld [vmem:[#allocation11] sm:$0xff]   ;;  %v9935_v57 = vld [vmem:[#allocation5 + $0x168] ss:$12 sps:$4 sm:$0xff]  }
 0x449   :  { %v2464_v30 = vpack.c.bf16 %v2405_v53, %v2405_v53  ;;  %v2411_v51 = vadd.f32 %v2410_v16, %v2409_v50  ;;  %v2428_v6 = vrot.slane %v2427_v34, 1  ;;  %v2433_v29 = vadd.f32 %v2432_v25, %v2431_v44  ;;  %9349 = vmatprep.subr.bf16.mxu1 %v9927_v33  ;;  %v9933_v50 = vld [vmem:[#allocation11 + $0x8] sm:$0xff]   ;;  %v9940_v2 = vld [vmem:[#allocation5 + $0x154] ss:$12 sps:$4 sm:$0xff]   ;;  %v9941_v44 = vld [vmem:[#allocation5 + $0x170] ss:$12 sps:$4 sm:$0xff]  }
 0x44a   :  { %v2467_v31 = vpack.c.bf16 %v2423_v59, %v2423_v59  ;;  %v2441_v52 = vadd.f32 %v2440_v42, %v2439_v14  ;;  %v2446_v1 = vrot.slane %v2445_v38, 1  ;;  %v9937_v14 = vld [vmem:[#allocation5 + $0x16c] ss:$12 sps:$4 sm:$0xff]   ;;  %v9938_v53 = vld [vmem:[#allocation5 + $0x150] ss:$12 sps:$4 sm:$0xff]  }
 0x44b   :  { %v2465_v0 = vpack.c.bf16 %v2411_v51, %v2411_v51  ;;  %v2429_v35 = vadd.f32 %v2428_v6, %v2427_v34  ;;  %v2434_v48 = vrot.slane %v2433_v29, 1  ;;  %v2528_v56 = vunpack.c.l.b16 %v2464_v30  ;;  %2985 = vmatprep.subr.bf16.mxu0 %v9937_v14  ;;  %v9944_v16 = vld [vmem:[#allocation5 + $0x13c] ss:$12 sps:$4 sm:$0xff]   ;;  %v9942_v5 = vld [vmem:[#allocation5 + $0x138] ss:$12 sps:$4 sm:$0xff]  }
 0x44c   :  { %v2447_v10 = vadd.f32 %v2446_v1, %v2445_v38  ;;  %v2531_v28 = vunpack.c.l.b16 %v2467_v31  ;;  %v2470_v40 = vpack.c.bf16 %v2441_v52, %v2441_v52  ;;  %2986 = vmatpush1.bf16.msra.mxu0 %v9935_v57  ;;  %v9949_v59 = vld [vmem:[#allocation5 + $0x124] ss:$12 sps:$4 sm:$0xff]   ;;  %v9947_v42 = vld [vmem:[#allocation5 + $0x120] ss:$12 sps:$4 sm:$0xff]   ;;  %v9951_v25 = vld [vmem:[#allocation5 + $0x108] ss:$12 sps:$4 sm:$0xff]  }
 0x44d   :  { %v2529_v26 = vunpack.c.l.b16 %v2465_v0  ;;  %v2468_v7 = vpack.c.bf16 %v2429_v35, %v2429_v35  ;;  %v2435_v15 = vadd.f32 %v2434_v48, %v2433_v29  ;;  %2987 = vmatprep.subr.bf16.mxu0 %v9940_v2  ;;  %v9953_v34 = vld [vmem:[#allocation5 + $0x10c] ss:$12 sps:$4 sm:$0xff]   ;;  %v8569_v51 = vld [vmem:[%s13623_s11] ss:$0 sm:$0xff] }
 0x44e   :  { %v2471_v39 = vpack.c.bf16 %v2447_v10, %v2447_v10  ;;  %v2534_v54 = vunpack.c.l.b16 %v2470_v40 }
 0x44f   :  { %v2557_v58 = vsel %vm2536_vm2, %v2529_v26, %v2528_v56  ;;  %v2532_v9 = vunpack.c.l.b16 %v2468_v7  ;;  %v2469_v4 = vpack.c.bf16 %v2435_v15, %v2435_v15 }
 0x450   :  { %v2558_v49 = vsel %vm2538_vm3, %v2530_v17, %v2557_v58  ;;  %v2535_v45 = vunpack.c.l.b16 %v2471_v39  ;;  %2988 = vmatpush1.bf16.msra.mxu0 %v9938_v53 }
 0x451   :  { %v2559_v61 = vsel %vm2540_vm4, %v2531_v28, %v2558_v49  ;;  %v2533_v47 = vunpack.c.l.b16 %v2469_v4  ;;  %2989 = vmatprep.subr.bf16.mxu0 %v9944_v16 }
 0x452   :  { %v2560_v60 = vsel %vm2542_vm5, %v2532_v9, %v2559_v61  ;;  %v9945_v61 = vld [vmem:[#allocation5 + $0x158] ss:$12 sps:$4 sm:$0xff]  }
 0x453   :  { %v2561_v63 = vsel %vm2544_vm6, %v2533_v47, %v2560_v60  ;;  %v9946_v47 = vld [vmem:[#allocation5 + $0x140] ss:$12 sps:$4 sm:$0xff]   ;;  %v9954_v60 = vld [vmem:[#allocation5 + $0x110] ss:$12 sps:$4 sm:$0xff]  }
 0x454   :  { %v2562_v41 = vsel %vm2546_vm7, %v2534_v54, %v2561_v63  ;;  %2990 = vmatpush1.bf16.msra.mxu0 %v9942_v5  ;;  %v9950_v54 = vld [vmem:[#allocation5 + $0x128] ss:$12 sps:$4 sm:$0xff]   ;;  %v9955_v63 = vld [vmem:[#allocation5 + $0xf0] ss:$12 sps:$4 sm:$0xff]  }
 0x455   :  { %v2563_v46 = vsel %vm2548_vm8, %v2535_v45, %v2562_v41  ;;  %2991 = vmatprep.subr.bf16.mxu0 %v9949_v59  ;;  %v9957_v45 = vld [vmem:[#allocation5 + $0xf4] ss:$12 sps:$4 sm:$0xff]   ;;  %v9958_v41 = vld [vmem:[#allocation5 + $0xf8] ss:$12 sps:$4 sm:$0xff]  }
 0x456   :  { %v2565_v18 = vpack.c.b16 %v2563_v46, %v2563_v46  ;;  %v9961_v46 = vld [vmem:[#allocation5 + $0xdc] ss:$12 sps:$4 sm:$0xff]  }
 0x458   :  { %9346 = vmatmul.mubr.bf16.vlgmr.msra.gmra.mxu1 %v2565_v18  ;;  %2992 = vmatpush1.bf16.msra.mxu0 %v9947_v42  ;;  %v9959_v18 = vld [vmem:[#allocation5 + $0xd8] ss:$12 sps:$4 sm:$0xff]  }
 0x459   :  { %9350 = vmatpush3.bf16.msra.mxu1 %v9927_v33  ;;  %2993 = vmatprep.subr.bf16.mxu0 %v9953_v34  ;;  %v9962_v33 = vld [vmem:[#allocation5 + $0xe0] ss:$12 sps:$4 sm:$0xff]  }
 0x45a   :  { %9351 = vmatprep.subr.bf16.mxu1 %v9928_v37 }
 0x45c   :  { %2994 = vmatpush1.bf16.msra.mxu0 %v9951_v25 }
 0x45d   :  { %9352 = vmatpush3.bf16.msra.mxu1 %v9928_v37  ;;  %2995 = vmatprep.subr.bf16.mxu0 %v9957_v45  ;;  %v9963_v37 = vld [vmem:[#allocation5 + $0xc0] ss:$12 sps:$4 sm:$0xff]  }
 0x45e   :  { %9353 = vmatprep.subr.bf16.mxu1 %v9929_v43 }
 0x460   :  { %2996 = vmatpush1.bf16.msra.mxu0 %v9955_v63 }
 0x461   :  { %9354 = vmatpush3.bf16.msra.mxu1 %v9929_v43  ;;  %2997 = vmatprep.subr.bf16.mxu0 %v9961_v46  ;;  %v9965_v43 = vld [vmem:[#allocation5 + $0xc4] ss:$12 sps:$4 sm:$0xff]  }
 0x462   :  { %9355 = vmatprep.subr.bf16.mxu1 %v9930_v11 }
 0x464   :  { %2998 = vmatpush1.bf16.msra.mxu0 %v9959_v18 }
 0x465   :  { %9356 = vmatpush3.bf16.msra.mxu1 %v9930_v11  ;;  %v9966_v11 = vld [vmem:[#allocation5 + $0xc8] ss:$12 sps:$4 sm:$0xff]   ;;  %2999 = vmatprep.subr.bf16.mxu0 %v9965_v43 }
 0x466   :  { %9357 = vmatprep.subr.bf16.mxu1 %v9931_v24 }
 0x468   :  { %3000 = vmatpush1.bf16.msra.mxu0 %v9963_v37 }
 0x469   :  { %9358 = vmatpush3.bf16.msra.mxu1 %v9931_v24 }
 0x46a   :  { %9359 = vmatprep.subr.bf16.mxu1 %v9932_v3 }
 0x46d   :  { %9360 = vmatpush3.bf16.msra.mxu1 %v9932_v3  ;;  %v8573_v3 = vld [vmem:[#allocation13] ss:$0 sm:$0xff] }
 0x46e   :  { %9361 = vmatprep.subr.bf16.mxu1 %v9933_v50 }
 0x471   :  { %9362 = vmatpush3.bf16.msra.mxu1 %v9933_v50 }
 0x472   :  { %9363 = vmatprep.subr.bf16.mxu1 %v9934_v55 }
 0x475   :  { %9364 = vmatpush3.bf16.msra.mxu1 %v9934_v55 }
 0x476   :  { %9369 = vmatprep.subr.bf16.mxu1 %v9941_v44 }
 0x518   :  { %v9347_v30 = vpop.f32.mrf.mxu1 }
 0x519   :  { %v2666_v38 = vadd.f32 %v9347_v30, %v11578_v21 }
 0x51a   :  { %v2650_v8 = vpop.f32.mrf.mxu1 }
 0x51b   :  { %v2676_v6 = vadd.f32 %v8569_v51, %v2666_v38  ;;  %v2664_v29 = vadd.f32 %v2650_v8, %v11580_v62 }
 0x51c   :  { %v9348_v31 = vpop.f32.mrf.mxu1 }
 0x51d   :  { %v8572_v0 = vmul.f32 -1.442695, %v2676_v6  ;;  %v2674_v52 = vadd.f32 %v8569_v51, %v2664_v29 }
 0x51e   :  { %v2653_v1 = vpop.f32.mrf.mxu1 }
 0x51f   :  { %10303 = vpow2.f32 %v8572_v0  ;;  %v8570_v35 = vmul.f32 -1.442695, %v2674_v52  ;;  %v2665_v48 = vadd.f32 %v2653_v1, %v11899_v19 }
 0x521   :  { %10305 = vpow2.f32 %v8570_v35  ;;  %v2675_v56 = vadd.f32 %v8569_v51, %v2665_v48  ;;  %v10928_v35 = vld [vmem:[%s13614_s2 + $0x8] sm:$0xff]   ;;  %v10929_v48 = vld [vmem:[%s13614_s2 + $0x10] sm:$0xff]  }
 0x523   :  { %v8571_v26 = vmul.f32 -1.442695, %v2675_v56 }
 0x525   :  { %10307 = vpow2.f32 %v8571_v26  ;;  %v10931_v26 = vld [vmem:[%s13614_s2 + $0x20] sm:$0xff]  }
 0x52c   :  { %v10304_v10 = vpop.eup %10303 }
 0x52d   :  { %v2688_v7 = vadd.f32 1.0, %v10304_v10  ;;  %v10932_v10 = vld [vmem:[%s13614_s2 + $0x28] sm:$0xff]  }
 0x52e   :  { %v10306_v17 = vpop.eup %10305 }
 0x52f   :  { %v2686_v21 = vadd.f32 1.0, %v10306_v17  ;;  %10309 = vrcp.f32 %v2688_v7  ;;  %v10933_v17 = vld [vmem:[%s13614_s2 + $0x30] sm:$0xff]   ;;  %v10934_v7 = vld [vmem:[%s13614_s2 + $0x38] sm:$0xff]  }
 0x531   :  { %10311 = vrcp.f32 %v2686_v21  ;;  %v10935_v21 = vld [vmem:[%s13614_s2 + $0x40] sm:$0xff]  }
 0x532   :  { %v10308_v15 = vpop.eup %10307 }
 0x533   :  { %v2687_v62 = vadd.f32 1.0, %v10308_v15  ;;  %v10936_v15 = vld [vmem:[%s13614_s2 + $0x48] sm:$0xff]  }
 0x535   :  { %10313 = vrcp.f32 %v2687_v62  ;;  %v10937_v62 = vld [vmem:[%s13614_s2 + $0x50] sm:$0xff]  }
 0x53c   :  { %v10310_v28 = vpop.eup %10309 }
 0x53d   :  { %v2697_v49 = vmul.f32 %v10310_v28, %v2676_v6  ;;  %v10938_v28 = vld [vmem:[%s13614_s2 + $0x58] sm:$0xff]  }
 0x53e   :  { %v10312_v58 = vpop.eup %10311 }
 0x53f   :  { %v2695_v9 = vmul.f32 %v10312_v58, %v2674_v52  ;;  %v2699_v4 = vpack.c.bf16 %v2697_v49, %v2697_v49  ;;  %v9967_v58 = vld [vmem:[#allocation8 + $0x78] sm:$0xff]   ;;  %v9969_v49 = vld [vmem:[#allocation8 + $0x68] sm:$0xff]  }
 0x542   :  { %v10314_v40 = vpop.eup %10313 }
 0x543   :  { %v2696_v39 = vmul.f32 %v10314_v40, %v2675_v56  ;;  %v10930_v56 = vld [vmem:[%s13614_s2 + $0x18] sm:$0xff]   ;;  %v9968_v40 = vld [vmem:[#allocation8 + $0x70] sm:$0xff]  }
 0x545   :  { %v2698_v19 = vpack.c.bf16 %v2696_v39, %v2695_v9  ;;  %v9970_v9 = vld [vmem:[#allocation8 + $0x60] sm:$0xff]   ;;  %v9971_v39 = vld [vmem:[#allocation8 + $0x58] sm:$0xff]  }
 0x547   :  { %9365 = vmatprep.mubr.bf16.mxu1 %v2698_v19  ;;  %v9972_v19 = vld [vmem:[#allocation8 + $0x50] sm:$0xff]  }
 0x548   :  { %9366 = vmatmul.mubr.bf16.vlgmr.msra.gmra.mxu1 %v2699_v4  ;;  %v9973_v4 = vld [vmem:[#allocation8 + $0x48] sm:$0xff]  }
 0x549   :  { %9370 = vmatpush3.bf16.msra.mxu1 %v9941_v44 }
 0x54a   :  { %9371 = vmatprep.subr.bf16.mxu1 %v9945_v61 }
 0x54d   :  { %9372 = vmatpush3.bf16.msra.mxu1 %v9945_v61  ;;  %v9974_v61 = vld [vmem:[#allocation8 + $0x40] sm:$0xff]  }
 0x54e   :  { %9373 = vmatprep.subr.bf16.mxu1 %v9946_v47 }
 0x551   :  { %9374 = vmatpush3.bf16.msra.mxu1 %v9946_v47 }
 0x552   :  { %9375 = vmatprep.subr.bf16.mxu1 %v9950_v54 }
 0x555   :  { %9376 = vmatpush3.bf16.msra.mxu1 %v9950_v54 }
 0x556   :  { %9377 = vmatprep.subr.bf16.mxu1 %v9954_v60 }
 0x559   :  { %9378 = vmatpush3.bf16.msra.mxu1 %v9954_v60 }
 0x55a   :  { %9379 = vmatprep.subr.bf16.mxu1 %v9958_v41 }
 0x55d   :  { %9380 = vmatpush3.bf16.msra.mxu1 %v9958_v41 }
 0x55e   :  { %9381 = vmatprep.subr.bf16.mxu1 %v9962_v33 }
 0x561   :  { %9382 = vmatpush3.bf16.msra.mxu1 %v9962_v33 }
 0x562   :  { %9383 = vmatprep.subr.bf16.mxu1 %v9966_v11 }
 0x565   :  { %9384 = vmatpush3.bf16.msra.mxu1 %v9966_v11 }
 0x566   :  { %9417 = vmatprep.subr.bf16.mxu1 %v9967_v58 }
 0x608   :  { %v9367_v24 = vpop.f32.mrf.mxu1 }
 0x609   :  { %v2814_v55 = vadd.f32 %v9367_v24, %v8573_v3 }
 0x60a   :  { %v2805_v50 = vpop.f32.mrf.mxu1 }
 0x60b   :  { %v2806_v14 = vadd.f32 %v8573_v3, %v2805_v50  ;;  %v12081_v53 = vadd.f32 %v2814_v55, %v11369_v20  ;;  %v10927_v20 = vld [vmem:[%s13614_s2] sm:$0xff]  }
 0x60c   :  { %v9368_v57 = vpop.f32.mrf.mxu1 }
 0x60d   :  { %v12084_v16 = vadd.f32 %v2806_v14, %v11371_v22  ;;  %v2823_v42 = vpack.c.bf16 %v12081_v53, %v12081_v53 }
 0x60e   :  { %v2808_v2 = vpop.f32.mrf.mxu1 }
 0x60f   :  { %v2809_v44 = vadd.f32 %v8573_v3, %v2808_v2  ;;  %v12174_v2 = vld [vmem:[%s13619_s7 + $0x1] ss:$0 sm:$0xff] }
 0x611   :  { %v12087_v5 = vadd.f32 %v2809_v44, %v11373_v23 }
 0x613   :  { %v2822_v59 = vpack.c.bf16 %v12087_v5, %v12084_v16 }
 0x615   :  { %3018 = vmatmul.mubr.bf16.vlgmr.msra.gmra.mxu0 %v2822_v59  ;;  %9385 = vmatprep.mubr.bf16.mxu1 %v2822_v59 }
 0x616   :  { %9386 = vmatmul.mubr.bf16.vlgmr.msra.gmra.mxu1 %v2823_v42  ;;  %3027 = vmatprep.mubr.bf16.mxu0 %v13707_v13 }
 0x617   :  { %9418 = vmatpush3.bf16.msra.mxu1 %v9967_v58 }
 0x618   :  { %9419 = vmatprep.subr.bf16.mxu1 %v9968_v40 }
 0x61b   :  { %9420 = vmatpush3.bf16.msra.mxu1 %v9968_v40 }
 0x61c   :  { %9421 = vmatprep.subr.bf16.mxu1 %v9969_v49 }
 0x61d   :  { %3028 = vmatmul.mubr.bf16.gmra.mxu0 %v2823_v42 }
 0x61e   :  { %9393 = vmatprep.mubr.msk.bf16.mxu0 %vm1507_vm0, %v10927_v20 }
 0x61f   :  { %9422 = vmatpush3.bf16.msra.mxu1 %v9969_v49 }
 0x620   :  { %9423 = vmatprep.subr.bf16.mxu1 %v9970_v9 }
 0x623   :  { %9424 = vmatpush3.bf16.msra.mxu1 %v9970_v9  ;;  %v13710_v9 = vld [vmem:[#allocation23_spill] sm:$0xff] }
 0x624   :  { %9425 = vmatprep.subr.bf16.mxu1 %v9971_v39 }
 0x627   :  { %9426 = vmatpush3.bf16.msra.mxu1 %v9971_v39 }
 0x628   :  { %9427 = vmatprep.subr.bf16.mxu1 %v9972_v19 }
 0x62b   :  { %9428 = vmatpush3.bf16.msra.mxu1 %v9972_v19 }
 0x62c   :  { %9429 = vmatprep.subr.bf16.mxu1 %v9973_v4 }
 0x62f   :  { %9430 = vmatpush3.bf16.msra.mxu1 %v9973_v4 }
 0x630   :  { %9431 = vmatprep.subr.bf16.mxu1 %v9974_v61 }
 0x633   :  { %9432 = vmatpush3.bf16.msra.mxu1 %v9974_v61 }
 0x6d5   :  { %v12098_v22 = vpop.f32.mrf.mxu0 }
 0x6d6   :  { %v12100_v23 = vpop.f32.mrf.mxu1  ;;  %v3094_v47 = vrot.slane %v12098_v22, %v11632_v36  ;;  %v3087_v54 = vcombine.high %v12098_v22, %v12098_v22 }
 0x6d7   :  { %v3021_v34 = vpop.f32.mrf.mxu0 }
 0x6d8   :  { %v12102_v25 = vpop.f32.mrf.mxu1  ;;  %v3102_v60 = vcombine.high %v3094_v47, %v3094_v47  ;;  %v3110_v45 = vrot.slane %v3094_v47, %v11632_v36  ;;  %v3101_v63 = vrot.slane %v3087_v54, %v11632_v36 }
 0x6d9   :  { %v12104_v30 = vpop.f32.mrf.mxu0 }
 0x6da   :  { %v9388_v51 = vpop.f32.mrf.mxu1  ;;  %v3124_v41 = vrot.slane %v3102_v60, %v11632_v36  ;;  %v3132_v46 = vcombine.high %v3110_v45, %v3110_v45  ;;  %v3136_v18 = vcombine.high %v12104_v30, %v12104_v30  ;;  %v3103_v33 = vcombine.high %v3101_v63, %v3101_v63 }
 0x6db   :  { %v3025_v38 = vpop.f32.mrf.mxu0  ;;  %v3117_v37 = vrot.slane %v3101_v63, %v11632_v36  ;;  %v3143_v43 = vrot.slane %v12104_v30, %v11632_v36  ;;  %v3237_v57 = vrot.slane %v3110_v45, %v11643_v12 }
 0x6dc   :  { %v3354_v0 = vpack.c.bf16 %v3025_v38, %v3021_v34  ;;  %v3245_v11 = vrot.slane %v3132_v46, %v11643_v12  ;;  %v3134_v24 = vcombine.high %v3124_v41, %v3124_v41  ;;  %v12168_v50 = vrot.slane %v3136_v18, %v11632_v36  ;;  %v13711_v46 = vld [vmem:[#allocation41_spill] sm:$0xff] }
 0x6dd   :  { %v12106_v8 = vpop.f32.mrf.mxu0  ;;  %v3151_v14 = vcombine.high %v3143_v43, %v3143_v43  ;;  %v3133_v59 = vcombine.high %v3117_v37, %v3117_v37  ;;  %v3131_v42 = vrot.slane %v3103_v33, %v11632_v36  ;;  %v12180_v30 = vrot.slane %v3143_v43, %v11632_v36 }
 0x6de   :  { %v3249_v34 = vrot.slane %v3134_v24, %v11643_v12  ;;  %v3185_v51 = vcombine.high %v12106_v8, %v12106_v8  ;;  %v3192_v38 = vrot.slane %v12106_v8, %v11632_v36  ;;  %v3253_v58 = vrot.slane %v3117_v37, %v11643_v12  ;;  %v13712_v24 = vld [vmem:[#allocation34_spill] sm:$0xff] }
 0x6df   :  { %v3031_v6 = vpop.f32.mrf.mxu0  ;;  %v3181_v47 = vcombine.high %v12180_v30, %v12180_v30  ;;  %v3269_v54 = vrot.slane %v12180_v30, %v11643_v12  ;;  %v3257_v37 = vrot.slane %v3131_v42, %v11643_v12 }
 0x6e0   :  { %v3355_v29 = vpack.c.bf16 %v3031_v6, %v3031_v6 }
 0x6e1   :  { %v3033_v31 = vpop.f32.mrf.mxu0 }
 0x6e2   :  { %v3357_v52 = vsel %vm1544_vm1, %v3355_v29, 0  ;;  %9774 = vmatprep.subr.msk.bf16.mxu0 %vm1544_vm1, %v3355_v29  ;;  %v3241_v29 = vrot.slane %v3124_v41, %v11643_v12  ;;  %v3152_v31 = vcombine.high %v12168_v50, %v12168_v50 }
 0x6e3   :  { %v3034_v1 = vpop.f32.mrf.mxu0  ;;  %9390 = vmatpush3.bf16.msra.mxu0 %v3357_v52 }
 0x6e4   :  { %9391 = vmatprep.subr.bf16.mxu0 %v3354_v0  ;;  %v12195_v1 = vrot.slane %v12168_v50, %v11632_v36 }
 0x6e7   :  { %9392 = vmatpush3.bf16.msra.mxu0 %v3354_v0 }
 0x6ea   :  { %9394 = vmatmul.mubr.msk.bf16.vlgmr.msra.gmra.mxu0 %vm1507_vm0, %v10928_v35  ;;  %v12198_v35 = vrot.slane %v3151_v14, %v11632_v36 }
 0x6eb   :  { %9397 = vmatprep.mubr.msk.bf16.mxu0 %vm1507_vm0, %v10929_v48  ;;  %v3261_v48 = vrot.slane %v3133_v59, %v11643_v12  ;;  %v3277_v59 = vrot.slane %v3181_v47, %v11643_v12 }
 0x6ec   :  { %v3183_v43 = vcombine.high %v12198_v35, %v12198_v35 }
 0x6f2   :  { %9398 = vmatmul.mubr.msk.bf16.gmra.mxu0 %vm1507_vm0, %v10930_v56  ;;  %v3135_v56 = vcombine.high %v3131_v42, %v3131_v42 }
 0x6f3   :  { %9401 = vmatprep.mubr.msk.bf16.mxu0 %vm1507_vm0, %v10931_v26 }
 0x6f4   :  { %v3265_v61 = vrot.slane %v3135_v56, %v11643_v12 }
 0x6fa   :  { %9402 = vmatmul.mubr.msk.bf16.gmra.mxu0 %vm1507_vm0, %v10932_v10 }
 0x6fb   :  { %9405 = vmatprep.mubr.msk.bf16.mxu0 %vm1507_vm0, %v10933_v17  ;;  %v13709_v17 = vld [vmem:[#allocation29_spill] sm:$0xff] }
 0x702   :  { %9406 = vmatmul.mubr.msk.bf16.gmra.mxu0 %vm1507_vm0, %v10934_v7 }
 0x703   :  { %9409 = vmatprep.mubr.msk.bf16.mxu0 %vm1507_vm0, %v10935_v21  ;;  %v12207_v21 = vrot.slane %v3185_v51, %v11632_v36 }
 0x705   :  { %v3201_v41 = vcombine.high %v12207_v21, %v12207_v21 }
 0x70a   :  { %9410 = vmatmul.mubr.msk.bf16.gmra.mxu0 %vm1507_vm0, %v10936_v15  ;;  %v3200_v15 = vcombine.high %v3192_v38, %v3192_v38 }
 0x70b   :  { %9413 = vmatprep.mubr.msk.bf16.mxu0 %vm1507_vm0, %v10937_v62  ;;  %v12210_v62 = vrot.slane %v3192_v38, %v11632_v36  ;;  %v3281_v38 = vrot.slane %v3183_v43, %v11643_v12 }
 0x712   :  { %9414 = vmatmul.mubr.msk.bf16.gmra.mxu0 %vm1507_vm0, %v10938_v28 }
 0x7aa   :  { %v9395_v3 = vpop.f32.mrf.mxu0 }
 0x7ab   :  { %v3490_v55 = vadd.f32 %v9395_v3, %v3245_v11 }
 0x7ac   :  { %v3393_v44 = vpop.f32.mrf.mxu0 }
 0x7ad   :  { %v3514_v20 = vadd.f32 %v3490_v55, %v11392_v32  ;;  %v3488_v22 = vadd.f32 %v3393_v44, %v3237_v57  ;;  %v12237_v55 = vrot.slane %v12207_v21, %v11632_v36  ;;  %v12240_v57 = vrot.slane %v3200_v15, %v11632_v36 }
 0x7ae   :  { %v9396_v6 = vpop.f32.mrf.mxu0 }
 0x7af   :  { %v12190_v32 = vadd.f32 %v12174_v2, %v3514_v20  ;;  %v3512_v0 = vadd.f32 %v3488_v22, %v11382_v27  ;;  %v3491_v52 = vadd.f32 %v9396_v6, %v3249_v34  ;;  %v13713_v20 = vld [vmem:[#allocation44_spill] sm:$0xff]  ;;  %v3273_v6 = vrot.slane %v12198_v35, %v11643_v12 }
 0x7b0   :  { %v3396_v8 = vpop.f32.mrf.mxu0  ;;  %v3230_v35 = vcombine.high %v12210_v62, %v12210_v62 }
 0x7b1   :  { %v8622_v26 = vmul.f32 -1.442695, %v12190_v32  ;;  %v12203_v10 = vadd.f32 %v12174_v2, %v3512_v0  ;;  %v3515_v7 = vadd.f32 %v3491_v52, %v13709_v17  ;;  %v3489_v27 = vadd.f32 %v3396_v8, %v3241_v29  ;;  %v13714_v8 = vld [vmem:[#allocation38_spill] sm:$0xff] }
 0x7b2   :  { %v9399_v28 = vpop.f32.mrf.mxu0  ;;  %v3182_v29 = vcombine.high %v12195_v1, %v12195_v1  ;;  %v3285_v17 = vrot.slane %v12195_v1, %v11643_v12  ;;  %v3301_v1 = vrot.slane %v12210_v62, %v11643_v12 }
 0x7b3   :  { %10315 = vpow2.f32 %v8622_v26  ;;  %v8620_v40 = vmul.f32 -1.442695, %v12203_v10  ;;  %v12215_v49 = vadd.f32 %v12174_v2, %v3515_v7  ;;  %v3513_v39 = vadd.f32 %v3489_v27, %v13710_v9 }
 0x7b4   :  { %v3494_v19 = vadd.f32 %v9399_v28, %v3261_v48  ;;  %v3409_v4 = vpop.f32.mrf.mxu0  ;;  %v12264_v7 = vrot.slane %v3152_v31, %v11632_v36  ;;  %v13715_v28 = vld [vmem:[#allocation53_spill] sm:$0xff]  ;;  %v3232_v31 = vcombine.high %v12240_v57, %v12240_v57 }
 0x7b5   :  { %10317 = vpow2.f32 %v8620_v40  ;;  %v8623_v60 = vmul.f32 -1.442695, %v12215_v49  ;;  %v12225_v45 = vadd.f32 %v12174_v2, %v3513_v39  ;;  %v3492_v63 = vadd.f32 %v3409_v4, %v3253_v58 }
 0x7b6   :  { %v3518_v18 = vadd.f32 %v3494_v19, %v13711_v46  ;;  %v9400_v33 = vpop.f32.mrf.mxu0  ;;  %v3293_v39 = vrot.slane %v3182_v29, %v11643_v12  ;;  %v3184_v46 = vcombine.high %v12264_v7, %v12264_v7 }
 0x7b7   :  { %10319 = vpow2.f32 %v8623_v60  ;;  %v8621_v11 = vmul.f32 -1.442695, %v12225_v45  ;;  %v3516_v3 = vadd.f32 %v3492_v63, %v13712_v24  ;;  %v3495_v50 = vadd.f32 %v9400_v33, %v3265_v61  ;;  %v13716_v60 = vld [vmem:[#allocation47_spill] sm:$0xff] }
 0x7b8   :  { %v12243_v14 = vadd.f32 %v12174_v2, %v3518_v18  ;;  %v3412_v44 = vpop.f32.mrf.mxu0  ;;  %v3289_v18 = vrot.slane %v12264_v7, %v11643_v12  ;;  %v3305_v33 = vrot.slane %v12240_v57, %v11643_v12  ;;  %v13719_v7 = vld [vmem:[#allocation65_spill] sm:$0xff] }
 0x7b9   :  { %10321 = vpow2.f32 %v8621_v11  ;;  %v12247_v42 = vadd.f32 %v12174_v2, %v3516_v3  ;;  %v3519_v22 = vadd.f32 %v3495_v50, %v13713_v20  ;;  %v3493_v34 = vadd.f32 %v3412_v44, %v3257_v37  ;;  %v13717_v11 = vld [vmem:[#allocation56_spill] sm:$0xff] }
 0x7ba   :  { %v8626_v30 = vmul.f32 -1.442695, %v12243_v14  ;;  %v9403_v51 = vpop.f32.mrf.mxu0  ;;  %v3309_v20 = vrot.slane %v3230_v35, %v11643_v12 }
 0x7bb   :  { %v8624_v0 = vmul.f32 -1.442695, %v12247_v42  ;;  %v12258_v52 = vadd.f32 %v12174_v2, %v3519_v22  ;;  %v3517_v48 = vadd.f32 %v3493_v34, %v13714_v8  ;;  %v3498_v56 = vadd.f32 %v9403_v51, %v3277_v59 }
 0x7bc   :  { %10323 = vpow2.f32 %v8626_v30  ;;  %v3425_v26 = vpop.f32.mrf.mxu0  ;;  %v12296_v22 = vrot.slane %v3232_v31, %v11643_v12 }
 0x7bd   :  { %10325 = vpow2.f32 %v8624_v0  ;;  %v8627_v27 = vmul.f32 -1.442695, %v12258_v52  ;;  %v12270_v15 = vadd.f32 %v12174_v2, %v3517_v48  ;;  %v3522_v58 = vadd.f32 %v3498_v56, %v13715_v28  ;;  %v13718_v0 = vld [vmem:[#allocation50_spill] sm:$0xff] }
 0x7be   :  { %v3496_v40 = vadd.f32 %v3425_v26, %v3269_v54  ;;  %v9404_v9 = vpop.f32.mrf.mxu0 }
 0x7bf   :  { %10327 = vpow2.f32 %v8627_v27  ;;  %v8625_v19 = vmul.f32 -1.442695, %v12270_v15  ;;  %v12280_v4 = vadd.f32 %v12174_v2, %v3522_v58  ;;  %v3499_v61 = vadd.f32 %v9404_v9, %v3281_v38 }
 0x7c0   :  { %v10316_v47 = vpop.eup %10315  ;;  %v3520_v63 = vadd.f32 %v3496_v40, %v13716_v60  ;;  %v3428_v54 = vpop.f32.mrf.mxu0  ;;  %v3231_v9 = vcombine.high %v12237_v55, %v12237_v55 }
 0x7c1   :  { %v3642_v37 = vadd.f32 1.0, %v10316_v47  ;;  %10329 = vpow2.f32 %v8625_v19  ;;  %v8630_v43 = vmul.f32 -1.442695, %v12280_v4  ;;  %v3523_v24 = vadd.f32 %v3499_v61, %v13717_v11  ;;  %v13720_v47 = vld [vmem:[#allocation59_spill] sm:$0xff] }
 0x7c2   :  { %v10318_v3 = vpop.eup %10317  ;;  %v12292_v50 = vadd.f32 %v12174_v2, %v3520_v63  ;;  %v3497_v44 = vadd.f32 %v3428_v54, %v3273_v6  ;;  %v9407_v59 = vpop.f32.mrf.mxu0  ;;  %v3297_v6 = vrot.slane %v3184_v46, %v11643_v12 }
 0x7c3   :  { %10331 = vrcp.f32 %v3642_v37  ;;  %v3640_v34 = vadd.f32 1.0, %v10318_v3  ;;  %v12299_v30 = vadd.f32 %v12174_v2, %v3523_v24  ;;  %v3502_v51 = vadd.f32 %v9407_v59, %v3293_v39  ;;  %v13721_v37 = vld [vmem:[#allocation68_spill] sm:$0xff] }
 0x7c4   :  { %v10320_v38 = vpop.eup %10319  ;;  %10333 = vpow2.f32 %v8630_v43  ;;  %v8628_v29 = vmul.f32 -1.442695, %v12292_v50  ;;  %v3521_v8 = vadd.f32 %v3497_v44, %v13718_v0  ;;  %v3441_v48 = vpop.f32.mrf.mxu0 }
 0x7c5   :  { %10335 = vrcp.f32 %v3640_v34  ;;  %v3643_v56 = vadd.f32 1.0, %v10320_v38  ;;  %v8631_v26 = vmul.f32 -1.442695, %v12299_v30  ;;  %v3526_v35 = vadd.f32 %v3502_v51, %v13719_v7  ;;  %v13722_v51 = vld [vmem:[#allocation62_spill] sm:$0xff]  ;;  %v13723_v7 = vld [vmem:[#allocation77_spill] sm:$0xff] }
 0x7c6   :  { %v10322_v27 = vpop.eup %10321  ;;  %10337 = vpow2.f32 %v8628_v29  ;;  %v12307_v28 = vadd.f32 %v12174_v2, %v3521_v8  ;;  %v3500_v58 = vadd.f32 %v3441_v48, %v3285_v17  ;;  %v9408_v40 = vpop.f32.mrf.mxu0  ;;  %v12320_v17 = vrot.slane %v3201_v41, %v11632_v36 }
 0x7c7   :  { %10339 = vrcp.f32 %v3643_v56  ;;  %v3641_v39 = vadd.f32 1.0, %v10322_v27  ;;  %v12312_v31 = vadd.f32 %v12174_v2, %v3526_v35  ;;  %v3503_v19 = vadd.f32 %v9408_v40, %v3297_v6 }
 0x7c8   :  { %10341 = vpow2.f32 %v8631_v26  ;;  %v8629_v61 = vmul.f32 -1.442695, %v12307_v28  ;;  %v3524_v60 = vadd.f32 %v3500_v58, %v13720_v47  ;;  %v3444_v63 = vpop.f32.mrf.mxu0  ;;  %v3317_v34 = vrot.slane %v12237_v55, %v11643_v12 }
 0x7c9   :  { %v10324_v54 = vpop.eup %10323  ;;  %10343 = vrcp.f32 %v3641_v39  ;;  %v8634_v46 = vmul.f32 -1.442695, %v12312_v31  ;;  %v3527_v43 = vadd.f32 %v3503_v19, %v13721_v37  ;;  %v3501_v11 = vadd.f32 %v3444_v63, %v3289_v18 }
 0x7ca   :  { %v10326_v24 = vpop.eup %10325  ;;  %v3646_v3 = vadd.f32 1.0, %v10324_v54  ;;  %10345 = vpow2.f32 %v8629_v61  ;;  %v12325_v44 = vadd.f32 %v12174_v2, %v3524_v60  ;;  %v9411_v59 = vpop.f32.mrf.mxu0  ;;  %v3233_v48 = vcombine.high %v12320_v17, %v12320_v17  ;;  %v13724_v60 = vld [vmem:[#allocation71_spill] sm:$0xff] }
 0x7cb   :  { %v3644_v21 = vadd.f32 1.0, %v10326_v24  ;;  %10347 = vpow2.f32 %v8634_v46  ;;  %v12330_v41 = vadd.f32 %v12174_v2, %v3527_v43  ;;  %v3525_v38 = vadd.f32 %v3501_v11, %v13722_v51 }
 0x7cc   :  { %v10328_v29 = vpop.eup %10327  ;;  %10349 = vrcp.f32 %v3646_v3  ;;  %v8632_v18 = vmul.f32 -1.442695, %v12325_v44  ;;  %v3506_v0 = vadd.f32 %v9411_v59, %v3309_v20  ;;  %v3457_v8 = vpop.f32.mrf.mxu0  ;;  %v3325_v58 = vrot.slane %v3231_v9, %v11643_v12  ;;  %v13725_v9 = vld [vmem:[#allocation80_spill] sm:$0xff] }
 0x7cd   :  { %10351 = vrcp.f32 %v3644_v21  ;;  %v3647_v6 = vadd.f32 1.0, %v10328_v29  ;;  %v8635_v55 = vmul.f32 -1.442695, %v12330_v41  ;;  %v12338_v56 = vadd.f32 %v12174_v2, %v3525_v38  ;;  %v13726_v38 = vld [vmem:[#allocation74_spill] sm:$0xff] }
 0x7ce   :  { %v10330_v26 = vpop.eup %10329  ;;  %10353 = vpow2.f32 %v8632_v18  ;;  %v3530_v35 = vadd.f32 %v3506_v0, %v13723_v7  ;;  %v3504_v27 = vadd.f32 %v3457_v8, %v3301_v1  ;;  %v9412_v20 = vpop.f32.mrf.mxu0  ;;  %v3321_v62 = vrot.slane %v12320_v17, %v11643_v12 }
 0x7cf   :  { %10355 = vrcp.f32 %v3647_v6  ;;  %v3645_v40 = vadd.f32 1.0, %v10330_v26  ;;  %v8633_v39 = vmul.f32 -1.442695, %v12338_v56  ;;  %v3507_v19 = vadd.f32 %v9412_v20, %v12296_v22 }
 0x7d0   :  { %v10332_v61 = vpop.eup %10331  ;;  %10357 = vpow2.f32 %v8635_v55  ;;  %v12348_v47 = vadd.f32 %v12174_v2, %v3530_v35  ;;  %v3528_v63 = vadd.f32 %v3504_v27, %v13724_v60  ;;  %v3460_v54 = vpop.f32.mrf.mxu0  ;;  %v3329_v22 = vrot.slane %v3233_v48, %v11643_v12  ;;  %v13727_v27 = vld [vmem:[#allocation89_spill] sm:$0xff] }
 0x7d1   :  { %v10334_v1 = vpop.eup %10333  ;;  %10359 = vrcp.f32 %v3645_v40  ;;  %v3531_v46 = vadd.f32 %v3507_v19, %v13725_v9  ;;  %v3505_v37 = vadd.f32 %v3460_v54, %v3305_v33  ;;  %v3714_v21 = vmul.f32 %v10332_v61, %v12190_v32  ;;  %v13728_v54 = vld [vmem:[#allocation83_spill] sm:$0xff] }
 0x7d2   :  { %v10336_v43 = vpop.eup %10335  ;;  %v3650_v11 = vadd.f32 1.0, %v10334_v1  ;;  %10361 = vpow2.f32 %v8633_v39  ;;  %v8638_v24 = vmul.f32 -1.442695, %v12348_v47  ;;  %v12360_v3 = vadd.f32 %v12174_v2, %v3528_v63  ;;  %v9415_v59 = vpop.f32.mrf.mxu0 }
 0x7d3   :  { %v10338_v17 = vpop.eup %10337  ;;  %v12364_v51 = vadd.f32 %v12174_v2, %v3531_v46  ;;  %v3529_v57 = vadd.f32 %v3505_v37, %v13726_v38  ;;  %v3510_v33 = vadd.f32 %v9415_v59, %v3325_v58  ;;  %v3712_v48 = vmul.f32 %v10336_v43, %v12203_v10 }
 0x7d4   :  { %v10340_v29 = vpop.eup %10339  ;;  %10363 = vrcp.f32 %v3650_v11  ;;  %v3648_v18 = vadd.f32 1.0, %v10338_v17  ;;  %v8636_v0 = vmul.f32 -1.442695, %v12360_v3  ;;  %v3473_v8 = vpop.f32.mrf.mxu0 }
 0x7d5   :  { %v10342_v6 = vpop.eup %10341  ;;  %v3715_v55 = vmul.f32 %v10340_v29, %v12215_v49  ;;  %10365 = vpow2.f32 %v8638_v24  ;;  %v8639_v32 = vmul.f32 -1.442695, %v12364_v51  ;;  %v12372_v26 = vadd.f32 %v12174_v2, %v3529_v57  ;;  %v13730_v57 = vld [vmem:[#allocation86_spill] sm:$0xff] }
 0x7d6   :  { %v10344_v7 = vpop.eup %10343  ;;  %10367 = vrcp.f32 %v3648_v18  ;;  %v3651_v35 = vadd.f32 1.0, %v10342_v6  ;;  %v3534_v20 = vadd.f32 %v3510_v33, %v13727_v27  ;;  %v3508_v58 = vadd.f32 %v3473_v8, %v3317_v34  ;;  %v9416_v40 = vpop.f32.mrf.mxu0  ;;  %v13729_v34 = vld [vmem:[#allocation92_spill] sm:$0xff] }
 0x7d7   :  { %v10346_v39 = vpop.eup %10345  ;;  %10369 = vpow2.f32 %v8636_v0  ;;  %v8637_v10 = vmul.f32 -1.442695, %v12372_v26  ;;  %v3511_v19 = vadd.f32 %v9416_v40, %v3329_v22  ;;  %v3713_v49 = vmul.f32 %v10344_v7, %v12225_v45 }
 0x7d8   :  { %v10348_v61 = vpop.eup %10347  ;;  %10371 = vrcp.f32 %v3651_v35  ;;  %v3649_v60 = vadd.f32 1.0, %v10346_v39  ;;  %v12378_v63 = vadd.f32 %v12174_v2, %v3534_v20  ;;  %v3532_v1 = vadd.f32 %v3508_v58, %v13728_v54  ;;  %v3476_v9 = vpop.f32.mrf.mxu0 }
 0x7d9   :  { %v10350_v46 = vpop.eup %10349  ;;  %v3654_v37 = vadd.f32 1.0, %v10348_v61  ;;  %10373 = vpow2.f32 %v8639_v32  ;;  %v3535_v43 = vadd.f32 %v3511_v19, %v13729_v34  ;;  %v3509_v11 = vadd.f32 %v3476_v9, %v3321_v62 }
 0x7da   :  { %v10352_v24 = vpop.eup %10351  ;;  %10375 = vrcp.f32 %v3649_v60  ;;  %v8642_v22 = vmul.f32 -1.442695, %v12378_v63  ;;  %v12384_v45 = vadd.f32 %v12174_v2, %v3532_v1  ;;  %v3736_v59 = vpack.c.bf16 %v3713_v49, %v3712_v48 }
 0x7db   :  { %v10354_v17 = vpop.eup %10353  ;;  %10377 = vrcp.f32 %v3654_v37  ;;  %v12387_v38 = vadd.f32 %v12174_v2, %v3535_v43  ;;  %v3533_v33 = vadd.f32 %v3509_v11, %v13730_v57  ;;  %v3737_v29 = vpack.c.bf16 %v3715_v55, %v3714_v21 }
 0x7dc   :  { %v10356_v18 = vpop.eup %10355  ;;  %v3652_v0 = vadd.f32 1.0, %v10354_v17  ;;  %10379 = vpow2.f32 %v8637_v10  ;;  %v8640_v62 = vmul.f32 -1.442695, %v12384_v45  ;;  %9433 = vmatprep.mubr.bf16.mxu1 %v3736_v59  ;;  %v3716_v35 = vmul.f32 %v10352_v24, %v12247_v42 }
 0x7dd   :  { %v10358_v8 = vpop.eup %10357  ;;  %10381 = vpow2.f32 %v8642_v22  ;;  %v8643_v6 = vmul.f32 -1.442695, %v12387_v38  ;;  %v12393_v48 = vadd.f32 %v12174_v2, %v3533_v33  ;;  %9434 = vmatmul.mubr.bf16.vlgmr.msra.gmra.mxu1 %v3737_v29  ;;  %v3719_v20 = vmul.f32 %v10356_v18, %v12258_v52 }
 0x7de   :  { %v10360_v32 = vpop.eup %10359  ;;  %10383 = vrcp.f32 %v3652_v0  ;;  %v3655_v7 = vadd.f32 1.0, %v10358_v8  ;;  %v3718_v39 = vmul.f32 %v10350_v46, %v12243_v14 }
 0x7df   :  { %v10362_v21 = vpop.eup %10361  ;;  %10385 = vpow2.f32 %v8640_v62  ;;  %v8641_v55 = vmul.f32 -1.442695, %v12393_v48  ;;  %v3717_v27 = vmul.f32 %v10360_v32, %v12270_v15 }
 0x7e0   :  { %10387 = vrcp.f32 %v3655_v7  ;;  %v3653_v58 = vadd.f32 1.0, %v10362_v21  ;;  %v3739_v42 = vpack.c.bf16 %v3719_v20, %v3718_v39 }
 0x7e1   :  { %v10364_v40 = vpop.eup %10363  ;;  %10389 = vpow2.f32 %v8643_v6  ;;  %v3738_v2 = vpack.c.bf16 %v3717_v27, %v3716_v35 }
 0x7e2   :  { %v10366_v10 = vpop.eup %10365  ;;  %10391 = vrcp.f32 %v3653_v58  ;;  %v3722_v43 = vmul.f32 %v10364_v40, %v12280_v4 }
 0x7e3   :  { %v10368_v19 = vpop.eup %10367  ;;  %10393 = vpow2.f32 %v8641_v55  ;;  %9437 = vmatprep.mubr.bf16.mxu1 %v3738_v2  ;;  %v3658_v52 = vadd.f32 1.0, %v10366_v10 }
 0x7e4   :  { %v10370_v49 = vpop.eup %10369  ;;  %v3720_v34 = vmul.f32 %v10368_v19, %v12292_v50 }
 0x7e5   :  { %v10372_v61 = vpop.eup %10371  ;;  %9438 = vmatmul.mubr.bf16.gmra.mxu1 %v3739_v42  ;;  %v3656_v15 = vadd.f32 1.0, %v10370_v49 }
 0x7e6   :  { %v10374_v60 = vpop.eup %10373  ;;  %v3723_v9 = vmul.f32 %v10372_v61, %v12299_v30 }
 0x7e7   :  { %v10376_v54 = vpop.eup %10375  ;;  %v3659_v1 = vadd.f32 1.0, %v10374_v60  ;;  %v9976_v60 = vld [vmem:[#allocation10 + $0x70] sm:$0xff]  }
 0x7e8   :  { %v10378_v37 = vpop.eup %10377  ;;  %v3721_v14 = vmul.f32 %v10376_v54, %v12307_v28  ;;  %v3741_v17 = vpack.c.bf16 %v3723_v9, %v3722_v43  ;;  %v12422_v54 = vld [vmem:[%s13621_s9 + $0x1] ss:$0 sm:$0xff] }
 0x7e9   :  { %v10380_v46 = vpop.eup %10379  ;;  %10395 = vrcp.f32 %v3659_v1  ;;  %v3726_v32 = vmul.f32 %v10378_v37, %v12312_v31  ;;  %v9982_v9 = vld [vmem:[#allocation10 + $0x40] sm:$0xff]  }
 0x7ea   :  { %v10382_v11 = vpop.eup %10381  ;;  %10397 = vrcp.f32 %v3656_v15  ;;  %v3657_v24 = vadd.f32 1.0, %v10380_v46  ;;  %v3740_v22 = vpack.c.bf16 %v3721_v14, %v3720_v34  ;;  %v9977_v15 = vld [vmem:[#allocation10 + $0x68] sm:$0xff]  }
 0x7eb   :  { %v10384_v59 = vpop.eup %10383  ;;  %10399 = vrcp.f32 %v3658_v52  ;;  %v3662_v29 = vadd.f32 1.0, %v10382_v11  ;;  %v9981_v52 = vld [vmem:[#allocation10 + $0x48] sm:$0xff]  }
 0x7ec   :  { %v10386_v57 = vpop.eup %10385  ;;  %10401 = vrcp.f32 %v3657_v24  ;;  %9441 = vmatprep.mubr.bf16.mxu1 %v3740_v22  ;;  %v3724_v62 = vmul.f32 %v10384_v59, %v12325_v44 }
 0x7ed   :  { %v10388_v30 = vpop.eup %10387  ;;  %v3660_v33 = vadd.f32 1.0, %v10386_v57  ;;  %9442 = vmatmul.mubr.bf16.gmra.mxu1 %v3741_v17 }
 0x7ee   :  { %v10390_v50 = vpop.eup %10389  ;;  %v3727_v0 = vmul.f32 %v10388_v30, %v12330_v41 }
 0x7ef   :  { %v10392_v28 = vpop.eup %10391  ;;  %v3663_v18 = vadd.f32 1.0, %v10390_v50  ;;  %10403 = vrcp.f32 %v3660_v33 }
 0x7f0   :  { %v10394_v4 = vpop.eup %10393  ;;  %v3725_v8 = vmul.f32 %v10392_v28, %v12338_v56  ;;  %v3743_v35 = vpack.c.bf16 %v3727_v0, %v3726_v32 }
 0x7f1   :  { %10405 = vrcp.f32 %v3663_v18  ;;  %v3661_v6 = vadd.f32 1.0, %v10394_v4 }
 0x7f2   :  { %10407 = vrcp.f32 %v3662_v29  ;;  %v3742_v7 = vpack.c.bf16 %v3725_v8, %v3724_v62 }
 0x7f3   :  { %10409 = vrcp.f32 %v3661_v6 }
 0x7f4   :  { %9445 = vmatprep.mubr.bf16.mxu1 %v3742_v7 }
 0x7f5   :  { %9446 = vmatmul.mubr.bf16.gmra.mxu1 %v3743_v35 }
 0x7f6   :  { %v10396_v21 = vpop.eup %10395 }
 0x7f7   :  { %v10398_v55 = vpop.eup %10397  ;;  %v3731_v20 = vmul.f32 %v10396_v21, %v12364_v51 }
 0x7f8   :  { %v10400_v27 = vpop.eup %10399  ;;  %v3728_v44 = vmul.f32 %v10398_v55, %v12360_v3 }
 0x7f9   :  { %v10402_v41 = vpop.eup %10401  ;;  %v3730_v58 = vmul.f32 %v10400_v27, %v12348_v47  ;;  %v9975_v47 = vld [vmem:[#allocation10 + $0x78] sm:$0xff]  }
 0x7fa   :  { %v3729_v56 = vmul.f32 %v10402_v41, %v12372_v26  ;;  %9457 = vmatprep.subr.bf16.mxu0 %v9975_v47 }
 0x7fb   :  { %v3745_v2 = vpack.c.bf16 %v3731_v20, %v3730_v58  ;;  %9458 = vmatpush3.bf16.msra.mxu0 %v9975_v47 }
 0x7fc   :  { %v3744_v40 = vpack.c.bf16 %v3729_v56, %v3728_v44  ;;  %v10404_v31 = vpop.eup %10403  ;;  %9459 = vmatprep.subr.bf16.mxu0 %v9976_v60 }
 0x7fd   :  { %v3732_v49 = vmul.f32 %v10404_v31, %v12384_v45  ;;  %v9978_v45 = vld [vmem:[#allocation10 + $0x60] sm:$0xff]  }
 0x7fe   :  { %v10406_v39 = vpop.eup %10405  ;;  %9449 = vmatprep.mubr.bf16.mxu1 %v3744_v40 }
 0x7ff   :  { %v10408_v10 = vpop.eup %10407  ;;  %9450 = vmatmul.mubr.bf16.gmra.mxu1 %v3745_v2  ;;  %v3735_v42 = vmul.f32 %v10406_v39, %v12387_v38  ;;  %9460 = vmatpush3.bf16.msra.mxu0 %v9976_v60  ;;  %v9979_v38 = vld [vmem:[#allocation10 + $0x58] sm:$0xff]  }
 0x800   :  { %v10410_v19 = vpop.eup %10409  ;;  %v3734_v3 = vmul.f32 %v10408_v10, %v12378_v63  ;;  %9461 = vmatprep.subr.bf16.mxu0 %v9977_v15  ;;  %v9980_v63 = vld [vmem:[#allocation10 + $0x50] sm:$0xff]  }
 0x801   :  { %v3733_v51 = vmul.f32 %v10410_v19, %v12393_v48  ;;  %v12417_v48 = vpop.f32.mrf.mxu1 }
 0x802   :  { %v3747_v26 = vpack.c.bf16 %v3735_v42, %v3734_v3 }
 0x803   :  { %v3746_v61 = vpack.c.bf16 %v3733_v51, %v3732_v49  ;;  %9462 = vmatpush3.bf16.msra.mxu0 %v9977_v15 }
 0x804   :  { %9463 = vmatprep.subr.bf16.mxu0 %v9978_v45 }
 0x805   :  { %9453 = vmatprep.mubr.bf16.mxu1 %v3746_v61 }
 0x807   :  { %9454 = vmatmul.mubr.bf16.gmra.mxu1 %v3747_v26  ;;  %9464 = vmatpush3.bf16.msra.mxu0 %v9978_v45 }
 0x808   :  { %4828 = vmatprep.mubr.bf16.mxu1 %v13707_v13  ;;  %9465 = vmatprep.subr.bf16.mxu0 %v9979_v38 }
 0x80b   :  { %9466 = vmatpush3.bf16.msra.mxu0 %v9979_v38 }
 0x80c   :  { %9467 = vmatprep.subr.bf16.mxu0 %v9980_v63 }
 0x80f   :  { %9468 = vmatpush3.bf16.msra.mxu0 %v9980_v63 }
 0x810   :  { %9469 = vmatprep.subr.bf16.mxu0 %v9981_v52 }
 0x813   :  { %9470 = vmatpush3.bf16.msra.mxu0 %v9981_v52 }
 0x814   :  { %9471 = vmatprep.subr.bf16.mxu0 %v9982_v9 }
 0x817   :  { %9472 = vmatpush3.bf16.msra.mxu0 %v9982_v9 }
 0x89d   :  { %v9435_v1 = vpop.f32.mrf.mxu1 }
 0x89e   :  { %v12425_v37 = vadd.f32 %v9435_v1, %v12422_v54 }
 0x89f   :  { %v3855_v34 = vpop.f32.mrf.mxu1 }
 0x8a0   :  { %v8656_v14 = vmul.f32 -1.442695, %v12425_v37  ;;  %v12429_v46 = vadd.f32 %v12422_v54, %v3855_v34 }
 0x8a1   :  { %v9436_v43 = vpop.f32.mrf.mxu1 }
 0x8a2   :  { %10411 = vpow2.f32 %v8656_v14  ;;  %v8654_v11 = vmul.f32 -1.442695, %v12429_v46  ;;  %v12433_v24 = vadd.f32 %v9436_v43, %v12422_v54 }
 0x8a3   :  { %v3858_v22 = vpop.f32.mrf.mxu1 }
 0x8a4   :  { %10413 = vpow2.f32 %v8654_v11  ;;  %v8657_v59 = vmul.f32 -1.442695, %v12433_v24  ;;  %v12437_v17 = vadd.f32 %v12422_v54, %v3858_v22 }
 0x8a5   :  { %v9439_v57 = vpop.f32.mrf.mxu1 }
 0x8a6   :  { %10415 = vpow2.f32 %v8657_v59  ;;  %v8655_v30 = vmul.f32 -1.442695, %v12437_v17  ;;  %v12441_v33 = vadd.f32 %v9439_v57, %v12422_v54 }
 0x8a7   :  { %v3871_v50 = vpop.f32.mrf.mxu1 }
 0x8a8   :  { %10417 = vpow2.f32 %v8655_v30  ;;  %v8660_v29 = vmul.f32 -1.442695, %v12441_v33  ;;  %v12445_v28 = vadd.f32 %v12422_v54, %v3871_v50 }
 0x8a9   :  { %v9440_v18 = vpop.f32.mrf.mxu1 }
 0x8aa   :  { %v8658_v0 = vmul.f32 -1.442695, %v12445_v28  ;;  %v12449_v4 = vadd.f32 %v9440_v18, %v12422_v54  ;;  %10419 = vpow2.f32 %v8660_v29 }
 0x8ab   :  { %v3874_v62 = vpop.f32.mrf.mxu1 }
 0x8ac   :  { %10421 = vpow2.f32 %v8658_v0  ;;  %v8661_v8 = vmul.f32 -1.442695, %v12449_v4  ;;  %v12453_v6 = vadd.f32 %v12422_v54, %v3874_v62 }
 0x8ad   :  { %v9443_v32 = vpop.f32.mrf.mxu1 }
 0x8ae   :  { %v8659_v7 = vmul.f32 -1.442695, %v12453_v6  ;;  %v12457_v35 = vadd.f32 %v9443_v32, %v12422_v54  ;;  %10423 = vpow2.f32 %v8661_v8 }
 0x8af   :  { %v10412_v21 = vpop.eup %10411  ;;  %v3887_v55 = vpop.f32.mrf.mxu1 }
 0x8b0   :  { %v4024_v27 = vadd.f32 1.0, %v10412_v21  ;;  %10425 = vpow2.f32 %v8659_v7  ;;  %v8664_v41 = vmul.f32 -1.442695, %v12457_v35  ;;  %v12461_v20 = vadd.f32 %v12422_v54, %v3887_v55 }
 0x8b1   :  { %v10414_v44 = vpop.eup %10413  ;;  %v9444_v56 = vpop.f32.mrf.mxu1 }
 0x8b2   :  { %10427 = vrcp.f32 %v4024_v27  ;;  %v4022_v58 = vadd.f32 1.0, %v10414_v44  ;;  %v8662_v40 = vmul.f32 -1.442695, %v12461_v20  ;;  %v12465_v31 = vadd.f32 %v9444_v56, %v12422_v54 }
 0x8b3   :  { %v10416_v2 = vpop.eup %10415  ;;  %10429 = vpow2.f32 %v8664_v41  ;;  %v3890_v39 = vpop.f32.mrf.mxu1 }
 0x8b4   :  { %10431 = vrcp.f32 %v4022_v58  ;;  %v4025_v10 = vadd.f32 1.0, %v10416_v2  ;;  %v8665_v19 = vmul.f32 -1.442695, %v12465_v31  ;;  %v12469_v42 = vadd.f32 %v12422_v54, %v3890_v39 }
 0x8b5   :  { %v10418_v49 = vpop.eup %10417  ;;  %10433 = vpow2.f32 %v8662_v40  ;;  %v9447_v51 = vpop.f32.mrf.mxu1 }
 0x8b6   :  { %10435 = vrcp.f32 %v4025_v10  ;;  %v4023_v3 = vadd.f32 1.0, %v10418_v49  ;;  %v8663_v61 = vmul.f32 -1.442695, %v12469_v42  ;;  %v12473_v26 = vadd.f32 %v9447_v51, %v12422_v54 }
 0x8b7   :  { %10437 = vpow2.f32 %v8665_v19  ;;  %v3903_v47 = vpop.f32.mrf.mxu1  ;;  %v10420_v60 = vpop.eup %10419 }
 0x8b8   :  { %10439 = vrcp.f32 %v4023_v3  ;;  %v8668_v15 = vmul.f32 -1.442695, %v12473_v26  ;;  %v12477_v45 = vadd.f32 %v12422_v54, %v3903_v47  ;;  %v4028_v52 = vadd.f32 1.0, %v10420_v60 }
 0x8b9   :  { %v10422_v38 = vpop.eup %10421  ;;  %10441 = vpow2.f32 %v8663_v61  ;;  %v9448_v43 = vpop.f32.mrf.mxu1 }
 0x8ba   :  { %v8666_v63 = vmul.f32 -1.442695, %v12477_v45  ;;  %10443 = vpow2.f32 %v8668_v15  ;;  %v4026_v9 = vadd.f32 1.0, %v10422_v38  ;;  %v12483_v55 = vadd.f32 %v9448_v43, %v12422_v54 }
 0x8bb   :  { %v10424_v1 = vpop.eup %10423  ;;  %v3906_v0 = vpop.f32.mrf.mxu1 }
 0x8bc   :  { %10445 = vpow2.f32 %v8666_v63  ;;  %v4029_v57 = vadd.f32 1.0, %v10424_v1  ;;  %v12488_v39 = vadd.f32 %v12422_v54, %v3906_v0  ;;  %v8669_v10 = vmul.f32 -1.442695, %v12483_v55 }
 0x8bd   :  { %v10426_v34 = vpop.eup %10425  ;;  %10447 = vrcp.f32 %v4028_v52 }
 0x8be   :  { %v4027_v14 = vadd.f32 1.0, %v10426_v34  ;;  %10449 = vrcp.f32 %v4026_v9 }
 0x8bf   :  { %v10428_v11 = vpop.eup %10427  ;;  %v9451_v44 = vpop.f32.mrf.mxu1 }
 0x8c0   :  { %v10430_v22 = vpop.eup %10429  ;;  %v4096_v59 = vmul.f32 %v10428_v11, %v12425_v37  ;;  %10451 = vrcp.f32 %v4027_v14  ;;  %v12492_v19 = vadd.f32 %v9451_v44, %v12422_v54 }
 0x8c1   :  { %v10432_v30 = vpop.eup %10431  ;;  %v4032_v50 = vadd.f32 1.0, %v10430_v22  ;;  %v3919_v38 = vpop.f32.mrf.mxu1 }
 0x8c2   :  { %v10434_v29 = vpop.eup %10433  ;;  %v4130_v18 = vrot.slane %v4096_v59, 4  ;;  %v4094_v8 = vmul.f32 %v10432_v30, %v12429_v46  ;;  %v8672_v52 = vmul.f32 -1.442695, %v12492_v19  ;;  %v12502_v44 = vadd.f32 %v12422_v54, %v3919_v38 }
 0x8c3   :  { %v10436_v62 = vpop.eup %10435  ;;  %10453 = vrcp.f32 %v4032_v50  ;;  %v4030_v32 = vadd.f32 1.0, %v10434_v29 }
 0x8c4   :  { %v10438_v7 = vpop.eup %10437  ;;  %10455 = vrcp.f32 %v4029_v57  ;;  %v4131_v27 = vadd.f32 %v4130_v18, %v4096_v59  ;;  %v4118_v56 = vrot.slane %v4094_v8, 4  ;;  %v4097_v46 = vmul.f32 %v10436_v62, %v12433_v24  ;;  %v9452_v59 = vpop.f32.mrf.mxu1 }
 0x8c5   :  { %v10440_v21 = vpop.eup %10439  ;;  %10457 = vrcp.f32 %v4030_v32  ;;  %v4033_v58 = vadd.f32 1.0, %v10438_v7  ;;  %v8667_v24 = vmul.f32 -1.442695, %v12488_v39 }
 0x8c6   :  { %v10442_v37 = vpop.eup %10441  ;;  %v4095_v41 = vmul.f32 %v10440_v21, %v12437_v17  ;;  %v4132_v51 = vrot.slane %v4131_v27, 2  ;;  %v4119_v17 = vadd.f32 %v4118_v56, %v4094_v8  ;;  %v4136_v15 = vrot.slane %v4097_v46, 4 }
 0x8c7   :  { %v4031_v40 = vadd.f32 1.0, %v10442_v37  ;;  %v10444_v2 = vpop.eup %10443  ;;  %v3922_v37 = vpop.f32.mrf.mxu1  ;;  %v12506_v56 = vadd.f32 %v9452_v59, %v12422_v54 }
 0x8c8   :  { %v4124_v3 = vrot.slane %v4095_v41, 4  ;;  %v4036_v61 = vadd.f32 1.0, %v10444_v2  ;;  %v4133_v34 = vadd.f32 %v4132_v51, %v4131_v27  ;;  %v4120_v14 = vrot.slane %v4119_v17, 2 }
 0x8c9   :  { %v10446_v49 = vpop.eup %10445  ;;  %10459 = vrcp.f32 %v4031_v40  ;;  %v4137_v11 = vadd.f32 %v4136_v15, %v4097_v46  ;;  %v12511_v2 = vadd.f32 %v12422_v54, %v3922_v37  ;;  %v8673_v38 = vmul.f32 -1.442695, %v12506_v56 }
 0x8ca   :  { %10461 = vrcp.f32 %v4033_v58  ;;  %v4034_v47 = vadd.f32 1.0, %v10446_v49  ;;  %v10448_v60 = vpop.eup %10447  ;;  %v4125_v9 = vadd.f32 %v4124_v3, %v4095_v41  ;;  %v4134_v62 = vrot.slane %v4133_v34, 1 }
 0x8cb   :  { %v10450_v63 = vpop.eup %10449  ;;  %10463 = vpow2.f32 %v8669_v10  ;;  %v4100_v30 = vmul.f32 %v10448_v60, %v12441_v33  ;;  %v4121_v8 = vadd.f32 %v4120_v14, %v4119_v17  ;;  %v4138_v32 = vrot.slane %v4137_v11, 2 }
 0x8cc   :  { %10465 = vrcp.f32 %v4034_v47  ;;  %v4098_v22 = vmul.f32 %v10450_v63, %v12445_v28  ;;  %v4126_v29 = vrot.slane %v4125_v9, 2  ;;  %v12508_v58 = vadd.f32 %v4134_v62, %v4133_v34 }
 0x8cd   :  { %v10452_v1 = vpop.eup %10451  ;;  %10467 = vrcp.f32 %v4036_v61  ;;  %v4154_v28 = vrot.slane %v4100_v30, 4  ;;  %v4122_v40 = vrot.slane %v4121_v8, 1  ;;  %v4139_v46 = vadd.f32 %v4138_v32, %v4137_v11 }
 0x8ce   :  { %10469 = vpow2.f32 %v8667_v24  ;;  %v4099_v50 = vmul.f32 %v10452_v1, %v12453_v6  ;;  %v4142_v7 = vrot.slane %v4098_v22, 4  ;;  %v4127_v33 = vadd.f32 %v4126_v29, %v4125_v9 }
 0x8cf   :  { %10471 = vpow2.f32 %v8672_v52  ;;  %v4155_v51 = vadd.f32 %v4154_v28, %v4100_v30  ;;  %v8670_v61 = vmul.f32 -1.442695, %v12502_v44  ;;  %v4264_v52 = vpack.c.bf16 %v12508_v58, %v12508_v58 }
 0x8d0   :  { %v10454_v43 = vpop.eup %10453  ;;  %v4148_v27 = vrot.slane %v4099_v50, 4  ;;  %v4143_v10 = vadd.f32 %v4142_v7, %v4098_v22  ;;  %v4128_v60 = vrot.slane %v4127_v33, 1  ;;  %v12518_v1 = vadd.f32 %v4122_v40, %v4121_v8 }
 0x8d1   :  { %v10456_v57 = vpop.eup %10455  ;;  %v4104_v18 = vmul.f32 %v10454_v43, %v12457_v35  ;;  %v8671_v34 = vmul.f32 -1.442695, %v12511_v2  ;;  %v4140_v43 = vrot.slane %v4139_v46, 1  ;;  %v4156_v30 = vrot.slane %v4155_v51, 2 }
 0x8d2   :  { %v10458_v0 = vpop.eup %10457  ;;  %v4101_v21 = vmul.f32 %v10456_v57, %v12449_v4  ;;  %v4149_v3 = vadd.f32 %v4148_v27, %v4099_v50  ;;  %v4144_v11 = vrot.slane %v4143_v10, 2  ;;  %v4129_v62 = vadd.f32 %v4128_v60, %v4127_v33 }
 0x8d3   :  { %v4178_v41 = vrot.slane %v4104_v18, 4  ;;  %v4102_v6 = vmul.f32 %v10458_v0, %v12461_v20  ;;  %v9455_v20 = vpop.f32.mrf.mxu1  ;;  %v4157_v60 = vadd.f32 %v4156_v30, %v4155_v51 }
 0x8d4   :  { %v4160_v49 = vrot.slane %v4101_v21, 4  ;;  %v4145_v27 = vadd.f32 %v4144_v11, %v4143_v10 }
 0x8d5   :  { %v4179_v17 = vadd.f32 %v4178_v41, %v4104_v18  ;;  %v4166_v15 = vrot.slane %v4102_v6, 4  ;;  %v3935_v18 = vpop.f32.mrf.mxu1 }
 0x8d6   :  { %v10460_v35 = vpop.eup %10459  ;;  %v4161_v22 = vadd.f32 %v4160_v49, %v4101_v21  ;;  %v12526_v21 = vadd.f32 %v4140_v43, %v4139_v46  ;;  %v4146_v46 = vrot.slane %v4145_v27, 1 }
 0x8d7   :  { %v10462_v4 = vpop.eup %10461  ;;  %v4103_v24 = vmul.f32 %v10460_v35, %v12469_v42  ;;  %v4150_v42 = vrot.slane %v4149_v3, 2  ;;  %v4180_v50 = vrot.slane %v4179_v17, 2  ;;  %v4167_v32 = vadd.f32 %v4166_v15, %v4102_v6  ;;  %v9456_v6 = vpop.f32.mrf.mxu1 }
 0x8d8   :  { %v10464_v47 = vpop.eup %10463  ;;  %v4105_v9 = vmul.f32 %v10462_v4, %v12465_v31  ;;  %v4262_v31 = vpack.c.bf16 %v12518_v1, %v12518_v1  ;;  %v4162_v41 = vrot.slane %v4161_v22, 2 }
 0x8d9   :  { %v10466_v63 = vpop.eup %10465  ;;  %v4172_v59 = vrot.slane %v4103_v24, 4  ;;  %v4037_v29 = vadd.f32 1.0, %v10464_v47  ;;  %v4151_v40 = vadd.f32 %v4150_v42, %v4149_v3  ;;  %v4181_v4 = vadd.f32 %v4180_v50, %v4179_v17  ;;  %v3938_v43 = vpop.f32.mrf.mxu1 }
 0x8da   :  { %v10468_v14 = vpop.eup %10467  ;;  %v4106_v7 = vmul.f32 %v10466_v63, %v12477_v45  ;;  %v4184_v37 = vrot.slane %v4105_v9, 4  ;;  %v4263_v47 = vpack.c.bf16 %v4129_v62, %v4129_v62  ;;  %v4168_v45 = vrot.slane %v4167_v32, 2 }
 0x8db   :  { %v10470_v57 = vpop.eup %10469  ;;  %v4173_v8 = vadd.f32 %v4172_v59, %v4103_v24  ;;  %v4108_v28 = vmul.f32 %v10468_v14, %v12473_v26  ;;  %10473 = vrcp.f32 %v4037_v29  ;;  %v12529_v26 = vadd.f32 %v9455_v20, %v12422_v54 }
 0x8dc   :  { %v10472_v0 = vpop.eup %10471  ;;  %v4035_v49 = vadd.f32 1.0, %v10470_v57  ;;  %v4190_v15 = vrot.slane %v4106_v7, 4  ;;  %v4185_v24 = vadd.f32 %v4184_v37, %v4105_v9  ;;  %v4163_v1 = vadd.f32 %v4162_v41, %v4161_v22 }
 0x8dd   :  { %v4174_v35 = vrot.slane %v4173_v8, 2  ;;  %v4040_v33 = vadd.f32 1.0, %v10472_v0  ;;  %v4202_v63 = vrot.slane %v4108_v28, 4  ;;  %v4152_v14 = vrot.slane %v4151_v40, 1 }
 0x8de   :  { %10475 = vrcp.f32 %v4035_v49  ;;  %v4182_v3 = vrot.slane %v4181_v4, 1  ;;  %v8676_v17 = vmul.f32 -1.442695, %v12529_v26  ;;  %v4169_v11 = vadd.f32 %v4168_v45, %v4167_v32 }
 0x8df   :  { %v4175_v10 = vadd.f32 %v4174_v35, %v4173_v8  ;;  %10477 = vrcp.f32 %v4040_v33  ;;  %v4191_v51 = vadd.f32 %v4190_v15, %v4106_v7  ;;  %v12533_v9 = vadd.f32 %v12422_v54, %v3935_v18 }
 0x8e0   :  { %10479 = vpow2.f32 %v8670_v61  ;;  %v4186_v59 = vrot.slane %v4185_v24, 2  ;;  %v4203_v57 = vadd.f32 %v4202_v63, %v4108_v28  ;;  %v12536_v20 = vadd.f32 %v9456_v6, %v12422_v54 }
 0x8e1   :  { %10481 = vpow2.f32 %v8673_v38  ;;  %v4176_v22 = vrot.slane %v4175_v10, 1  ;;  %v8674_v30 = vmul.f32 -1.442695, %v12533_v9  ;;  %v12540_v61 = vadd.f32 %v12422_v54, %v3938_v43 }
 0x8e2   :  { %10483 = vpow2.f32 %v8671_v34  ;;  %v4147_v42 = vadd.f32 %v4146_v46, %v4145_v27  ;;  %v4153_v50 = vadd.f32 %v4152_v14, %v4151_v40  ;;  %v4183_v29 = vadd.f32 %v4182_v3, %v4181_v4 }
 0x8e3   :  { %10485 = vpow2.f32 %v8676_v17  ;;  %v8677_v38 = vmul.f32 -1.442695, %v12536_v20  ;;  %v4170_v18 = vrot.slane %v4169_v11, 1  ;;  %v4192_v0 = vrot.slane %v4191_v51, 2 }
 0x8e4   :  { %10487 = vpow2.f32 %v8674_v30  ;;  %v8675_v34 = vmul.f32 -1.442695, %v12540_v61  ;;  %v4265_v62 = vpack.c.bf16 %v12526_v21, %v12526_v21  ;;  %v4158_v32 = vrot.slane %v4157_v60, 1 }
 0x8e5   :  { %v4187_v8 = vadd.f32 %v4186_v59, %v4185_v24  ;;  %10489 = vpow2.f32 %v8677_v38  ;;  %v4328_v37 = vunpack.c.l.b16 %v4263_v47  ;;  %v4177_v54 = vadd.f32 %v4176_v22, %v4175_v10 }
 0x8e6   :  { %v4204_v28 = vrot.slane %v4203_v57, 2  ;;  %10491 = vpow2.f32 %v8675_v34  ;;  %v4327_v27 = vunpack.c.l.b16 %v4262_v31  ;;  %v4266_v41 = vpack.c.bf16 %v4147_v42, %v4147_v42 }
 0x8e7   :  { %v4164_v35 = vrot.slane %v4163_v1, 1  ;;  %v4267_v4 = vpack.c.bf16 %v4153_v50, %v4153_v50  ;;  %v4272_v49 = vpack.c.bf16 %v4183_v29, %v4183_v29  ;;  %v4171_v33 = vadd.f32 %v4170_v18, %v4169_v11 }
 0x8e8   :  { %v10474_v7 = vpop.eup %10473  ;;  %v4193_v6 = vadd.f32 %v4192_v0, %v4191_v51  ;;  %v4329_v21 = vunpack.c.l.b16 %v4264_v52  ;;  %v4330_v45 = vunpack.c.l.b16 %v4265_v62  ;;  %v4188_v15 = vrot.slane %v4187_v8, 1 }
 0x8e9   :  { %v4109_v40 = vmul.f32 %v10474_v7, %v12483_v55  ;;  %v4351_v63 = vsel %vm2536_vm2, %v4328_v37, %v4327_v27  ;;  %v12551_v46 = vadd.f32 %v4158_v32, %v4157_v60  ;;  %v4271_v31 = vpack.c.bf16 %v4177_v54, %v4177_v54 }
 0x8ea   :  { %v4205_v10 = vadd.f32 %v4204_v28, %v4203_v57  ;;  %v4331_v55 = vunpack.c.l.b16 %v4266_v41  ;;  %v12553_v3 = vadd.f32 %v4164_v35, %v4163_v1  ;;  %v4332_v58 = vunpack.c.l.b16 %v4267_v4 }
 0x8eb   :  { %v4208_v24 = vrot.slane %v4109_v40, 4  ;;  %v10476_v47 = vpop.eup %10475  ;;  %v4337_v52 = vunpack.c.l.b16 %v4272_v49  ;;  %v4270_v51 = vpack.c.bf16 %v4171_v33, %v4171_v33  ;;  %v4194_v59 = vrot.slane %v4193_v6, 1 }
 0x8ec   :  { %v10478_v14 = vpop.eup %10477  ;;  %v4107_v43 = vmul.f32 %v10476_v47, %v12488_v39  ;;  %v4189_v30 = vadd.f32 %v4188_v15, %v4187_v8  ;;  %v4336_v38 = vunpack.c.l.b16 %v4271_v31  ;;  %v4206_v57 = vrot.slane %v4205_v10, 1 }
 0x8ed   :  { %v4209_v17 = vadd.f32 %v4208_v24, %v4109_v40  ;;  %v10480_v11 = vpop.eup %10479  ;;  %v4112_v18 = vmul.f32 %v10478_v14, %v12492_v19  ;;  %v4335_v32 = vunpack.c.l.b16 %v4270_v51  ;;  %v4195_v7 = vadd.f32 %v4194_v59, %v4193_v6 }
 0x8ee   :  { %v10482_v22 = vpop.eup %10481  ;;  %v4196_v50 = vrot.slane %v4107_v43, 4  ;;  %v4038_v60 = vadd.f32 1.0, %v10480_v11  ;;  %v4352_v27 = vsel %vm2538_vm3, %v4329_v21, %v4351_v63  ;;  %v4273_v35 = vpack.c.bf16 %v4189_v30, %v4189_v30 }
 0x8ef   :  { %v4210_v42 = vrot.slane %v4209_v17, 2  ;;  %v10484_v29 = vpop.eup %10483  ;;  %v4041_v1 = vadd.f32 1.0, %v10482_v22  ;;  %v4207_v40 = vadd.f32 %v4206_v57, %v4205_v10  ;;  %v4358_v49 = vsel %vm2536_vm2, %v4336_v38, %v4335_v32 }
 0x8f0   :  { %v10486_v0 = vpop.eup %10485  ;;  %v4197_v62 = vadd.f32 %v4196_v50, %v4107_v43  ;;  %10493 = vrcp.f32 %v4038_v60  ;;  %v4039_v39 = vadd.f32 1.0, %v10484_v29  ;;  %v4226_v15 = vrot.slane %v4112_v18, 4 }
 0x8f1   :  { %v4211_v34 = vadd.f32 %v4210_v42, %v4209_v17  ;;  %10495 = vrcp.f32 %v4041_v1  ;;  %v4044_v37 = vadd.f32 1.0, %v10486_v0  ;;  %v10488_v54 = vpop.eup %10487  ;;  %v4274_v6 = vpack.c.bf16 %v4195_v7, %v4195_v7 }
 0x8f2   :  { %v4198_v28 = vrot.slane %v4197_v62, 2  ;;  %10497 = vrcp.f32 %v4039_v39  ;;  %v10490_v41 = vpop.eup %10489  ;;  %v4042_v19 = vadd.f32 1.0, %v10488_v54  ;;  %v4353_v31 = vsel %vm2540_vm4, %v4330_v45, %v4352_v27 }
 0x8f3   :  { %v4212_v8 = vrot.slane %v4211_v34, 1  ;;  %10499 = vrcp.f32 %v4044_v37  ;;  %v10492_v4 = vpop.eup %10491  ;;  %v4045_v24 = vadd.f32 1.0, %v10490_v41  ;;  %v4268_v14 = vpack.c.bf16 %v12551_v46, %v12551_v46 }
 0x8f4   :  { %v4199_v33 = vadd.f32 %v4198_v28, %v4197_v62  ;;  %10501 = vrcp.f32 %v4042_v19  ;;  %v4043_v47 = vadd.f32 1.0, %v10492_v4  ;;  %v4359_v10 = vsel %vm2538_vm3, %v4337_v52, %v4358_v49 }
 0x8f5   :  { %v4213_v21 = vadd.f32 %v4212_v8, %v4211_v34  ;;  %10503 = vrcp.f32 %v4045_v24  ;;  %v4338_v17 = vunpack.c.l.b16 %v4273_v35  ;;  %v4227_v11 = vadd.f32 %v4226_v15, %v4112_v18 }
 0x8f6   :  { %v4200_v63 = vrot.slane %v4199_v33, 1  ;;  %10505 = vrcp.f32 %v4043_v47  ;;  %v4354_v51 = vsel %vm2542_vm5, %v4331_v55, %v4353_v31  ;;  %v4269_v59 = vpack.c.bf16 %v12553_v3, %v12553_v3 }
 0x8f7   :  { %v4276_v22 = vpack.c.bf16 %v4207_v40, %v4207_v40  ;;  %v4339_v30 = vunpack.c.l.b16 %v4274_v6  ;;  %v4355_v45 = vsel %vm2544_vm6, %v4332_v58, %v4354_v51  ;;  %v4333_v42 = vunpack.c.l.b16 %v4268_v14 }
 0x8f8   :  { %v4201_v43 = vadd.f32 %v4200_v63, %v4199_v33  ;;  %v4277_v46 = vpack.c.bf16 %v4213_v21, %v4213_v21  ;;  %v4360_v60 = vsel %vm2540_vm4, %v4338_v17, %v4359_v10  ;;  %v4228_v38 = vrot.slane %v4227_v11, 2 }
 0x8f9   :  { %v4356_v52 = vsel %vm2546_vm7, %v4333_v42, %v4355_v45  ;;  %v4341_v18 = vunpack.c.l.b16 %v4276_v22  ;;  %v4334_v1 = vunpack.c.l.b16 %v4269_v59  ;;  %v4361_v55 = vsel %vm2542_vm5, %v4339_v30, %v4360_v60 }
 0x8fa   :  { %v4275_v50 = vpack.c.bf16 %v4201_v43, %v4201_v43  ;;  %v4342_v34 = vunpack.c.l.b16 %v4277_v46  ;;  %v4229_v54 = vadd.f32 %v4228_v38, %v4227_v11 }
 0x8fb   :  { %v4357_v32 = vsel %vm2548_vm8, %v4334_v1, %v4356_v52 }
 0x8fc   :  { %v4340_v29 = vunpack.c.l.b16 %v4275_v50  ;;  %v4230_v6 = vrot.slane %v4229_v54, 1 }
 0x8fd   :  { %v10494_v57 = vpop.eup %10493 }
 0x8fe   :  { %v10496_v0 = vpop.eup %10495  ;;  %v4110_v3 = vmul.f32 %v10494_v57, %v12502_v44  ;;  %v4362_v58 = vsel %vm2544_vm6, %v4340_v29, %v4361_v55 }
 0x8ff   :  { %v10498_v62 = vpop.eup %10497  ;;  %v4113_v39 = vmul.f32 %v10496_v0, %v12506_v56  ;;  %v4363_v7 = vsel %vm2546_vm7, %v4341_v18, %v4362_v58 }
 0x900   :  { %v10500_v37 = vpop.eup %10499  ;;  %v4214_v8 = vrot.slane %v4110_v3, 4  ;;  %v4111_v28 = vmul.f32 %v10498_v62, %v12511_v2  ;;  %v4364_v27 = vsel %vm2548_vm8, %v4342_v34, %v4363_v7 }
 0x901   :  { %v4232_v41 = vrot.slane %v4113_v39, 4  ;;  %v4116_v44 = vmul.f32 %v10500_v37, %v12529_v26  ;;  %v4372_v35 = vpack.c.b16 %v4364_v27, %v4357_v32  ;;  %v10502_v40 = vpop.eup %10501 }
 0x902   :  { %v4215_v19 = vadd.f32 %v4214_v8, %v4110_v3  ;;  %v4220_v4 = vrot.slane %v4111_v28, 4  ;;  %v10504_v49 = vpop.eup %10503  ;;  %v4114_v15 = vmul.f32 %v10502_v40, %v12533_v9  ;;  %v4231_v9 = vadd.f32 %v4230_v6, %v4229_v54 }
 0x903   :  { %v4233_v56 = vadd.f32 %v4232_v41, %v4113_v39  ;;  %v4250_v33 = vrot.slane %v4116_v44, 4  ;;  %9473 = vmatprep.mubr.bf16.mxu0 %v4372_v35  ;;  %v10506_v24 = vpop.eup %10505  ;;  %v4117_v2 = vmul.f32 %v10504_v49, %v12536_v20 }
 0x904   :  { %v4216_v47 = vrot.slane %v4215_v19, 2  ;;  %v4221_v31 = vadd.f32 %v4220_v4, %v4111_v28  ;;  %v4238_v63 = vrot.slane %v4114_v15, 4  ;;  %v4115_v26 = vmul.f32 %v10506_v24, %v12540_v61 }
 0x905   :  { %v4234_v14 = vrot.slane %v4233_v56, 2  ;;  %v4251_v21 = vadd.f32 %v4250_v33, %v4116_v44  ;;  %v4256_v43 = vrot.slane %v4117_v2, 4  ;;  %v4280_v34 = vpack.c.bf16 %v4231_v9, %v4231_v9  ;;  %v9989_v9 = vld [vmem:[#allocation11 + $0x48] sm:$0xff]  }
 0x906   :  { %v4217_v10 = vadd.f32 %v4216_v47, %v4215_v19  ;;  %v4222_v17 = vrot.slane %v4221_v31, 2  ;;  %v4239_v59 = vadd.f32 %v4238_v63, %v4114_v15  ;;  %v4244_v22 = vrot.slane %v4115_v26, 4 }
 0x907   :  { %v4235_v11 = vadd.f32 %v4234_v14, %v4233_v56  ;;  %v4252_v51 = vrot.slane %v4251_v21, 2  ;;  %v4257_v42 = vadd.f32 %v4256_v43, %v4117_v2  ;;  %v4345_v44 = vunpack.c.l.b16 %v4280_v34  ;;  %v9984_v43 = vld [vmem:[#allocation11 + $0x70] sm:$0xff]  }
 0x908   :  { %v4218_v30 = vrot.slane %v4217_v10, 1  ;;  %v4223_v45 = vadd.f32 %v4222_v17, %v4221_v31  ;;  %v4240_v60 = vrot.slane %v4239_v59, 2  ;;  %v4245_v20 = vadd.f32 %v4244_v22, %v4115_v26  ;;  %v9983_v17 = vld [vmem:[#allocation11 + $0x78] sm:$0xff]   ;;  %v9988_v22 = vld [vmem:[#allocation11 + $0x50] sm:$0xff]  }
 0x909   :  { %v4236_v46 = vrot.slane %v4235_v11, 1  ;;  %v4253_v50 = vadd.f32 %v4252_v51, %v4251_v21  ;;  %v4258_v52 = vrot.slane %v4257_v42, 2  ;;  %9477 = vmatprep.subr.bf16.mxu0 %v9983_v17  ;;  %v9986_v51 = vld [vmem:[#allocation11 + $0x60] sm:$0xff]  }
 0x90a   :  { %v4219_v29 = vadd.f32 %v4218_v30, %v4217_v10  ;;  %v4224_v38 = vrot.slane %v4223_v45, 1  ;;  %v4241_v18 = vadd.f32 %v4240_v60, %v4239_v59  ;;  %v4246_v1 = vrot.slane %v4245_v20, 2  ;;  %v9987_v59 = vld [vmem:[#allocation11 + $0x58] sm:$0xff]   ;;  %v9990_v30 = vld [vmem:[#allocation11 + $0x40] sm:$0xff]  }
 0x90b   :  { %v4237_v57 = vadd.f32 %v4236_v46, %v4235_v11  ;;  %v4254_v61 = vrot.slane %v4253_v50, 1  ;;  %v4259_v3 = vadd.f32 %v4258_v52, %v4257_v42  ;;  %v9985_v11 = vld [vmem:[#allocation11 + $0x68] sm:$0xff]   ;;  %v9996_v46 = vld [vmem:[#allocation5 + $0x214] ss:$12 sps:$4 sm:$0xff]   ;;  %v9994_v60 = vld [vmem:[#allocation5 + $0x210] ss:$12 sps:$4 sm:$0xff]  }
 0x90c   :  { %v4278_v55 = vpack.c.bf16 %v4219_v29, %v4219_v29  ;;  %v4225_v0 = vadd.f32 %v4224_v38, %v4223_v45  ;;  %v4242_v58 = vrot.slane %v4241_v18, 1  ;;  %v4247_v62 = vadd.f32 %v4246_v1, %v4245_v20  ;;  %v9991_v45 = vld [vmem:[#allocation5 + $0x228] ss:$12 sps:$4 sm:$0xff]   ;;  %v9993_v42 = vld [vmem:[#allocation5 + $0x22c] ss:$12 sps:$4 sm:$0xff]  }
 0x90d   :  { %v4281_v39 = vpack.c.bf16 %v4237_v57, %v4237_v57  ;;  %v4255_v7 = vadd.f32 %v4254_v61, %v4253_v50  ;;  %v4260_v37 = vrot.slane %v4259_v3, 1  ;;  %v9997_v50 = vld [vmem:[#allocation5 + $0x230] ss:$12 sps:$4 sm:$0xff]   ;;  %4796 = vmatprep.subr.bf16.mxu1 %v9993_v42  ;;  %v9998_v29 = vld [vmem:[#allocation5 + $0x1f8] ss:$12 sps:$4 sm:$0xff]  }
 0x90e   :  { %v4279_v32 = vpack.c.bf16 %v4225_v0, %v4225_v0  ;;  %v4243_v54 = vadd.f32 %v4242_v58, %v4241_v18  ;;  %v4248_v8 = vrot.slane %v4247_v62, 1  ;;  %v4343_v28 = vunpack.c.l.b16 %v4278_v55  ;;  %4797 = vmatpush1.bf16.msra.mxu1 %v9991_v45  ;;  %v10000_v20 = vld [vmem:[#allocation5 + $0x1fc] ss:$12 sps:$4 sm:$0xff]   ;;  %v10005_v38 = vld [vmem:[#allocation5 + $0x1e4] ss:$12 sps:$4 sm:$0xff]  }
 0x90f   :  { %v4261_v41 = vadd.f32 %v4260_v37, %v4259_v3  ;;  %v4346_v19 = vunpack.c.l.b16 %v4281_v39  ;;  %v4284_v49 = vpack.c.bf16 %v4255_v7, %v4255_v7  ;;  %4798 = vmatprep.subr.bf16.mxu1 %v9996_v46  ;;  %v10003_v52 = vld [vmem:[#allocation5 + $0x1e0] ss:$12 sps:$4 sm:$0xff]   ;;  %v10007_v61 = vld [vmem:[#allocation5 + $0x1c8] ss:$12 sps:$4 sm:$0xff]  }
 0x910   :  { %v4344_v27 = vunpack.c.l.b16 %v4279_v32  ;;  %v4282_v35 = vpack.c.bf16 %v4243_v54, %v4243_v54  ;;  %v4249_v40 = vadd.f32 %v4248_v8, %v4247_v62  ;;  %v10009_v57 = vld [vmem:[#allocation5 + $0x1cc] ss:$12 sps:$4 sm:$0xff]   ;;  %v8687_v1 = vld [vmem:[%s13623_s11 + $0x1] ss:$0 sm:$0xff] }
 0x911   :  { %v4285_v15 = vpack.c.bf16 %v4261_v41, %v4261_v41  ;;  %v4349_v31 = vunpack.c.l.b16 %v4284_v49 }
 0x912   :  { %v4365_v4 = vsel %vm2536_vm2, %v4344_v27, %v4343_v28  ;;  %v4347_v33 = vunpack.c.l.b16 %v4282_v35  ;;  %v4283_v24 = vpack.c.bf16 %v4249_v40, %v4249_v40  ;;  %4799 = vmatpush1.bf16.msra.mxu1 %v9994_v60 }
 0x913   :  { %v4366_v56 = vsel %vm2538_vm3, %v4345_v44, %v4365_v4  ;;  %v4350_v14 = vunpack.c.l.b16 %v4285_v15  ;;  %4800 = vmatprep.subr.bf16.mxu1 %v10000_v20  ;;  %v10001_v15 = vld [vmem:[#allocation5 + $0x218] ss:$12 sps:$4 sm:$0xff]  }
 0x914   :  { %v4367_v6 = vsel %vm2540_vm4, %v4346_v19, %v4366_v56  ;;  %v4348_v47 = vunpack.c.l.b16 %v4283_v24  ;;  %v10002_v24 = vld [vmem:[#allocation5 + $0x200] ss:$12 sps:$4 sm:$0xff]  }
 0x915   :  { %v4368_v2 = vsel %vm2542_vm5, %v4347_v33, %v4367_v6  ;;  %v10006_v6 = vld [vmem:[#allocation5 + $0x1e8] ss:$12 sps:$4 sm:$0xff]  }
 0x916   :  { %v4369_v21 = vsel %vm2544_vm6, %v4348_v47, %v4368_v2  ;;  %4801 = vmatpush1.bf16.msra.mxu1 %v9998_v29  ;;  %v10010_v47 = vld [vmem:[#allocation5 + $0x1d0] ss:$12 sps:$4 sm:$0xff]  }
 0x917   :  { %v4370_v63 = vsel %vm2546_vm7, %v4349_v31, %v4369_v21  ;;  %4802 = vmatprep.subr.bf16.mxu1 %v10005_v38  ;;  %v10013_v31 = vld [vmem:[#allocation5 + $0x1b4] ss:$12 sps:$4 sm:$0xff]   ;;  %v10011_v2 = vld [vmem:[#allocation5 + $0x1b0] ss:$12 sps:$4 sm:$0xff]  }
 0x918   :  { %v4371_v26 = vsel %vm2548_vm8, %v4350_v14, %v4370_v63  ;;  %v10014_v14 = vld [vmem:[#allocation5 + $0x1b8] ss:$12 sps:$4 sm:$0xff]   ;;  %v10017_v21 = vld [vmem:[#allocation5 + $0x19c] ss:$12 sps:$4 sm:$0xff]  }
 0x919   :  { %v4373_v10 = vpack.c.b16 %v4371_v26, %v4371_v26  ;;  %v10015_v63 = vld [vmem:[#allocation5 + $0x198] ss:$12 sps:$4 sm:$0xff]   ;;  %v10018_v26 = vld [vmem:[#allocation5 + $0x1a0] ss:$12 sps:$4 sm:$0xff]  }
 0x91a   :  { %4803 = vmatpush1.bf16.msra.mxu1 %v10003_v52 }
 0x91b   :  { %9474 = vmatmul.mubr.bf16.vlgmr.msra.gmra.mxu0 %v4373_v10  ;;  %4804 = vmatprep.subr.bf16.mxu1 %v10009_v57  ;;  %v10019_v10 = vld [vmem:[#allocation5 + $0x180] ss:$12 sps:$4 sm:$0xff]  }
 0x91c   :  { %9478 = vmatpush3.bf16.msra.mxu0 %v9983_v17  ;;  %v10021_v17 = vld [vmem:[#allocation5 + $0x184] ss:$12 sps:$4 sm:$0xff]  }
 0x91d   :  { %9479 = vmatprep.subr.bf16.mxu0 %v9984_v43 }
 0x91e   :  { %4805 = vmatpush1.bf16.msra.mxu1 %v10007_v61 }
 0x91f   :  { %4806 = vmatprep.subr.bf16.mxu1 %v10013_v31 }
 0x920   :  { %9480 = vmatpush3.bf16.msra.mxu0 %v9984_v43  ;;  %v10022_v43 = vld [vmem:[#allocation5 + $0x188] ss:$12 sps:$4 sm:$0xff]  }
 0x921   :  { %9481 = vmatprep.subr.bf16.mxu0 %v9985_v11 }
 0x922   :  { %4807 = vmatpush1.bf16.msra.mxu1 %v10011_v2 }
 0x923   :  { %4808 = vmatprep.subr.bf16.mxu1 %v10017_v21 }
 0x924   :  { %9482 = vmatpush3.bf16.msra.mxu0 %v9985_v11 }
 0x925   :  { %9483 = vmatprep.subr.bf16.mxu0 %v9986_v51 }
 0x926   :  { %4809 = vmatpush1.bf16.msra.mxu1 %v10015_v63 }
 0x927   :  { %4810 = vmatprep.subr.bf16.mxu1 %v10021_v17 }
 0x928   :  { %9484 = vmatpush3.bf16.msra.mxu0 %v9986_v51  ;;  %v8691_v51 = vld [vmem:[#allocation13 + $0x1] ss:$0 sm:$0xff] }
 0x929   :  { %9485 = vmatprep.subr.bf16.mxu0 %v9987_v59 }
 0x92a   :  { %4811 = vmatpush1.bf16.msra.mxu1 %v10019_v10 }
 0x92c   :  { %9486 = vmatpush3.bf16.msra.mxu0 %v9987_v59 }
 0x92d   :  { %9487 = vmatprep.subr.bf16.mxu0 %v9988_v22 }
 0x930   :  { %9488 = vmatpush3.bf16.msra.mxu0 %v9988_v22 }
 0x931   :  { %9489 = vmatprep.subr.bf16.mxu0 %v9989_v9 }
 0x934   :  { %9490 = vmatpush3.bf16.msra.mxu0 %v9989_v9 }
 0x935   :  { %9491 = vmatprep.subr.bf16.mxu0 %v9990_v30 }
 0x938   :  { %9492 = vmatpush3.bf16.msra.mxu0 %v9990_v30 }
 0x939   :  { %9497 = vmatprep.subr.bf16.mxu0 %v9997_v50 }
 0x9db   :  { %v9475_v18 = vpop.f32.mrf.mxu0 }
 0x9dc   :  { %v4474_v55 = vadd.f32 %v9475_v18, %v12100_v23 }
 0x9dd   :  { %v4458_v0 = vpop.f32.mrf.mxu0 }
 0x9de   :  { %v4485_v3 = vadd.f32 %v8687_v1, %v4474_v55  ;;  %v4472_v34 = vadd.f32 %v4458_v0, %v12102_v25 }
 0x9df   :  { %v9476_v58 = vpop.f32.mrf.mxu0 }
 0x9e0   :  { %v8690_v62 = vmul.f32 -1.442695, %v4485_v3  ;;  %v4483_v39 = vadd.f32 %v8687_v1, %v4472_v34 }
 0x9e1   :  { %v4461_v32 = vpop.f32.mrf.mxu0 }
 0x9e2   :  { %10507 = vpow2.f32 %v8690_v62  ;;  %v8688_v7 = vmul.f32 -1.442695, %v4483_v39  ;;  %v4473_v37 = vadd.f32 %v4461_v32, %v12417_v48  ;;  %v10941_v32 = vld [vmem:[%s13614_s2 + $0x10] sm:$0xff]  }
 0x9e4   :  { %10509 = vpow2.f32 %v8688_v7  ;;  %v4484_v54 = vadd.f32 %v8687_v1, %v4473_v37  ;;  %v10942_v7 = vld [vmem:[%s13614_s2 + $0x18] sm:$0xff]   ;;  %v10943_v37 = vld [vmem:[%s13614_s2 + $0x20] sm:$0xff]  }
 0x9e6   :  { %v8689_v8 = vmul.f32 -1.442695, %v4484_v54 }
 0x9e8   :  { %10511 = vpow2.f32 %v8689_v8  ;;  %v10945_v8 = vld [vmem:[%s13614_s2 + $0x30] sm:$0xff]  }
 0x9ef   :  { %v10508_v28 = vpop.eup %10507 }
 0x9f0   :  { %v4497_v41 = vadd.f32 1.0, %v10508_v28  ;;  %v10946_v28 = vld [vmem:[%s13614_s2 + $0x38] sm:$0xff]  }
 0x9f1   :  { %v10510_v27 = vpop.eup %10509 }
 0x9f2   :  { %v4495_v23 = vadd.f32 1.0, %v10510_v27  ;;  %10513 = vrcp.f32 %v4497_v41  ;;  %v10947_v27 = vld [vmem:[%s13614_s2 + $0x40] sm:$0xff]   ;;  %v10948_v41 = vld [vmem:[%s13614_s2 + $0x48] sm:$0xff]  }
 0x9f4   :  { %10515 = vrcp.f32 %v4495_v23  ;;  %v10949_v23 = vld [vmem:[%s13614_s2 + $0x50] sm:$0xff]  }
 0x9f5   :  { %v10512_v44 = vpop.eup %10511 }
 0x9f6   :  { %v4496_v25 = vadd.f32 1.0, %v10512_v44  ;;  %v10950_v44 = vld [vmem:[%s13614_s2 + $0x58] sm:$0xff]  }
 0x9f8   :  { %10517 = vrcp.f32 %v4496_v25  ;;  %v10023_v25 = vld [vmem:[#allocation8 + $0xb8] sm:$0xff]  }
 0x9ff   :  { %v10514_v35 = vpop.eup %10513 }
 0xa00   :  { %v4506_v4 = vmul.f32 %v10514_v35, %v4485_v3  ;;  %v10024_v35 = vld [vmem:[#allocation8 + $0xb0] sm:$0xff]  }
 0xa01   :  { %v10516_v40 = vpop.eup %10515 }
 0xa02   :  { %v4504_v49 = vmul.f32 %v10516_v40, %v4483_v39  ;;  %v4508_v33 = vpack.c.bf16 %v4506_v4, %v4506_v4  ;;  %v10940_v39 = vld [vmem:[%s13614_s2 + $0x8] sm:$0xff]   ;;  %v10027_v4 = vld [vmem:[#allocation8 + $0x98] sm:$0xff]  }
 0xa03   :  { %v10025_v40 = vld [vmem:[#allocation8 + $0xa8] sm:$0xff]  }
 0xa05   :  { %v10518_v19 = vpop.eup %10517 }
 0xa06   :  { %v4505_v56 = vmul.f32 %v10518_v19, %v4484_v54  ;;  %v10944_v54 = vld [vmem:[%s13614_s2 + $0x28] sm:$0xff]   ;;  %v10026_v19 = vld [vmem:[#allocation8 + $0xa0] sm:$0xff]  }
 0xa08   :  { %v4507_v48 = vpack.c.bf16 %v4505_v56, %v4504_v49  ;;  %v10028_v49 = vld [vmem:[#allocation8 + $0x90] sm:$0xff]   ;;  %v10029_v56 = vld [vmem:[#allocation8 + $0x88] sm:$0xff]  }
 0xa0a   :  { %9493 = vmatprep.mubr.bf16.mxu0 %v4507_v48  ;;  %v10030_v48 = vld [vmem:[#allocation8 + $0x80] sm:$0xff]  }
 0xa0b   :  { %9494 = vmatmul.mubr.bf16.vlgmr.msra.gmra.mxu0 %v4508_v33 }
 0xa0c   :  { %9498 = vmatpush3.bf16.msra.mxu0 %v9997_v50 }
 0xa0d   :  { %9499 = vmatprep.subr.bf16.mxu0 %v10001_v15 }
 0xa10   :  { %9500 = vmatpush3.bf16.msra.mxu0 %v10001_v15 }
 0xa11   :  { %9501 = vmatprep.subr.bf16.mxu0 %v10002_v24 }
 0xa14   :  { %9502 = vmatpush3.bf16.msra.mxu0 %v10002_v24 }
 0xa15   :  { %9503 = vmatprep.subr.bf16.mxu0 %v10006_v6 }
 0xa18   :  { %9504 = vmatpush3.bf16.msra.mxu0 %v10006_v6 }
 0xa19   :  { %9505 = vmatprep.subr.bf16.mxu0 %v10010_v47 }
 0xa1c   :  { %9506 = vmatpush3.bf16.msra.mxu0 %v10010_v47 }
 0xa1d   :  { %9507 = vmatprep.subr.bf16.mxu0 %v10014_v14 }
 0xa20   :  { %9508 = vmatpush3.bf16.msra.mxu0 %v10014_v14 }
 0xa21   :  { %9509 = vmatprep.subr.bf16.mxu0 %v10018_v26 }
 0xa24   :  { %9510 = vmatpush3.bf16.msra.mxu0 %v10018_v26 }
 0xa25   :  { %9511 = vmatprep.subr.bf16.mxu0 %v10022_v43 }
 0xa28   :  { %9512 = vmatpush3.bf16.msra.mxu0 %v10022_v43 }
 0xa29   :  { %9545 = vmatprep.subr.bf16.mxu0 %v10023_v25 }
 0xacb   :  { %v9495_v11 = vpop.f32.mrf.mxu0 }
 0xacc   :  { %v4625_v22 = vadd.f32 %v9495_v11, %v8691_v51 }
 0xacd   :  { %v4616_v59 = vpop.f32.mrf.mxu0 }
 0xace   :  { %v4617_v30 = vadd.f32 %v8691_v51, %v4616_v59  ;;  %v12595_v46 = vadd.f32 %v4625_v22, %v12081_v53  ;;  %v10939_v53 = vld [vmem:[%s13614_s2] sm:$0xff]  }
 0xacf   :  { %v9496_v9 = vpop.f32.mrf.mxu0  ;;  %v12688_v22 = vld [vmem:[%s13619_s7 + $0x2] ss:$0 sm:$0xff] }
 0xad0   :  { %v12598_v50 = vadd.f32 %v4617_v30, %v12084_v16  ;;  %v4634_v29 = vpack.c.bf16 %v12595_v46, %v12595_v46 }
 0xad1   :  { %v4619_v45 = vpop.f32.mrf.mxu0 }
 0xad2   :  { %v4620_v42 = vadd.f32 %v8691_v51, %v4619_v45  ;;  %v13731_v45 = vld [vmem:[#allocation28_spill] sm:$0xff] }
 0xad4   :  { %v12601_v60 = vadd.f32 %v4620_v42, %v12087_v5 }
 0xad6   :  { %v4633_v20 = vpack.c.bf16 %v12601_v60, %v12598_v50 }
 0xad8   :  { %4829 = vmatmul.mubr.bf16.vlgmr.msra.gmra.mxu1 %v4633_v20  ;;  %9513 = vmatprep.mubr.bf16.mxu0 %v4633_v20 }
 0xad9   :  { %9514 = vmatmul.mubr.bf16.vlgmr.msra.gmra.mxu0 %v4634_v29  ;;  %4838 = vmatprep.mubr.bf16.mxu1 %v13707_v13 }
 0xada   :  { %9546 = vmatpush3.bf16.msra.mxu0 %v10023_v25 }
 0xadb   :  { %9547 = vmatprep.subr.bf16.mxu0 %v10024_v35 }
 0xade   :  { %9548 = vmatpush3.bf16.msra.mxu0 %v10024_v35 }
 0xadf   :  { %9549 = vmatprep.subr.bf16.mxu0 %v10025_v40 }
 0xae0   :  { %4839 = vmatmul.mubr.bf16.gmra.mxu1 %v4634_v29 }
 0xae1   :  { %9521 = vmatprep.mubr.msk.bf16.mxu1 %vm1507_vm0, %v10939_v53 }
 0xae2   :  { %9550 = vmatpush3.bf16.msra.mxu0 %v10025_v40  ;;  %v13734_v40 = vld [vmem:[#allocation26_spill] sm:$0xff] }
 0xae3   :  { %9551 = vmatprep.subr.bf16.mxu0 %v10026_v19 }
 0xae6   :  { %9552 = vmatpush3.bf16.msra.mxu0 %v10026_v19 }
 0xae7   :  { %9553 = vmatprep.subr.bf16.mxu0 %v10027_v4 }
 0xaea   :  { %9554 = vmatpush3.bf16.msra.mxu0 %v10027_v4 }
 0xaeb   :  { %9555 = vmatprep.subr.bf16.mxu0 %v10028_v49 }
 0xaee   :  { %9556 = vmatpush3.bf16.msra.mxu0 %v10028_v49 }
 0xaef   :  { %9557 = vmatprep.subr.bf16.mxu0 %v10029_v56 }
 0xaf2   :  { %9558 = vmatpush3.bf16.msra.mxu0 %v10029_v56 }
 0xaf3   :  { %9559 = vmatprep.subr.bf16.mxu0 %v10030_v48 }
 0xaf6   :  { %9560 = vmatpush3.bf16.msra.mxu0 %v10030_v48 }
 0xb98   :  { %v12612_v16 = vpop.f32.mrf.mxu1 }
 0xb99   :  { %v12614_v5 = vpop.f32.mrf.mxu0  ;;  %v4905_v33 = vrot.slane %v12612_v16, %v11632_v36  ;;  %v4898_v15 = vcombine.high %v12612_v16, %v12612_v16 }
 0xb9a   :  { %v4832_v38 = vpop.f32.mrf.mxu1 }
 0xb9b   :  { %v12616_v52 = vpop.f32.mrf.mxu0  ;;  %v4913_v24 = vcombine.high %v4905_v33, %v4905_v33  ;;  %v4921_v6 = vrot.slane %v4905_v33, %v11632_v36  ;;  %v4912_v47 = vrot.slane %v4898_v15, %v11632_v36 }
 0xb9c   :  { %v12618_v57 = vpop.f32.mrf.mxu1 }
 0xb9d   :  { %v9516_v61 = vpop.f32.mrf.mxu0  ;;  %v4935_v31 = vrot.slane %v4913_v24, %v11632_v36  ;;  %v4943_v2 = vcombine.high %v4921_v6, %v4921_v6  ;;  %v4914_v14 = vcombine.high %v4912_v47, %v4912_v47  ;;  %v4947_v21 = vcombine.high %v12618_v57, %v12618_v57 }
 0xb9e   :  { %v4836_v18 = vpop.f32.mrf.mxu1  ;;  %v4928_v10 = vrot.slane %v4912_v47, %v11632_v36  ;;  %v4954_v43 = vrot.slane %v12618_v57, %v11632_v36  ;;  %v5048_v51 = vrot.slane %v4921_v6, %v11643_v12 }
 0xb9f   :  { %v5165_v34 = vpack.c.bf16 %v4836_v18, %v4832_v38  ;;  %v5056_v63 = vrot.slane %v4943_v2, %v11643_v12  ;;  %v4945_v26 = vcombine.high %v4935_v31, %v4935_v31  ;;  %v12683_v59 = vrot.slane %v4947_v21, %v11632_v36  ;;  %v13732_v18 = vld [vmem:[#allocation24_spill] sm:$0xff] }
 0xba0   :  { %v12620_v1 = vpop.f32.mrf.mxu1  ;;  %v4942_v30 = vrot.slane %v4914_v14, %v11632_v36  ;;  %v5052_v16 = vrot.slane %v4935_v31, %v11643_v12  ;;  %v4944_v38 = vcombine.high %v4928_v10, %v4928_v10  ;;  %v4962_v57 = vcombine.high %v4954_v43, %v4954_v43  ;;  %v13735_v31 = vld [vmem:[#allocation39_spill] sm:$0xff] }
 0xba1   :  { %v5060_v29 = vrot.slane %v4945_v26, %v11643_v12  ;;  %v13736_v26 = vld [vmem:[#allocation33_spill] sm:$0xff] }
 0xba2   :  { %v4842_v55 = vpop.f32.mrf.mxu1  ;;  %v12724_v4 = vrot.slane %v4962_v57, %v11632_v36  ;;  %v5068_v21 = vrot.slane %v4942_v30, %v11643_v12 }
 0xba3   :  { %v5166_v0 = vpack.c.bf16 %v4842_v55, %v4842_v55 }
 0xba4   :  { %v4844_v3 = vpop.f32.mrf.mxu1 }
 0xba5   :  { %v5168_v58 = vsel %vm1544_vm1, %v5166_v0, 0  ;;  %9775 = vmatprep.subr.msk.bf16.mxu1 %vm1544_vm1, %v5166_v0  ;;  %v4963_v3 = vcombine.high %v12683_v59, %v12683_v59 }
 0xba6   :  { %v4845_v62 = vpop.f32.mrf.mxu1  ;;  %9518 = vmatpush3.bf16.msra.mxu1 %v5168_v58  ;;  %v12705_v58 = vrot.slane %v12683_v59, %v11632_v36 }
 0xba7   :  { %9519 = vmatprep.subr.bf16.mxu1 %v5165_v34 }
 0xbaa   :  { %9520 = vmatpush3.bf16.msra.mxu1 %v5165_v34  ;;  %v12701_v34 = vrot.slane %v4954_v43, %v11632_v36 }
 0xbac   :  { %v4992_v48 = vcombine.high %v12701_v34, %v12701_v34  ;;  %v5080_v57 = vrot.slane %v12701_v34, %v11643_v12 }
 0xbad   :  { %9522 = vmatmul.mubr.msk.bf16.vlgmr.msra.gmra.mxu1 %vm1507_vm0, %v10940_v39  ;;  %v4946_v39 = vcombine.high %v4942_v30, %v4942_v30 }
 0xbae   :  { %9525 = vmatprep.mubr.msk.bf16.mxu1 %vm1507_vm0, %v10941_v32  ;;  %v5088_v59 = vrot.slane %v4992_v48, %v11643_v12  ;;  %v13740_v48 = vld [vmem:[#allocation45_spill] sm:$0xff] }
 0xbb5   :  { %9526 = vmatmul.mubr.msk.bf16.gmra.mxu1 %vm1507_vm0, %v10942_v7 }
 0xbb6   :  { %9529 = vmatprep.mubr.msk.bf16.mxu1 %vm1507_vm0, %v10943_v37  ;;  %v13733_v37 = vld [vmem:[#allocation31_spill] sm:$0xff] }
 0xbbd   :  { %9530 = vmatmul.mubr.msk.bf16.gmra.mxu1 %vm1507_vm0, %v10944_v54 }
 0xbbe   :  { %9533 = vmatprep.mubr.msk.bf16.mxu1 %vm1507_vm0, %v10945_v8 }
 0xbc5   :  { %9534 = vmatmul.mubr.msk.bf16.gmra.mxu1 %vm1507_vm0, %v10946_v28  ;;  %v4996_v28 = vcombine.high %v12620_v1, %v12620_v1 }
 0xbc6   :  { %9537 = vmatprep.mubr.msk.bf16.mxu1 %vm1507_vm0, %v10947_v27  ;;  %v5003_v27 = vrot.slane %v12620_v1, %v11632_v36  ;;  %v5076_v1 = vrot.slane %v4946_v39, %v11643_v12 }
 0xbc7   :  { %v12734_v6 = vrot.slane %v4996_v28, %v11632_v36 }
 0xbc8   :  { %v5011_v47 = vcombine.high %v5003_v27, %v5003_v27  ;;  %v12741_v43 = vrot.slane %v5003_v27, %v11632_v36  ;;  %v13739_v27 = vld [vmem:[#allocation51_spill] sm:$0xff] }
 0xbcd   :  { %9538 = vmatmul.mubr.msk.bf16.gmra.mxu1 %vm1507_vm0, %v10948_v41  ;;  %v5072_v41 = vrot.slane %v4944_v38, %v11643_v12 }
 0xbce   :  { %9541 = vmatprep.mubr.msk.bf16.mxu1 %vm1507_vm0, %v10949_v23 }
 0xbd5   :  { %9542 = vmatmul.mubr.msk.bf16.gmra.mxu1 %vm1507_vm0, %v10950_v44  ;;  %v5064_v44 = vrot.slane %v4928_v10, %v11643_v12 }
 0xc6d   :  { %v9523_v17 = vpop.f32.mrf.mxu1 }
 0xc6e   :  { %v5301_v11 = vadd.f32 %v9523_v17, %v5056_v63 }
 0xc6f   :  { %v5204_v9 = vpop.f32.mrf.mxu1 }
 0xc70   :  { %v5325_v42 = vadd.f32 %v5301_v11, %v13731_v45  ;;  %v5299_v20 = vadd.f32 %v5204_v9, %v5048_v51  ;;  %v4994_v9 = vcombine.high %v12724_v4, %v12724_v4  ;;  %v13737_v45 = vld [vmem:[#allocation42_spill] sm:$0xff] }
 0xc71   :  { %v9524_v53 = vpop.f32.mrf.mxu1 }
 0xc72   :  { %v12695_v61 = vadd.f32 %v12688_v22, %v5325_v42  ;;  %v5323_v55 = vadd.f32 %v5299_v20, %v13732_v18  ;;  %v5302_v0 = vadd.f32 %v9524_v53, %v5060_v29  ;;  %v5012_v29 = vcombine.high %v12734_v6, %v12734_v6 }
 0xc73   :  { %v5207_v62 = vpop.f32.mrf.mxu1  ;;  %v12757_v53 = vrot.slane %v12734_v6, %v11632_v36 }
 0xc74   :  { %v8740_v32 = vmul.f32 -1.442695, %v12695_v61  ;;  %v12709_v7 = vadd.f32 %v12688_v22, %v5323_v55  ;;  %v5326_v54 = vadd.f32 %v5302_v0, %v13733_v37  ;;  %v5300_v8 = vadd.f32 %v5207_v62, %v5052_v16  ;;  %v13738_v0 = vld [vmem:[#allocation36_spill] sm:$0xff] }
 0xc75   :  { %v9527_v23 = vpop.f32.mrf.mxu1  ;;  %v5092_v37 = vrot.slane %v4994_v9, %v11643_v12 }
 0xc76   :  { %10519 = vpow2.f32 %v8740_v32  ;;  %v8738_v25 = vmul.f32 -1.442695, %v12709_v7  ;;  %v12720_v35 = vadd.f32 %v12688_v22, %v5326_v54  ;;  %v5324_v19 = vadd.f32 %v5300_v8, %v13734_v40 }
 0xc77   :  { %v5305_v49 = vadd.f32 %v9527_v23, %v5072_v41  ;;  %v5220_v56 = vpop.f32.mrf.mxu1  ;;  %v4993_v54 = vcombine.high %v12705_v58, %v12705_v58  ;;  %v12771_v8 = vrot.slane %v4963_v3, %v11632_v36  ;;  %v12779_v23 = vrot.slane %v5011_v47, %v11632_v36 }
 0xc78   :  { %10521 = vpow2.f32 %v8738_v25  ;;  %v8741_v33 = vmul.f32 -1.442695, %v12720_v35  ;;  %v12731_v15 = vadd.f32 %v12688_v22, %v5324_v19  ;;  %v5303_v24 = vadd.f32 %v5220_v56, %v5064_v44 }
 0xc79   :  { %v5329_v2 = vadd.f32 %v5305_v49, %v13735_v31  ;;  %v9528_v14 = vpop.f32.mrf.mxu1  ;;  %v5084_v40 = vrot.slane %v12724_v4, %v11643_v12  ;;  %v5096_v3 = vrot.slane %v12705_v58, %v11643_v12  ;;  %v5104_v47 = vrot.slane %v4993_v54, %v11643_v12 }
 0xc7a   :  { %10523 = vpow2.f32 %v8741_v33  ;;  %v8739_v63 = vmul.f32 -1.442695, %v12731_v15  ;;  %v5327_v10 = vadd.f32 %v5303_v24, %v13736_v26  ;;  %v5306_v17 = vadd.f32 %v9528_v14, %v5076_v1  ;;  %v13741_v14 = vld [vmem:[#allocation54_spill] sm:$0xff] }
 0xc7b   :  { %v12744_v11 = vadd.f32 %v12688_v22, %v5329_v2  ;;  %v5223_v51 = vpop.f32.mrf.mxu1  ;;  %v4995_v31 = vcombine.high %v12771_v8, %v12771_v8  ;;  %v5041_v4 = vcombine.high %v12741_v43, %v12741_v43 }
 0xc7c   :  { %10525 = vpow2.f32 %v8739_v63  ;;  %v12750_v30 = vadd.f32 %v12688_v22, %v5327_v10  ;;  %v5330_v42 = vadd.f32 %v5306_v17, %v13737_v45  ;;  %v5304_v20 = vadd.f32 %v5223_v51, %v5068_v21 }
 0xc7d   :  { %v8744_v16 = vmul.f32 -1.442695, %v12744_v11  ;;  %v9531_v38 = vpop.f32.mrf.mxu1  ;;  %v5112_v51 = vrot.slane %v12741_v43, %v11643_v12 }
 0xc7e   :  { %v8742_v18 = vmul.f32 -1.442695, %v12750_v30  ;;  %v12764_v55 = vadd.f32 %v12688_v22, %v5330_v42  ;;  %v5328_v62 = vadd.f32 %v5304_v20, %v13738_v0  ;;  %v5309_v39 = vadd.f32 %v9531_v38, %v5088_v59  ;;  %v13742_v38 = vld [vmem:[#allocation48_spill] sm:$0xff] }
 0xc7f   :  { %10527 = vpow2.f32 %v8744_v16  ;;  %v5236_v32 = vpop.f32.mrf.mxu1  ;;  %v5043_v59 = vcombine.high %v12779_v23, %v12779_v23  ;;  %v5108_v0 = vrot.slane %v4995_v31, %v11643_v12 }
 0xc80   :  { %10529 = vpow2.f32 %v8742_v18  ;;  %v8745_v34 = vmul.f32 -1.442695, %v12764_v55  ;;  %v12775_v28 = vadd.f32 %v12688_v22, %v5328_v62  ;;  %v5333_v41 = vadd.f32 %v5309_v39, %v13739_v27  ;;  %v13743_v39 = vld [vmem:[#allocation63_spill] sm:$0xff] }
 0xc81   :  { %v5307_v44 = vadd.f32 %v5236_v32, %v5080_v57  ;;  %v9532_v25 = vpop.f32.mrf.mxu1 }
 0xc82   :  { %10531 = vpow2.f32 %v8745_v34  ;;  %v8743_v19 = vmul.f32 -1.442695, %v12775_v28  ;;  %v12787_v49 = vadd.f32 %v12688_v22, %v5333_v41  ;;  %v5310_v56 = vadd.f32 %v9532_v25, %v5092_v37 }
 0xc83   :  { %v10520_v1 = vpop.eup %10519  ;;  %v5331_v33 = vadd.f32 %v5307_v44, %v13740_v48  ;;  %v5239_v24 = vpop.f32.mrf.mxu1  ;;  %v5100_v41 = vrot.slane %v12771_v8, %v11643_v12 }
 0xc84   :  { %v5453_v58 = vadd.f32 1.0, %v10520_v1  ;;  %10533 = vpow2.f32 %v8743_v19  ;;  %v8748_v2 = vmul.f32 -1.442695, %v12787_v49  ;;  %v5334_v21 = vadd.f32 %v5310_v56, %v13741_v14  ;;  %v13744_v56 = vld [vmem:[#allocation57_spill] sm:$0xff] }
 0xc85   :  { %v10522_v63 = vpop.eup %10521  ;;  %v12798_v26 = vadd.f32 %v12688_v22, %v5331_v33  ;;  %v5308_v10 = vadd.f32 %v5239_v24, %v5084_v40  ;;  %v9535_v17 = vpop.f32.mrf.mxu1  ;;  %v5120_v33 = vrot.slane %v5041_v4, %v11643_v12 }
 0xc86   :  { %10535 = vrcp.f32 %v5453_v58  ;;  %v5451_v9 = vadd.f32 1.0, %v10522_v63  ;;  %v12805_v45 = vadd.f32 %v12688_v22, %v5334_v21  ;;  %v5313_v42 = vadd.f32 %v9535_v17, %v5104_v47  ;;  %v13745_v47 = vld [vmem:[#allocation66_spill] sm:$0xff]  ;;  %v13746_v17 = vld [vmem:[#allocation60_spill] sm:$0xff] }
 0xc87   :  { %v10524_v20 = vpop.eup %10523  ;;  %10537 = vpow2.f32 %v8748_v2  ;;  %v8746_v16 = vmul.f32 -1.442695, %v12798_v26  ;;  %v5332_v57 = vadd.f32 %v5308_v10, %v13742_v38  ;;  %v5252_v18 = vpop.f32.mrf.mxu1  ;;  %v5124_v63 = vrot.slane %v5043_v59, %v11643_v12 }
 0xc88   :  { %10539 = vrcp.f32 %v5451_v9  ;;  %v5454_v43 = vadd.f32 1.0, %v10524_v20  ;;  %v8749_v62 = vmul.f32 -1.442695, %v12805_v45  ;;  %v5337_v32 = vadd.f32 %v5313_v42, %v13743_v39 }
 0xc89   :  { %v10526_v37 = vpop.eup %10525  ;;  %10541 = vpow2.f32 %v8746_v16  ;;  %v12813_v54 = vadd.f32 %v12688_v22, %v5332_v57  ;;  %v5311_v34 = vadd.f32 %v5252_v18, %v5096_v3  ;;  %v9536_v27 = vpop.f32.mrf.mxu1  ;;  %v5042_v57 = vcombine.high %v12757_v53, %v12757_v53 }
 0xc8a   :  { %10543 = vrcp.f32 %v5454_v43  ;;  %v5452_v44 = vadd.f32 1.0, %v10526_v37  ;;  %v12818_v25 = vadd.f32 %v12688_v22, %v5337_v32  ;;  %v5314_v40 = vadd.f32 %v9536_v27, %v5108_v0 }
 0xc8b   :  { %10545 = vpow2.f32 %v8749_v62  ;;  %v8747_v19 = vmul.f32 -1.442695, %v12813_v54  ;;  %v5335_v1 = vadd.f32 %v5311_v34, %v13744_v56  ;;  %v5255_v48 = vpop.f32.mrf.mxu1  ;;  %v12844_v0 = vrot.slane %v5012_v29, %v11632_v36  ;;  %v13747_v62 = vld [vmem:[#allocation75_spill] sm:$0xff]  ;;  %v13748_v29 = vld [vmem:[#allocation69_spill] sm:$0xff] }
 0xc8c   :  { %v10528_v24 = vpop.eup %10527  ;;  %10547 = vrcp.f32 %v5452_v44  ;;  %v8752_v3 = vmul.f32 -1.442695, %v12818_v25  ;;  %v5338_v8 = vadd.f32 %v5314_v40, %v13745_v47  ;;  %v5312_v31 = vadd.f32 %v5255_v48, %v5100_v41 }
 0xc8d   :  { %v10530_v58 = vpop.eup %10529  ;;  %v5457_v2 = vadd.f32 1.0, %v10528_v24  ;;  %10549 = vpow2.f32 %v8747_v19  ;;  %v12826_v14 = vadd.f32 %v12688_v22, %v5335_v1  ;;  %v9539_v21 = vpop.f32.mrf.mxu1  ;;  %v5116_v34 = vrot.slane %v12779_v23, %v11643_v12 }
 0xc8e   :  { %v5455_v10 = vadd.f32 1.0, %v10530_v58  ;;  %10551 = vpow2.f32 %v8752_v3  ;;  %v12830_v4 = vadd.f32 %v12688_v22, %v5338_v8  ;;  %v5336_v9 = vadd.f32 %v5312_v31, %v13746_v17 }
 0xc8f   :  { %v10532_v42 = vpop.eup %10531  ;;  %10553 = vrcp.f32 %v5457_v2  ;;  %v8750_v20 = vmul.f32 -1.442695, %v12826_v14  ;;  %v5317_v16 = vadd.f32 %v9539_v21, %v5120_v33  ;;  %v5268_v38 = vpop.f32.mrf.mxu1  ;;  %v5136_v48 = vrot.slane %v5042_v57, %v11643_v12  ;;  %v13749_v33 = vld [vmem:[#allocation78_spill] sm:$0xff] }
 0xc90   :  { %10555 = vrcp.f32 %v5455_v10  ;;  %v8753_v18 = vmul.f32 -1.442695, %v12830_v4  ;;  %v12838_v59 = vadd.f32 %v12688_v22, %v5336_v9  ;;  %v5315_v32 = vadd.f32 %v5268_v38, %v5112_v51  ;;  %v13750_v10 = vld [vmem:[#allocation72_spill] sm:$0xff] }
 0xc91   :  { %v10534_v43 = vpop.eup %10533  ;;  %10557 = vpow2.f32 %v8750_v20  ;;  %v5341_v39 = vadd.f32 %v5317_v16, %v13747_v62  ;;  %v9540_v37 = vpop.f32.mrf.mxu1  ;;  %v5458_v27 = vadd.f32 1.0, %v10532_v42  ;;  %v5044_v3 = vcombine.high %v12844_v0, %v12844_v0 }
 0xc92   :  { %v5456_v41 = vadd.f32 1.0, %v10534_v43  ;;  %v8751_v44 = vmul.f32 -1.442695, %v12838_v59  ;;  %v5318_v40 = vadd.f32 %v9540_v37, %v5124_v63  ;;  %10559 = vpow2.f32 %v8753_v18  ;;  %v13751_v37 = vld [vmem:[#allocation87_spill] sm:$0xff] }
 0xc93   :  { %v10536_v19 = vpop.eup %10535  ;;  %v12851_v6 = vadd.f32 %v12688_v22, %v5341_v39  ;;  %v5339_v56 = vadd.f32 %v5315_v32, %v13748_v29  ;;  %v5271_v1 = vpop.f32.mrf.mxu1  ;;  %v5128_v38 = vrot.slane %v12757_v53, %v11643_v12  ;;  %v5140_v39 = vrot.slane %v5044_v3, %v11643_v12 }
 0xc94   :  { %v10538_v51 = vpop.eup %10537  ;;  %10561 = vrcp.f32 %v5456_v41  ;;  %v5342_v24 = vadd.f32 %v5318_v40, %v13749_v33  ;;  %v5316_v23 = vadd.f32 %v5271_v1, %v5116_v34  ;;  %v5132_v29 = vrot.slane %v12844_v0, %v11643_v12  ;;  %v13752_v33 = vld [vmem:[#allocation81_spill] sm:$0xff] }
 0xc95   :  { %v10540_v47 = vpop.eup %10539  ;;  %v5461_v8 = vadd.f32 1.0, %v10538_v51  ;;  %10563 = vpow2.f32 %v8751_v44  ;;  %v8756_v31 = vmul.f32 -1.442695, %v12851_v6  ;;  %v12860_v58 = vadd.f32 %v12688_v22, %v5339_v56  ;;  %v9543_v2 = vpop.f32.mrf.mxu1 }
 0xc96   :  { %v10542_v21 = vpop.eup %10541  ;;  %10565 = vrcp.f32 %v5458_v27  ;;  %v12863_v63 = vadd.f32 %v12688_v22, %v5342_v24  ;;  %v5340_v17 = vadd.f32 %v5316_v23, %v13750_v10  ;;  %v5321_v9 = vadd.f32 %v9543_v2, %v5136_v48 }
 0xc97   :  { %v10544_v42 = vpop.eup %10543  ;;  %10567 = vrcp.f32 %v5461_v8  ;;  %v5459_v20 = vadd.f32 1.0, %v10542_v21  ;;  %v8754_v16 = vmul.f32 -1.442695, %v12860_v58  ;;  %v5284_v57 = vpop.f32.mrf.mxu1  ;;  %v5525_v8 = vmul.f32 %v10536_v19, %v12695_v61 }
 0xc98   :  { %v10546_v18 = vpop.eup %10545  ;;  %10569 = vpow2.f32 %v8756_v31  ;;  %v8757_v43 = vmul.f32 -1.442695, %v12863_v63  ;;  %v12871_v62 = vadd.f32 %v12688_v22, %v5340_v17  ;;  %v5345_v34 = vadd.f32 %v5321_v9, %v13751_v37  ;;  %v13753_v31 = vld [vmem:[#allocation90_spill] sm:$0xff] }
 0xc99   :  { %v10548_v32 = vpop.eup %10547  ;;  %10571 = vrcp.f32 %v5459_v20  ;;  %v5319_v27 = vadd.f32 %v5284_v57, %v5128_v38  ;;  %v9544_v41 = vpop.f32.mrf.mxu1  ;;  %v5462_v40 = vadd.f32 1.0, %v10546_v18  ;;  %v5526_v0 = vmul.f32 %v10544_v42, %v12720_v35  ;;  %v13754_v38 = vld [vmem:[#allocation84_spill] sm:$0xff] }
 0xc9a   :  { %v10550_v44 = vpop.eup %10549  ;;  %10573 = vpow2.f32 %v8754_v16  ;;  %v5322_v53 = vadd.f32 %v9544_v41, %v5140_v39  ;;  %v8755_v48 = vmul.f32 -1.442695, %v12871_v62  ;;  %v12879_v51 = vadd.f32 %v12688_v22, %v5345_v34 }
 0xc9b   :  { %v10552_v56 = vpop.eup %10551  ;;  %v5460_v1 = vadd.f32 1.0, %v10550_v44  ;;  %v5343_v24 = vadd.f32 %v5319_v27, %v13752_v33  ;;  %v5287_v23 = vpop.f32.mrf.mxu1  ;;  %10575 = vpow2.f32 %v8757_v43  ;;  %v5524_v19 = vmul.f32 %v10548_v32, %v12731_v15 }
 0xc9c   :  { %v10554_v3 = vpop.eup %10553  ;;  %v5346_v2 = vadd.f32 %v5322_v53, %v13753_v31  ;;  %v5320_v21 = vadd.f32 %v5287_v23, %v5132_v29  ;;  %v8760_v17 = vmul.f32 -1.442695, %v12879_v51  ;;  %v5523_v35 = vmul.f32 %v10540_v47, %v12709_v7 }
 0xc9d   :  { %v10556_v10 = vpop.eup %10555  ;;  %10577 = vrcp.f32 %v5460_v1  ;;  %v12887_v9 = vadd.f32 %v12688_v22, %v5343_v24  ;;  %v5548_v34 = vpack.c.bf16 %v5526_v0, %v5525_v8 }
 0xc9e   :  { %v10558_v20 = vpop.eup %10557  ;;  %10579 = vrcp.f32 %v5462_v40  ;;  %v12890_v16 = vadd.f32 %v12688_v22, %v5346_v2  ;;  %v5344_v61 = vadd.f32 %v5320_v21, %v13754_v38  ;;  %v5547_v41 = vpack.c.bf16 %v5524_v19, %v5523_v35 }
 0xc9f   :  { %v5463_v57 = vadd.f32 1.0, %v10558_v20  ;;  %10581 = vpow2.f32 %v8755_v48  ;;  %v8758_v18 = vmul.f32 -1.442695, %v12887_v9  ;;  %v10560_v42 = vpop.eup %10559  ;;  %v5527_v32 = vmul.f32 %v10556_v10, %v12750_v30 }
 0xca0   :  { %10583 = vpow2.f32 %v8760_v17  ;;  %v8761_v43 = vmul.f32 -1.442695, %v12890_v16  ;;  %v12898_v39 = vadd.f32 %v12688_v22, %v5344_v61  ;;  %v5466_v27 = vadd.f32 1.0, %v10560_v42  ;;  %9561 = vmatprep.mubr.bf16.mxu0 %v5547_v41 }
 0xca1   :  { %v10562_v37 = vpop.eup %10561  ;;  %10585 = vrcp.f32 %v5463_v57  ;;  %v5465_v22 = vadd.f32 1.0, %v10552_v56  ;;  %9562 = vmatmul.mubr.bf16.vlgmr.msra.gmra.mxu0 %v5548_v34  ;;  %v5529_v30 = vmul.f32 %v10554_v3, %v12744_v11 }
 0xca2   :  { %v10564_v44 = vpop.eup %10563  ;;  %10587 = vpow2.f32 %v8758_v18  ;;  %v8759_v15 = vmul.f32 -1.442695, %v12898_v39  ;;  %v5528_v7 = vmul.f32 %v10562_v37, %v12775_v28 }
 0xca3   :  { %v10566_v47 = vpop.eup %10565  ;;  %10589 = vrcp.f32 %v5466_v27  ;;  %v5464_v40 = vadd.f32 1.0, %v10564_v44 }
 0xca4   :  { %v10568_v53 = vpop.eup %10567  ;;  %10591 = vpow2.f32 %v8761_v43  ;;  %v5549_v29 = vpack.c.bf16 %v5528_v7, %v5527_v32  ;;  %v5530_v33 = vmul.f32 %v10566_v47, %v12764_v55 }
 0xca5   :  { %v10570_v1 = vpop.eup %10569  ;;  %10593 = vrcp.f32 %v5464_v40  ;;  %v5533_v57 = vmul.f32 %v10568_v53, %v12787_v49 }
 0xca6   :  { %v10572_v48 = vpop.eup %10571  ;;  %10595 = vpow2.f32 %v8759_v15  ;;  %9565 = vmatprep.mubr.bf16.mxu0 %v5549_v29  ;;  %v5550_v2 = vpack.c.bf16 %v5530_v33, %v5529_v30  ;;  %v5469_v17 = vadd.f32 1.0, %v10570_v1 }
 0xca7   :  { %v10574_v24 = vpop.eup %10573  ;;  %10597 = vrcp.f32 %v5465_v22  ;;  %v5531_v21 = vmul.f32 %v10572_v48, %v12798_v26 }
 0xca8   :  { %v10576_v28 = vpop.eup %10575  ;;  %v5467_v23 = vadd.f32 1.0, %v10574_v24 }
 0xca9   :  { %v5470_v31 = vadd.f32 1.0, %v10576_v28  ;;  %9566 = vmatmul.mubr.bf16.gmra.mxu0 %v5550_v2  ;;  %v12927_v2 = vld [vmem:[%s13621_s9 + $0x2] ss:$0 sm:$0xff] }
 0xcaa   :  { %v10578_v8 = vpop.eup %10577  ;;  %10599 = vrcp.f32 %v5467_v23 }
 0xcab   :  { %v10580_v56 = vpop.eup %10579  ;;  %v5532_v10 = vmul.f32 %v10578_v8, %v12813_v54  ;;  %10601 = vrcp.f32 %v5470_v31  ;;  %v10032_v8 = vld [vmem:[#allocation10 + $0xb0] sm:$0xff]   ;;  %v12922_v31 = vpop.f32.mrf.mxu0 }
 0xcac   :  { %v10582_v0 = vpop.eup %10581  ;;  %v5534_v11 = vmul.f32 %v10580_v56, %v12805_v45  ;;  %v10037_v56 = vld [vmem:[#allocation10 + $0x88] sm:$0xff]  }
 0xcad   :  { %v10584_v55 = vpop.eup %10583  ;;  %v5468_v20 = vadd.f32 1.0, %v10582_v0  ;;  %v5551_v38 = vpack.c.bf16 %v5532_v10, %v5531_v21  ;;  %v10038_v10 = vld [vmem:[#allocation10 + $0x80] sm:$0xff]  }
 0xcae   :  { %v10586_v61 = vpop.eup %10585  ;;  %v5552_v42 = vpack.c.bf16 %v5534_v11, %v5533_v57  ;;  %v5473_v27 = vadd.f32 1.0, %v10584_v55 }
 0xcaf   :  { %v10588_v3 = vpop.eup %10587  ;;  %10603 = vrcp.f32 %v5468_v20  ;;  %9569 = vmatprep.mubr.bf16.mxu0 %v5551_v38  ;;  %v5535_v37 = vmul.f32 %v10586_v61, %v12826_v14 }
 0xcb0   :  { %v10590_v19 = vpop.eup %10589  ;;  %10605 = vrcp.f32 %v5469_v17  ;;  %v5471_v26 = vadd.f32 1.0, %v10588_v3 }
 0xcb1   :  { %v10592_v54 = vpop.eup %10591  ;;  %9570 = vmatmul.mubr.bf16.gmra.mxu0 %v5552_v42  ;;  %v5538_v49 = vmul.f32 %v10590_v19, %v12830_v4 }
 0xcb2   :  { %v10594_v18 = vpop.eup %10593  ;;  %v5474_v35 = vadd.f32 1.0, %v10592_v54  ;;  %10607 = vrcp.f32 %v5471_v26 }
 0xcb3   :  { %v10596_v43 = vpop.eup %10595  ;;  %v5536_v34 = vmul.f32 %v10594_v18, %v12838_v59 }
 0xcb4   :  { %v5472_v45 = vadd.f32 1.0, %v10596_v43  ;;  %v10598_v41 = vpop.eup %10597  ;;  %10609 = vrcp.f32 %v5474_v35 }
 0xcb5   :  { %v5553_v44 = vpack.c.bf16 %v5536_v34, %v5535_v37  ;;  %v5537_v15 = vmul.f32 %v10598_v41, %v12818_v25 }
 0xcb6   :  { %10611 = vrcp.f32 %v5472_v45 }
 0xcb7   :  { %9573 = vmatprep.mubr.bf16.mxu0 %v5553_v44  ;;  %10613 = vrcp.f32 %v5473_v27  ;;  %v10600_v32 = vpop.eup %10599  ;;  %v5554_v7 = vpack.c.bf16 %v5538_v49, %v5537_v15 }
 0xcb8   :  { %v10602_v47 = vpop.eup %10601  ;;  %v5539_v40 = vmul.f32 %v10600_v32, %v12860_v58 }
 0xcb9   :  { %9574 = vmatmul.mubr.bf16.gmra.mxu0 %v5554_v7  ;;  %v5542_v22 = vmul.f32 %v10602_v47, %v12863_v63 }
 0xcbc   :  { %v10604_v14 = vpop.eup %10603 }
 0xcbd   :  { %v10606_v59 = vpop.eup %10605  ;;  %v5540_v53 = vmul.f32 %v10604_v14, %v12871_v62 }
 0xcbe   :  { %v5541_v4 = vmul.f32 %v10606_v59, %v12851_v6  ;;  %v10031_v6 = vld [vmem:[#allocation10 + $0xb8] sm:$0xff]  }
 0xcbf   :  { %v5555_v29 = vpack.c.bf16 %v5540_v53, %v5539_v40  ;;  %v10608_v1 = vpop.eup %10607  ;;  %9585 = vmatprep.subr.bf16.mxu1 %v10031_v6 }
 0xcc0   :  { %v5556_v25 = vpack.c.bf16 %v5542_v22, %v5541_v4  ;;  %v5543_v24 = vmul.f32 %v10608_v1, %v12887_v9  ;;  %9586 = vmatpush3.bf16.msra.mxu1 %v10031_v6  ;;  %v10033_v9 = vld [vmem:[#allocation10 + $0xa8] sm:$0xff]  }
 0xcc1   :  { %9577 = vmatprep.mubr.bf16.mxu0 %v5555_v29  ;;  %v10610_v48 = vpop.eup %10609  ;;  %9587 = vmatprep.subr.bf16.mxu1 %v10032_v8 }
 0xcc2   :  { %9578 = vmatmul.mubr.bf16.gmra.mxu0 %v5556_v25  ;;  %v5546_v58 = vmul.f32 %v10610_v48, %v12890_v16  ;;  %v10035_v16 = vld [vmem:[#allocation10 + $0x98] sm:$0xff]  }
 0xcc3   :  { %v10612_v33 = vpop.eup %10611 }
 0xcc4   :  { %v5544_v30 = vmul.f32 %v10612_v33, %v12898_v39  ;;  %v10614_v28 = vpop.eup %10613  ;;  %9588 = vmatpush3.bf16.msra.mxu1 %v10032_v8  ;;  %v10034_v39 = vld [vmem:[#allocation10 + $0xa0] sm:$0xff]  }
 0xcc5   :  { %v5545_v62 = vmul.f32 %v10614_v28, %v12879_v51  ;;  %9589 = vmatprep.subr.bf16.mxu1 %v10033_v9  ;;  %v10036_v51 = vld [vmem:[#allocation10 + $0x90] sm:$0xff]  }
 0xcc6   :  { %v5557_v23 = vpack.c.bf16 %v5544_v30, %v5543_v24 }
 0xcc7   :  { %v5558_v63 = vpack.c.bf16 %v5546_v58, %v5545_v62 }
 0xcc8   :  { %9581 = vmatprep.mubr.bf16.mxu0 %v5557_v23  ;;  %9590 = vmatpush3.bf16.msra.mxu1 %v10033_v9 }
 0xcc9   :  { %9591 = vmatprep.subr.bf16.mxu1 %v10034_v39 }
 0xcca   :  { %9582 = vmatmul.mubr.bf16.gmra.mxu0 %v5558_v63 }
 0xccb   :  { %6639 = vmatprep.mubr.bf16.mxu0 %v13707_v13 }
 0xccc   :  { %9592 = vmatpush3.bf16.msra.mxu1 %v10034_v39 }
 0xccd   :  { %9593 = vmatprep.subr.bf16.mxu1 %v10035_v16 }
 0xcd0   :  { %9594 = vmatpush3.bf16.msra.mxu1 %v10035_v16 }
 0xcd1   :  { %9595 = vmatprep.subr.bf16.mxu1 %v10036_v51 }
 0xcd4   :  { %9596 = vmatpush3.bf16.msra.mxu1 %v10036_v51 }
 0xcd5   :  { %9597 = vmatprep.subr.bf16.mxu1 %v10037_v56 }
 0xcd8   :  { %9598 = vmatpush3.bf16.msra.mxu1 %v10037_v56 }
 0xcd9   :  { %9599 = vmatprep.subr.bf16.mxu1 %v10038_v10 }
 0xcdc   :  { %9600 = vmatpush3.bf16.msra.mxu1 %v10038_v10 }
 0xd61   :  { %v9563_v21 = vpop.f32.mrf.mxu0 }
 0xd62   :  { %v12930_v0 = vadd.f32 %v9563_v21, %v12927_v2 }
 0xd63   :  { %v5666_v17 = vpop.f32.mrf.mxu0 }
 0xd64   :  { %v8774_v55 = vmul.f32 -1.442695, %v12930_v0  ;;  %v12934_v20 = vadd.f32 %v12927_v2, %v5666_v17 }
 0xd65   :  { %v9564_v38 = vpop.f32.mrf.mxu0 }
 0xd66   :  { %10615 = vpow2.f32 %v8774_v55  ;;  %v8772_v61 = vmul.f32 -1.442695, %v12934_v20  ;;  %v12938_v11 = vadd.f32 %v9564_v38, %v12927_v2 }
 0xd67   :  { %v5669_v3 = vpop.f32.mrf.mxu0 }
 0xd68   :  { %10617 = vpow2.f32 %v8772_v61  ;;  %v8775_v19 = vmul.f32 -1.442695, %v12938_v11  ;;  %v12942_v57 = vadd.f32 %v12927_v2, %v5669_v3 }
 0xd69   :  { %v9567_v26 = vpop.f32.mrf.mxu0 }
 0xd6a   :  { %10619 = vpow2.f32 %v8775_v19  ;;  %v8773_v54 = vmul.f32 -1.442695, %v12942_v57  ;;  %v12946_v18 = vadd.f32 %v9567_v26, %v12927_v2 }
 0xd6b   :  { %v5682_v35 = vpop.f32.mrf.mxu0 }
 0xd6c   :  { %10621 = vpow2.f32 %v8773_v54  ;;  %v8778_v42 = vmul.f32 -1.442695, %v12946_v18  ;;  %v12950_v43 = vadd.f32 %v12927_v2, %v5682_v35 }
 0xd6d   :  { %v9568_v37 = vpop.f32.mrf.mxu0 }
 0xd6e   :  { %v8776_v34 = vmul.f32 -1.442695, %v12950_v43  ;;  %v12954_v27 = vadd.f32 %v9568_v37, %v12927_v2  ;;  %10623 = vpow2.f32 %v8778_v42 }
 0xd6f   :  { %v5685_v45 = vpop.f32.mrf.mxu0 }
 0xd70   :  { %10625 = vpow2.f32 %v8776_v34  ;;  %v12957_v41 = vadd.f32 %v12927_v2, %v5685_v45  ;;  %v8779_v44 = vmul.f32 -1.442695, %v12954_v27 }
 0xd71   :  { %v9571_v49 = vpop.f32.mrf.mxu0 }
 0xd72   :  { %v8777_v15 = vmul.f32 -1.442695, %v12957_v41  ;;  %v12962_v32 = vadd.f32 %v9571_v49, %v12927_v2 }
 0xd73   :  { %v10616_v7 = vpop.eup %10615  ;;  %v5698_v47 = vpop.f32.mrf.mxu0 }
 0xd74   :  { %v5835_v14 = vadd.f32 1.0, %v10616_v7  ;;  %10627 = vpow2.f32 %v8777_v15  ;;  %v8782_v59 = vmul.f32 -1.442695, %v12962_v32  ;;  %v12966_v40 = vadd.f32 %v12927_v2, %v5698_v47 }
 0xd75   :  { %v10618_v53 = vpop.eup %10617  ;;  %10629 = vpow2.f32 %v8779_v44  ;;  %v9572_v22 = vpop.f32.mrf.mxu0 }
 0xd76   :  { %10631 = vrcp.f32 %v5835_v14  ;;  %v5833_v29 = vadd.f32 1.0, %v10618_v53  ;;  %v8780_v4 = vmul.f32 -1.442695, %v12966_v40  ;;  %v12970_v1 = vadd.f32 %v9572_v22, %v12927_v2 }
 0xd77   :  { %v10620_v48 = vpop.eup %10619  ;;  %10633 = vpow2.f32 %v8782_v59  ;;  %v5701_v25 = vpop.f32.mrf.mxu0 }
 0xd78   :  { %10635 = vrcp.f32 %v5833_v29  ;;  %v5836_v33 = vadd.f32 1.0, %v10620_v48  ;;  %v8783_v24 = vmul.f32 -1.442695, %v12970_v1  ;;  %v12974_v30 = vadd.f32 %v12927_v2, %v5701_v25 }
 0xd79   :  { %v10622_v28 = vpop.eup %10621  ;;  %10637 = vpow2.f32 %v8780_v4  ;;  %v9575_v58 = vpop.f32.mrf.mxu0 }
 0xd7a   :  { %10639 = vrcp.f32 %v5836_v33  ;;  %v5834_v23 = vadd.f32 1.0, %v10622_v28  ;;  %v8781_v62 = vmul.f32 -1.442695, %v12974_v30  ;;  %v12978_v63 = vadd.f32 %v9575_v58, %v12927_v2 }
 0xd7b   :  { %10641 = vpow2.f32 %v8783_v24  ;;  %v5714_v6 = vpop.f32.mrf.mxu0  ;;  %v10624_v8 = vpop.eup %10623 }
 0xd7c   :  { %10643 = vrcp.f32 %v5834_v23  ;;  %v8786_v9 = vmul.f32 -1.442695, %v12978_v63  ;;  %v12982_v39 = vadd.f32 %v12927_v2, %v5714_v6  ;;  %v5839_v56 = vadd.f32 1.0, %v10624_v8 }
 0xd7d   :  { %v10626_v16 = vpop.eup %10625  ;;  %10645 = vpow2.f32 %v8781_v62  ;;  %v9576_v21 = vpop.f32.mrf.mxu0 }
 0xd7e   :  { %v8784_v51 = vmul.f32 -1.442695, %v12982_v39  ;;  %10647 = vpow2.f32 %v8786_v9  ;;  %v5837_v10 = vadd.f32 1.0, %v10626_v16  ;;  %v12987_v14 = vadd.f32 %v9576_v21, %v12927_v2 }
 0xd7f   :  { %v5717_v3 = vpop.f32.mrf.mxu0 }
 0xd80   :  { %10649 = vpow2.f32 %v8784_v51  ;;  %v12993_v33 = vadd.f32 %v12927_v2, %v5717_v3  ;;  %v8787_v24 = vmul.f32 -1.442695, %v12987_v14 }
 0xd81   :  { %v10628_v17 = vpop.eup %10627  ;;  %10651 = vrcp.f32 %v5839_v56 }
 0xd82   :  { %v10630_v55 = vpop.eup %10629  ;;  %v5838_v38 = vadd.f32 1.0, %v10628_v17  ;;  %10653 = vrcp.f32 %v5837_v10  ;;  %v9579_v49 = vpop.f32.mrf.mxu0  ;;  %v8785_v16 = vmul.f32 -1.442695, %v12993_v33 }
 0xd83   :  { %v10632_v61 = vpop.eup %10631  ;;  %v5840_v37 = vadd.f32 1.0, %v10630_v55  ;;  %v12997_v28 = vadd.f32 %v9579_v49, %v12927_v2 }
 0xd84   :  { %v10634_v19 = vpop.eup %10633  ;;  %v5907_v26 = vmul.f32 %v10632_v61, %v12930_v0  ;;  %10655 = vrcp.f32 %v5838_v38  ;;  %v5730_v29 = vpop.f32.mrf.mxu0 }
 0xd85   :  { %v10636_v54 = vpop.eup %10635  ;;  %v5843_v35 = vadd.f32 1.0, %v10634_v19  ;;  %v8790_v21 = vmul.f32 -1.442695, %v12997_v28 }
 0xd86   :  { %v10638_v42 = vpop.eup %10637  ;;  %v5941_v45 = vrot.slane %v5907_v26, 4  ;;  %v5905_v53 = vmul.f32 %v10636_v54, %v12934_v20  ;;  %v13000_v20 = vadd.f32 %v12927_v2, %v5730_v29  ;;  %v9580_v51 = vpop.f32.mrf.mxu0 }
 0xd87   :  { %v10640_v34 = vpop.eup %10639  ;;  %10657 = vrcp.f32 %v5843_v35  ;;  %v5841_v44 = vadd.f32 1.0, %v10638_v42 }
 0xd88   :  { %v10642_v15 = vpop.eup %10641  ;;  %v5942_v0 = vadd.f32 %v5941_v45, %v5907_v26  ;;  %v5908_v48 = vmul.f32 %v10640_v34, %v12938_v11  ;;  %v5929_v62 = vrot.slane %v5905_v53, 4  ;;  %v8788_v38 = vmul.f32 -1.442695, %v13000_v20  ;;  %v5733_v54 = vpop.f32.mrf.mxu0 }
 0xd89   :  { %v10644_v7 = vpop.eup %10643  ;;  %10659 = vrcp.f32 %v5841_v44  ;;  %v5844_v47 = vadd.f32 1.0, %v10642_v15 }
 0xd8a   :  { %v10646_v59 = vpop.eup %10645  ;;  %10661 = vrcp.f32 %v5840_v37  ;;  %v5906_v25 = vmul.f32 %v10644_v7, %v12942_v57  ;;  %v5943_v23 = vrot.slane %v5942_v0, 2  ;;  %v5947_v57 = vrot.slane %v5908_v48, 4 }
 0xd8b   :  { %v5842_v22 = vadd.f32 1.0, %v10646_v59  ;;  %v10648_v4 = vpop.eup %10647  ;;  %10663 = vrcp.f32 %v5844_v47  ;;  %v5930_v55 = vadd.f32 %v5929_v62, %v5905_v53 }
 0xd8c   :  { %v5847_v6 = vadd.f32 1.0, %v10648_v4  ;;  %v5935_v9 = vrot.slane %v5906_v25, 4  ;;  %v5944_v17 = vadd.f32 %v5943_v23, %v5942_v0  ;;  %v5948_v3 = vadd.f32 %v5947_v57, %v5908_v48 }
 0xd8d   :  { %v10650_v58 = vpop.eup %10649  ;;  %10665 = vrcp.f32 %v5842_v22  ;;  %v5931_v49 = vrot.slane %v5930_v55, 2 }
 0xd8e   :  { %v5845_v11 = vadd.f32 1.0, %v10650_v58  ;;  %v10652_v8 = vpop.eup %10651  ;;  %10667 = vpow2.f32 %v8787_v24  ;;  %v5936_v19 = vadd.f32 %v5935_v9, %v5906_v25  ;;  %v5945_v44 = vrot.slane %v5944_v17, 1 }
 0xd8f   :  { %v10654_v56 = vpop.eup %10653  ;;  %v5911_v35 = vmul.f32 %v10652_v8, %v12946_v18  ;;  %v5949_v15 = vrot.slane %v5948_v3, 2  ;;  %v13011_v18 = vadd.f32 %v9580_v51, %v12927_v2  ;;  %v5932_v25 = vadd.f32 %v5931_v49, %v5930_v55 }
 0xd90   :  { %10669 = vrcp.f32 %v5845_v11  ;;  %v5909_v26 = vmul.f32 %v10654_v56, %v12950_v43  ;;  %v5937_v7 = vrot.slane %v5936_v19, 2  ;;  %v9583_v43 = vpop.f32.mrf.mxu0  ;;  %v13017_v48 = vadd.f32 %v5945_v44, %v5944_v17 }
 0xd91   :  { %v10656_v10 = vpop.eup %10655  ;;  %10671 = vrcp.f32 %v5847_v6  ;;  %v5965_v0 = vrot.slane %v5911_v35, 4  ;;  %v5950_v58 = vadd.f32 %v5949_v15, %v5948_v3  ;;  %v8791_v57 = vmul.f32 -1.442695, %v13011_v18 }
 0xd92   :  { %10673 = vpow2.f32 %v8785_v16  ;;  %v5910_v42 = vmul.f32 %v10656_v10, %v12957_v41  ;;  %v5953_v47 = vrot.slane %v5909_v26, 4  ;;  %v5938_v23 = vadd.f32 %v5937_v7, %v5936_v19 }
 0xd93   :  { %10675 = vpow2.f32 %v8790_v21  ;;  %v5966_v6 = vadd.f32 %v5965_v0, %v5911_v35  ;;  %v5933_v17 = vrot.slane %v5932_v25, 1  ;;  %v5951_v3 = vrot.slane %v5950_v58, 1 }
 0xd94   :  { %v10658_v61 = vpop.eup %10657  ;;  %10677 = vpow2.f32 %v8788_v38  ;;  %v5959_v53 = vrot.slane %v5910_v42, 4  ;;  %v5954_v62 = vadd.f32 %v5953_v47, %v5909_v26  ;;  %v5939_v19 = vrot.slane %v5938_v23, 1 }
 0xd95   :  { %v5915_v34 = vmul.f32 %v10658_v61, %v12962_v32  ;;  %v13015_v32 = vadd.f32 %v12927_v2, %v5733_v54  ;;  %v13030_v47 = vadd.f32 %v5933_v17, %v5932_v25 }
 0xd96   :  { %v10660_v37 = vpop.eup %10659  ;;  %v5960_v11 = vadd.f32 %v5959_v53, %v5910_v42  ;;  %v5955_v26 = vrot.slane %v5954_v62, 2  ;;  %v5967_v42 = vrot.slane %v5966_v6, 2  ;;  %v13033_v53 = vadd.f32 %v5951_v3, %v5950_v58 }
 0xd97   :  { %v10662_v45 = vpop.eup %10661  ;;  %v5913_v59 = vmul.f32 %v10660_v37, %v12966_v40  ;;  %v5989_v22 = vrot.slane %v5915_v34, 4  ;;  %v13020_v40 = vadd.f32 %v9583_v43, %v12927_v2  ;;  %v8789_v56 = vmul.f32 -1.442695, %v13015_v32 }
 0xd98   :  { %v10664_v41 = vpop.eup %10663  ;;  %v5912_v29 = vmul.f32 %v10662_v45, %v12954_v27 }
 0xd99   :  { %v5977_v24 = vrot.slane %v5913_v59, 4  ;;  %v5990_v8 = vadd.f32 %v5989_v22, %v5915_v34  ;;  %v5916_v16 = vmul.f32 %v10664_v41, %v12970_v1  ;;  %v8794_v38 = vmul.f32 -1.442695, %v13020_v40  ;;  %v5746_v34 = vpop.f32.mrf.mxu0 }
 0xd9a   :  { %v10666_v4 = vpop.eup %10665  ;;  %v5971_v9 = vrot.slane %v5912_v29, 4  ;;  %v5961_v1 = vrot.slane %v5960_v11, 2  ;;  %v5940_v22 = vadd.f32 %v5939_v19, %v5938_v23  ;;  %v5956_v41 = vadd.f32 %v5955_v26, %v5954_v62 }
 0xd9b   :  { %v10668_v27 = vpop.eup %10667  ;;  %v5914_v51 = vmul.f32 %v10666_v4, %v12974_v30  ;;  %v5978_v55 = vadd.f32 %v5977_v24, %v5913_v59  ;;  %v5991_v37 = vrot.slane %v5990_v8, 2  ;;  %v5995_v49 = vrot.slane %v5916_v16, 4 }
 0xd9c   :  { %v5848_v30 = vadd.f32 1.0, %v10668_v27  ;;  %v5972_v44 = vadd.f32 %v5971_v9, %v5912_v29  ;;  %v5962_v24 = vadd.f32 %v5961_v1, %v5960_v11  ;;  %v9584_v9 = vpop.f32.mrf.mxu0  ;;  %v13036_v11 = vadd.f32 %v12927_v2, %v5746_v34 }
 0xd9d   :  { %v10670_v21 = vpop.eup %10669  ;;  %v5983_v54 = vrot.slane %v5914_v51, 4  ;;  %v5979_v59 = vrot.slane %v5978_v55, 2  ;;  %v5992_v27 = vadd.f32 %v5991_v37, %v5990_v8 }
 0xd9e   :  { %v10672_v61 = vpop.eup %10671  ;;  %v5917_v7 = vmul.f32 %v10670_v21, %v12982_v39  ;;  %10679 = vrcp.f32 %v5848_v30  ;;  %v5996_v39 = vadd.f32 %v5995_v49, %v5916_v16  ;;  %v5957_v30 = vrot.slane %v5956_v41, 1  ;;  %v5749_v8 = vpop.f32.mrf.mxu0 }
 0xd9f   :  { %v10674_v35 = vpop.eup %10673  ;;  %v5984_v15 = vadd.f32 %v5983_v54, %v5914_v51  ;;  %v5919_v43 = vmul.f32 %v10672_v61, %v12978_v63  ;;  %v5968_v51 = vadd.f32 %v5967_v42, %v5966_v6  ;;  %v5973_v54 = vrot.slane %v5972_v44, 2 }
 0xda0   :  { %v10676_v45 = vpop.eup %10675  ;;  %v5846_v10 = vadd.f32 1.0, %v10674_v35  ;;  %v6001_v25 = vrot.slane %v5917_v7, 4  ;;  %v5980_v21 = vadd.f32 %v5979_v59, %v5978_v55  ;;  %v6074_v61 = vpack.c.bf16 %v5940_v22, %v5940_v22 }
 0xda1   :  { %v10678_v0 = vpop.eup %10677  ;;  %v5985_v4 = vrot.slane %v5984_v15, 2  ;;  %v5851_v29 = vadd.f32 1.0, %v10676_v45  ;;  %v6013_v17 = vrot.slane %v5919_v43, 4  ;;  %v5963_v23 = vrot.slane %v5962_v24, 1 }
 0xda2   :  { %10681 = vrcp.f32 %v5846_v10  ;;  %v5849_v63 = vadd.f32 1.0, %v10678_v0  ;;  %v5993_v62 = vrot.slane %v5992_v27, 1  ;;  %v5997_v3 = vrot.slane %v5996_v39, 2 }
 0xda3   :  { %v5986_v58 = vadd.f32 %v5985_v4, %v5984_v15  ;;  %10683 = vrcp.f32 %v5851_v29  ;;  %v6002_v6 = vadd.f32 %v6001_v25, %v5917_v7  ;;  %v13039_v16 = vadd.f32 %v9584_v9, %v12927_v2 }
 0xda4   :  { %10685 = vrcp.f32 %v5849_v63  ;;  %v5981_v55 = vrot.slane %v5980_v21, 1  ;;  %v6014_v10 = vadd.f32 %v6013_v17, %v5919_v43  ;;  %v8792_v19 = vmul.f32 -1.442695, %v13036_v11 }
 0xda5   :  { %10687 = vpow2.f32 %v8791_v57  ;;  %v5987_v26 = vrot.slane %v5986_v58, 1  ;;  %v8795_v35 = vmul.f32 -1.442695, %v13039_v16  ;;  %v13044_v42 = vadd.f32 %v12927_v2, %v5749_v8 }
 0xda6   :  { %10689 = vpow2.f32 %v8789_v56  ;;  %v5958_v1 = vadd.f32 %v5957_v30, %v5956_v41  ;;  %v5974_v37 = vadd.f32 %v5973_v54, %v5972_v44  ;;  %v5964_v34 = vadd.f32 %v5963_v23, %v5962_v24 }
 0xda7   :  { %10691 = vpow2.f32 %v8794_v38  ;;  %v5998_v57 = vadd.f32 %v5997_v3, %v5996_v39  ;;  %v6003_v45 = vrot.slane %v6002_v6, 2  ;;  %v8793_v49 = vmul.f32 -1.442695, %v13044_v42 }
 0xda8   :  { %10693 = vpow2.f32 %v8792_v19  ;;  %v6073_v56 = vpack.c.bf16 %v13030_v47, %v13030_v47  ;;  %v6076_v38 = vpack.c.bf16 %v13033_v53, %v13033_v53  ;;  %v5994_v15 = vadd.f32 %v5993_v62, %v5992_v27 }
 0xda9   :  { %10695 = vpow2.f32 %v8795_v35  ;;  %v5982_v7 = vadd.f32 %v5981_v55, %v5980_v21  ;;  %v5969_v2 = vrot.slane %v5968_v51, 1  ;;  %v5988_v43 = vadd.f32 %v5987_v26, %v5986_v58 }
 0xdaa   :  { %v6015_v0 = vrot.slane %v6014_v10, 2  ;;  %10697 = vpow2.f32 %v8793_v49  ;;  %v13755_v44 = vpack.c.bf16 %v13017_v48, %v13017_v48  ;;  %v6139_v41 = vunpack.c.l.b16 %v6074_v61 }
 0xdab   :  { %v10680_v59 = vpop.eup %10679  ;;  %v5975_v4 = vrot.slane %v5974_v37, 1  ;;  %v6077_v29 = vpack.c.bf16 %v5958_v1, %v5958_v1  ;;  %v6078_v47 = vpack.c.bf16 %v5964_v34, %v5964_v34  ;;  %v5999_v9 = vrot.slane %v5998_v57, 1 }
 0xdac   :  { %v6140_v22 = vunpack.c.l.b16 %v13755_v44  ;;  %v5920_v24 = vmul.f32 %v10680_v59, %v12987_v14  ;;  %v6004_v54 = vadd.f32 %v6003_v45, %v6002_v6  ;;  %v6138_v53 = vunpack.c.l.b16 %v6073_v56 }
 0xdad   :  { %v6083_v27 = vpack.c.bf16 %v5994_v15, %v5994_v15  ;;  %v6081_v39 = vpack.c.bf16 %v5982_v7, %v5982_v7  ;;  %v6141_v17 = vunpack.c.l.b16 %v6076_v38  ;;  %v13055_v63 = vadd.f32 %v5969_v2, %v5968_v51 }
 0xdae   :  { %v6019_v25 = vrot.slane %v5920_v24, 4  ;;  %v6082_v30 = vpack.c.bf16 %v5988_v43, %v5988_v43  ;;  %v6016_v58 = vadd.f32 %v6015_v0, %v6014_v10  ;;  %v6162_v61 = vsel %vm2536_vm2, %v6139_v41, %v6138_v53 }
 0xdaf   :  { %v10682_v21 = vpop.eup %10681  ;;  %v13058_v23 = vadd.f32 %v5975_v4, %v5974_v37  ;;  %v6142_v3 = vunpack.c.l.b16 %v6077_v29  ;;  %v6143_v6 = vunpack.c.l.b16 %v6078_v47  ;;  %v6000_v55 = vadd.f32 %v5999_v9, %v5998_v57 }
 0xdb0   :  { %v10684_v48 = vpop.eup %10683  ;;  %v6020_v14 = vadd.f32 %v6019_v25, %v5920_v24  ;;  %v5918_v62 = vmul.f32 %v10682_v21, %v12993_v33  ;;  %v6005_v19 = vrot.slane %v6004_v54, 1  ;;  %v6148_v35 = vunpack.c.l.b16 %v6083_v27 }
 0xdb1   :  { %v10686_v8 = vpop.eup %10685  ;;  %v6146_v1 = vunpack.c.l.b16 %v6081_v39  ;;  %v6147_v10 = vunpack.c.l.b16 %v6082_v30  ;;  %v6017_v49 = vrot.slane %v6016_v58, 1  ;;  %v5923_v56 = vmul.f32 %v10684_v48, %v12997_v28 }
 0xdb2   :  { %v10688_v26 = vpop.eup %10687  ;;  %v6021_v51 = vrot.slane %v6020_v14, 2  ;;  %v6007_v34 = vrot.slane %v5918_v62, 4  ;;  %v5921_v33 = vmul.f32 %v10686_v8, %v13000_v20  ;;  %v6084_v57 = vpack.c.bf16 %v6000_v55, %v6000_v55 }
 0xdb3   :  { %v10690_v45 = vpop.eup %10689  ;;  %v5852_v37 = vadd.f32 1.0, %v10688_v26  ;;  %v6006_v43 = vadd.f32 %v6005_v19, %v6004_v54  ;;  %v6163_v24 = vsel %vm2538_vm3, %v6140_v22, %v6162_v61  ;;  %v6018_v29 = vadd.f32 %v6017_v49, %v6016_v58 }
 0xdb4   :  { %v10692_v38 = vpop.eup %10691  ;;  %v6022_v15 = vadd.f32 %v6021_v51, %v6020_v14  ;;  %v6008_v7 = vadd.f32 %v6007_v34, %v5918_v62  ;;  %v5850_v59 = vadd.f32 1.0, %v10690_v45  ;;  %v6169_v53 = vsel %vm2536_vm2, %v6147_v10, %v6146_v1 }
 0xdb5   :  { %v10694_v2 = vpop.eup %10693  ;;  %10699 = vrcp.f32 %v5852_v37  ;;  %v5855_v0 = vadd.f32 1.0, %v10692_v38  ;;  %v6037_v27 = vrot.slane %v5923_v56, 4  ;;  %v6025_v39 = vrot.slane %v5921_v33, 4 }
 0xdb6   :  { %v10696_v44 = vpop.eup %10695  ;;  %v6023_v41 = vrot.slane %v6022_v15, 1  ;;  %v6009_v4 = vrot.slane %v6008_v7, 2  ;;  %10701 = vrcp.f32 %v5850_v59  ;;  %v5853_v28 = vadd.f32 1.0, %v10694_v2 }
 0xdb7   :  { %10703 = vrcp.f32 %v5855_v0  ;;  %v5856_v47 = vadd.f32 1.0, %v10696_v44  ;;  %v10698_v9 = vpop.eup %10697  ;;  %v6085_v25 = vpack.c.bf16 %v6006_v43, %v6006_v43  ;;  %v6164_v21 = vsel %vm2540_vm4, %v6141_v17, %v6163_v24 }
 0xdb8   :  { %v6010_v20 = vadd.f32 %v6009_v4, %v6008_v7  ;;  %10705 = vrcp.f32 %v5853_v28  ;;  %v5854_v54 = vadd.f32 1.0, %v10698_v9  ;;  %v6079_v30 = vpack.c.bf16 %v13055_v63, %v13055_v63 }
 0xdb9   :  { %v6024_v48 = vadd.f32 %v6023_v41, %v6022_v15  ;;  %10707 = vrcp.f32 %v5856_v47  ;;  %v6149_v58 = vunpack.c.l.b16 %v6084_v57  ;;  %v6170_v61 = vsel %vm2538_vm3, %v6148_v35, %v6169_v53 }
 0xdba   :  { %v6011_v22 = vrot.slane %v6010_v20, 1  ;;  %10709 = vrcp.f32 %v5854_v54  ;;  %v6038_v62 = vadd.f32 %v6037_v27, %v5923_v56  ;;  %v6026_v8 = vadd.f32 %v6025_v39, %v5921_v33 }
 0xdbb   :  { %v6165_v55 = vsel %vm2542_vm5, %v6142_v3, %v6164_v21  ;;  %v6080_v19 = vpack.c.bf16 %v13058_v23, %v13058_v23  ;;  %v6087_v26 = vpack.c.bf16 %v6018_v29, %v6018_v29  ;;  %v6150_v17 = vunpack.c.l.b16 %v6085_v25 }
 0xdbc   :  { %v6012_v14 = vadd.f32 %v6011_v22, %v6010_v20  ;;  %v6166_v1 = vsel %vm2544_vm6, %v6143_v6, %v6165_v55  ;;  %v6144_v63 = vunpack.c.l.b16 %v6079_v30  ;;  %v6088_v51 = vpack.c.bf16 %v6024_v48, %v6024_v48 }
 0xdbd   :  { %v6171_v45 = vsel %vm2540_vm4, %v6149_v58, %v6170_v61  ;;  %v6039_v49 = vrot.slane %v6038_v62, 2  ;;  %v6027_v35 = vrot.slane %v6026_v8, 2  ;;  %v6152_v37 = vunpack.c.l.b16 %v6087_v26 }
 0xdbe   :  { %v6086_v34 = vpack.c.bf16 %v6012_v14, %v6012_v14  ;;  %v6167_v56 = vsel %vm2546_vm7, %v6144_v63, %v6166_v1  ;;  %v6145_v38 = vunpack.c.l.b16 %v6080_v19  ;;  %v6172_v3 = vsel %vm2542_vm5, %v6150_v17, %v6171_v45 }
 0xdbf   :  { %v6153_v23 = vunpack.c.l.b16 %v6088_v51  ;;  %v6040_v43 = vadd.f32 %v6039_v49, %v6038_v62  ;;  %v6028_v0 = vadd.f32 %v6027_v35, %v6026_v8 }
 0xdc0   :  { %v6151_v10 = vunpack.c.l.b16 %v6086_v34  ;;  %v6168_v59 = vsel %vm2548_vm8, %v6145_v38, %v6167_v56 }
 0xdc1   :  { %v6041_v39 = vrot.slane %v6040_v43, 1  ;;  %v6029_v25 = vrot.slane %v6028_v0, 1 }
 0xdc2   :  { %v10700_v15 = vpop.eup %10699  ;;  %v6173_v7 = vsel %vm2544_vm6, %v6151_v10, %v6172_v3 }
 0xdc3   :  { %v10702_v33 = vpop.eup %10701  ;;  %v5924_v6 = vmul.f32 %v10700_v15, %v13011_v18  ;;  %v6174_v2 = vsel %vm2546_vm7, %v6152_v37, %v6173_v7  ;;  %v6042_v55 = vadd.f32 %v6041_v39, %v6040_v43 }
 0xdc4   :  { %v10704_v57 = vpop.eup %10703  ;;  %v5922_v44 = vmul.f32 %v10702_v33, %v13015_v32  ;;  %v6175_v41 = vsel %vm2548_vm8, %v6153_v23, %v6174_v2 }
 0xdc5   :  { %v6043_v4 = vrot.slane %v5924_v6, 4  ;;  %v5927_v24 = vmul.f32 %v10704_v57, %v13020_v40  ;;  %v6183_v29 = vpack.c.b16 %v6175_v41, %v6168_v59  ;;  %v10706_v28 = vpop.eup %10705  ;;  %v6091_v38 = vpack.c.bf16 %v6042_v55, %v6042_v55  ;;  %v10046_v55 = vld [vmem:[#allocation11 + $0x80] sm:$0xff]  }
 0xdc6   :  { %v6031_v47 = vrot.slane %v5922_v44, 4  ;;  %v10708_v9 = vpop.eup %10707  ;;  %v5925_v20 = vmul.f32 %v10706_v28, %v13036_v11  ;;  %v6030_v11 = vadd.f32 %v6029_v25, %v6028_v0 }
 0xdc7   :  { %v6044_v53 = vadd.f32 %v6043_v4, %v5924_v6  ;;  %v6061_v18 = vrot.slane %v5927_v24, 4  ;;  %9601 = vmatprep.mubr.bf16.mxu1 %v6183_v29  ;;  %v10710_v27 = vpop.eup %10709  ;;  %v5928_v32 = vmul.f32 %v10708_v9, %v13039_v16 }
 0xdc8   :  { %v6032_v54 = vadd.f32 %v6031_v47, %v5922_v44  ;;  %v6049_v48 = vrot.slane %v5925_v20, 4  ;;  %v5926_v40 = vmul.f32 %v10710_v27, %v13044_v42  ;;  %v6089_v35 = vpack.c.bf16 %v6030_v11, %v6030_v11  ;;  %v10047_v11 = vld [vmem:[#allocation5 + $0x2e8] ss:$12 sps:$4 sm:$0xff]  }
 0xdc9   :  { %v6045_v21 = vrot.slane %v6044_v53, 2  ;;  %v6062_v30 = vadd.f32 %v6061_v18, %v5927_v24  ;;  %v6067_v58 = vrot.slane %v5928_v32, 4  ;;  %v6156_v44 = vunpack.c.l.b16 %v6091_v38 }
 0xdca   :  { %v6033_v22 = vrot.slane %v6032_v54, 2  ;;  %v6050_v62 = vadd.f32 %v6049_v48, %v5925_v20  ;;  %v6055_v8 = vrot.slane %v5926_v40, 4  ;;  %v6154_v57 = vunpack.c.l.b16 %v6089_v35 }
 0xdcb   :  { %v6046_v61 = vadd.f32 %v6045_v21, %v6044_v53  ;;  %v6063_v14 = vrot.slane %v6062_v30, 2  ;;  %v6068_v26 = vadd.f32 %v6067_v58, %v5928_v32  ;;  %v10041_v58 = vld [vmem:[#allocation11 + $0xa8] sm:$0xff]  }
 0xdcc   :  { %v6034_v19 = vadd.f32 %v6033_v22, %v6032_v54  ;;  %v6051_v63 = vrot.slane %v6050_v62, 2  ;;  %v6056_v51 = vadd.f32 %v6055_v8, %v5926_v40  ;;  %v10039_v40 = vld [vmem:[#allocation11 + $0xb8] sm:$0xff]   ;;  %v10040_v22 = vld [vmem:[#allocation11 + $0xb0] sm:$0xff]   ;;  %v10045_v8 = vld [vmem:[#allocation11 + $0x88] sm:$0xff]  }
 0xdcd   :  { %v6047_v17 = vrot.slane %v6046_v61, 1  ;;  %v6064_v1 = vadd.f32 %v6063_v14, %v6062_v30  ;;  %v6069_v34 = vrot.slane %v6068_v26, 2  ;;  %9605 = vmatprep.subr.bf16.mxu1 %v10039_v40  ;;  %v10043_v14 = vld [vmem:[#allocation11 + $0x98] sm:$0xff]  }
 0xdce   :  { %v6035_v16 = vrot.slane %v6034_v19, 1  ;;  %v6052_v49 = vadd.f32 %v6051_v63, %v6050_v62  ;;  %v6057_v42 = vrot.slane %v6056_v51, 2  ;;  %v10044_v62 = vld [vmem:[#allocation11 + $0x90] sm:$0xff]   ;;  %v10056_v63 = vld [vmem:[#allocation5 + $0x2bc] ss:$12 sps:$4 sm:$0xff]  }
 0xdcf   :  { %v6048_v45 = vadd.f32 %v6047_v17, %v6046_v61  ;;  %v6065_v10 = vrot.slane %v6064_v1, 1  ;;  %v6070_v37 = vadd.f32 %v6069_v34, %v6068_v26  ;;  %v10042_v61 = vld [vmem:[#allocation11 + $0xa0] sm:$0xff]   ;;  %v10053_v17 = vld [vmem:[#allocation5 + $0x2f0] ss:$12 sps:$4 sm:$0xff]  }
 0xdd0   :  { %v6036_v56 = vadd.f32 %v6035_v16, %v6034_v19  ;;  %v6053_v3 = vrot.slane %v6052_v49, 1  ;;  %v6058_v15 = vadd.f32 %v6057_v42, %v6056_v51  ;;  %v10049_v19 = vld [vmem:[#allocation5 + $0x2ec] ss:$12 sps:$4 sm:$0xff]   ;;  %v10052_v26 = vld [vmem:[#allocation5 + $0x2d4] ss:$12 sps:$4 sm:$0xff]  }
 0xdd1   :  { %v6092_v23 = vpack.c.bf16 %v6048_v45, %v6048_v45  ;;  %v6066_v33 = vadd.f32 %v6065_v10, %v6064_v1  ;;  %v6071_v6 = vrot.slane %v6070_v37, 1  ;;  %6607 = vmatprep.subr.bf16.mxu0 %v10049_v19  ;;  %v10050_v1 = vld [vmem:[#allocation5 + $0x2d0] ss:$12 sps:$4 sm:$0xff]   ;;  %v10054_v51 = vld [vmem:[#allocation5 + $0x2b8] ss:$12 sps:$4 sm:$0xff]  }
 0xdd2   :  { %v6090_v7 = vpack.c.bf16 %v6036_v56, %v6036_v56  ;;  %v6054_v59 = vadd.f32 %v6053_v3, %v6052_v49  ;;  %v6059_v2 = vrot.slane %v6058_v15, 1  ;;  %6608 = vmatpush1.bf16.msra.mxu0 %v10047_v11  ;;  %v10061_v16 = vld [vmem:[#allocation5 + $0x2a4] ss:$12 sps:$4 sm:$0xff]   ;;  %v10059_v34 = vld [vmem:[#allocation5 + $0x2a0] ss:$12 sps:$4 sm:$0xff]  }
 0xdd3   :  { %v6072_v0 = vadd.f32 %v6071_v6, %v6070_v37  ;;  %v6157_v24 = vunpack.c.l.b16 %v6092_v23  ;;  %v6095_v28 = vpack.c.bf16 %v6066_v33, %v6066_v33  ;;  %6609 = vmatprep.subr.bf16.mxu0 %v10052_v26  ;;  %v10065_v45 = vld [vmem:[#allocation5 + $0x28c] ss:$12 sps:$4 sm:$0xff]   ;;  %v10063_v10 = vld [vmem:[#allocation5 + $0x288] ss:$12 sps:$4 sm:$0xff]   ;;  %v8805_v42 = vld [vmem:[%s13623_s11 + $0x2] ss:$0 sm:$0xff] }
 0xdd4   :  { %v6155_v43 = vunpack.c.l.b16 %v6090_v7  ;;  %v6093_v41 = vpack.c.bf16 %v6054_v59, %v6054_v59  ;;  %v6060_v4 = vadd.f32 %v6059_v2, %v6058_v15 }
 0xdd5   :  { %v6096_v53 = vpack.c.bf16 %v6072_v0, %v6072_v0  ;;  %v6160_v39 = vunpack.c.l.b16 %v6095_v28 }
 0xdd6   :  { %v6176_v29 = vsel %vm2536_vm2, %v6155_v43, %v6154_v57  ;;  %v6158_v9 = vunpack.c.l.b16 %v6093_v41  ;;  %v6094_v18 = vpack.c.bf16 %v6060_v4, %v6060_v4  ;;  %6610 = vmatpush1.bf16.msra.mxu0 %v10050_v1 }
 0xdd7   :  { %v6177_v47 = vsel %vm2538_vm3, %v6156_v44, %v6176_v29  ;;  %v6161_v54 = vunpack.c.l.b16 %v6096_v53  ;;  %6611 = vmatprep.subr.bf16.mxu0 %v10056_v63  ;;  %v10057_v53 = vld [vmem:[#allocation5 + $0x2d8] ss:$12 sps:$4 sm:$0xff]  }
 0xdd8   :  { %v6178_v20 = vsel %vm2540_vm4, %v6157_v24, %v6177_v47  ;;  %v6159_v27 = vunpack.c.l.b16 %v6094_v18  ;;  %v10058_v18 = vld [vmem:[#allocation5 + $0x2c0] ss:$12 sps:$4 sm:$0xff]  }
 0xdd9   :  { %v6179_v25 = vsel %vm2542_vm5, %v6158_v9, %v6178_v20  ;;  %v10062_v20 = vld [vmem:[#allocation5 + $0x2a8] ss:$12 sps:$4 sm:$0xff]  }
 0xdda   :  { %v6180_v32 = vsel %vm2544_vm6, %v6159_v27, %v6179_v25  ;;  %6612 = vmatpush1.bf16.msra.mxu0 %v10054_v51  ;;  %v10066_v27 = vld [vmem:[#allocation5 + $0x290] ss:$12 sps:$4 sm:$0xff]  }
 0xddb   :  { %v6181_v21 = vsel %vm2546_vm7, %v6160_v39, %v6180_v32  ;;  %6613 = vmatprep.subr.bf16.mxu0 %v10061_v16  ;;  %v10069_v39 = vld [vmem:[#allocation5 + $0x274] ss:$12 sps:$4 sm:$0xff]   ;;  %v10067_v25 = vld [vmem:[#allocation5 + $0x270] ss:$12 sps:$4 sm:$0xff]  }
 0xddc   :  { %v6182_v30 = vsel %vm2548_vm8, %v6161_v54, %v6181_v21  ;;  %v10070_v54 = vld [vmem:[#allocation5 + $0x278] ss:$12 sps:$4 sm:$0xff]   ;;  %v10073_v32 = vld [vmem:[#allocation5 + $0x25c] ss:$12 sps:$4 sm:$0xff]  }
 0xddd   :  { %v6184_v48 = vpack.c.b16 %v6182_v30, %v6182_v30  ;;  %v10071_v21 = vld [vmem:[#allocation5 + $0x258] ss:$12 sps:$4 sm:$0xff]   ;;  %v10074_v30 = vld [vmem:[#allocation5 + $0x260] ss:$12 sps:$4 sm:$0xff]  }
 0xdde   :  { %6614 = vmatpush1.bf16.msra.mxu0 %v10059_v34 }
 0xddf   :  { %9602 = vmatmul.mubr.bf16.vlgmr.msra.gmra.mxu1 %v6184_v48  ;;  %6615 = vmatprep.subr.bf16.mxu0 %v10065_v45  ;;  %v10075_v48 = vld [vmem:[#allocation5 + $0x240] ss:$12 sps:$4 sm:$0xff]  }
 0xde0   :  { %9606 = vmatpush3.bf16.msra.mxu1 %v10039_v40  ;;  %v10077_v40 = vld [vmem:[#allocation5 + $0x244] ss:$12 sps:$4 sm:$0xff]  }
 0xde1   :  { %9607 = vmatprep.subr.bf16.mxu1 %v10040_v22 }
 0xde2   :  { %6616 = vmatpush1.bf16.msra.mxu0 %v10063_v10 }
 0xde3   :  { %6617 = vmatprep.subr.bf16.mxu0 %v10069_v39 }
 0xde4   :  { %9608 = vmatpush3.bf16.msra.mxu1 %v10040_v22  ;;  %v10078_v22 = vld [vmem:[#allocation5 + $0x248] ss:$12 sps:$4 sm:$0xff]  }
 0xde5   :  { %9609 = vmatprep.subr.bf16.mxu1 %v10041_v58 }
 0xde6   :  { %6618 = vmatpush1.bf16.msra.mxu0 %v10067_v25 }
 0xde7   :  { %6619 = vmatprep.subr.bf16.mxu0 %v10073_v32 }
 0xde8   :  { %9610 = vmatpush3.bf16.msra.mxu1 %v10041_v58 }
 0xde9   :  { %9611 = vmatprep.subr.bf16.mxu1 %v10042_v61 }
 0xdea   :  { %6620 = vmatpush1.bf16.msra.mxu0 %v10071_v21 }
 0xdeb   :  { %6621 = vmatprep.subr.bf16.mxu0 %v10077_v40 }
 0xdec   :  { %9612 = vmatpush3.bf16.msra.mxu1 %v10042_v61  ;;  %v8809_v61 = vld [vmem:[#allocation13 + $0x2] ss:$0 sm:$0xff] }
 0xded   :  { %9613 = vmatprep.subr.bf16.mxu1 %v10043_v14 }
 0xdee   :  { %6622 = vmatpush1.bf16.msra.mxu0 %v10075_v48 }
 0xdf0   :  { %9614 = vmatpush3.bf16.msra.mxu1 %v10043_v14 }
 0xdf1   :  { %9615 = vmatprep.subr.bf16.mxu1 %v10044_v62 }
 0xdf4   :  { %9616 = vmatpush3.bf16.msra.mxu1 %v10044_v62 }
 0xdf5   :  { %9617 = vmatprep.subr.bf16.mxu1 %v10045_v8 }
 0xdf8   :  { %9618 = vmatpush3.bf16.msra.mxu1 %v10045_v8 }
 0xdf9   :  { %9619 = vmatprep.subr.bf16.mxu1 %v10046_v55 }
 0xdfc   :  { %9620 = vmatpush3.bf16.msra.mxu1 %v10046_v55 }
 0xdfd   :  { %9625 = vmatprep.subr.bf16.mxu1 %v10053_v17 }
 0xe9f   :  { %v9603_v49 = vpop.f32.mrf.mxu1 }
 0xea0   :  { %v6285_v35 = vadd.f32 %v9603_v49, %v12614_v5 }
 0xea1   :  { %v6269_v56 = vpop.f32.mrf.mxu1 }
 0xea2   :  { %v6296_v37 = vadd.f32 %v8805_v42, %v6285_v35  ;;  %v6283_v38 = vadd.f32 %v6269_v56, %v12616_v52 }
 0xea3   :  { %v9604_v3 = vpop.f32.mrf.mxu1 }
 0xea4   :  { %v8808_v15 = vmul.f32 -1.442695, %v6296_v37  ;;  %v6294_v23 = vadd.f32 %v8805_v42, %v6283_v38 }
 0xea5   :  { %v6272_v7 = vpop.f32.mrf.mxu1 }
 0xea6   :  { %10711 = vpow2.f32 %v8808_v15  ;;  %v8806_v33 = vmul.f32 -1.442695, %v6294_v23  ;;  %v6284_v6 = vadd.f32 %v6272_v7, %v12922_v31  ;;  %v10952_v15 = vld [vmem:[%s13614_s2 + $0x8] sm:$0xff]   ;;  %v10954_v7 = vld [vmem:[%s13614_s2 + $0x18] sm:$0xff]  }
 0xea8   :  { %10713 = vpow2.f32 %v8806_v33  ;;  %v6295_v59 = vadd.f32 %v8805_v42, %v6284_v6  ;;  %v10955_v33 = vld [vmem:[%s13614_s2 + $0x20] sm:$0xff]   ;;  %v10956_v6 = vld [vmem:[%s13614_s2 + $0x28] sm:$0xff]  }
 0xeaa   :  { %v8807_v2 = vmul.f32 -1.442695, %v6295_v59 }
 0xeac   :  { %10715 = vpow2.f32 %v8807_v2  ;;  %v10958_v2 = vld [vmem:[%s13614_s2 + $0x38] sm:$0xff]  }
 0xeb3   :  { %v10712_v57 = vpop.eup %10711 }
 0xeb4   :  { %v6308_v0 = vadd.f32 1.0, %v10712_v57  ;;  %v10959_v57 = vld [vmem:[%s13614_s2 + $0x40] sm:$0xff]  }
 0xeb5   :  { %v10714_v43 = vpop.eup %10713 }
 0xeb6   :  { %v6306_v5 = vadd.f32 1.0, %v10714_v43  ;;  %10717 = vrcp.f32 %v6308_v0  ;;  %v10960_v43 = vld [vmem:[%s13614_s2 + $0x48] sm:$0xff]   ;;  %v10961_v0 = vld [vmem:[%s13614_s2 + $0x50] sm:$0xff]  }
 0xeb8   :  { %10719 = vrcp.f32 %v6306_v5  ;;  %v10962_v5 = vld [vmem:[%s13614_s2 + $0x58] sm:$0xff]  }
 0xeb9   :  { %v10716_v44 = vpop.eup %10715 }
 0xeba   :  { %v6307_v52 = vadd.f32 1.0, %v10716_v44  ;;  %v10079_v44 = vld [vmem:[#allocation8 + $0xf8] sm:$0xff]  }
 0xebc   :  { %10721 = vrcp.f32 %v6307_v52  ;;  %v10080_v52 = vld [vmem:[#allocation8 + $0xf0] sm:$0xff]  }
 0xec3   :  { %v10718_v41 = vpop.eup %10717 }
 0xec4   :  { %v6317_v29 = vmul.f32 %v10718_v41, %v6296_v37  ;;  %v10081_v41 = vld [vmem:[#allocation8 + $0xe8] sm:$0xff]  }
 0xec5   :  { %v10720_v4 = vpop.eup %10719 }
 0xec6   :  { %v6315_v28 = vmul.f32 %v10720_v4, %v6294_v23  ;;  %v6319_v9 = vpack.c.bf16 %v6317_v29, %v6317_v29  ;;  %v10953_v23 = vld [vmem:[%s13614_s2 + $0x10] sm:$0xff]   ;;  %v10082_v4 = vld [vmem:[#allocation8 + $0xe0] sm:$0xff]  }
 0xec7   :  { %v10084_v29 = vld [vmem:[#allocation8 + $0xd0] sm:$0xff]  }
 0xec9   :  { %v10722_v24 = vpop.eup %10721 }
 0xeca   :  { %v6316_v47 = vmul.f32 %v10722_v24, %v6295_v59  ;;  %v10957_v59 = vld [vmem:[%s13614_s2 + $0x30] sm:$0xff]   ;;  %v10083_v24 = vld [vmem:[#allocation8 + $0xd8] sm:$0xff]  }
 0xecc   :  { %v6318_v31 = vpack.c.bf16 %v6316_v47, %v6315_v28  ;;  %v10085_v28 = vld [vmem:[#allocation8 + $0xc8] sm:$0xff]   ;;  %v10086_v47 = vld [vmem:[#allocation8 + $0xc0] sm:$0xff]  }
 0xece   :  { %9621 = vmatprep.mubr.bf16.mxu1 %v6318_v31 }
 0xecf   :  { %9622 = vmatmul.mubr.bf16.vlgmr.msra.gmra.mxu1 %v6319_v9 }
 0xed0   :  { %9626 = vmatpush3.bf16.msra.mxu1 %v10053_v17 }
 0xed1   :  { %9627 = vmatprep.subr.bf16.mxu1 %v10057_v53 }
 0xed4   :  { %9628 = vmatpush3.bf16.msra.mxu1 %v10057_v53 }
 0xed5   :  { %9629 = vmatprep.subr.bf16.mxu1 %v10058_v18 }
 0xed8   :  { %9630 = vmatpush3.bf16.msra.mxu1 %v10058_v18 }
 0xed9   :  { %9631 = vmatprep.subr.bf16.mxu1 %v10062_v20 }
 0xedc   :  { %9632 = vmatpush3.bf16.msra.mxu1 %v10062_v20 }
 0xedd   :  { %9633 = vmatprep.subr.bf16.mxu1 %v10066_v27 }
 0xee0   :  { %9634 = vmatpush3.bf16.msra.mxu1 %v10066_v27 }
 0xee1   :  { %9635 = vmatprep.subr.bf16.mxu1 %v10070_v54 }
 0xee4   :  { %9636 = vmatpush3.bf16.msra.mxu1 %v10070_v54 }
 0xee5   :  { %9637 = vmatprep.subr.bf16.mxu1 %v10074_v30 }
 0xee8   :  { %9638 = vmatpush3.bf16.msra.mxu1 %v10074_v30 }
 0xee9   :  { %9639 = vmatprep.subr.bf16.mxu1 %v10078_v22 }
 0xeec   :  { %9640 = vmatpush3.bf16.msra.mxu1 %v10078_v22 }
 0xeed   :  { %9673 = vmatprep.subr.bf16.mxu1 %v10079_v44 }
 0xf8f   :  { %v9623_v58 = vpop.f32.mrf.mxu1 }
 0xf90   :  { %v6436_v62 = vadd.f32 %v9623_v58, %v8809_v61 }
 0xf91   :  { %v6427_v14 = vpop.f32.mrf.mxu1 }
 0xf92   :  { %v6428_v55 = vadd.f32 %v8809_v61, %v6427_v14  ;;  %v13100_v26 = vadd.f32 %v6436_v62, %v12595_v46  ;;  %v10951_v46 = vld [vmem:[%s13614_s2] sm:$0xff]  }
 0xf93   :  { %v9624_v8 = vpop.f32.mrf.mxu1  ;;  %v13193_v14 = vld [vmem:[%s13619_s7 + $0x3] ss:$0 sm:$0xff] }
 0xf94   :  { %v13103_v17 = vadd.f32 %v6428_v55, %v12598_v50  ;;  %v6445_v51 = vpack.c.bf16 %v13100_v26, %v13100_v26  ;;  %v13756_v55 = vld [vmem:[#allocation30_spill] sm:$0xff] }
 0xf95   :  { %v6430_v11 = vpop.f32.mrf.mxu1 }
 0xf96   :  { %v6431_v19 = vadd.f32 %v8809_v61, %v6430_v11 }
 0xf98   :  { %v13106_v1 = vadd.f32 %v6431_v19, %v12601_v60 }
 0xf9a   :  { %v6444_v63 = vpack.c.bf16 %v13106_v1, %v13103_v17 }
 0xf9c   :  { %6640 = vmatmul.mubr.bf16.vlgmr.msra.gmra.mxu0 %v6444_v63  ;;  %9641 = vmatprep.mubr.bf16.mxu1 %v6444_v63 }
 0xf9d   :  { %9642 = vmatmul.mubr.bf16.vlgmr.msra.gmra.mxu1 %v6445_v51  ;;  %6649 = vmatprep.mubr.bf16.mxu0 %v13707_v13 }
 0xf9e   :  { %9674 = vmatpush3.bf16.msra.mxu1 %v10079_v44 }
 0xf9f   :  { %9675 = vmatprep.subr.bf16.mxu1 %v10080_v52 }
 0xfa2   :  { %9676 = vmatpush3.bf16.msra.mxu1 %v10080_v52  ;;  %v13759_v52 = vld [vmem:[#allocation27_spill] sm:$0xff] }
 0xfa3   :  { %9677 = vmatprep.subr.bf16.mxu1 %v10081_v41 }
 0xfa4   :  { %6650 = vmatmul.mubr.bf16.gmra.mxu0 %v6445_v51 }
 0xfa5   :  { %9649 = vmatprep.mubr.msk.bf16.mxu0 %vm1507_vm0, %v10951_v46 }
 0xfa6   :  { %9678 = vmatpush3.bf16.msra.mxu1 %v10081_v41 }
 0xfa7   :  { %9679 = vmatprep.subr.bf16.mxu1 %v10082_v4 }
 0xfaa   :  { %9680 = vmatpush3.bf16.msra.mxu1 %v10082_v4 }
 0xfab   :  { %9681 = vmatprep.subr.bf16.mxu1 %v10083_v24 }
 0xfae   :  { %9682 = vmatpush3.bf16.msra.mxu1 %v10083_v24 }
 0xfaf   :  { %9683 = vmatprep.subr.bf16.mxu1 %v10084_v29 }
 0xfb2   :  { %9684 = vmatpush3.bf16.msra.mxu1 %v10084_v29 }
 0xfb3   :  { %9685 = vmatprep.subr.bf16.mxu1 %v10085_v28 }
 0xfb6   :  { %9686 = vmatpush3.bf16.msra.mxu1 %v10085_v28 }
 0xfb7   :  { %9687 = vmatprep.subr.bf16.mxu1 %v10086_v47 }
 0xfba   :  { %9688 = vmatpush3.bf16.msra.mxu1 %v10086_v47 }
0x105c   :  { %v13117_v50 = vpop.f32.mrf.mxu0 }
0x105d   :  { %v13119_v60 = vpop.f32.mrf.mxu1  ;;  %v6716_v31 = vrot.slane %v13117_v50, %v11632_v36  ;;  %v6709_v9 = vcombine.high %v13117_v50, %v13117_v50 }
0x105e   :  { %v6643_v16 = vpop.f32.mrf.mxu0 }
0x105f   :  { %v13121_v34 = vpop.f32.mrf.mxu1  ;;  %v6724_v53 = vcombine.high %v6716_v31, %v6716_v31  ;;  %v6732_v18 = vrot.slane %v6716_v31, %v11632_v36  ;;  %v6723_v20 = vrot.slane %v6709_v9, %v11632_v36 }
0x1060   :  { %v13123_v45 = vpop.f32.mrf.mxu0 }
0x1061   :  { %v9644_v10 = vpop.f32.mrf.mxu1  ;;  %v6746_v27 = vrot.slane %v6724_v53, %v11632_v36  ;;  %v6754_v39 = vcombine.high %v6732_v18, %v6732_v18  ;;  %v6725_v25 = vcombine.high %v6723_v20, %v6723_v20  ;;  %v6758_v54 = vcombine.high %v13123_v45, %v13123_v45 }
0x1062   :  { %v6647_v49 = vpop.f32.mrf.mxu0  ;;  %v6739_v30 = vrot.slane %v6723_v20, %v11632_v36  ;;  %v6765_v40 = vrot.slane %v13123_v45, %v11632_v36  ;;  %v6859_v58 = vrot.slane %v6732_v18, %v11643_v12  ;;  %v13757_v10 = vld [vmem:[#allocation25_spill] sm:$0xff]  ;;  %v13760_v20 = vld [vmem:[#allocation40_spill] sm:$0xff] }
0x1063   :  { %v6976_v37 = vpack.c.bf16 %v6647_v49, %v6643_v16  ;;  %v6867_v32 = vrot.slane %v6754_v39, %v11643_v12  ;;  %v6756_v21 = vcombine.high %v6746_v27, %v6746_v27  ;;  %v13188_v61 = vrot.slane %v6758_v54, %v11632_v36 }
0x1064   :  { %v13125_v42 = vpop.f32.mrf.mxu0  ;;  %v6753_v8 = vrot.slane %v6725_v25, %v11632_v36  ;;  %v6863_v46 = vrot.slane %v6746_v27, %v11643_v12  ;;  %v6755_v50 = vcombine.high %v6739_v30, %v6739_v30  ;;  %v6773_v16 = vcombine.high %v6765_v40, %v6765_v40 }
0x1065   :  { %v6871_v63 = vrot.slane %v6756_v21, %v11643_v12 }
0x1066   :  { %v6653_v13 = vpop.f32.mrf.mxu0  ;;  %v13229_v4 = vrot.slane %v6773_v16, %v11632_v36  ;;  %v6879_v25 = vrot.slane %v6753_v8, %v11643_v12 }
0x1067   :  { %v6977_v35 = vpack.c.bf16 %v6653_v13, %v6653_v13 }
0x1068   :  { %v6655_v56 = vpop.f32.mrf.mxu0 }
0x1069   :  { %v6979_v38 = vsel %vm1544_vm1, %v6977_v35, 0  ;;  %9776 = vmatprep.subr.msk.bf16.mxu0 %vm1544_vm1, %v6977_v35  ;;  %v6774_v35 = vcombine.high %v13188_v61, %v13188_v61  ;;  %v13206_v56 = vrot.slane %v6765_v40, %v11632_v36 }
0x106a   :  { %v6656_v3 = vpop.f32.mrf.mxu0  ;;  %9646 = vmatpush3.bf16.msra.mxu0 %v6979_v38 }
0x106b   :  { %9647 = vmatprep.subr.bf16.mxu0 %v6976_v37  ;;  %v6757_v3 = vcombine.high %v6753_v8, %v6753_v8  ;;  %v6803_v28 = vcombine.high %v13206_v56, %v13206_v56  ;;  %v13762_v8 = vld [vmem:[#allocation43_spill] sm:$0xff] }
0x106e   :  { %9648 = vmatpush3.bf16.msra.mxu0 %v6976_v37  ;;  %v13210_v37 = vrot.slane %v13188_v61, %v11632_v36  ;;  %v6805_v61 = vcombine.high %v13229_v4, %v13229_v4 }
0x1071   :  { %9650 = vmatmul.mubr.msk.bf16.vlgmr.msra.gmra.mxu0 %vm1507_vm0, %v10952_v15 }
0x1072   :  { %9653 = vmatprep.mubr.msk.bf16.mxu0 %vm1507_vm0, %v10953_v23 }
0x1079   :  { %9654 = vmatmul.mubr.msk.bf16.gmra.mxu0 %vm1507_vm0, %v10954_v7  ;;  %v13758_v7 = vld [vmem:[#allocation32_spill] sm:$0xff] }
0x107a   :  { %9657 = vmatprep.mubr.msk.bf16.mxu0 %vm1507_vm0, %v10955_v33 }
0x1081   :  { %9658 = vmatmul.mubr.msk.bf16.gmra.mxu0 %vm1507_vm0, %v10956_v6 }
0x1082   :  { %9661 = vmatprep.mubr.msk.bf16.mxu0 %vm1507_vm0, %v10957_v59  ;;  %v6807_v59 = vcombine.high %v13125_v42, %v13125_v42 }
0x1084   :  { %v13239_v53 = vrot.slane %v6807_v59, %v11632_v36  ;;  %v13764_v59 = vld [vmem:[#allocation52_spill] sm:$0xff] }
0x1089   :  { %9662 = vmatmul.mubr.msk.bf16.gmra.mxu0 %vm1507_vm0, %v10958_v2  ;;  %v6814_v2 = vrot.slane %v13125_v42, %v11632_v36  ;;  %v6887_v42 = vrot.slane %v6757_v3, %v11643_v12 }
0x108a   :  { %9665 = vmatprep.mubr.msk.bf16.mxu0 %vm1507_vm0, %v10959_v57  ;;  %v6883_v57 = vrot.slane %v6755_v50, %v11643_v12  ;;  %v6891_v50 = vrot.slane %v13206_v56, %v11643_v12 }
0x108b   :  { %v6822_v18 = vcombine.high %v6814_v2, %v6814_v2 }
0x1091   :  { %9666 = vmatmul.mubr.msk.bf16.gmra.mxu0 %vm1507_vm0, %v10960_v43 }
0x1092   :  { %9669 = vmatprep.mubr.msk.bf16.mxu0 %vm1507_vm0, %v10961_v0  ;;  %v6875_v0 = vrot.slane %v6739_v30, %v11643_v12 }
0x1099   :  { %9670 = vmatmul.mubr.msk.bf16.gmra.mxu0 %vm1507_vm0, %v10962_v5 }
0x1131   :  { %v9651_v48 = vpop.f32.mrf.mxu0 }
0x1132   :  { %v7112_v22 = vadd.f32 %v9651_v48, %v6867_v32  ;;  %v13761_v32 = vld [vmem:[#allocation35_spill] sm:$0xff]  ;;  %v13246_v48 = vrot.slane %v6814_v2, %v11632_v36 }
0x1133   :  { %v7015_v62 = vpop.f32.mrf.mxu0 }
0x1134   :  { %v7136_v11 = vadd.f32 %v7112_v22, %v13756_v55  ;;  %v7110_v19 = vadd.f32 %v7015_v62, %v6859_v58  ;;  %v6899_v58 = vrot.slane %v6803_v28, %v11643_v12 }
0x1135   :  { %v9652_v51 = vpop.f32.mrf.mxu0 }
0x1136   :  { %v13200_v45 = vadd.f32 %v13193_v14, %v7136_v11  ;;  %v7134_v49 = vadd.f32 %v7110_v19, %v13757_v10  ;;  %v7113_v13 = vadd.f32 %v9652_v51, %v6871_v63  ;;  %v6823_v19 = vcombine.high %v13239_v53, %v13239_v53 }
0x1137   :  { %v7018_v38 = vpop.f32.mrf.mxu0  ;;  %v13262_v63 = vrot.slane %v13239_v53, %v11632_v36 }
0x1138   :  { %v8858_v15 = vmul.f32 -1.442695, %v13200_v45  ;;  %v13214_v23 = vadd.f32 %v13193_v14, %v7134_v49  ;;  %v7137_v33 = vadd.f32 %v7113_v13, %v13758_v7  ;;  %v7111_v6 = vadd.f32 %v7018_v38, %v6863_v46  ;;  %v13763_v49 = vld [vmem:[#allocation37_spill] sm:$0xff] }
0x1139   :  { %v9655_v43 = vpop.f32.mrf.mxu0  ;;  %v6804_v7 = vcombine.high %v13210_v37, %v13210_v37 }
0x113a   :  { %10723 = vpow2.f32 %v8858_v15  ;;  %v8856_v5 = vmul.f32 -1.442695, %v13214_v23  ;;  %v13225_v44 = vadd.f32 %v13193_v14, %v7137_v33  ;;  %v7135_v41 = vadd.f32 %v7111_v6, %v13759_v52 }
0x113b   :  { %v7116_v24 = vadd.f32 %v9655_v43, %v6883_v57  ;;  %v7031_v29 = vpop.f32.mrf.mxu0  ;;  %v6903_v15 = vrot.slane %v6805_v61, %v11643_v12  ;;  %v13276_v33 = vrot.slane %v6774_v35, %v11632_v36  ;;  %v13284_v57 = vrot.slane %v6822_v18, %v11632_v36 }
0x113c   :  { %10725 = vpow2.f32 %v8856_v5  ;;  %v8859_v47 = vmul.f32 -1.442695, %v13225_v44  ;;  %v13236_v31 = vadd.f32 %v13193_v14, %v7135_v41  ;;  %v7114_v9 = vadd.f32 %v7031_v29, %v6875_v0 }
0x113d   :  { %v7140_v27 = vadd.f32 %v7116_v24, %v13760_v20  ;;  %v9656_v39 = vpop.f32.mrf.mxu0  ;;  %v6895_v5 = vrot.slane %v13229_v4, %v11643_v12  ;;  %v6907_v35 = vrot.slane %v13210_v37, %v11643_v12  ;;  %v6806_v18 = vcombine.high %v13276_v33, %v13276_v33 }
0x113e   :  { %10727 = vpow2.f32 %v8859_v47  ;;  %v8857_v54 = vmul.f32 -1.442695, %v13236_v31  ;;  %v7138_v21 = vadd.f32 %v7114_v9, %v13761_v32  ;;  %v7117_v30 = vadd.f32 %v9656_v39, %v6887_v42  ;;  %v13765_v42 = vld [vmem:[#allocation46_spill] sm:$0xff] }
0x113f   :  { %v13249_v40 = vadd.f32 %v13193_v14, %v7140_v27  ;;  %v7034_v22 = vpop.f32.mrf.mxu0  ;;  %v6915_v9 = vrot.slane %v6804_v7, %v11643_v12  ;;  %v6852_v4 = vcombine.high %v13246_v48, %v13246_v48  ;;  %v13766_v27 = vld [vmem:[#allocation55_spill] sm:$0xff] }
0x1140   :  { %10729 = vpow2.f32 %v8857_v54  ;;  %v13255_v62 = vadd.f32 %v13193_v14, %v7138_v21  ;;  %v7141_v55 = vadd.f32 %v7117_v30, %v13762_v8  ;;  %v7115_v11 = vadd.f32 %v7034_v22, %v6879_v25 }
0x1141   :  { %v8862_v51 = vmul.f32 -1.442695, %v13249_v40  ;;  %v9659_v46 = vpop.f32.mrf.mxu0  ;;  %v6923_v30 = vrot.slane %v13246_v48, %v11643_v12  ;;  %v6854_v22 = vcombine.high %v13284_v57, %v13284_v57 }
0x1142   :  { %v8860_v16 = vmul.f32 -1.442695, %v13255_v62  ;;  %v13269_v10 = vadd.f32 %v13193_v14, %v7141_v55  ;;  %v7139_v13 = vadd.f32 %v7115_v11, %v13763_v49  ;;  %v7120_v38 = vadd.f32 %v9659_v46, %v6899_v58 }
0x1143   :  { %10731 = vpow2.f32 %v8862_v51  ;;  %v7047_v3 = vpop.f32.mrf.mxu0  ;;  %v13767_v51 = vld [vmem:[#allocation49_spill] sm:$0xff] }
0x1144   :  { %10733 = vpow2.f32 %v8860_v16  ;;  %v8863_v56 = vmul.f32 -1.442695, %v13269_v10  ;;  %v13280_v6 = vadd.f32 %v13193_v14, %v7139_v13  ;;  %v7144_v2 = vadd.f32 %v7120_v38, %v13764_v59  ;;  %v13768_v13 = vld [vmem:[#allocation64_spill] sm:$0xff] }
0x1145   :  { %v7118_v43 = vadd.f32 %v7047_v3, %v6891_v50  ;;  %v9660_v0 = vpop.f32.mrf.mxu0  ;;  %v6919_v16 = vrot.slane %v6806_v18, %v11643_v12  ;;  %v6911_v59 = vrot.slane %v13276_v33, %v11643_v12 }
0x1146   :  { %10735 = vpow2.f32 %v8863_v56  ;;  %v8861_v52 = vmul.f32 -1.442695, %v13280_v6  ;;  %v13292_v41 = vadd.f32 %v13193_v14, %v7144_v2  ;;  %v7121_v24 = vadd.f32 %v9660_v0, %v6903_v15 }
0x1147   :  { %v10724_v29 = vpop.eup %10723  ;;  %v7142_v28 = vadd.f32 %v7118_v43, %v13765_v42  ;;  %v7050_v47 = vpop.f32.mrf.mxu0  ;;  %v6931_v42 = vrot.slane %v6852_v4, %v11643_v12 }
0x1148   :  { %v7264_v37 = vadd.f32 1.0, %v10724_v29  ;;  %10737 = vpow2.f32 %v8861_v52  ;;  %v8866_v20 = vmul.f32 -1.442695, %v13292_v41  ;;  %v7145_v39 = vadd.f32 %v7121_v24, %v13766_v27  ;;  %v13769_v52 = vld [vmem:[#allocation58_spill] sm:$0xff] }
0x1149   :  { %v10726_v25 = vpop.eup %10725  ;;  %v13303_v54 = vadd.f32 %v13193_v14, %v7142_v28  ;;  %v7119_v32 = vadd.f32 %v7050_v47, %v6895_v5  ;;  %v9663_v21 = vpop.f32.mrf.mxu0  ;;  %v13770_v47 = vld [vmem:[#allocation67_spill] sm:$0xff] }
0x114a   :  { %10739 = vrcp.f32 %v7264_v37  ;;  %v7262_v58 = vadd.f32 1.0, %v10726_v25  ;;  %v13310_v61 = vadd.f32 %v13193_v14, %v7145_v39  ;;  %v7124_v8 = vadd.f32 %v9663_v21, %v6915_v9 }
0x114b   :  { %v10728_v55 = vpop.eup %10727  ;;  %10741 = vpow2.f32 %v8866_v20  ;;  %v8864_v11 = vmul.f32 -1.442695, %v13303_v54  ;;  %v7143_v46 = vadd.f32 %v7119_v32, %v13767_v51  ;;  %v7063_v50 = vpop.f32.mrf.mxu0  ;;  %v6935_v39 = vrot.slane %v6854_v22, %v11643_v12  ;;  %v13771_v32 = vld [vmem:[#allocation61_spill] sm:$0xff] }
0x114c   :  { %10743 = vrcp.f32 %v7262_v58  ;;  %v7265_v48 = vadd.f32 1.0, %v10728_v55  ;;  %v8867_v49 = vmul.f32 -1.442695, %v13310_v61  ;;  %v7148_v38 = vadd.f32 %v7124_v8, %v13768_v13 }
0x114d   :  { %v10730_v3 = vpop.eup %10729  ;;  %10745 = vpow2.f32 %v8864_v11  ;;  %v13318_v15 = vadd.f32 %v13193_v14, %v7143_v46  ;;  %v7122_v7 = vadd.f32 %v7063_v50, %v6907_v35  ;;  %v9664_v56 = vpop.f32.mrf.mxu0  ;;  %v6853_v51 = vcombine.high %v13262_v63, %v13262_v63 }
0x114e   :  { %10747 = vrcp.f32 %v7265_v48  ;;  %v7263_v2 = vadd.f32 1.0, %v10730_v3  ;;  %v13323_v43 = vadd.f32 %v13193_v14, %v7148_v38  ;;  %v7125_v0 = vadd.f32 %v9664_v56, %v6919_v16  ;;  %v13772_v48 = vld [vmem:[#allocation76_spill] sm:$0xff] }
0x114f   :  { %10749 = vpow2.f32 %v8867_v49  ;;  %v8865_v5 = vmul.f32 -1.442695, %v13318_v15  ;;  %v7146_v24 = vadd.f32 %v7122_v7, %v13769_v52  ;;  %v7066_v29 = vpop.f32.mrf.mxu0  ;;  %v13349_v50 = vrot.slane %v6823_v19, %v11632_v36  ;;  %v13773_v36 = vld [vmem:[#allocation70_spill] sm:$0xff] }
0x1150   :  { %v10732_v28 = vpop.eup %10731  ;;  %10751 = vrcp.f32 %v7263_v2  ;;  %v8870_v35 = vmul.f32 -1.442695, %v13323_v43  ;;  %v7149_v33 = vadd.f32 %v7125_v0, %v13770_v47  ;;  %v7123_v9 = vadd.f32 %v7066_v29, %v6911_v59 }
0x1151   :  { %v10734_v18 = vpop.eup %10733  ;;  %v7268_v37 = vadd.f32 1.0, %v10732_v28  ;;  %10753 = vpow2.f32 %v8865_v5  ;;  %v13331_v20 = vadd.f32 %v13193_v14, %v7146_v24  ;;  %v9667_v27 = vpop.f32.mrf.mxu0  ;;  %v6927_v3 = vrot.slane %v13284_v57, %v11643_v12  ;;  %v13774_v24 = vld [vmem:[#allocation79_spill] sm:$0xff] }
0x1152   :  { %v7266_v25 = vadd.f32 1.0, %v10734_v18  ;;  %10755 = vpow2.f32 %v8870_v35  ;;  %v13335_v4 = vadd.f32 %v13193_v14, %v7149_v33  ;;  %v7147_v21 = vadd.f32 %v7123_v9, %v13771_v32 }
0x1153   :  { %v10736_v58 = vpop.eup %10735  ;;  %10757 = vrcp.f32 %v7268_v37  ;;  %v8868_v8 = vmul.f32 -1.442695, %v13331_v20  ;;  %v7128_v55 = vadd.f32 %v9667_v27, %v6931_v42  ;;  %v7079_v11 = vpop.f32.mrf.mxu0  ;;  %v6947_v52 = vrot.slane %v6853_v51, %v11643_v12  ;;  %v13775_v27 = vld [vmem:[#allocation73_spill] sm:$0xff] }
0x1154   :  { %10759 = vrcp.f32 %v7266_v25  ;;  %v8871_v46 = vmul.f32 -1.442695, %v13335_v4  ;;  %v13343_v22 = vadd.f32 %v13193_v14, %v7147_v21  ;;  %v7126_v13 = vadd.f32 %v7079_v11, %v6923_v30 }
0x1155   :  { %v10738_v16 = vpop.eup %10737  ;;  %10761 = vpow2.f32 %v8868_v8  ;;  %v7152_v49 = vadd.f32 %v7128_v55, %v13772_v48  ;;  %v9668_v38 = vpop.f32.mrf.mxu0  ;;  %v7269_v7 = vadd.f32 1.0, %v10736_v58  ;;  %v6855_v42 = vcombine.high %v13349_v50, %v13349_v50 }
0x1156   :  { %v7267_v56 = vadd.f32 1.0, %v10738_v16  ;;  %v8869_v59 = vmul.f32 -1.442695, %v13343_v22  ;;  %v7129_v2 = vadd.f32 %v9668_v38, %v6935_v39  ;;  %10763 = vpow2.f32 %v8871_v46 }
0x1157   :  { %v10740_v0 = vpop.eup %10739  ;;  %v13356_v53 = vadd.f32 %v13193_v14, %v7152_v49  ;;  %v7150_v19 = vadd.f32 %v7126_v13, %v13773_v36  ;;  %v7082_v5 = vpop.f32.mrf.mxu0  ;;  %v6939_v8 = vrot.slane %v13262_v63, %v11643_v12  ;;  %v6951_v16 = vrot.slane %v6855_v42, %v11643_v12  ;;  %v13776_v49 = vld [vmem:[#allocation88_spill] sm:$0xff]  ;;  %v13778_v42 = vld [vmem:[#allocation91_spill] sm:$0xff] }
0x1158   :  { %v10742_v30 = vpop.eup %10741  ;;  %10765 = vrcp.f32 %v7267_v56  ;;  %v7153_v29 = vadd.f32 %v7129_v2, %v13774_v24  ;;  %v7127_v57 = vadd.f32 %v7082_v5, %v6927_v3 }
0x1159   :  { %v10744_v28 = vpop.eup %10743  ;;  %v7272_v35 = vadd.f32 1.0, %v10742_v30  ;;  %10767 = vpow2.f32 %v8869_v59  ;;  %v8874_v47 = vmul.f32 -1.442695, %v13356_v53  ;;  %v13365_v33 = vadd.f32 %v13193_v14, %v7150_v19  ;;  %v9671_v9 = vpop.f32.mrf.mxu0 }
0x115a   :  { %v10746_v18 = vpop.eup %10745  ;;  %10769 = vrcp.f32 %v7269_v7  ;;  %v13368_v37 = vadd.f32 %v13193_v14, %v7153_v29  ;;  %v7151_v39 = vadd.f32 %v7127_v57, %v13775_v27  ;;  %v7132_v25 = vadd.f32 %v9671_v9, %v6947_v52  ;;  %v13777_v52 = vld [vmem:[#allocation82_spill] sm:$0xff] }
0x115b   :  { %v10748_v32 = vpop.eup %10747  ;;  %10771 = vrcp.f32 %v7272_v35  ;;  %v7270_v21 = vadd.f32 1.0, %v10746_v18  ;;  %v8872_v58 = vmul.f32 -1.442695, %v13365_v33  ;;  %v7095_v55 = vpop.f32.mrf.mxu0  ;;  %v6943_v59 = vrot.slane %v13349_v50, %v11643_v12 }
0x115c   :  { %v10750_v11 = vpop.eup %10749  ;;  %10773 = vpow2.f32 %v8874_v47  ;;  %v8875_v51 = vmul.f32 -1.442695, %v13368_v37  ;;  %v13376_v46 = vadd.f32 %v13193_v14, %v7151_v39  ;;  %v7156_v13 = vadd.f32 %v7132_v25, %v13776_v49  ;;  %v13779_v25 = vld [vmem:[#allocation85_spill] sm:$0xff] }
0x115d   :  { %v10752_v48 = vpop.eup %10751  ;;  %10775 = vrcp.f32 %v7270_v21  ;;  %v7130_v38 = vadd.f32 %v7095_v55, %v6939_v8  ;;  %v9672_v3 = vpop.f32.mrf.mxu0  ;;  %v7273_v56 = vadd.f32 1.0, %v10750_v11  ;;  %v7336_v57 = vmul.f32 %v10740_v0, %v13200_v45 }
0x115e   :  { %v10754_v7 = vpop.eup %10753  ;;  %10777 = vpow2.f32 %v8872_v58  ;;  %v7133_v63 = vadd.f32 %v9672_v3, %v6951_v16  ;;  %v8873_v19 = vmul.f32 -1.442695, %v13376_v46  ;;  %v13384_v5 = vadd.f32 %v13193_v14, %v7156_v13 }
0x115f   :  { %v10756_v2 = vpop.eup %10755  ;;  %v7271_v36 = vadd.f32 1.0, %v10754_v7  ;;  %v7154_v30 = vadd.f32 %v7130_v38, %v13777_v52  ;;  %v7098_v24 = vpop.f32.mrf.mxu0  ;;  %10779 = vpow2.f32 %v8875_v51  ;;  %v7337_v12 = vmul.f32 %v10748_v32, %v13225_v44 }
0x1160   :  { %v10758_v29 = vpop.eup %10757  ;;  %v7157_v35 = vadd.f32 %v7133_v63, %v13778_v42  ;;  %v7131_v47 = vadd.f32 %v7098_v24, %v6943_v59  ;;  %v8878_v50 = vmul.f32 -1.442695, %v13384_v5  ;;  %v7335_v0 = vmul.f32 %v10752_v48, %v13236_v31 }
0x1161   :  { %v10760_v9 = vpop.eup %10759  ;;  %10781 = vrcp.f32 %v7271_v36  ;;  %v13392_v18 = vadd.f32 %v13193_v14, %v7154_v30  ;;  %v7334_v44 = vmul.f32 %v10744_v28, %v13214_v23  ;;  %v7359_v51 = vpack.c.bf16 %v7337_v12, %v7336_v57 }
0x1162   :  { %v10762_v27 = vpop.eup %10761  ;;  %10783 = vrcp.f32 %v7273_v56  ;;  %v13395_v39 = vadd.f32 %v13193_v14, %v7157_v35  ;;  %v7155_v45 = vadd.f32 %v7131_v47, %v13779_v25  ;;  %v7338_v48 = vmul.f32 %v10760_v9, %v13255_v62 }
0x1163   :  { %v7274_v21 = vadd.f32 1.0, %v10762_v27  ;;  %10785 = vpow2.f32 %v8873_v19  ;;  %v8876_v58 = vmul.f32 -1.442695, %v13392_v18  ;;  %v10764_v32 = vpop.eup %10763  ;;  %v7358_v49 = vpack.c.bf16 %v7335_v0, %v7334_v44 }
0x1164   :  { %10787 = vpow2.f32 %v8878_v50  ;;  %v8879_v8 = vmul.f32 -1.442695, %v13395_v39  ;;  %v13403_v55 = vadd.f32 %v13193_v14, %v7155_v45  ;;  %v7277_v16 = vadd.f32 1.0, %v10764_v32 }
0x1165   :  { %v10766_v11 = vpop.eup %10765  ;;  %10789 = vrcp.f32 %v7274_v21  ;;  %9689 = vmatprep.mubr.bf16.mxu1 %v7358_v49  ;;  %v7276_v14 = vadd.f32 1.0, %v10756_v2  ;;  %v7340_v62 = vmul.f32 %v10758_v29, %v13249_v40 }
0x1166   :  { %v10768_v13 = vpop.eup %10767  ;;  %10791 = vpow2.f32 %v8876_v58  ;;  %v8877_v31 = vmul.f32 -1.442695, %v13403_v55  ;;  %v7339_v23 = vmul.f32 %v10766_v11, %v13280_v6  ;;  %9690 = vmatmul.mubr.bf16.vlgmr.msra.gmra.mxu1 %v7359_v51 }
0x1167   :  { %v10770_v28 = vpop.eup %10769  ;;  %10793 = vrcp.f32 %v7277_v16  ;;  %v7275_v38 = vadd.f32 1.0, %v10768_v13 }
0x1168   :  { %v10772_v3 = vpop.eup %10771  ;;  %10795 = vpow2.f32 %v8879_v8  ;;  %v7360_v7 = vpack.c.bf16 %v7339_v23, %v7338_v48  ;;  %v7341_v59 = vmul.f32 %v10770_v28, %v13269_v10 }
0x1169   :  { %v10774_v56 = vpop.eup %10773  ;;  %10797 = vrcp.f32 %v7275_v38  ;;  %v7344_v25 = vmul.f32 %v10772_v3, %v13292_v41 }
0x116a   :  { %v10776_v63 = vpop.eup %10775  ;;  %10799 = vpow2.f32 %v8877_v31  ;;  %9693 = vmatprep.mubr.bf16.mxu1 %v7360_v7  ;;  %v7361_v24 = vpack.c.bf16 %v7341_v59, %v7340_v62  ;;  %v7280_v47 = vadd.f32 1.0, %v10774_v56  ;;  %v10088_v62 = vld [vmem:[#allocation10 + $0xf0] sm:$0xff]  }
0x116b   :  { %v10778_v36 = vpop.eup %10777  ;;  %10801 = vrcp.f32 %v7276_v14  ;;  %v7342_v57 = vmul.f32 %v10776_v63, %v13303_v54 }
0x116c   :  { %v10780_v6 = vpop.eup %10779  ;;  %v7278_v19 = vadd.f32 1.0, %v10778_v36 }
0x116d   :  { %v7281_v30 = vadd.f32 1.0, %v10780_v6  ;;  %v10089_v6 = vld [vmem:[#allocation10 + $0xe8] sm:$0xff]  }
0x116e   :  { %v10782_v52 = vpop.eup %10781  ;;  %9694 = vmatmul.mubr.bf16.gmra.mxu1 %v7361_v24  ;;  %10803 = vrcp.f32 %v7278_v19  ;;  %v13431_v19 = vld [vmem:[%s13621_s9 + $0x3] ss:$0 sm:$0xff] }
0x116f   :  { %v10784_v2 = vpop.eup %10783  ;;  %v7343_v42 = vmul.f32 %v10782_v52, %v13318_v15  ;;  %10805 = vrcp.f32 %v7281_v30  ;;  %v10093_v52 = vld [vmem:[#allocation10 + $0xc8] sm:$0xff]   ;;  %v10094_v24 = vld [vmem:[#allocation10 + $0xc0] sm:$0xff]  }
0x1170   :  { %v10786_v35 = vpop.eup %10785  ;;  %v7345_v40 = vmul.f32 %v10784_v2, %v13310_v61 }
0x1171   :  { %v10788_v10 = vpop.eup %10787  ;;  %v7279_v9 = vadd.f32 1.0, %v10786_v35  ;;  %v7362_v12 = vpack.c.bf16 %v7343_v42, %v7342_v57 }
0x1172   :  { %v10790_v50 = vpop.eup %10789  ;;  %v7363_v21 = vpack.c.bf16 %v7345_v40, %v7344_v25  ;;  %v7284_v8 = vadd.f32 1.0, %v10788_v10 }
0x1173   :  { %v10792_v29 = vpop.eup %10791  ;;  %10807 = vrcp.f32 %v7279_v9  ;;  %9697 = vmatprep.mubr.bf16.mxu1 %v7362_v12  ;;  %v7346_v44 = vmul.f32 %v10790_v50, %v13331_v20 }
0x1174   :  { %v10794_v27 = vpop.eup %10793  ;;  %10809 = vrcp.f32 %v7280_v47  ;;  %v7282_v54 = vadd.f32 1.0, %v10792_v29 }
0x1175   :  { %v10796_v15 = vpop.eup %10795  ;;  %v7349_v41 = vmul.f32 %v10794_v27, %v13335_v4 }
0x1176   :  { %v10798_v45 = vpop.eup %10797  ;;  %v7285_v0 = vadd.f32 1.0, %v10796_v15  ;;  %10811 = vrcp.f32 %v7282_v54  ;;  %9698 = vmatmul.mubr.bf16.gmra.mxu1 %v7363_v21 }
0x1177   :  { %v10800_v58 = vpop.eup %10799  ;;  %v7347_v32 = vmul.f32 %v10798_v45, %v13343_v22 }
0x1178   :  { %v7283_v61 = vadd.f32 1.0, %v10800_v58  ;;  %v10802_v11 = vpop.eup %10801  ;;  %10813 = vrcp.f32 %v7285_v0 }
0x1179   :  { %v7364_v51 = vpack.c.bf16 %v7347_v32, %v7346_v44  ;;  %v7348_v16 = vmul.f32 %v10802_v11, %v13323_v43 }
0x117a   :  { %10815 = vrcp.f32 %v7283_v61 }
0x117b   :  { %9701 = vmatprep.mubr.bf16.mxu1 %v7364_v51  ;;  %10817 = vrcp.f32 %v7284_v8  ;;  %v10804_v49 = vpop.eup %10803  ;;  %v7365_v13 = vpack.c.bf16 %v7349_v41, %v7348_v16 }
0x117c   :  { %v10806_v31 = vpop.eup %10805  ;;  %v7350_v48 = vmul.f32 %v10804_v49, %v13365_v33 }
0x117d   :  { %v7353_v28 = vmul.f32 %v10806_v31, %v13368_v37 }
0x117e   :  { %9702 = vmatmul.mubr.bf16.gmra.mxu1 %v7365_v13 }
0x1180   :  { %v10808_v20 = vpop.eup %10807 }
0x1181   :  { %v10810_v22 = vpop.eup %10809  ;;  %v7351_v23 = vmul.f32 %v10808_v20, %v13376_v46 }
0x1182   :  { %v7352_v4 = vmul.f32 %v10810_v22, %v13356_v53  ;;  %v10087_v53 = vld [vmem:[#allocation10 + $0xf8] sm:$0xff]  }
0x1183   :  { %v7366_v38 = vpack.c.bf16 %v7351_v23, %v7350_v48  ;;  %v10812_v3 = vpop.eup %10811  ;;  %9713 = vmatprep.subr.bf16.mxu0 %v10087_v53 }
0x1184   :  { %v7367_v43 = vpack.c.bf16 %v7353_v28, %v7352_v4  ;;  %v7354_v56 = vmul.f32 %v10812_v3, %v13392_v18  ;;  %9714 = vmatpush3.bf16.msra.mxu0 %v10087_v53  ;;  %v10090_v18 = vld [vmem:[#allocation10 + $0xe0] sm:$0xff]  }
0x1185   :  { %9705 = vmatprep.mubr.bf16.mxu1 %v7366_v38  ;;  %v10814_v14 = vpop.eup %10813  ;;  %9715 = vmatprep.subr.bf16.mxu0 %v10088_v62 }
0x1186   :  { %9706 = vmatmul.mubr.bf16.gmra.mxu1 %v7367_v43  ;;  %v7357_v33 = vmul.f32 %v10814_v14, %v13395_v39  ;;  %v10092_v39 = vld [vmem:[#allocation10 + $0xd0] sm:$0xff]  }
0x1187   :  { %v10816_v7 = vpop.eup %10815 }
0x1188   :  { %v7355_v63 = vmul.f32 %v10816_v7, %v13403_v55  ;;  %v10818_v59 = vpop.eup %10817  ;;  %9716 = vmatpush3.bf16.msra.mxu0 %v10088_v62  ;;  %v10091_v55 = vld [vmem:[#allocation10 + $0xd8] sm:$0xff]  }
0x1189   :  { %v7356_v46 = vmul.f32 %v10818_v59, %v13384_v5  ;;  %9717 = vmatprep.subr.bf16.mxu0 %v10089_v6  ;;  %v13426_v5 = vpop.f32.mrf.mxu1 }
0x118a   :  { %v7368_v36 = vpack.c.bf16 %v7355_v63, %v7354_v56 }
0x118b   :  { %v7369_v37 = vpack.c.bf16 %v7357_v33, %v7356_v46 }
0x118c   :  { %9709 = vmatprep.mubr.bf16.mxu1 %v7368_v36  ;;  %9718 = vmatpush3.bf16.msra.mxu0 %v10089_v6 }
0x118d   :  { %9719 = vmatprep.subr.bf16.mxu0 %v10090_v18 }
0x118e   :  { %9710 = vmatmul.mubr.bf16.gmra.mxu1 %v7369_v37 }
0x1190   :  { %9720 = vmatpush3.bf16.msra.mxu0 %v10090_v18 }
0x1191   :  { %9721 = vmatprep.subr.bf16.mxu0 %v10091_v55 }
0x1194   :  { %9722 = vmatpush3.bf16.msra.mxu0 %v10091_v55 }
0x1195   :  { %9723 = vmatprep.subr.bf16.mxu0 %v10092_v39 }
0x1198   :  { %9724 = vmatpush3.bf16.msra.mxu0 %v10092_v39 }
0x1199   :  { %9725 = vmatprep.subr.bf16.mxu0 %v10093_v52 }
0x119c   :  { %9726 = vmatpush3.bf16.msra.mxu0 %v10093_v52 }
0x119d   :  { %9727 = vmatprep.subr.bf16.mxu0 %v10094_v24 }
0x11a0   :  { %9728 = vmatpush3.bf16.msra.mxu0 %v10094_v24 }
0x1226   :  { %v9691_v30 = vpop.f32.mrf.mxu1 }
0x1227   :  { %v13434_v2 = vadd.f32 %v9691_v30, %v13431_v19 }
0x1228   :  { %v7477_v57 = vpop.f32.mrf.mxu1 }
0x1229   :  { %v8892_v42 = vmul.f32 -1.442695, %v13434_v2  ;;  %v13438_v35 = vadd.f32 %v13431_v19, %v7477_v57 }
0x122a   :  { %v9692_v47 = vpop.f32.mrf.mxu1 }
0x122b   :  { %10819 = vpow2.f32 %v8892_v42  ;;  %v8890_v10 = vmul.f32 -1.442695, %v13438_v35  ;;  %v13442_v9 = vadd.f32 %v9692_v47, %v13431_v19 }
0x122c   :  { %v7480_v12 = vpop.f32.mrf.mxu1 }
0x122d   :  { %10821 = vpow2.f32 %v8890_v10  ;;  %v8893_v50 = vmul.f32 -1.442695, %v13442_v9  ;;  %v13446_v40 = vadd.f32 %v13431_v19, %v7480_v12 }
0x122e   :  { %v9695_v29 = vpop.f32.mrf.mxu1 }
0x122f   :  { %10823 = vpow2.f32 %v8893_v50  ;;  %v8891_v27 = vmul.f32 -1.442695, %v13446_v40  ;;  %v13450_v25 = vadd.f32 %v9695_v29, %v13431_v19 }
0x1230   :  { %v7493_v54 = vpop.f32.mrf.mxu1 }
0x1231   :  { %10825 = vpow2.f32 %v8891_v27  ;;  %v8896_v15 = vmul.f32 -1.442695, %v13450_v25  ;;  %v13454_v45 = vadd.f32 %v13431_v19, %v7493_v54 }
0x1232   :  { %v9696_v0 = vpop.f32.mrf.mxu1 }
0x1233   :  { %v8894_v21 = vmul.f32 -1.442695, %v13454_v45  ;;  %v13458_v58 = vadd.f32 %v9696_v0, %v13431_v19  ;;  %10827 = vpow2.f32 %v8896_v15 }
0x1234   :  { %v7496_v44 = vpop.f32.mrf.mxu1 }
0x1235   :  { %10829 = vpow2.f32 %v8894_v21  ;;  %v13461_v32 = vadd.f32 %v13431_v19, %v7496_v44  ;;  %v8897_v8 = vmul.f32 -1.442695, %v13458_v58 }
0x1236   :  { %v9699_v61 = vpop.f32.mrf.mxu1 }
0x1237   :  { %v8895_v11 = vmul.f32 -1.442695, %v13461_v32  ;;  %v13466_v51 = vadd.f32 %v9699_v61, %v13431_v19 }
0x1238   :  { %v10820_v41 = vpop.eup %10819  ;;  %v7509_v16 = vpop.f32.mrf.mxu1 }
0x1239   :  { %v7646_v49 = vadd.f32 1.0, %v10820_v41  ;;  %10831 = vpow2.f32 %v8895_v11  ;;  %v8900_v13 = vmul.f32 -1.442695, %v13466_v51  ;;  %v13470_v31 = vadd.f32 %v13431_v19, %v7509_v16 }
0x123a   :  { %v10822_v20 = vpop.eup %10821  ;;  %10833 = vpow2.f32 %v8897_v8  ;;  %v9700_v22 = vpop.f32.mrf.mxu1 }
0x123b   :  { %10835 = vrcp.f32 %v7646_v49  ;;  %v7644_v48 = vadd.f32 1.0, %v10822_v20  ;;  %v8898_v23 = vmul.f32 -1.442695, %v13470_v31  ;;  %v13474_v28 = vadd.f32 %v9700_v22, %v13431_v19 }
0x123c   :  { %v10824_v38 = vpop.eup %10823  ;;  %10837 = vpow2.f32 %v8900_v13  ;;  %v7512_v4 = vpop.f32.mrf.mxu1 }
0x123d   :  { %10839 = vrcp.f32 %v7644_v48  ;;  %v7647_v3 = vadd.f32 1.0, %v10824_v38  ;;  %v8901_v14 = vmul.f32 -1.442695, %v13474_v28  ;;  %v13478_v43 = vadd.f32 %v13431_v19, %v7512_v4 }
0x123e   :  { %v10826_v7 = vpop.eup %10825  ;;  %10841 = vpow2.f32 %v8898_v23  ;;  %v9703_v56 = vpop.f32.mrf.mxu1 }
0x123f   :  { %10843 = vrcp.f32 %v7647_v3  ;;  %v7645_v63 = vadd.f32 1.0, %v10826_v7  ;;  %v8899_v59 = vmul.f32 -1.442695, %v13478_v43  ;;  %v13482_v33 = vadd.f32 %v9703_v56, %v13431_v19 }
0x1240   :  { %10845 = vpow2.f32 %v8901_v14  ;;  %v7525_v36 = vpop.f32.mrf.mxu1  ;;  %v10828_v46 = vpop.eup %10827 }
0x1241   :  { %10847 = vrcp.f32 %v7645_v63  ;;  %v8904_v37 = vmul.f32 -1.442695, %v13482_v33  ;;  %v13486_v53 = vadd.f32 %v13431_v19, %v7525_v36  ;;  %v7650_v18 = vadd.f32 1.0, %v10828_v46 }
0x1242   :  { %v10830_v62 = vpop.eup %10829  ;;  %10849 = vpow2.f32 %v8899_v59  ;;  %v9704_v55 = vpop.f32.mrf.mxu1 }
0x1243   :  { %v8902_v6 = vmul.f32 -1.442695, %v13486_v53  ;;  %10851 = vpow2.f32 %v8904_v37  ;;  %v7648_v39 = vadd.f32 1.0, %v10830_v62  ;;  %v13491_v11 = vadd.f32 %v9704_v55, %v13431_v19 }
0x1244   :  { %v7528_v42 = vpop.f32.mrf.mxu1 }
0x1245   :  { %10853 = vpow2.f32 %v8902_v6  ;;  %v13497_v23 = vadd.f32 %v13431_v19, %v7528_v42  ;;  %v8905_v38 = vmul.f32 -1.442695, %v13491_v11 }
0x1246   :  { %v10832_v52 = vpop.eup %10831  ;;  %10855 = vrcp.f32 %v7650_v18  ;;  %v9707_v21 = vpop.f32.mrf.mxu1 }
0x1247   :  { %v10834_v30 = vpop.eup %10833  ;;  %v7649_v24 = vadd.f32 1.0, %v10832_v52  ;;  %10857 = vrcp.f32 %v7648_v39  ;;  %v13501_v4 = vadd.f32 %v9707_v21, %v13431_v19  ;;  %v8903_v36 = vmul.f32 -1.442695, %v13497_v23 }
0x1248   :  { %v10836_v57 = vpop.eup %10835  ;;  %v7651_v27 = vadd.f32 1.0, %v10834_v30  ;;  %v7541_v13 = vpop.f32.mrf.mxu1 }
0x1249   :  { %v10838_v47 = vpop.eup %10837  ;;  %v7718_v10 = vmul.f32 %v10836_v57, %v13434_v2  ;;  %10859 = vrcp.f32 %v7649_v24  ;;  %v8908_v62 = vmul.f32 -1.442695, %v13501_v4 }
0x124a   :  { %v10840_v12 = vpop.eup %10839  ;;  %v7654_v50 = vadd.f32 1.0, %v10838_v47  ;;  %v9708_v46 = vpop.f32.mrf.mxu1 }
0x124b   :  { %v10842_v29 = vpop.eup %10841  ;;  %v7752_v15 = vrot.slane %v7718_v10, 4  ;;  %v7716_v16 = vmul.f32 %v10840_v12, %v13438_v35  ;;  %v13504_v35 = vadd.f32 %v13431_v19, %v7541_v13 }
0x124c   :  { %v10844_v54 = vpop.eup %10843  ;;  %10861 = vrcp.f32 %v7654_v50  ;;  %v7652_v0 = vadd.f32 1.0, %v10842_v29  ;;  %v7544_v42 = vpop.f32.mrf.mxu1 }
0x124d   :  { %v10846_v44 = vpop.eup %10845  ;;  %v7753_v2 = vadd.f32 %v7752_v15, %v7718_v10  ;;  %v7719_v22 = vmul.f32 %v10844_v54, %v13442_v9  ;;  %v7740_v7 = vrot.slane %v7716_v16, 4  ;;  %v8906_v39 = vmul.f32 -1.442695, %v13504_v35 }
0x124e   :  { %v10848_v8 = vpop.eup %10847  ;;  %10863 = vrcp.f32 %v7652_v0  ;;  %v7655_v61 = vadd.f32 1.0, %v10846_v44 }
0x124f   :  { %v10850_v41 = vpop.eup %10849  ;;  %10865 = vrcp.f32 %v7651_v27  ;;  %v7717_v48 = vmul.f32 %v10848_v8, %v13446_v40  ;;  %v7754_v14 = vrot.slane %v7753_v2, 2  ;;  %v7758_v40 = vrot.slane %v7719_v22, 4 }
0x1250   :  { %v7653_v49 = vadd.f32 1.0, %v10850_v41  ;;  %v10852_v20 = vpop.eup %10851  ;;  %10867 = vrcp.f32 %v7655_v61  ;;  %v7741_v55 = vadd.f32 %v7740_v7, %v7716_v16 }
0x1251   :  { %v7658_v56 = vadd.f32 1.0, %v10852_v20  ;;  %v7746_v59 = vrot.slane %v7717_v48, 4  ;;  %v7755_v18 = vadd.f32 %v7754_v14, %v7753_v2  ;;  %v7759_v30 = vadd.f32 %v7758_v40, %v7719_v22 }
0x1252   :  { %v10854_v3 = vpop.eup %10853  ;;  %10869 = vrcp.f32 %v7653_v49  ;;  %v7742_v54 = vrot.slane %v7741_v55, 2 }
0x1253   :  { %v7656_v9 = vadd.f32 1.0, %v10854_v3  ;;  %v10856_v63 = vpop.eup %10855  ;;  %10871 = vpow2.f32 %v8905_v38  ;;  %v7747_v24 = vadd.f32 %v7746_v59, %v7717_v48  ;;  %v7756_v27 = vrot.slane %v7755_v18, 1 }
0x1254   :  { %v10858_v37 = vpop.eup %10857  ;;  %v7722_v47 = vmul.f32 %v10856_v63, %v13450_v25  ;;  %v7760_v15 = vrot.slane %v7759_v30, 2  ;;  %v13515_v25 = vadd.f32 %v9708_v46, %v13431_v19  ;;  %v7743_v13 = vadd.f32 %v7742_v54, %v7741_v55 }
0x1255   :  { %10873 = vrcp.f32 %v7656_v9  ;;  %v7720_v57 = vmul.f32 %v10858_v37, %v13454_v45  ;;  %v7748_v0 = vrot.slane %v7747_v24, 2  ;;  %v9711_v45 = vpop.f32.mrf.mxu1  ;;  %v13521_v49 = vadd.f32 %v7756_v27, %v7755_v18 }
0x1256   :  { %v10860_v6 = vpop.eup %10859  ;;  %10875 = vrcp.f32 %v7658_v56  ;;  %v7776_v8 = vrot.slane %v7722_v47, 4  ;;  %v7761_v22 = vadd.f32 %v7760_v15, %v7759_v30  ;;  %v8909_v56 = vmul.f32 -1.442695, %v13515_v25 }
0x1257   :  { %10877 = vpow2.f32 %v8903_v36  ;;  %v7721_v10 = vmul.f32 %v10860_v6, %v13461_v32  ;;  %v7764_v21 = vrot.slane %v7720_v57, 4  ;;  %v7749_v48 = vadd.f32 %v7748_v0, %v7747_v24 }
0x1258   :  { %10879 = vpow2.f32 %v8908_v62  ;;  %v7777_v3 = vadd.f32 %v7776_v8, %v7722_v47  ;;  %v7886_v46 = vpack.c.bf16 %v13521_v49, %v13521_v49  ;;  %v7744_v37 = vrot.slane %v7743_v13, 1  ;;  %v7557_v47 = vpop.f32.mrf.mxu1 }
0x1259   :  { %v10862_v52 = vpop.eup %10861  ;;  %10881 = vpow2.f32 %v8906_v39  ;;  %v7770_v61 = vrot.slane %v7721_v10, 4  ;;  %v7765_v38 = vadd.f32 %v7764_v21, %v7720_v57  ;;  %v7762_v55 = vrot.slane %v7761_v22, 1 }
0x125a   :  { %v7726_v50 = vmul.f32 %v10862_v52, %v13466_v51  ;;  %v13519_v51 = vadd.f32 %v13431_v19, %v7544_v42  ;;  %v7750_v39 = vrot.slane %v7749_v48, 1  ;;  %v7778_v57 = vrot.slane %v7777_v3, 2 }
0x125b   :  { %v10864_v12 = vpop.eup %10863  ;;  %v7771_v14 = vadd.f32 %v7770_v61, %v7721_v10  ;;  %v7766_v52 = vrot.slane %v7765_v38, 2  ;;  %v13534_v54 = vadd.f32 %v7744_v37, %v7743_v13 }
0x125c   :  { %v10866_v29 = vpop.eup %10865  ;;  %v7724_v44 = vmul.f32 %v10864_v12, %v13470_v31  ;;  %v7800_v41 = vrot.slane %v7726_v50, 4  ;;  %v13524_v31 = vadd.f32 %v9711_v45, %v13431_v19  ;;  %v8907_v59 = vmul.f32 -1.442695, %v13519_v51 }
0x125d   :  { %v10868_v32 = vpop.eup %10867  ;;  %v7723_v2 = vmul.f32 %v10866_v29, %v13458_v58  ;;  %v7751_v45 = vadd.f32 %v7750_v39, %v7749_v48  ;;  %v7767_v8 = vadd.f32 %v7766_v52, %v7765_v38 }
0x125e   :  { %v7788_v20 = vrot.slane %v7724_v44, 4  ;;  %v7801_v7 = vadd.f32 %v7800_v41, %v7726_v50  ;;  %v7727_v63 = vmul.f32 %v10868_v32, %v13474_v28  ;;  %v8912_v6 = vmul.f32 -1.442695, %v13524_v31 }
0x125f   :  { %v10870_v16 = vpop.eup %10869  ;;  %v7782_v9 = vrot.slane %v7723_v2, 4  ;;  %v7772_v28 = vrot.slane %v7771_v14, 2  ;;  %v7885_v37 = vpack.c.bf16 %v7751_v45, %v7751_v45 }
0x1260   :  { %v10872_v58 = vpop.eup %10871  ;;  %v7725_v40 = vmul.f32 %v10870_v16, %v13478_v43  ;;  %v7789_v62 = vadd.f32 %v7788_v20, %v7724_v44  ;;  %v7802_v42 = vrot.slane %v7801_v7, 2  ;;  %v7806_v50 = vrot.slane %v7727_v63, 4  ;;  %v9712_v20 = vpop.f32.mrf.mxu1 }
0x1261   :  { %v7659_v43 = vadd.f32 1.0, %v10872_v58  ;;  %v7783_v12 = vadd.f32 %v7782_v9, %v7723_v2  ;;  %v13537_v44 = vadd.f32 %v7762_v55, %v7761_v22  ;;  %v7773_v41 = vadd.f32 %v7772_v28, %v7771_v14 }
0x1262   :  { %v10874_v36 = vpop.eup %10873  ;;  %v7794_v30 = vrot.slane %v7725_v40, 4  ;;  %v7790_v15 = vrot.slane %v7789_v62, 2  ;;  %v7803_v32 = vadd.f32 %v7802_v42, %v7801_v7  ;;  %v7779_v58 = vadd.f32 %v7778_v57, %v7777_v3  ;;  %v7560_v7 = vpop.f32.mrf.mxu1 }
0x1263   :  { %v10876_v18 = vpop.eup %10875  ;;  %v7728_v27 = vmul.f32 %v10874_v36, %v13486_v53  ;;  %10883 = vrcp.f32 %v7659_v43  ;;  %v7784_v9 = vrot.slane %v7783_v12, 2  ;;  %v7807_v53 = vadd.f32 %v7806_v50, %v7727_v63 }
0x1264   :  { %v10878_v24 = vpop.eup %10877  ;;  %v7795_v29 = vadd.f32 %v7794_v30, %v7725_v40  ;;  %v7730_v0 = vmul.f32 %v10876_v18, %v13482_v33  ;;  %v7791_v40 = vadd.f32 %v7790_v15, %v7789_v62  ;;  %v7768_v18 = vrot.slane %v7767_v8, 1 }
0x1265   :  { %v10880_v10 = vpop.eup %10879  ;;  %v7657_v16 = vadd.f32 1.0, %v10878_v24  ;;  %v7812_v13 = vrot.slane %v7728_v27, 4  ;;  %v7774_v48 = vrot.slane %v7773_v41, 1  ;;  %v7804_v38 = vrot.slane %v7803_v32, 1 }
0x1266   :  { %v10882_v21 = vpop.eup %10881  ;;  %v7796_v61 = vrot.slane %v7795_v29, 2  ;;  %v7662_v2 = vadd.f32 1.0, %v10880_v10  ;;  %v7824_v36 = vrot.slane %v7730_v0, 4  ;;  %v13540_v14 = vadd.f32 %v13431_v19, %v7557_v47 }
0x1267   :  { %10885 = vrcp.f32 %v7657_v16  ;;  %v7660_v33 = vadd.f32 1.0, %v10882_v21  ;;  %v7808_v55 = vrot.slane %v7807_v53, 2  ;;  %v7813_v3 = vadd.f32 %v7812_v13, %v7728_v27 }
0x1268   :  { %v7797_v22 = vadd.f32 %v7796_v61, %v7795_v29  ;;  %10887 = vrcp.f32 %v7662_v2  ;;  %v13543_v63 = vadd.f32 %v9712_v20, %v13431_v19  ;;  %v7792_v62 = vrot.slane %v7791_v40, 1 }
0x1269   :  { %10889 = vrcp.f32 %v7660_v33  ;;  %v7825_v39 = vadd.f32 %v7824_v36, %v7730_v0  ;;  %v8910_v52 = vmul.f32 -1.442695, %v13540_v14  ;;  %v13548_v57 = vadd.f32 %v13431_v19, %v7560_v7 }
0x126a   :  { %10891 = vpow2.f32 %v8909_v56  ;;  %v7798_v30 = vrot.slane %v7797_v22, 1  ;;  %v8913_v24 = vmul.f32 -1.442695, %v13543_v63  ;;  %v7769_v28 = vadd.f32 %v7768_v18, %v7767_v8 }
0x126b   :  { %10893 = vpow2.f32 %v8907_v59  ;;  %v7785_v42 = vadd.f32 %v7784_v9, %v7783_v12  ;;  %v7775_v43 = vadd.f32 %v7774_v48, %v7773_v41  ;;  %v7809_v56 = vadd.f32 %v7808_v55, %v7807_v53 }
0x126c   :  { %10895 = vpow2.f32 %v8912_v6  ;;  %v7814_v47 = vrot.slane %v7813_v3, 2  ;;  %v8911_v10 = vmul.f32 -1.442695, %v13548_v57  ;;  %v7884_v59 = vpack.c.bf16 %v13534_v54, %v13534_v54 }
0x126d   :  { %10897 = vpow2.f32 %v8910_v52  ;;  %v7887_v6 = vpack.c.bf16 %v13537_v44, %v13537_v44  ;;  %v7805_v50 = vadd.f32 %v7804_v38, %v7803_v32  ;;  %v7793_v29 = vadd.f32 %v7792_v62, %v7791_v40 }
0x126e   :  { %10899 = vpow2.f32 %v8913_v24  ;;  %v7780_v19 = vrot.slane %v7779_v58, 1  ;;  %v7799_v15 = vadd.f32 %v7798_v30, %v7797_v22  ;;  %v7826_v0 = vrot.slane %v7825_v39, 2 }
0x126f   :  { %10901 = vpow2.f32 %v8911_v10  ;;  %v7951_v12 = vunpack.c.l.b16 %v7886_v46  ;;  %v7950_v21 = vunpack.c.l.b16 %v7885_v37  ;;  %v7786_v45 = vrot.slane %v7785_v42, 1 }
0x1270   :  { %v10884_v27 = vpop.eup %10883  ;;  %v7888_v61 = vpack.c.bf16 %v7769_v28, %v7769_v28  ;;  %v7889_v54 = vpack.c.bf16 %v7775_v43, %v7775_v43  ;;  %v7810_v41 = vrot.slane %v7809_v56, 1  ;;  %v7815_v16 = vadd.f32 %v7814_v47, %v7813_v3 }
0x1271   :  { %v7731_v8 = vmul.f32 %v10884_v27, %v13491_v11  ;;  %v7949_v44 = vunpack.c.l.b16 %v7884_v59  ;;  %v7894_v32 = vpack.c.bf16 %v7805_v50, %v7805_v50  ;;  %v7892_v2 = vpack.c.bf16 %v7793_v29, %v7793_v29 }
0x1272   :  { %v7952_v53 = vunpack.c.l.b16 %v7887_v6  ;;  %v13559_v13 = vadd.f32 %v7780_v19, %v7779_v58  ;;  %v7893_v40 = vpack.c.bf16 %v7799_v15, %v7799_v15  ;;  %v7827_v36 = vadd.f32 %v7826_v0, %v7825_v39 }
0x1273   :  { %v7830_v20 = vrot.slane %v7731_v8, 4  ;;  %v7973_v46 = vsel %vm2536_vm2, %v7950_v21, %v7949_v44  ;;  %v13562_v33 = vadd.f32 %v7786_v45, %v7785_v42  ;;  %v7953_v22 = vunpack.c.l.b16 %v7888_v61 }
0x1274   :  { %v10886_v9 = vpop.eup %10885  ;;  %v7954_v48 = vunpack.c.l.b16 %v7889_v54  ;;  %v7811_v38 = vadd.f32 %v7810_v41, %v7809_v56  ;;  %v7816_v7 = vrot.slane %v7815_v16, 1  ;;  %v7959_v3 = vunpack.c.l.b16 %v7894_v32 }
0x1275   :  { %v10888_v49 = vpop.eup %10887  ;;  %v7831_v11 = vadd.f32 %v7830_v20, %v7731_v8  ;;  %v7729_v37 = vmul.f32 %v10886_v9, %v13497_v23  ;;  %v7957_v62 = vunpack.c.l.b16 %v7892_v2  ;;  %v7958_v39 = vunpack.c.l.b16 %v7893_v40 }
0x1276   :  { %v10890_v18 = vpop.eup %10889  ;;  %v7828_v24 = vrot.slane %v7827_v36, 1  ;;  %v7734_v28 = vmul.f32 %v10888_v49, %v13501_v4  ;;  %v7895_v56 = vpack.c.bf16 %v7811_v38, %v7811_v38  ;;  %v7817_v50 = vadd.f32 %v7816_v7, %v7815_v16 }
0x1277   :  { %v10892_v55 = vpop.eup %10891  ;;  %v7832_v58 = vrot.slane %v7831_v11, 2  ;;  %v7818_v52 = vrot.slane %v7729_v37, 4  ;;  %v7732_v23 = vmul.f32 %v10890_v18, %v13504_v35  ;;  %v7974_v0 = vsel %vm2538_vm3, %v7951_v12, %v7973_v46 }
0x1278   :  { %v10894_v30 = vpop.eup %10893  ;;  %v7663_v42 = vadd.f32 1.0, %v10892_v55  ;;  %v7829_v21 = vadd.f32 %v7828_v24, %v7827_v36  ;;  %v7980_v61 = vsel %vm2536_vm2, %v7958_v39, %v7957_v62  ;;  %v7848_v54 = vrot.slane %v7734_v28, 4 }
0x1279   :  { %v10896_v43 = vpop.eup %10895  ;;  %v7833_v47 = vadd.f32 %v7832_v58, %v7831_v11  ;;  %v7819_v10 = vadd.f32 %v7818_v52, %v7729_v37  ;;  %v7661_v59 = vadd.f32 1.0, %v10894_v30  ;;  %v7836_v41 = vrot.slane %v7732_v23, 4 }
0x127a   :  { %v10898_v6 = vpop.eup %10897  ;;  %10903 = vrcp.f32 %v7663_v42  ;;  %v7666_v29 = vadd.f32 1.0, %v10896_v43  ;;  %v7896_v44 = vpack.c.bf16 %v7817_v50, %v7817_v50  ;;  %v7975_v32 = vsel %vm2540_vm4, %v7952_v53, %v7974_v0 }
0x127b   :  { %v10900_v27 = vpop.eup %10899  ;;  %v7834_v19 = vrot.slane %v7833_v47, 1  ;;  %v7820_v15 = vrot.slane %v7819_v10, 2  ;;  %10905 = vrcp.f32 %v7661_v59  ;;  %v7664_v4 = vadd.f32 1.0, %v10898_v6 }
0x127c   :  { %10907 = vrcp.f32 %v7666_v29  ;;  %v7667_v45 = vadd.f32 1.0, %v10900_v27  ;;  %v10902_v8 = vpop.eup %10901  ;;  %v7890_v2 = vpack.c.bf16 %v13559_v13, %v13559_v13  ;;  %v7960_v9 = vunpack.c.l.b16 %v7895_v56 }
0x127d   :  { %v7821_v35 = vadd.f32 %v7820_v15, %v7819_v10  ;;  %10909 = vrcp.f32 %v7664_v4  ;;  %v7665_v16 = vadd.f32 1.0, %v10902_v8  ;;  %v7835_v20 = vadd.f32 %v7834_v19, %v7833_v47 }
0x127e   :  { %10911 = vrcp.f32 %v7667_v45  ;;  %v7981_v40 = vsel %vm2538_vm3, %v7959_v3, %v7980_v61  ;;  %v7849_v49 = vadd.f32 %v7848_v54, %v7734_v28  ;;  %v7837_v46 = vadd.f32 %v7836_v41, %v7732_v23 }
0x127f   :  { %v7822_v12 = vrot.slane %v7821_v35, 1  ;;  %10913 = vrcp.f32 %v7665_v16  ;;  %v7976_v11 = vsel %vm2542_vm5, %v7953_v22, %v7975_v32  ;;  %v7891_v37 = vpack.c.bf16 %v13562_v33, %v13562_v33 }
0x1280   :  { %v7898_v18 = vpack.c.bf16 %v7829_v21, %v7829_v21  ;;  %v7961_v53 = vunpack.c.l.b16 %v7896_v44  ;;  %v7977_v38 = vsel %vm2544_vm6, %v7954_v48, %v7976_v11  ;;  %v7955_v13 = vunpack.c.l.b16 %v7890_v2 }
0x1281   :  { %v7823_v36 = vadd.f32 %v7822_v12, %v7821_v35  ;;  %v7899_v7 = vpack.c.bf16 %v7835_v20, %v7835_v20  ;;  %v7982_v62 = vsel %vm2540_vm4, %v7960_v9, %v7981_v40  ;;  %v7850_v52 = vrot.slane %v7849_v49, 2 }
0x1282   :  { %v7838_v3 = vrot.slane %v7837_v46, 2  ;;  %v7978_v30 = vsel %vm2546_vm7, %v7955_v13, %v7977_v38  ;;  %v7963_v39 = vunpack.c.l.b16 %v7898_v18  ;;  %v7956_v24 = vunpack.c.l.b16 %v7891_v37 }
0x1283   :  { %v7897_v55 = vpack.c.bf16 %v7823_v36, %v7823_v36  ;;  %v7983_v22 = vsel %vm2542_vm5, %v7961_v53, %v7982_v62  ;;  %v7964_v33 = vunpack.c.l.b16 %v7899_v7  ;;  %v7851_v59 = vadd.f32 %v7850_v52, %v7849_v49 }
0x1284   :  { %v7979_v47 = vsel %vm2548_vm8, %v7956_v24, %v7978_v30  ;;  %v7839_v6 = vadd.f32 %v7838_v3, %v7837_v46 }
0x1285   :  { %v7962_v58 = vunpack.c.l.b16 %v7897_v55  ;;  %v7852_v61 = vrot.slane %v7851_v59, 1 }
0x1286   :  { %v7840_v35 = vrot.slane %v7839_v6, 1 }
0x1287   :  { %v10904_v28 = vpop.eup %10903  ;;  %v7984_v42 = vsel %vm2544_vm6, %v7962_v58, %v7983_v22  ;;  %v7853_v36 = vadd.f32 %v7852_v61, %v7851_v59 }
0x1288   :  { %v10906_v43 = vpop.eup %10905  ;;  %v7735_v48 = vmul.f32 %v10904_v28, %v13515_v25  ;;  %v7985_v10 = vsel %vm2546_vm7, %v7963_v39, %v7984_v42 }
0x1289   :  { %v10908_v23 = vpop.eup %10907  ;;  %v7733_v56 = vmul.f32 %v10906_v43, %v13519_v51  ;;  %v7986_v50 = vsel %vm2548_vm8, %v7964_v33, %v7985_v10  ;;  %v7902_v3 = vpack.c.bf16 %v7853_v36, %v7853_v36  ;;  %v10105_v36 = vld [vmem:[#allocation14 + $0x28] sm:$0xff]  }
0x128a   :  { %v7854_v29 = vrot.slane %v7735_v48, 4  ;;  %v7738_v27 = vmul.f32 %v10908_v23, %v13524_v31  ;;  %v7994_v19 = vpack.c.b16 %v7986_v50, %v7979_v47  ;;  %v10910_v15 = vpop.eup %10909 }
0x128b   :  { %v7842_v0 = vrot.slane %v7733_v56, 4  ;;  %v10912_v21 = vpop.eup %10911  ;;  %v7736_v45 = vmul.f32 %v10910_v15, %v13540_v14  ;;  %v7841_v14 = vadd.f32 %v7840_v35, %v7839_v6  ;;  %v7967_v23 = vunpack.c.l.b16 %v7902_v3 }
0x128c   :  { %v7855_v4 = vadd.f32 %v7854_v29, %v7735_v48  ;;  %v7872_v25 = vrot.slane %v7738_v27, 4  ;;  %9729 = vmatprep.mubr.bf16.mxu0 %v7994_v19  ;;  %v10914_v8 = vpop.eup %10913  ;;  %v7739_v51 = vmul.f32 %v10912_v21, %v13543_v63 }
0x128d   :  { %v7843_v54 = vadd.f32 %v7842_v0, %v7733_v56  ;;  %v7860_v16 = vrot.slane %v7736_v45, 4  ;;  %v7737_v31 = vmul.f32 %v10914_v8, %v13548_v57  ;;  %v7900_v62 = vpack.c.bf16 %v7841_v14, %v7841_v14  ;;  %v10106_v14 = vld [vmem:[#allocation14 + $0x20] sm:$0xff]  }
0x128e   :  { %v7856_v41 = vrot.slane %v7855_v4, 2  ;;  %v7873_v44 = vadd.f32 %v7872_v25, %v7738_v27  ;;  %v7878_v2 = vrot.slane %v7739_v51, 4 }
0x128f   :  { %v7844_v32 = vrot.slane %v7843_v54, 2  ;;  %v7861_v9 = vadd.f32 %v7860_v16, %v7736_v45  ;;  %v7866_v40 = vrot.slane %v7737_v31, 4  ;;  %v7965_v48 = vunpack.c.l.b16 %v7900_v62  ;;  %v10097_v16 = vld [vmem:[#allocation11 + $0xe8] sm:$0xff]  }
0x1290   :  { %v7857_v20 = vadd.f32 %v7856_v41, %v7855_v4  ;;  %v7874_v12 = vrot.slane %v7873_v44, 2  ;;  %v7879_v46 = vadd.f32 %v7878_v2, %v7739_v51  ;;  %v10095_v41 = vld [vmem:[#allocation11 + $0xf8] sm:$0xff]   ;;  %v10100_v2 = vld [vmem:[#allocation11 + $0xd0] sm:$0xff]  }
0x1291   :  { %v7845_v49 = vadd.f32 %v7844_v32, %v7843_v54  ;;  %v7862_v18 = vrot.slane %v7861_v9, 2  ;;  %v7867_v53 = vadd.f32 %v7866_v40, %v7737_v31  ;;  %9733 = vmatprep.subr.bf16.mxu0 %v10095_v41  ;;  %v10098_v31 = vld [vmem:[#allocation11 + $0xe0] sm:$0xff]   ;;  %v10099_v32 = vld [vmem:[#allocation11 + $0xd8] sm:$0xff]  }
0x1292   :  { %v7858_v11 = vrot.slane %v7857_v20, 1  ;;  %v7875_v37 = vadd.f32 %v7874_v12, %v7873_v44  ;;  %v7880_v38 = vrot.slane %v7879_v46, 2  ;;  %v10096_v44 = vld [vmem:[#allocation11 + $0xf0] sm:$0xff]   ;;  %v10102_v12 = vld [vmem:[#allocation11 + $0xc0] sm:$0xff]  }
0x1293   :  { %v7846_v63 = vrot.slane %v7845_v49, 1  ;;  %v7863_v55 = vadd.f32 %v7862_v18, %v7861_v9  ;;  %v7868_v57 = vrot.slane %v7867_v53, 2  ;;  %v10103_v9 = vld [vmem:[#allocation14 + $0x38] sm:$0xff]   ;;  %v10104_v40 = vld [vmem:[#allocation14 + $0x30] sm:$0xff]  }
0x1294   :  { %v7859_v13 = vadd.f32 %v7858_v11, %v7857_v20  ;;  %v7876_v7 = vrot.slane %v7875_v37, 1  ;;  %v7881_v52 = vadd.f32 %v7880_v38, %v7879_v46  ;;  %v10101_v20 = vld [vmem:[#allocation11 + $0xc8] sm:$0xff]   ;;  %9753 = vmatprep.subr.bf16.mxu1 %v10103_v9  ;;  %v8923_v11 = vld [vmem:[%s13623_s11 + $0x3] ss:$0 sm:$0xff] }
0x1295   :  { %v7847_v58 = vadd.f32 %v7846_v63, %v7845_v49  ;;  %v7864_v30 = vrot.slane %v7863_v55, 1  ;;  %v7869_v39 = vadd.f32 %v7868_v57, %v7867_v53  ;;  %9754 = vmatpush3.bf16.msra.mxu1 %v10103_v9  ;;  %v10107_v49 = vld [vmem:[#allocation14 + $0x18] sm:$0xff]  }
0x1296   :  { %v7903_v24 = vpack.c.bf16 %v7859_v13, %v7859_v13  ;;  %v7877_v28 = vadd.f32 %v7876_v7, %v7875_v37  ;;  %v7882_v33 = vrot.slane %v7881_v52, 1  ;;  %9755 = vmatprep.subr.bf16.mxu1 %v10104_v40 }
0x1297   :  { %v7901_v22 = vpack.c.bf16 %v7847_v58, %v7847_v58  ;;  %v7865_v42 = vadd.f32 %v7864_v30, %v7863_v55  ;;  %v7870_v43 = vrot.slane %v7869_v39, 1 }
0x1298   :  { %v7883_v10 = vadd.f32 %v7882_v33, %v7881_v52  ;;  %v7968_v56 = vunpack.c.l.b16 %v7903_v24  ;;  %v7906_v29 = vpack.c.bf16 %v7877_v28, %v7877_v28 }
0x1299   :  { %v7966_v47 = vunpack.c.l.b16 %v7901_v22  ;;  %v7904_v59 = vpack.c.bf16 %v7865_v42, %v7865_v42  ;;  %v7871_v6 = vadd.f32 %v7870_v43, %v7869_v39  ;;  %9756 = vmatpush3.bf16.msra.mxu1 %v10104_v40 }
0x129a   :  { %v7907_v15 = vpack.c.bf16 %v7883_v10, %v7883_v10  ;;  %v7971_v25 = vunpack.c.l.b16 %v7906_v29  ;;  %9757 = vmatprep.subr.bf16.mxu1 %v10105_v36  ;;  %v10108_v10 = vld [vmem:[#allocation14 + $0x10] sm:$0xff]  }
0x129b   :  { %v7987_v50 = vsel %vm2536_vm2, %v7966_v47, %v7965_v48  ;;  %v7969_v19 = vunpack.c.l.b16 %v7904_v59  ;;  %v7905_v0 = vpack.c.bf16 %v7871_v6, %v7871_v6  ;;  %v10110_v59 = vld [vmem:[#allocation14] sm:$0xff]  }
0x129c   :  { %v7988_v27 = vsel %vm2538_vm3, %v7967_v23, %v7987_v50  ;;  %v7972_v8 = vunpack.c.l.b16 %v7907_v15  ;;  %v10109_v23 = vld [vmem:[#allocation14 + $0x8] sm:$0xff]  }
0x129d   :  { %v7989_v21 = vsel %vm2540_vm4, %v7968_v56, %v7988_v27  ;;  %v7970_v4 = vunpack.c.l.b16 %v7905_v0  ;;  %9758 = vmatpush3.bf16.msra.mxu1 %v10105_v36  ;;  %v8927_v56 = vld [vmem:[#allocation13 + $0x3] ss:$0 sm:$0xff] }
0x129e   :  { %v7990_v45 = vsel %vm2542_vm5, %v7969_v19, %v7989_v21  ;;  %9759 = vmatprep.subr.bf16.mxu1 %v10106_v14 }
0x129f   :  { %v7991_v61 = vsel %vm2544_vm6, %v7970_v4, %v7990_v45 }
0x12a0   :  { %v7992_v35 = vsel %vm2546_vm7, %v7971_v25, %v7991_v61  ;;  %v8936_v61 = vld [vmem:[%s13627_s15] ss:$0 sm:$0xff] }
0x12a1   :  { %v7993_v54 = vsel %vm2548_vm8, %v7972_v8, %v7992_v35  ;;  %9760 = vmatpush3.bf16.msra.mxu1 %v10106_v14 }
0x12a2   :  { %v7995_v51 = vpack.c.b16 %v7993_v54, %v7993_v54  ;;  %9761 = vmatprep.subr.bf16.mxu1 %v10107_v49 }
0x12a4   :  { %9730 = vmatmul.mubr.bf16.vlgmr.msra.gmra.mxu0 %v7995_v51 }
0x12a5   :  { %9734 = vmatpush3.bf16.msra.mxu0 %v10095_v41  ;;  %9762 = vmatpush3.bf16.msra.mxu1 %v10107_v49 }
0x12a6   :  { %9735 = vmatprep.subr.bf16.mxu0 %v10096_v44  ;;  %9763 = vmatprep.subr.bf16.mxu1 %v10108_v10 }
0x12a9   :  { %9736 = vmatpush3.bf16.msra.mxu0 %v10096_v44  ;;  %9764 = vmatpush3.bf16.msra.mxu1 %v10108_v10 }
0x12aa   :  { %9737 = vmatprep.subr.bf16.mxu0 %v10097_v16  ;;  %9765 = vmatprep.subr.bf16.mxu1 %v10109_v23 }
0x12ad   :  { %9738 = vmatpush3.bf16.msra.mxu0 %v10097_v16  ;;  %9766 = vmatpush3.bf16.msra.mxu1 %v10109_v23 }
0x12ae   :  { %9739 = vmatprep.subr.bf16.mxu0 %v10098_v31  ;;  %9767 = vmatprep.subr.bf16.mxu1 %v10110_v59 }
0x12b1   :  { %9740 = vmatpush3.bf16.msra.mxu0 %v10098_v31  ;;  %9768 = vmatpush3.bf16.msra.mxu1 %v10110_v59 }
0x12b2   :  { %9741 = vmatprep.subr.bf16.mxu0 %v10099_v32 }
0x12b5   :  { %9742 = vmatpush3.bf16.msra.mxu0 %v10099_v32 }
0x12b6   :  { %9743 = vmatprep.subr.bf16.mxu0 %v10100_v2 }
0x12b9   :  { %9744 = vmatpush3.bf16.msra.mxu0 %v10100_v2 }
0x12ba   :  { %9745 = vmatprep.subr.bf16.mxu0 %v10101_v20 }
0x12bd   :  { %9746 = vmatpush3.bf16.msra.mxu0 %v10101_v20 }
0x12be   :  { %9747 = vmatprep.subr.bf16.mxu0 %v10102_v12 }
0x12c1   :  { %9748 = vmatpush3.bf16.msra.mxu0 %v10102_v12 }
0x1364   :  { %v9731_v46 = vpop.f32.mrf.mxu0 }
0x1365   :  { %v8096_v37 = vadd.f32 %v9731_v46, %v13119_v60 }
0x1366   :  { %v8080_v18 = vpop.f32.mrf.mxu0 }
0x1367   :  { %v8107_v53 = vadd.f32 %v8923_v11, %v8096_v37  ;;  %v8094_v63 = vadd.f32 %v8080_v18, %v13121_v34 }
0x1368   :  { %v9732_v38 = vpop.f32.mrf.mxu0 }
0x1369   :  { %v8926_v13 = vmul.f32 -1.442695, %v8107_v53  ;;  %v8105_v7 = vadd.f32 %v8923_v11, %v8094_v63 }
0x136a   :  { %v8083_v55 = vpop.f32.mrf.mxu0 }
0x136b   :  { %10915 = vpow2.f32 %v8926_v13  ;;  %v8924_v57 = vmul.f32 -1.442695, %v8105_v7  ;;  %v8095_v62 = vadd.f32 %v8083_v55, %v13426_v5 }
0x136d   :  { %10917 = vpow2.f32 %v8924_v57  ;;  %v8106_v58 = vadd.f32 %v8923_v11, %v8095_v62 }
0x136f   :  { %v8925_v52 = vmul.f32 -1.442695, %v8106_v58 }
0x1371   :  { %10919 = vpow2.f32 %v8925_v52 }
0x1378   :  { %v10916_v3 = vpop.eup %10915 }
0x1379   :  { %v8119_v39 = vadd.f32 1.0, %v10916_v3 }
0x137a   :  { %v10918_v30 = vpop.eup %10917 }
0x137b   :  { %v8117_v60 = vadd.f32 1.0, %v10918_v30  ;;  %10921 = vrcp.f32 %v8119_v39 }
0x137d   :  { %10923 = vrcp.f32 %v8117_v60 }
0x137e   :  { %v10920_v24 = vpop.eup %10919 }
0x137f   :  { %v8118_v34 = vadd.f32 1.0, %v10920_v24 }
0x1381   :  { %10925 = vrcp.f32 %v8118_v34 }
0x1388   :  { %v10922_v22 = vpop.eup %10921 }
0x1389   :  { %v8128_v42 = vmul.f32 %v10922_v22, %v8107_v53 }
0x138a   :  { %v10924_v28 = vpop.eup %10923 }
0x138b   :  { %v8126_v43 = vmul.f32 %v10924_v28, %v8105_v7  ;;  %v8130_v47 = vpack.c.bf16 %v8128_v42, %v8128_v42 }
0x138e   :  { %v10926_v33 = vpop.eup %10925 }
0x138f   :  { %v8127_v48 = vmul.f32 %v10926_v33, %v8106_v58 }
0x1391   :  { %v8129_v5 = vpack.c.bf16 %v8127_v48, %v8126_v43 }
0x1393   :  { %9749 = vmatprep.mubr.bf16.mxu0 %v8129_v5 }
0x1394   :  { %9750 = vmatmul.mubr.bf16.vlgmr.msra.gmra.mxu0 %v8130_v47 }
0x1454   :  { %v9751_v6 = vpop.f32.mrf.mxu0 }
0x1455   :  { %v8247_v29 = vadd.f32 %v9751_v6, %v8927_v56 }
0x1456   :  { %v8238_v50 = vpop.f32.mrf.mxu0 }
0x1457   :  { %v8239_v19 = vadd.f32 %v8927_v56, %v8238_v50  ;;  %v8254_v21 = vadd.f32 %v8247_v29, %v13100_v26 }
0x1458   :  { %v9752_v27 = vpop.f32.mrf.mxu0 }
0x1459   :  { %v8252_v4 = vadd.f32 %v8239_v19, %v13103_v17  ;;  %v8256_v8 = vpack.c.bf16 %v8254_v21, %v8254_v21 }
0x145a   :  { %v8241_v15 = vpop.f32.mrf.mxu0 }
0x145b   :  { %v8242_v0 = vadd.f32 %v8927_v56, %v8241_v15 }
0x145d   :  { %v8253_v25 = vadd.f32 %v8242_v0, %v13106_v1 }
0x145f   :  { %v8255_v45 = vpack.c.bf16 %v8253_v25, %v8252_v4 }
0x1461   :  { %9769 = vmatprep.mubr.bf16.mxu1 %v8255_v45 }
0x1462   :  { %9770 = vmatmul.mubr.bf16.vlgmr.msra.gmra.mxu1 %v8256_v8 }
0x1522   :  { %v9771_v35 = vpop.f32.mrf.mxu1 }
0x1523   :  { %v8371_v54 = vadd.f32 %v9771_v35, %v8936_v61 }
0x1524   :  { %v8362_v51 = vpop.f32.mrf.mxu1 }
0x1525   :  { %8378 = vst [vmem:[#allocation16 + $0x10] sm:$0xff] %v8371_v54  ;;  %v8363_v41 = vadd.f32 %v8936_v61, %v8362_v51 }
0x1526   :  { %v9772_v44 = vpop.f32.mrf.mxu1 }
0x1527   :  { %8376 = vst [vmem:[#allocation16] sm:$0xff] %v8363_v41 }
0x1528   :  { %v8365_v26 = vpop.f32.mrf.mxu1 }
0x1529   :  { %v8366_v17 = vadd.f32 %v8936_v61, %v8365_v26 }
0x152b   :  { %8377 = vst [vmem:[#allocation16 + $0x8] sm:$0xff] %v8366_v17 }
0x152c   :  { %11134 = shalt.err (!%p11131_p2)
}
0x152d   :  { %s11173_s15 = smov 128   ;;  %s11174_s0 = smov 8  }
0x152e   :  { %8390 = dma.vmem_to_hbm [thread:$0]  %s8385_s18, 384, %s13628_s16, [#allocation4], %s11173_s15, %s11173_s15, %s11174_s0  }
0x152f   :  { %11153 = dma.done.wait [#allocation4], 384  }
0x1530   :  { %11154 = vsyncadd [#allocation4], 4294966912 }
0x1531   :  { %8394 = vsyncpa [#allocation3], 1 }
0x1532   :  { %8395 = vsyncpa [#allocation6], 1 }
0x1533   :  { %8396 = vsyncpa [#allocation9], 1 }
0x1534   :  { %8397 = vsyncpa [#allocation12], 1 }
0x1535   :  { %8398 = vsyncpa [#allocation15], 1 }
0x1536   :  { %8399 = vsyncpa [#allocation4], 1 }

</bundles_post_ra>
